<compile_context>
chip_gen: v5e
topology: v5e:2x2
jax: 0.10.0
libtpu: 0.0.40
codegen_flags: <defaults>
</compile_context>

<pallas_src>
import functools

import jax
import jax.numpy as jnp
from jax import lax
from jax.experimental import pallas as pl
from jax.experimental.pallas import tpu as pltpu

RELU_SLOPE = 0.2
_VMEM_LIMIT = 40 * 1024 * 1024  # below v7x's 64 MiB physical VMEM


# ----------------------------- elementwise (FRN) -----------------------------
def _leaky_relu(v, slope):
    return jnp.where(v >= 0, v, slope * v)


def _gelu_exact(v):
    # PyTorch nn.GELU() default (erf-based, exact)
    return 0.5 * v * (1.0 + lax.erf(v * 0.7071067811865476))


def _frn(v, slope):
    g = _gelu_exact(v)
    out1 = 0.5267 * _leaky_relu(v, slope)
    out2 = 0.4733 * g
    out3 = 0.5497 * g
    return 0.4591 * _leaky_relu(out1 + out2, slope) + out3


# ------------------------------- fused kernel --------------------------------
def _fused_up_block_kernel(x_ref, br_ref, wt_ref, bt_ref, w1_ref, b1_ref,
                           w2_ref, b2_ref, widu_ref, widb_ref, bid_ref,
                           out_ref, cat_pad_ref, t1_pad_ref, *, relu_slope):
    # x_ref  : (H,  W,  Cin)   whole image for this batch element (VMEM resident)
    # br_ref : (H2, W2, Cb)    whole bridge image for this batch element
    # wt_ref : (2, 2, Cin, Cout)  wt[a, b, c, o] = Wt[c, o, a, b]
    # w1_ref : (9, Ccat, Cout)    tap k = 3*kh + kw ;  w2_ref: (9, Cout, Cout)
    # widu_ref/widb_ref : identity 1x1 conv split over [up | bridge] channels
    # out_ref: (TH2, W2, Cout)    one row tile of the output
    # cat_pad_ref: (TH2+4, W2+2, Ccat) zero-padded cat tile (2-row halo each side)
    # t1_pad_ref : (TH2+2, W2+2, Cout) zero-padded FRN(conv_1) tile (1-row halo)
    H, W, Cin = x_ref.shape
    H2, W2, Cb = br_ref.shape
    TH2, _, Cout = out_ref.shape
    THX = TH2 // 2
    Ccat = Cout + Cb
    cdt = cat_pad_ref.dtype

    t = pl.program_id(1)
    n_t = pl.num_programs(1)
    x_row0 = t * THX          # first x row of this tile's core
    r0 = 2 * x_row0           # first output / cat row of this tile's core

    # ConvTranspose2d(k=2, s=2) of `n` x rows -> (2n, W2, Cout) interleaved rows.
    def deconv_rows(xm, n):   # xm: (n*W, Cin)
        phases = []
        for a in range(2):
            cols = []
            for b in range(2):
                u = jnp.dot(xm, wt_ref[a, b, :, :],
                            preferred_element_type=jnp.float32) + bt_ref[...]
                cols.append(u.reshape(n * W, 1, Cout))
            # column-phase interleave: (n*W, 2, Cout) -> (n, W2, Cout)
            va = jnp.concatenate(cols, axis=1).reshape(n, W2, Cout)
            phases.append(va.reshape(n, 1, W2, Cout))
        # row-phase interleave: (n, 2, W2, Cout) -> (2n, W2, Cout)
        return jnp.concatenate(phases, axis=1).reshape(2 * n, W2, Cout)

    # -- 1-px left/right zero columns (every step: keeps each grid point fully
    #    self-contained, so megacore splitting of either axis is safe).
    cat_pad_ref[:, 0:1, :] = jnp.zeros((TH2 + 4, 1, Ccat), cdt)
    cat_pad_ref[:, W2 + 1:W2 + 2, :] = jnp.zeros((TH2 + 4, 1, Ccat), cdt)
    t1_pad_ref[:, 0:1, :] = jnp.zeros((TH2 + 2, 1, Cout), cdt)
    t1_pad_ref[:, W2 + 1:W2 + 2, :] = jnp.zeros((TH2 + 2, 1, Cout), cdt)

    # -- core rows: deconv of x rows [x_row0, x_row0+THX) and bridge rows
    #    [r0, r0+TH2), written into disjoint channel slices (no concat).
    x_core = x_ref[pl.ds(x_row0, THX), :, :].reshape(THX * W, Cin)
    up_core = deconv_rows(x_core, THX)                  # (TH2, W2, Cout) fp32
    up_core_c = up_core.astype(cdt)
    br_core = br_ref[pl.ds(r0, TH2), :, :]              # (TH2, W2, Cb)
    cat_pad_ref[2:TH2 + 2, 1:W2 + 1, 0:Cout] = up_core_c
    cat_pad_ref[2:TH2 + 2, 1:W2 + 1, Cout:Ccat] = br_core

    # -- 2-row top halo (cat rows r0-2, r0-1): recomputed from neighbour rows for
    #    interior tiles; zero (global conv padding) on the first tile.
    @pl.when(t > 0)
    def _():
        x_row = x_ref[pl.ds(x_row0 - 1, 1), :, :].reshape(W, Cin)
        cat_pad_ref[0:2, 1:W2 + 1, 0:Cout] = deconv_rows(x_row, 1).astype(cdt)
        cat_pad_ref[0:2, 1:W2 + 1, Cout:Ccat] = br_ref[pl.ds(r0 - 2, 2), :, :]

    @pl.when(t == 0)
    def _():
        cat_pad_ref[0:2, :, :] = jnp.zeros((2, W2 + 2, Ccat), cdt)

    # -- 2-row bottom halo (cat rows r0+TH2, r0+TH2+1)
    @pl.when(t < n_t - 1)
    def _():
        x_row = x_ref[pl.ds(x_row0 + THX, 1), :, :].reshape(W, Cin)
        cat_pad_ref[TH2 + 2:TH2 + 4, 1:W2 + 1, 0:Cout] = (
            deconv_rows(x_row, 1).astype(cdt))
        cat_pad_ref[TH2 + 2:TH2 + 4, 1:W2 + 1, Cout:Ccat] = (
            br_ref[pl.ds(r0 + TH2, 2), :, :])

    @pl.when(t == n_t - 1)
    def _():
        cat_pad_ref[TH2 + 2:TH2 + 4, :, :] = jnp.zeros((2, W2 + 2, Ccat), cdt)

    # -- conv_1 (3x3, pad 1): 9 accumulated K=Ccat dots (no materialized im2col),
    #    producing the TH2+2 t1 rows that conv_2 needs (2 halo rows per tile).
    r1 = (TH2 + 2) * W2
    acc1 = jnp.zeros((r1, Cout), jnp.float32)
    for kh in range(3):
        for kw in range(3):
            win = cat_pad_ref[pl.ds(kh, TH2 + 2), pl.ds(kw, W2), :]
            acc1 = acc1 + jnp.dot(win.reshape(r1, Ccat), w1_ref[3 * kh + kw, :, :],
                                  preferred_element_type=jnp.float32)
    t1 = _frn(acc1 + b1_ref[...], relu_slope)
    t1_pad_ref[:, 1:W2 + 1, :] = t1.reshape(TH2 + 2, W2, Cout).astype(cdt)

    # t1 rows outside the image are conv_2's zero padding
    @pl.when(t == 0)
    def _():
        t1_pad_ref[0:1, :, :] = jnp.zeros((1, W2 + 2, Cout), cdt)

    @pl.when(t == n_t - 1)
    def _():
        t1_pad_ref[TH2 + 1:TH2 + 2, :, :] = jnp.zeros((1, W2 + 2, Cout), cdt)

    # -- conv_2 (3x3, pad 1) + FRN + identity (1x1 conv split over up / bridge)
    r2 = TH2 * W2
    acc2 = jnp.zeros((r2, Cout), jnp.float32)
    for kh in range(3):
        for kw in range(3):
            win = t1_pad_ref[pl.ds(kh, TH2), pl.ds(kw, W2), :]
            acc2 = acc2 + jnp.dot(win.reshape(r2, Cout), w2_ref[3 * kh + kw, :, :],
                                  preferred_element_type=jnp.float32)
    t2 = _frn(acc2 + b2_ref[...], relu_slope)

    idn = (jnp.dot(up_core_c.reshape(r2, Cout), widu_ref[...],
                   preferred_element_type=jnp.float32)
           + jnp.dot(br_core.reshape(r2, Cb), widb_ref[...],
                     preferred_element_type=jnp.float32)
           + bid_ref[...])

    out_ref[...] = (t2 + idn).reshape(TH2, W2, Cout).astype(out_ref.dtype)


# --------------------------------- wrappers -----------------------------------
def _pick_x_row_tile(h, target=32):
    best = 1
    for d in range(1, min(h, target) + 1):
        if h % d == 0:
            best = d
    return best


def unet_up_block_forward_nhwc(x, bridge, params, relu_slope=RELU_SLOPE,
                               compute_dtype=jnp.bfloat16, x_row_tile=None):
    """UNetUpBlock forward, NHWC in / NHWC (fp32) out, one fused pallas_call.

    compute_dtype: dtype of matmul operands / scratches (bf16 default: 2x MXU
    rate on v6e/v7x, half the VMEM/HBM bytes on all gens); accumulation and the
    FRN nonlinearity always stay fp32.
    """
    N, H, W, Cin = x.shape
    Nb, H2, W2, Cb = bridge.shape
    Cout = params["bt"].shape[0]
    Ccat = Cout + Cb
    assert (Nb, H2, W2) == (N, 2 * H, 2 * W), (x.shape, bridge.shape)
    assert Ccat == Cin, "conv_block in_size must equal Cout + bridge channels"

    if x_row_tile is None:
        x_row_tile = _pick_x_row_tile(H)
    assert H % x_row_tile == 0, (H, x_row_tile)
    THX = x_row_tile
    TH2 = 2 * THX
    num_tiles = H // THX

    cdt = compute_dtype
    xc = x.astype(cdt)
    brc = bridge.astype(cdt)

    # ConvTranspose2d weight (Cin, Cout, 2, 2) -> (a, b, Cin, Cout)
    wt_r = jnp.transpose(params["wt"], (2, 3, 0, 1)).astype(cdt)
    bt = params["bt"][None, :].astype(jnp.float32)
    # 3x3 conv weights (O, I, 3, 3) -> (9, I, O), tap index k = 3*kh + kw
    w1r = jnp.transpose(params["w1"], (2, 3, 1, 0)).reshape(9, Ccat, Cout).astype(cdt)
    w2r = jnp.transpose(params["w2"], (2, 3, 1, 0)).reshape(9, Cout, Cout).astype(cdt)
    b1 = params["b1"][None, :].astype(jnp.float32)
    b2 = params["b2"][None, :].astype(jnp.float32)
    # identity 1x1 conv, split over the [up | bridge] channel ranges
    wid = params["wid"][:, :, 0, 0]                                   # (Cout, Ccat)
    wid_u = jnp.transpose(wid[:, :Cout], (1, 0)).astype(cdt)          # (Cout, Cout)
    wid_b = jnp.transpose(wid[:, Cout:], (1, 0)).astype(cdt)          # (Cb,   Cout)
    bid = params["bid"][None, :].astype(jnp.float32)

    kern = functools.partial(_fused_up_block_kernel, relu_slope=relu_slope)
    out = pl.pallas_call(
        kern,
        out_shape=jax.ShapeDtypeStruct((N, H2, W2, Cout), jnp.float32),
        grid=(N, num_tiles),
        in_specs=[
            # x / bridge: whole image per batch; the block index ignores the
            # row-tile axis so they are DMA'd once per batch and row/halo slices
            # are taken in VMEM inside the kernel.
            pl.BlockSpec((None, H, W, Cin), lambda b, t: (b, 0, 0, 0)),
            pl.BlockSpec((None, H2, W2, Cb), lambda b, t: (b, 0, 0, 0)),
            pl.BlockSpec((2, 2, Cin, Cout), lambda b, t: (0, 0, 0, 0)),
            pl.BlockSpec((1, Cout), lambda b, t: (0, 0)),
            pl.BlockSpec((9, Ccat, Cout), lambda b, t: (0, 0, 0)),
            pl.BlockSpec((1, Cout), lambda b, t: (0, 0)),
            pl.BlockSpec((9, Cout, Cout), lambda b, t: (0, 0, 0)),
            pl.BlockSpec((1, Cout), lambda b, t: (0, 0)),
            pl.BlockSpec((Cout, Cout), lambda b, t: (0, 0)),
            pl.BlockSpec((Cb, Cout), lambda b, t: (0, 0)),
            pl.BlockSpec((1, Cout), lambda b, t: (0, 0)),
        ],
        out_specs=pl.BlockSpec((None, TH2, W2, Cout), lambda b, t: (b, t, 0, 0)),
        scratch_shapes=[
            pltpu.VMEM((TH2 + 4, W2 + 2, Ccat), cdt),  # padded cat tile (+2-row halo)
            pltpu.VMEM((TH2 + 2, W2 + 2, Cout), cdt),  # padded FRN(conv_1) tile
        ],
        compiler_params=pltpu.CompilerParams(
            dimension_semantics=("parallel", "parallel"),
            vmem_limit_bytes=_VMEM_LIMIT),
    )(xc, brc, wt_r, bt, w1r, b1, w2r, b2, wid_u, wid_b, bid)
    return out


def unet_up_block_forward(x_nchw, bridge_nchw, params, relu_slope=RELU_SLOPE,
                          compute_dtype=jnp.bfloat16, x_row_tile=None):
    """PyTorch-layout (NCHW) compatibility wrapper around the NHWC fast path."""
    x = jnp.transpose(x_nchw, (0, 2, 3, 1))
    bridge = jnp.transpose(bridge_nchw, (0, 2, 3, 1))
    out = unet_up_block_forward_nhwc(x, bridge, params, relu_slope,
                                     compute_dtype, x_row_tile)
    return jnp.transpose(out, (0, 3, 1, 2))


# ---------------------------- pure-JAX reference ------------------------------
def _ref_forward(x_nchw, bridge_nchw, p, slope):
    N, Cin, H, W = x_nchw.shape
    Cout = p["bt"].shape[0]
    # ConvTranspose2d(k=2,s=2): up[n,o,2i+a,2j+b] = sum_c x[n,c,i,j]*Wt[c,o,a,b]+bt
    e = jnp.einsum("ncij,coab->noiajb", x_nchw, p["wt"])
    up = e.reshape(N, Cout, 2 * H, 2 * W) + p["bt"][None, :, None, None]
    cat = jnp.concatenate([up, bridge_nchw], axis=1)

    def conv(x, w, b, pad):
        y = lax.conv_general_dilated(x, w, (1, 1), ((pad, pad), (pad, pad)),
                                     dimension_numbers=("NCHW", "OIHW", "NCHW"))
        return y + b[None, :, None, None]

    out = _frn(conv(cat, p["w1"], p["b1"], 1), slope)
    out = _frn(conv(out, p["w2"], p["b2"], 1), slope)
    out = out + conv(cat, p["wid"], p["bid"], 0)
    return out


# ------------------------------------ main ------------------------------------
if __name__ == "__main__":
    key = jax.random.PRNGKey(0)
    ks = jax.random.split(key, 10)
    N, in_size, out_size, H, W = 2, 8, 4, 8, 8
    slope = RELU_SLOPE

    x_nchw = jax.random.normal(ks[0], (N, in_size, H, W), jnp.float32)
    bridge_nchw = jax.random.normal(ks[1], (N, in_size - out_size, 2 * H, 2 * W),
                                    jnp.float32)

    params = {
        "wt":  0.2 * jax.random.normal(ks[2], (in_size, out_size, 2, 2), jnp.float32),
        "bt":  0.05 * jax.random.normal(ks[3], (out_size,), jnp.float32),
        "w1":  0.2 * jax.random.normal(ks[4], (out_size, in_size, 3, 3), jnp.float32),
        "b1":  0.05 * jax.random.normal(ks[5], (out_size,), jnp.float32),
        "w2":  0.2 * jax.random.normal(ks[6], (out_size, out_size, 3, 3), jnp.float32),
        "b2":  0.05 * jax.random.normal(ks[7], (out_size,), jnp.float32),
        "wid": 0.2 * jax.random.normal(ks[8], (out_size, in_size, 1, 1), jnp.float32),
        "bid": 0.05 * jax.random.normal(ks[9], (out_size,), jnp.float32),
    }

    ref_nchw = _ref_forward(x_nchw, bridge_nchw, params, slope)
    ref_nhwc = jnp.transpose(ref_nchw, (0, 2, 3, 1))

    x_nhwc = jnp.transpose(x_nchw, (0, 2, 3, 1))
    br_nhwc = jnp.transpose(bridge_nchw, (0, 2, 3, 1))

    # fp32 operands, 2 row tiles per image (exercises the interior-halo path)
    f32_tiled = jax.jit(lambda a, b: unet_up_block_forward_nhwc(
        a, b, params, slope, compute_dtype=jnp.float32, x_row_tile=4))
    out = jax.block_until_ready(f32_tiled(x_nhwc, br_nhwc))
    assert out.shape == (N, 2 * H, 2 * W, out_size), out.shape
    assert jnp.allclose(out, ref_nhwc, atol=2e-3, rtol=2e-3), \
        float(jnp.max(jnp.abs(out - ref_nhwc)))

    # fp32 operands, single whole-image tile (default tile picker)
    f32_whole = jax.jit(lambda a, b: unet_up_block_forward_nhwc(
        a, b, params, slope, compute_dtype=jnp.float32))
    out = jax.block_until_ready(f32_whole(x_nhwc, br_nhwc))
    assert jnp.allclose(out, ref_nhwc, atol=2e-3, rtol=2e-3), \
        float(jnp.max(jnp.abs(out - ref_nhwc)))

    # bf16 matmul operands (default; fp32 accumulation + fp32 FRN), 4 row tiles
    bf16_tiled = jax.jit(lambda a, b: unet_up_block_forward_nhwc(
        a, b, params, slope, x_row_tile=2))
    out = jax.block_until_ready(bf16_tiled(x_nhwc, br_nhwc))
    assert jnp.allclose(out, ref_nhwc, atol=0.3, rtol=0.1), \
        float(jnp.max(jnp.abs(out - ref_nhwc)))

    # PyTorch-layout (NCHW) compatibility entry point
    nchw_fwd = jax.jit(lambda a, b: unet_up_block_forward(a, b, params, slope))
    out = jax.block_until_ready(nchw_fwd(x_nchw, bridge_nchw))
    assert out.shape == (N, out_size, 2 * H, 2 * W), out.shape
    assert jnp.allclose(out, ref_nchw, atol=0.3, rtol=0.1), \
        float(jnp.max(jnp.abs(out - ref_nchw)))

    print("KERNEL_OK")
</pallas_src>

<mosaic_0001>
module attributes {stable_mosaic.version = 11 : i64} {
  func.func @_fused_up_block_kernel(%arg0: i32, %arg1: i32, %arg2: memref<1x8x8x8xf32, #tpu.memory_space<vmem>>, %arg3: memref<1x16x16x4xf32, #tpu.memory_space<vmem>>, %arg4: memref<2x2x8x4xf32, #tpu.memory_space<vmem>>, %arg5: memref<1x4xf32, #tpu.memory_space<vmem>>, %arg6: memref<9x8x4xf32, #tpu.memory_space<vmem>>, %arg7: memref<1x4xf32, #tpu.memory_space<vmem>>, %arg8: memref<9x4x4xf32, #tpu.memory_space<vmem>>, %arg9: memref<1x4xf32, #tpu.memory_space<vmem>>, %arg10: memref<4x4xf32, #tpu.memory_space<vmem>>, %arg11: memref<4x4xf32, #tpu.memory_space<vmem>>, %arg12: memref<1x4xf32, #tpu.memory_space<vmem>>, %arg13: memref<1x8x16x4xf32, #tpu.memory_space<vmem>>, %arg14: memref<12x18x8xf32, #tpu.memory_space<vmem>>, %arg15: memref<10x18x4xf32, #tpu.memory_space<vmem>>) attributes {dimension_semantics = [#tpu.dimension_semantics<parallel>, #tpu.dimension_semantics<parallel>], iteration_bounds = array<i64: 2, 2>, scalar_prefetch = 0 : i64, scratch_operands = 2 : i64, tpu.core_type = #tpu.core_type<tc>, window_params = [{transform_indices = @transform_0, window_bounds = array<i64: 1, 8, 8, 8>}, {transform_indices = @transform_1, window_bounds = array<i64: 1, 16, 16, 4>}, {pipeline_mode = #tpu.pipeline_mode<synchronous>, transform_indices = @transform_2, window_bounds = array<i64: 2, 2, 8, 4>}, {pipeline_mode = #tpu.pipeline_mode<synchronous>, transform_indices = @transform_3, window_bounds = array<i64: 1, 4>}, {pipeline_mode = #tpu.pipeline_mode<synchronous>, transform_indices = @transform_4, window_bounds = array<i64: 9, 8, 4>}, {pipeline_mode = #tpu.pipeline_mode<synchronous>, transform_indices = @transform_5, window_bounds = array<i64: 1, 4>}, {pipeline_mode = #tpu.pipeline_mode<synchronous>, transform_indices = @transform_6, window_bounds = array<i64: 9, 4, 4>}, {pipeline_mode = #tpu.pipeline_mode<synchronous>, transform_indices = @transform_7, window_bounds = array<i64: 1, 4>}, {pipeline_mode = #tpu.pipeline_mode<synchronous>, transform_indices = @transform_8, window_bounds = array<i64: 4, 4>}, {pipeline_mode = #tpu.pipeline_mode<synchronous>, transform_indices = @transform_9, window_bounds = array<i64: 4, 4>}, {pipeline_mode = #tpu.pipeline_mode<synchronous>, transform_indices = @transform_10, window_bounds = array<i64: 1, 4>}, {transform_indices = @transform_11, window_bounds = array<i64: 1, 8, 16, 4>}]} {
    %c4_i32 = arith.constant 4 : i32
    %0 = arith.muli %arg1, %c4_i32 : i32
    %c2_i32 = arith.constant 2 : i32
    %1 = arith.muli %c2_i32, %0 : i32
    %cst = arith.constant 0.000000e+00 : f32
    %2 = vector.broadcast %cst : f32 to vector<12x1x8xf32>
    %c0 = arith.constant 0 : index
    %c0_0 = arith.constant 0 : index
    %c0_1 = arith.constant 0 : index
    %3 = vector.load %arg14[%c0, %c0_0, %c0_1] : memref<12x18x8xf32, #tpu.memory_space<vmem>>, vector<12x1x8xf32>
    tpu.vector_store %arg14[%c0, %c0_0, %c0_1], %2 {strides = array<i32>} : memref<12x18x8xf32, #tpu.memory_space<vmem>>, vector<12x1x8xf32>,
    %cst_2 = arith.constant 0.000000e+00 : f32
    %4 = vector.broadcast %cst_2 : f32 to vector<12x1x8xf32>
    %c0_3 = arith.constant 0 : index
    %c17 = arith.constant 17 : index
    %c0_4 = arith.constant 0 : index
    %5 = vector.load %arg14[%c0_3, %c17, %c0_4] : memref<12x18x8xf32, #tpu.memory_space<vmem>>, vector<12x1x8xf32>
    tpu.vector_store %arg14[%c0_3, %c17, %c0_4], %4 {strides = array<i32>} : memref<12x18x8xf32, #tpu.memory_space<vmem>>, vector<12x1x8xf32>,
    %cst_5 = arith.constant 0.000000e+00 : f32
    %6 = vector.broadcast %cst_5 : f32 to vector<10x1x4xf32>
    %c0_6 = arith.constant 0 : index
    %c0_7 = arith.constant 0 : index
    %c0_8 = arith.constant 0 : index
    %7 = vector.load %arg15[%c0_6, %c0_7, %c0_8] : memref<10x18x4xf32, #tpu.memory_space<vmem>>, vector<10x1x4xf32>
    tpu.vector_store %arg15[%c0_6, %c0_7, %c0_8], %6 {strides = array<i32>} : memref<10x18x4xf32, #tpu.memory_space<vmem>>, vector<10x1x4xf32>,
    %cst_9 = arith.constant 0.000000e+00 : f32
    %8 = vector.broadcast %cst_9 : f32 to vector<10x1x4xf32>
    %c0_10 = arith.constant 0 : index
    %c17_11 = arith.constant 17 : index
    %c0_12 = arith.constant 0 : index
    %9 = vector.load %arg15[%c0_10, %c17_11, %c0_12] : memref<10x18x4xf32, #tpu.memory_space<vmem>>, vector<10x1x4xf32>
    tpu.vector_store %arg15[%c0_10, %c17_11, %c0_12], %8 {strides = array<i32>} : memref<10x18x4xf32, #tpu.memory_space<vmem>>, vector<10x1x4xf32>,
    %c0_13 = arith.constant 0 : index
    %10 = arith.index_cast %0 : i32 to index
    %c0_14 = arith.constant 0 : index
    %c0_15 = arith.constant 0 : index
    %11 = vector.load %arg2[%c0_13, %10, %c0_14, %c0_15] : memref<1x8x8x8xf32, #tpu.memory_space<vmem>>, vector<1x4x8x8xf32>
    %12 = vector.shape_cast %11 : vector<1x4x8x8xf32> to vector<4x8x8xf32>
    %13 = vector.shape_cast %12 : vector<4x8x8xf32> to vector<32x8xf32>
    %c0_16 = arith.constant 0 : index
    %c0_17 = arith.constant 0 : index
    %c0_18 = arith.constant 0 : index
    %c0_19 = arith.constant 0 : index
    %14 = vector.load %arg4[%c0_16, %c0_17, %c0_18, %c0_19] : memref<2x2x8x4xf32, #tpu.memory_space<vmem>>, vector<1x1x8x4xf32>
    %15 = vector.shape_cast %14 : vector<1x1x8x4xf32> to vector<8x4xf32>
    %cst_20 = arith.constant dense<0.000000e+00> : vector<32x4xf32>
    %16 = tpu.matmul %13, %15, %cst_20 {dimension_numbers = #tpu.dot_dimension_numbers<[1], [0], [0], [1], [0, 0, 1, 1], [], []>} : vector<32x8xf32>, vector<8x4xf32>, vector<32x4xf32> -> vector<32x4xf32>
    %c0_21 = arith.constant 0 : index
    %c0_22 = arith.constant 0 : index
    %17 = vector.load %arg5[%c0_21, %c0_22] : memref<1x4xf32, #tpu.memory_space<vmem>>, vector<1x4xf32>
    %18 = vector.broadcast %17 : vector<1x4xf32> to vector<32x4xf32>
    %19 = arith.addf %16, %18 : vector<32x4xf32>
    %20 = vector.shape_cast %19 : vector<32x4xf32> to vector<32x1x4xf32>
    %c0_23 = arith.constant 0 : index
    %c1 = arith.constant 1 : index
    %c0_24 = arith.constant 0 : index
    %c0_25 = arith.constant 0 : index
    %21 = vector.load %arg4[%c0_23, %c1, %c0_24, %c0_25] : memref<2x2x8x4xf32, #tpu.memory_space<vmem>>, vector<1x1x8x4xf32>
    %22 = vector.shape_cast %21 : vector<1x1x8x4xf32> to vector<8x4xf32>
    %cst_26 = arith.constant dense<0.000000e+00> : vector<32x4xf32>
    %23 = tpu.matmul %13, %22, %cst_26 {dimension_numbers = #tpu.dot_dimension_numbers<[1], [0], [0], [1], [0, 0, 1, 1], [], []>} : vector<32x8xf32>, vector<8x4xf32>, vector<32x4xf32> -> vector<32x4xf32>
    %c0_27 = arith.constant 0 : index
    %c0_28 = arith.constant 0 : index
    %24 = vector.load %arg5[%c0_27, %c0_28] : memref<1x4xf32, #tpu.memory_space<vmem>>, vector<1x4xf32>
    %25 = vector.broadcast %24 : vector<1x4xf32> to vector<32x4xf32>
    %26 = arith.addf %23, %25 : vector<32x4xf32>
    %27 = vector.shape_cast %26 : vector<32x4xf32> to vector<32x1x4xf32>
    %28 = tpu.concatenate %20, %27 in 1 : vector<32x1x4xf32>, vector<32x1x4xf32> -> vector<32x2x4xf32>
    %29 = vector.shape_cast %28 : vector<32x2x4xf32> to vector<4x16x4xf32>
    %30 = vector.shape_cast %29 : vector<4x16x4xf32> to vector<4x1x16x4xf32>
    %c1_29 = arith.constant 1 : index
    %c0_30 = arith.constant 0 : index
    %c0_31 = arith.constant 0 : index
    %c0_32 = arith.constant 0 : index
    %31 = vector.load %arg4[%c1_29, %c0_30, %c0_31, %c0_32] : memref<2x2x8x4xf32, #tpu.memory_space<vmem>>, vector<1x1x8x4xf32>
    %32 = vector.shape_cast %31 : vector<1x1x8x4xf32> to vector<8x4xf32>
    %cst_33 = arith.constant dense<0.000000e+00> : vector<32x4xf32>
    %33 = tpu.matmul %13, %32, %cst_33 {dimension_numbers = #tpu.dot_dimension_numbers<[1], [0], [0], [1], [0, 0, 1, 1], [], []>} : vector<32x8xf32>, vector<8x4xf32>, vector<32x4xf32> -> vector<32x4xf32>
    %c0_34 = arith.constant 0 : index
    %c0_35 = arith.constant 0 : index
    %34 = vector.load %arg5[%c0_34, %c0_35] : memref<1x4xf32, #tpu.memory_space<vmem>>, vector<1x4xf32>
    %35 = vector.broadcast %34 : vector<1x4xf32> to vector<32x4xf32>
    %36 = arith.addf %33, %35 : vector<32x4xf32>
    %37 = vector.shape_cast %36 : vector<32x4xf32> to vector<32x1x4xf32>
    %c1_36 = arith.constant 1 : index
    %c1_37 = arith.constant 1 : index
    %c0_38 = arith.constant 0 : index
    %c0_39 = arith.constant 0 : index
    %38 = vector.load %arg4[%c1_36, %c1_37, %c0_38, %c0_39] : memref<2x2x8x4xf32, #tpu.memory_space<vmem>>, vector<1x1x8x4xf32>
    %39 = vector.shape_cast %38 : vector<1x1x8x4xf32> to vector<8x4xf32>
    %cst_40 = arith.constant dense<0.000000e+00> : vector<32x4xf32>
    %40 = tpu.matmul %13, %39, %cst_40 {dimension_numbers = #tpu.dot_dimension_numbers<[1], [0], [0], [1], [0, 0, 1, 1], [], []>} : vector<32x8xf32>, vector<8x4xf32>, vector<32x4xf32> -> vector<32x4xf32>
    %c0_41 = arith.constant 0 : index
    %c0_42 = arith.constant 0 : index
    %41 = vector.load %arg5[%c0_41, %c0_42] : memref<1x4xf32, #tpu.memory_space<vmem>>, vector<1x4xf32>
    %42 = vector.broadcast %41 : vector<1x4xf32> to vector<32x4xf32>
    %43 = arith.addf %40, %42 : vector<32x4xf32>
    %44 = vector.shape_cast %43 : vector<32x4xf32> to vector<32x1x4xf32>
    %45 = tpu.concatenate %37, %44 in 1 : vector<32x1x4xf32>, vector<32x1x4xf32> -> vector<32x2x4xf32>
    %46 = vector.shape_cast %45 : vector<32x2x4xf32> to vector<4x16x4xf32>
    %47 = vector.shape_cast %46 : vector<4x16x4xf32> to vector<4x1x16x4xf32>
    %48 = tpu.concatenate %30, %47 in 1 : vector<4x1x16x4xf32>, vector<4x1x16x4xf32> -> vector<4x2x16x4xf32>
    %49 = vector.shape_cast %48 : vector<4x2x16x4xf32> to vector<8x16x4xf32>
    %c0_43 = arith.constant 0 : index
    %50 = arith.index_cast %1 : i32 to index
    %c0_44 = arith.constant 0 : index
    %c0_45 = arith.constant 0 : index
    %51 = vector.load %arg3[%c0_43, %50, %c0_44, %c0_45] : memref<1x16x16x4xf32, #tpu.memory_space<vmem>>, vector<1x8x16x4xf32>
    %52 = vector.shape_cast %51 : vector<1x8x16x4xf32> to vector<8x16x4xf32>
    %c2 = arith.constant 2 : index
    %c1_46 = arith.constant 1 : index
    %c0_47 = arith.constant 0 : index
    %53 = vector.load %arg14[%c2, %c1_46, %c0_47] : memref<12x18x8xf32, #tpu.memory_space<vmem>>, vector<8x16x4xf32>
    tpu.vector_store %arg14[%c2, %c1_46, %c0_47], %49 {strides = array<i32>} : memref<12x18x8xf32, #tpu.memory_space<vmem>>, vector<8x16x4xf32>,
    %c2_48 = arith.constant 2 : index
    %c1_49 = arith.constant 1 : index
    %c4 = arith.constant 4 : index
    %54 = vector.load %arg14[%c2_48, %c1_49, %c4] : memref<12x18x8xf32, #tpu.memory_space<vmem>>, vector<8x16x4xf32>
    tpu.vector_store %arg14[%c2_48, %c1_49, %c4], %52 {strides = array<i32>} : memref<12x18x8xf32, #tpu.memory_space<vmem>>, vector<8x16x4xf32>,
    %c0_i32 = arith.constant 0 : i32
    %55 = arith.cmpi sgt, %arg1, %c0_i32 : i32
    %56 = arith.extui %55 : i1 to i32
    %c0_i32_50 = arith.constant 0 : i32
    %57 = arith.cmpi ne, %56, %c0_i32_50 : i32
    scf.if %57 {
      %c1_i32_224 = arith.constant 1 : i32
      %262 = arith.subi %0, %c1_i32_224 : i32
      %c0_225 = arith.constant 0 : index
      %263 = arith.index_cast %262 : i32 to index
      %c0_226 = arith.constant 0 : index
      %c0_227 = arith.constant 0 : index
      %264 = vector.load %arg2[%c0_225, %263, %c0_226, %c0_227] : memref<1x8x8x8xf32, #tpu.memory_space<vmem>>, vector<1x1x8x8xf32>
      %265 = vector.shape_cast %264 : vector<1x1x8x8xf32> to vector<1x8x8xf32>
      %266 = vector.shape_cast %265 : vector<1x8x8xf32> to vector<8x8xf32>
      %c0_228 = arith.constant 0 : index
      %c0_229 = arith.constant 0 : index
      %c0_230 = arith.constant 0 : index
      %c0_231 = arith.constant 0 : index
      %267 = vector.load %arg4[%c0_228, %c0_229, %c0_230, %c0_231] : memref<2x2x8x4xf32, #tpu.memory_space<vmem>>, vector<1x1x8x4xf32>
      %268 = vector.shape_cast %267 : vector<1x1x8x4xf32> to vector<8x4xf32>
      %cst_232 = arith.constant dense<0.000000e+00> : vector<8x4xf32>
      %269 = tpu.matmul %266, %268, %cst_232 {dimension_numbers = #tpu.dot_dimension_numbers<[1], [0], [0], [1], [0, 0, 1, 1], [], []>} : vector<8x8xf32>, vector<8x4xf32>, vector<8x4xf32> -> vector<8x4xf32>
      %c0_233 = arith.constant 0 : index
      %c0_234 = arith.constant 0 : index
      %270 = vector.load %arg5[%c0_233, %c0_234] : memref<1x4xf32, #tpu.memory_space<vmem>>, vector<1x4xf32>
      %271 = vector.broadcast %270 : vector<1x4xf32> to vector<8x4xf32>
      %272 = arith.addf %269, %271 : vector<8x4xf32>
      %273 = vector.shape_cast %272 : vector<8x4xf32> to vector<8x1x4xf32>
      %c0_235 = arith.constant 0 : index
      %c1_236 = arith.constant 1 : index
      %c0_237 = arith.constant 0 : index
      %c0_238 = arith.constant 0 : index
      %274 = vector.load %arg4[%c0_235, %c1_236, %c0_237, %c0_238] : memref<2x2x8x4xf32, #tpu.memory_space<vmem>>, vector<1x1x8x4xf32>
      %275 = vector.shape_cast %274 : vector<1x1x8x4xf32> to vector<8x4xf32>
      %cst_239 = arith.constant dense<0.000000e+00> : vector<8x4xf32>
      %276 = tpu.matmul %266, %275, %cst_239 {dimension_numbers = #tpu.dot_dimension_numbers<[1], [0], [0], [1], [0, 0, 1, 1], [], []>} : vector<8x8xf32>, vector<8x4xf32>, vector<8x4xf32> -> vector<8x4xf32>
      %c0_240 = arith.constant 0 : index
      %c0_241 = arith.constant 0 : index
      %277 = vector.load %arg5[%c0_240, %c0_241] : memref<1x4xf32, #tpu.memory_space<vmem>>, vector<1x4xf32>
      %278 = vector.broadcast %277 : vector<1x4xf32> to vector<8x4xf32>
      %279 = arith.addf %276, %278 : vector<8x4xf32>
      %280 = vector.shape_cast %279 : vector<8x4xf32> to vector<8x1x4xf32>
      %281 = tpu.concatenate %273, %280 in 1 : vector<8x1x4xf32>, vector<8x1x4xf32> -> vector<8x2x4xf32>
      %282 = vector.shape_cast %281 : vector<8x2x4xf32> to vector<1x16x4xf32>
      %283 = vector.shape_cast %282 : vector<1x16x4xf32> to vector<1x1x16x4xf32>
      %c1_242 = arith.constant 1 : index
      %c0_243 = arith.constant 0 : index
      %c0_244 = arith.constant 0 : index
      %c0_245 = arith.constant 0 : index
      %284 = vector.load %arg4[%c1_242, %c0_243, %c0_244, %c0_245] : memref<2x2x8x4xf32, #tpu.memory_space<vmem>>, vector<1x1x8x4xf32>
      %285 = vector.shape_cast %284 : vector<1x1x8x4xf32> to vector<8x4xf32>
      %cst_246 = arith.constant dense<0.000000e+00> : vector<8x4xf32>
      %286 = tpu.matmul %266, %285, %cst_246 {dimension_numbers = #tpu.dot_dimension_numbers<[1], [0], [0], [1], [0, 0, 1, 1], [], []>} : vector<8x8xf32>, vector<8x4xf32>, vector<8x4xf32> -> vector<8x4xf32>
      %c0_247 = arith.constant 0 : index
      %c0_248 = arith.constant 0 : index
      %287 = vector.load %arg5[%c0_247, %c0_248] : memref<1x4xf32, #tpu.memory_space<vmem>>, vector<1x4xf32>
      %288 = vector.broadcast %287 : vector<1x4xf32> to vector<8x4xf32>
      %289 = arith.addf %286, %288 : vector<8x4xf32>
      %290 = vector.shape_cast %289 : vector<8x4xf32> to vector<8x1x4xf32>
      %c1_249 = arith.constant 1 : index
      %c1_250 = arith.constant 1 : index
      %c0_251 = arith.constant 0 : index
      %c0_252 = arith.constant 0 : index
      %291 = vector.load %arg4[%c1_249, %c1_250, %c0_251, %c0_252] : memref<2x2x8x4xf32, #tpu.memory_space<vmem>>, vector<1x1x8x4xf32>
      %292 = vector.shape_cast %291 : vector<1x1x8x4xf32> to vector<8x4xf32>
      %cst_253 = arith.constant dense<0.000000e+00> : vector<8x4xf32>
      %293 = tpu.matmul %266, %292, %cst_253 {dimension_numbers = #tpu.dot_dimension_numbers<[1], [0], [0], [1], [0, 0, 1, 1], [], []>} : vector<8x8xf32>, vector<8x4xf32>, vector<8x4xf32> -> vector<8x4xf32>
      %c0_254 = arith.constant 0 : index
      %c0_255 = arith.constant 0 : index
      %294 = vector.load %arg5[%c0_254, %c0_255] : memref<1x4xf32, #tpu.memory_space<vmem>>, vector<1x4xf32>
      %295 = vector.broadcast %294 : vector<1x4xf32> to vector<8x4xf32>
      %296 = arith.addf %293, %295 : vector<8x4xf32>
      %297 = vector.shape_cast %296 : vector<8x4xf32> to vector<8x1x4xf32>
      %298 = tpu.concatenate %290, %297 in 1 : vector<8x1x4xf32>, vector<8x1x4xf32> -> vector<8x2x4xf32>
      %299 = vector.shape_cast %298 : vector<8x2x4xf32> to vector<1x16x4xf32>
      %300 = vector.shape_cast %299 : vector<1x16x4xf32> to vector<1x1x16x4xf32>
      %301 = tpu.concatenate %283, %300 in 1 : vector<1x1x16x4xf32>, vector<1x1x16x4xf32> -> vector<1x2x16x4xf32>
      %302 = vector.shape_cast %301 : vector<1x2x16x4xf32> to vector<2x16x4xf32>
      %c0_256 = arith.constant 0 : index
      %c1_257 = arith.constant 1 : index
      %c0_258 = arith.constant 0 : index
      %303 = vector.load %arg14[%c0_256, %c1_257, %c0_258] : memref<12x18x8xf32, #tpu.memory_space<vmem>>, vector<2x16x4xf32>
      tpu.vector_store %arg14[%c0_256, %c1_257, %c0_258], %302 {strides = array<i32>} : memref<12x18x8xf32, #tpu.memory_space<vmem>>, vector<2x16x4xf32>,
      %c2_i32_259 = arith.constant 2 : i32
      %304 = arith.subi %1, %c2_i32_259 : i32
      %c0_260 = arith.constant 0 : index
      %305 = arith.index_cast %304 : i32 to index
      %c0_261 = arith.constant 0 : index
      %c0_262 = arith.constant 0 : index
      %306 = vector.load %arg3[%c0_260, %305, %c0_261, %c0_262] : memref<1x16x16x4xf32, #tpu.memory_space<vmem>>, vector<1x2x16x4xf32>
      %307 = vector.shape_cast %306 : vector<1x2x16x4xf32> to vector<2x16x4xf32>
      %c0_263 = arith.constant 0 : index
      %c1_264 = arith.constant 1 : index
      %c4_265 = arith.constant 4 : index
      %308 = vector.load %arg14[%c0_263, %c1_264, %c4_265] : memref<12x18x8xf32, #tpu.memory_space<vmem>>, vector<2x16x4xf32>
      tpu.vector_store %arg14[%c0_263, %c1_264, %c4_265], %307 {strides = array<i32>} : memref<12x18x8xf32, #tpu.memory_space<vmem>>, vector<2x16x4xf32>,
    } else {
    }
    %c0_i32_51 = arith.constant 0 : i32
    %58 = arith.cmpi eq, %arg1, %c0_i32_51 : i32
    %59 = arith.extui %58 : i1 to i32
    %c0_i32_52 = arith.constant 0 : i32
    %60 = arith.cmpi ne, %59, %c0_i32_52 : i32
    scf.if %60 {
      %cst_224 = arith.constant 0.000000e+00 : f32
      %262 = vector.broadcast %cst_224 : f32 to vector<2x18x8xf32>
      %c0_225 = arith.constant 0 : index
      %c0_226 = arith.constant 0 : index
      %c0_227 = arith.constant 0 : index
      %263 = vector.load %arg14[%c0_225, %c0_226, %c0_227] : memref<12x18x8xf32, #tpu.memory_space<vmem>>, vector<2x18x8xf32>
      tpu.vector_store %arg14[%c0_225, %c0_226, %c0_227], %262 {strides = array<i32>} : memref<12x18x8xf32, #tpu.memory_space<vmem>>, vector<2x18x8xf32>,
    } else {
    }
    %c1_i32 = arith.constant 1 : i32
    %61 = arith.cmpi slt, %arg1, %c1_i32 : i32
    %62 = arith.extui %61 : i1 to i32
    %c0_i32_53 = arith.constant 0 : i32
    %63 = arith.cmpi ne, %62, %c0_i32_53 : i32
    scf.if %63 {
      %c4_i32_224 = arith.constant 4 : i32
      %262 = arith.addi %0, %c4_i32_224 : i32
      %c0_225 = arith.constant 0 : index
      %263 = arith.index_cast %262 : i32 to index
      %c0_226 = arith.constant 0 : index
      %c0_227 = arith.constant 0 : index
      %264 = vector.load %arg2[%c0_225, %263, %c0_226, %c0_227] : memref<1x8x8x8xf32, #tpu.memory_space<vmem>>, vector<1x1x8x8xf32>
      %265 = vector.shape_cast %264 : vector<1x1x8x8xf32> to vector<1x8x8xf32>
      %266 = vector.shape_cast %265 : vector<1x8x8xf32> to vector<8x8xf32>
      %c0_228 = arith.constant 0 : index
      %c0_229 = arith.constant 0 : index
      %c0_230 = arith.constant 0 : index
      %c0_231 = arith.constant 0 : index
      %267 = vector.load %arg4[%c0_228, %c0_229, %c0_230, %c0_231] : memref<2x2x8x4xf32, #tpu.memory_space<vmem>>, vector<1x1x8x4xf32>
      %268 = vector.shape_cast %267 : vector<1x1x8x4xf32> to vector<8x4xf32>
      %cst_232 = arith.constant dense<0.000000e+00> : vector<8x4xf32>
      %269 = tpu.matmul %266, %268, %cst_232 {dimension_numbers = #tpu.dot_dimension_numbers<[1], [0], [0], [1], [0, 0, 1, 1], [], []>} : vector<8x8xf32>, vector<8x4xf32>, vector<8x4xf32> -> vector<8x4xf32>
      %c0_233 = arith.constant 0 : index
      %c0_234 = arith.constant 0 : index
      %270 = vector.load %arg5[%c0_233, %c0_234] : memref<1x4xf32, #tpu.memory_space<vmem>>, vector<1x4xf32>
      %271 = vector.broadcast %270 : vector<1x4xf32> to vector<8x4xf32>
      %272 = arith.addf %269, %271 : vector<8x4xf32>
      %273 = vector.shape_cast %272 : vector<8x4xf32> to vector<8x1x4xf32>
      %c0_235 = arith.constant 0 : index
      %c1_236 = arith.constant 1 : index
      %c0_237 = arith.constant 0 : index
      %c0_238 = arith.constant 0 : index
      %274 = vector.load %arg4[%c0_235, %c1_236, %c0_237, %c0_238] : memref<2x2x8x4xf32, #tpu.memory_space<vmem>>, vector<1x1x8x4xf32>
      %275 = vector.shape_cast %274 : vector<1x1x8x4xf32> to vector<8x4xf32>
      %cst_239 = arith.constant dense<0.000000e+00> : vector<8x4xf32>
      %276 = tpu.matmul %266, %275, %cst_239 {dimension_numbers = #tpu.dot_dimension_numbers<[1], [0], [0], [1], [0, 0, 1, 1], [], []>} : vector<8x8xf32>, vector<8x4xf32>, vector<8x4xf32> -> vector<8x4xf32>
      %c0_240 = arith.constant 0 : index
      %c0_241 = arith.constant 0 : index
      %277 = vector.load %arg5[%c0_240, %c0_241] : memref<1x4xf32, #tpu.memory_space<vmem>>, vector<1x4xf32>
      %278 = vector.broadcast %277 : vector<1x4xf32> to vector<8x4xf32>
      %279 = arith.addf %276, %278 : vector<8x4xf32>
      %280 = vector.shape_cast %279 : vector<8x4xf32> to vector<8x1x4xf32>
      %281 = tpu.concatenate %273, %280 in 1 : vector<8x1x4xf32>, vector<8x1x4xf32> -> vector<8x2x4xf32>
      %282 = vector.shape_cast %281 : vector<8x2x4xf32> to vector<1x16x4xf32>
      %283 = vector.shape_cast %282 : vector<1x16x4xf32> to vector<1x1x16x4xf32>
      %c1_242 = arith.constant 1 : index
      %c0_243 = arith.constant 0 : index
      %c0_244 = arith.constant 0 : index
      %c0_245 = arith.constant 0 : index
      %284 = vector.load %arg4[%c1_242, %c0_243, %c0_244, %c0_245] : memref<2x2x8x4xf32, #tpu.memory_space<vmem>>, vector<1x1x8x4xf32>
      %285 = vector.shape_cast %284 : vector<1x1x8x4xf32> to vector<8x4xf32>
      %cst_246 = arith.constant dense<0.000000e+00> : vector<8x4xf32>
      %286 = tpu.matmul %266, %285, %cst_246 {dimension_numbers = #tpu.dot_dimension_numbers<[1], [0], [0], [1], [0, 0, 1, 1], [], []>} : vector<8x8xf32>, vector<8x4xf32>, vector<8x4xf32> -> vector<8x4xf32>
      %c0_247 = arith.constant 0 : index
      %c0_248 = arith.constant 0 : index
      %287 = vector.load %arg5[%c0_247, %c0_248] : memref<1x4xf32, #tpu.memory_space<vmem>>, vector<1x4xf32>
      %288 = vector.broadcast %287 : vector<1x4xf32> to vector<8x4xf32>
      %289 = arith.addf %286, %288 : vector<8x4xf32>
      %290 = vector.shape_cast %289 : vector<8x4xf32> to vector<8x1x4xf32>
      %c1_249 = arith.constant 1 : index
      %c1_250 = arith.constant 1 : index
      %c0_251 = arith.constant 0 : index
      %c0_252 = arith.constant 0 : index
      %291 = vector.load %arg4[%c1_249, %c1_250, %c0_251, %c0_252] : memref<2x2x8x4xf32, #tpu.memory_space<vmem>>, vector<1x1x8x4xf32>
      %292 = vector.shape_cast %291 : vector<1x1x8x4xf32> to vector<8x4xf32>
      %cst_253 = arith.constant dense<0.000000e+00> : vector<8x4xf32>
      %293 = tpu.matmul %266, %292, %cst_253 {dimension_numbers = #tpu.dot_dimension_numbers<[1], [0], [0], [1], [0, 0, 1, 1], [], []>} : vector<8x8xf32>, vector<8x4xf32>, vector<8x4xf32> -> vector<8x4xf32>
      %c0_254 = arith.constant 0 : index
      %c0_255 = arith.constant 0 : index
      %294 = vector.load %arg5[%c0_254, %c0_255] : memref<1x4xf32, #tpu.memory_space<vmem>>, vector<1x4xf32>
      %295 = vector.broadcast %294 : vector<1x4xf32> to vector<8x4xf32>
      %296 = arith.addf %293, %295 : vector<8x4xf32>
      %297 = vector.shape_cast %296 : vector<8x4xf32> to vector<8x1x4xf32>
      %298 = tpu.concatenate %290, %297 in 1 : vector<8x1x4xf32>, vector<8x1x4xf32> -> vector<8x2x4xf32>
      %299 = vector.shape_cast %298 : vector<8x2x4xf32> to vector<1x16x4xf32>
      %300 = vector.shape_cast %299 : vector<1x16x4xf32> to vector<1x1x16x4xf32>
      %301 = tpu.concatenate %283, %300 in 1 : vector<1x1x16x4xf32>, vector<1x1x16x4xf32> -> vector<1x2x16x4xf32>
      %302 = vector.shape_cast %301 : vector<1x2x16x4xf32> to vector<2x16x4xf32>
      %c10 = arith.constant 10 : index
      %c1_256 = arith.constant 1 : index
      %c0_257 = arith.constant 0 : index
      %303 = vector.load %arg14[%c10, %c1_256, %c0_257] : memref<12x18x8xf32, #tpu.memory_space<vmem>>, vector<2x16x4xf32>
      tpu.vector_store %arg14[%c10, %c1_256, %c0_257], %302 {strides = array<i32>} : memref<12x18x8xf32, #tpu.memory_space<vmem>>, vector<2x16x4xf32>,
      %c8_i32 = arith.constant 8 : i32
      %304 = arith.addi %1, %c8_i32 : i32
      %c0_258 = arith.constant 0 : index
      %305 = arith.index_cast %304 : i32 to index
      %c0_259 = arith.constant 0 : index
      %c0_260 = arith.constant 0 : index
      %306 = vector.load %arg3[%c0_258, %305, %c0_259, %c0_260] : memref<1x16x16x4xf32, #tpu.memory_space<vmem>>, vector<1x2x16x4xf32>
      %307 = vector.shape_cast %306 : vector<1x2x16x4xf32> to vector<2x16x4xf32>
      %c10_261 = arith.constant 10 : index
      %c1_262 = arith.constant 1 : index
      %c4_263 = arith.constant 4 : index
      %308 = vector.load %arg14[%c10_261, %c1_262, %c4_263] : memref<12x18x8xf32, #tpu.memory_space<vmem>>, vector<2x16x4xf32>
      tpu.vector_store %arg14[%c10_261, %c1_262, %c4_263], %307 {strides = array<i32>} : memref<12x18x8xf32, #tpu.memory_space<vmem>>, vector<2x16x4xf32>,
    } else {
    }
    %c1_i32_54 = arith.constant 1 : i32
    %64 = arith.cmpi eq, %arg1, %c1_i32_54 : i32
    %65 = arith.extui %64 : i1 to i32
    %c0_i32_55 = arith.constant 0 : i32
    %66 = arith.cmpi ne, %65, %c0_i32_55 : i32
    scf.if %66 {
      %cst_224 = arith.constant 0.000000e+00 : f32
      %262 = vector.broadcast %cst_224 : f32 to vector<2x18x8xf32>
      %c10 = arith.constant 10 : index
      %c0_225 = arith.constant 0 : index
      %c0_226 = arith.constant 0 : index
      %263 = vector.load %arg14[%c10, %c0_225, %c0_226] : memref<12x18x8xf32, #tpu.memory_space<vmem>>, vector<2x18x8xf32>
      tpu.vector_store %arg14[%c10, %c0_225, %c0_226], %262 {strides = array<i32>} : memref<12x18x8xf32, #tpu.memory_space<vmem>>, vector<2x18x8xf32>,
    } else {
    }
    %cst_56 = arith.constant 0.000000e+00 : f32
    %67 = vector.broadcast %cst_56 : f32 to vector<160x4xf32>
    %c0_57 = arith.constant 0 : index
    %c0_58 = arith.constant 0 : index
    %c0_59 = arith.constant 0 : index
    %68 = vector.load %arg14[%c0_57, %c0_58, %c0_59] : memref<12x18x8xf32, #tpu.memory_space<vmem>>, vector<10x16x8xf32>
    %69 = vector.shape_cast %68 : vector<10x16x8xf32> to vector<160x8xf32>
    %c0_60 = arith.constant 0 : index
    %c0_61 = arith.constant 0 : index
    %c0_62 = arith.constant 0 : index
    %70 = vector.load %arg6[%c0_60, %c0_61, %c0_62] : memref<9x8x4xf32, #tpu.memory_space<vmem>>, vector<1x8x4xf32>
    %71 = vector.shape_cast %70 : vector<1x8x4xf32> to vector<8x4xf32>
    %cst_63 = arith.constant dense<0.000000e+00> : vector<160x4xf32>
    %72 = tpu.matmul %69, %71, %cst_63 {dimension_numbers = #tpu.dot_dimension_numbers<[1], [0], [0], [1], [0, 0, 1, 1], [], []>} : vector<160x8xf32>, vector<8x4xf32>, vector<160x4xf32> -> vector<160x4xf32>
    %73 = arith.addf %67, %72 : vector<160x4xf32>
    %c0_64 = arith.constant 0 : index
    %c1_65 = arith.constant 1 : index
    %c0_66 = arith.constant 0 : index
    %74 = vector.load %arg14[%c0_64, %c1_65, %c0_66] : memref<12x18x8xf32, #tpu.memory_space<vmem>>, vector<10x16x8xf32>
    %75 = vector.shape_cast %74 : vector<10x16x8xf32> to vector<160x8xf32>
    %c1_67 = arith.constant 1 : index
    %c0_68 = arith.constant 0 : index
    %c0_69 = arith.constant 0 : index
    %76 = vector.load %arg6[%c1_67, %c0_68, %c0_69] : memref<9x8x4xf32, #tpu.memory_space<vmem>>, vector<1x8x4xf32>
    %77 = vector.shape_cast %76 : vector<1x8x4xf32> to vector<8x4xf32>
    %cst_70 = arith.constant dense<0.000000e+00> : vector<160x4xf32>
    %78 = tpu.matmul %75, %77, %cst_70 {dimension_numbers = #tpu.dot_dimension_numbers<[1], [0], [0], [1], [0, 0, 1, 1], [], []>} : vector<160x8xf32>, vector<8x4xf32>, vector<160x4xf32> -> vector<160x4xf32>
    %79 = arith.addf %73, %78 : vector<160x4xf32>
    %c0_71 = arith.constant 0 : index
    %c2_72 = arith.constant 2 : index
    %c0_73 = arith.constant 0 : index
    %80 = vector.load %arg14[%c0_71, %c2_72, %c0_73] : memref<12x18x8xf32, #tpu.memory_space<vmem>>, vector<10x16x8xf32>
    %81 = vector.shape_cast %80 : vector<10x16x8xf32> to vector<160x8xf32>
    %c2_74 = arith.constant 2 : index
    %c0_75 = arith.constant 0 : index
    %c0_76 = arith.constant 0 : index
    %82 = vector.load %arg6[%c2_74, %c0_75, %c0_76] : memref<9x8x4xf32, #tpu.memory_space<vmem>>, vector<1x8x4xf32>
    %83 = vector.shape_cast %82 : vector<1x8x4xf32> to vector<8x4xf32>
    %cst_77 = arith.constant dense<0.000000e+00> : vector<160x4xf32>
    %84 = tpu.matmul %81, %83, %cst_77 {dimension_numbers = #tpu.dot_dimension_numbers<[1], [0], [0], [1], [0, 0, 1, 1], [], []>} : vector<160x8xf32>, vector<8x4xf32>, vector<160x4xf32> -> vector<160x4xf32>
    %85 = arith.addf %79, %84 : vector<160x4xf32>
    %c1_78 = arith.constant 1 : index
    %c0_79 = arith.constant 0 : index
    %c0_80 = arith.constant 0 : index
    %86 = vector.load %arg14[%c1_78, %c0_79, %c0_80] : memref<12x18x8xf32, #tpu.memory_space<vmem>>, vector<10x16x8xf32>
    %87 = vector.shape_cast %86 : vector<10x16x8xf32> to vector<160x8xf32>
    %c3 = arith.constant 3 : index
    %c0_81 = arith.constant 0 : index
    %c0_82 = arith.constant 0 : index
    %88 = vector.load %arg6[%c3, %c0_81, %c0_82] : memref<9x8x4xf32, #tpu.memory_space<vmem>>, vector<1x8x4xf32>
    %89 = vector.shape_cast %88 : vector<1x8x4xf32> to vector<8x4xf32>
    %cst_83 = arith.constant dense<0.000000e+00> : vector<160x4xf32>
    %90 = tpu.matmul %87, %89, %cst_83 {dimension_numbers = #tpu.dot_dimension_numbers<[1], [0], [0], [1], [0, 0, 1, 1], [], []>} : vector<160x8xf32>, vector<8x4xf32>, vector<160x4xf32> -> vector<160x4xf32>
    %91 = arith.addf %85, %90 : vector<160x4xf32>
    %c1_84 = arith.constant 1 : index
    %c1_85 = arith.constant 1 : index
    %c0_86 = arith.constant 0 : index
    %92 = vector.load %arg14[%c1_84, %c1_85, %c0_86] : memref<12x18x8xf32, #tpu.memory_space<vmem>>, vector<10x16x8xf32>
    %93 = vector.shape_cast %92 : vector<10x16x8xf32> to vector<160x8xf32>
    %c4_87 = arith.constant 4 : index
    %c0_88 = arith.constant 0 : index
    %c0_89 = arith.constant 0 : index
    %94 = vector.load %arg6[%c4_87, %c0_88, %c0_89] : memref<9x8x4xf32, #tpu.memory_space<vmem>>, vector<1x8x4xf32>
    %95 = vector.shape_cast %94 : vector<1x8x4xf32> to vector<8x4xf32>
    %cst_90 = arith.constant dense<0.000000e+00> : vector<160x4xf32>
    %96 = tpu.matmul %93, %95, %cst_90 {dimension_numbers = #tpu.dot_dimension_numbers<[1], [0], [0], [1], [0, 0, 1, 1], [], []>} : vector<160x8xf32>, vector<8x4xf32>, vector<160x4xf32> -> vector<160x4xf32>
    %97 = arith.addf %91, %96 : vector<160x4xf32>
    %c1_91 = arith.constant 1 : index
    %c2_92 = arith.constant 2 : index
    %c0_93 = arith.constant 0 : index
    %98 = vector.load %arg14[%c1_91, %c2_92, %c0_93] : memref<12x18x8xf32, #tpu.memory_space<vmem>>, vector<10x16x8xf32>
    %99 = vector.shape_cast %98 : vector<10x16x8xf32> to vector<160x8xf32>
    %c5 = arith.constant 5 : index
    %c0_94 = arith.constant 0 : index
    %c0_95 = arith.constant 0 : index
    %100 = vector.load %arg6[%c5, %c0_94, %c0_95] : memref<9x8x4xf32, #tpu.memory_space<vmem>>, vector<1x8x4xf32>
    %101 = vector.shape_cast %100 : vector<1x8x4xf32> to vector<8x4xf32>
    %cst_96 = arith.constant dense<0.000000e+00> : vector<160x4xf32>
    %102 = tpu.matmul %99, %101, %cst_96 {dimension_numbers = #tpu.dot_dimension_numbers<[1], [0], [0], [1], [0, 0, 1, 1], [], []>} : vector<160x8xf32>, vector<8x4xf32>, vector<160x4xf32> -> vector<160x4xf32>
    %103 = arith.addf %97, %102 : vector<160x4xf32>
    %c2_97 = arith.constant 2 : index
    %c0_98 = arith.constant 0 : index
    %c0_99 = arith.constant 0 : index
    %104 = vector.load %arg14[%c2_97, %c0_98, %c0_99] : memref<12x18x8xf32, #tpu.memory_space<vmem>>, vector<10x16x8xf32>
    %105 = vector.shape_cast %104 : vector<10x16x8xf32> to vector<160x8xf32>
    %c6 = arith.constant 6 : index
    %c0_100 = arith.constant 0 : index
    %c0_101 = arith.constant 0 : index
    %106 = vector.load %arg6[%c6, %c0_100, %c0_101] : memref<9x8x4xf32, #tpu.memory_space<vmem>>, vector<1x8x4xf32>
    %107 = vector.shape_cast %106 : vector<1x8x4xf32> to vector<8x4xf32>
    %cst_102 = arith.constant dense<0.000000e+00> : vector<160x4xf32>
    %108 = tpu.matmul %105, %107, %cst_102 {dimension_numbers = #tpu.dot_dimension_numbers<[1], [0], [0], [1], [0, 0, 1, 1], [], []>} : vector<160x8xf32>, vector<8x4xf32>, vector<160x4xf32> -> vector<160x4xf32>
    %109 = arith.addf %103, %108 : vector<160x4xf32>
    %c2_103 = arith.constant 2 : index
    %c1_104 = arith.constant 1 : index
    %c0_105 = arith.constant 0 : index
    %110 = vector.load %arg14[%c2_103, %c1_104, %c0_105] : memref<12x18x8xf32, #tpu.memory_space<vmem>>, vector<10x16x8xf32>
    %111 = vector.shape_cast %110 : vector<10x16x8xf32> to vector<160x8xf32>
    %c7 = arith.constant 7 : index
    %c0_106 = arith.constant 0 : index
    %c0_107 = arith.constant 0 : index
    %112 = vector.load %arg6[%c7, %c0_106, %c0_107] : memref<9x8x4xf32, #tpu.memory_space<vmem>>, vector<1x8x4xf32>
    %113 = vector.shape_cast %112 : vector<1x8x4xf32> to vector<8x4xf32>
    %cst_108 = arith.constant dense<0.000000e+00> : vector<160x4xf32>
    %114 = tpu.matmul %111, %113, %cst_108 {dimension_numbers = #tpu.dot_dimension_numbers<[1], [0], [0], [1], [0, 0, 1, 1], [], []>} : vector<160x8xf32>, vector<8x4xf32>, vector<160x4xf32> -> vector<160x4xf32>
    %115 = arith.addf %109, %114 : vector<160x4xf32>
    %c2_109 = arith.constant 2 : index
    %c2_110 = arith.constant 2 : index
    %c0_111 = arith.constant 0 : index
    %116 = vector.load %arg14[%c2_109, %c2_110, %c0_111] : memref<12x18x8xf32, #tpu.memory_space<vmem>>, vector<10x16x8xf32>
    %117 = vector.shape_cast %116 : vector<10x16x8xf32> to vector<160x8xf32>
    %c8 = arith.constant 8 : index
    %c0_112 = arith.constant 0 : index
    %c0_113 = arith.constant 0 : index
    %118 = vector.load %arg6[%c8, %c0_112, %c0_113] : memref<9x8x4xf32, #tpu.memory_space<vmem>>, vector<1x8x4xf32>
    %119 = vector.shape_cast %118 : vector<1x8x4xf32> to vector<8x4xf32>
    %cst_114 = arith.constant dense<0.000000e+00> : vector<160x4xf32>
    %120 = tpu.matmul %117, %119, %cst_114 {dimension_numbers = #tpu.dot_dimension_numbers<[1], [0], [0], [1], [0, 0, 1, 1], [], []>} : vector<160x8xf32>, vector<8x4xf32>, vector<160x4xf32> -> vector<160x4xf32>
    %121 = arith.addf %115, %120 : vector<160x4xf32>
    %c0_115 = arith.constant 0 : index
    %c0_116 = arith.constant 0 : index
    %122 = vector.load %arg7[%c0_115, %c0_116] : memref<1x4xf32, #tpu.memory_space<vmem>>, vector<1x4xf32>
    %123 = vector.broadcast %122 : vector<1x4xf32> to vector<160x4xf32>
    %124 = arith.addf %121, %123 : vector<160x4xf32>
    %cst_117 = arith.constant 5.000000e-01 : f32
    %125 = vector.broadcast %cst_117 : f32 to vector<160x4xf32>
    %126 = arith.mulf %125, %124 : vector<160x4xf32>
    %cst_118 = arith.constant 0.707106769 : f32
    %127 = vector.broadcast %cst_118 : f32 to vector<160x4xf32>
    %128 = arith.mulf %124, %127 : vector<160x4xf32>
    %129 = math.erf %128 : vector<160x4xf32>
    %cst_119 = arith.constant 1.000000e+00 : f32
    %130 = vector.broadcast %cst_119 : f32 to vector<160x4xf32>
    %131 = arith.addf %130, %129 : vector<160x4xf32>
    %132 = arith.mulf %126, %131 : vector<160x4xf32>
    %cst_120 = arith.constant 0.000000e+00 : f32
    %133 = vector.broadcast %cst_120 : f32 to vector<160x4xf32>
    %134 = arith.cmpf oge, %124, %133 : vector<160x4xf32>
    %cst_121 = arith.constant 2.000000e-01 : f32
    %135 = vector.broadcast %cst_121 : f32 to vector<160x4xf32>
    %136 = arith.mulf %135, %124 : vector<160x4xf32>
    %137 = arith.select %134, %124, %136 : vector<160x4xi1>, vector<160x4xf32>
    %cst_122 = arith.constant 5.267000e-01 : f32
    %138 = vector.broadcast %cst_122 : f32 to vector<160x4xf32>
    %139 = arith.mulf %138, %137 : vector<160x4xf32>
    %cst_123 = arith.constant 4.733000e-01 : f32
    %140 = vector.broadcast %cst_123 : f32 to vector<160x4xf32>
    %141 = arith.mulf %140, %132 : vector<160x4xf32>
    %cst_124 = arith.constant 5.497000e-01 : f32
    %142 = vector.broadcast %cst_124 : f32 to vector<160x4xf32>
    %143 = arith.mulf %142, %132 : vector<160x4xf32>
    %144 = arith.addf %139, %141 : vector<160x4xf32>
    %cst_125 = arith.constant 0.000000e+00 : f32
    %145 = vector.broadcast %cst_125 : f32 to vector<160x4xf32>
    %146 = arith.cmpf oge, %144, %145 : vector<160x4xf32>
    %cst_126 = arith.constant 2.000000e-01 : f32
    %147 = vector.broadcast %cst_126 : f32 to vector<160x4xf32>
    %148 = arith.mulf %147, %144 : vector<160x4xf32>
    %149 = arith.select %146, %144, %148 : vector<160x4xi1>, vector<160x4xf32>
    %cst_127 = arith.constant 4.591000e-01 : f32
    %150 = vector.broadcast %cst_127 : f32 to vector<160x4xf32>
    %151 = arith.mulf %150, %149 : vector<160x4xf32>
    %152 = arith.addf %151, %143 : vector<160x4xf32>
    %153 = vector.shape_cast %152 : vector<160x4xf32> to vector<10x16x4xf32>
    %c0_128 = arith.constant 0 : index
    %c1_129 = arith.constant 1 : index
    %c0_130 = arith.constant 0 : index
    %154 = vector.load %arg15[%c0_128, %c1_129, %c0_130] : memref<10x18x4xf32, #tpu.memory_space<vmem>>, vector<10x16x4xf32>
    tpu.vector_store %arg15[%c0_128, %c1_129, %c0_130], %153 {strides = array<i32>} : memref<10x18x4xf32, #tpu.memory_space<vmem>>, vector<10x16x4xf32>,
    %c0_i32_131 = arith.constant 0 : i32
    %155 = arith.cmpi eq, %arg1, %c0_i32_131 : i32
    %156 = arith.extui %155 : i1 to i32
    %c0_i32_132 = arith.constant 0 : i32
    %157 = arith.cmpi ne, %156, %c0_i32_132 : i32
    scf.if %157 {
      %cst_224 = arith.constant 0.000000e+00 : f32
      %262 = vector.broadcast %cst_224 : f32 to vector<1x18x4xf32>
      %c0_225 = arith.constant 0 : index
      %c0_226 = arith.constant 0 : index
      %c0_227 = arith.constant 0 : index
      %263 = vector.load %arg15[%c0_225, %c0_226, %c0_227] : memref<10x18x4xf32, #tpu.memory_space<vmem>>, vector<1x18x4xf32>
      tpu.vector_store %arg15[%c0_225, %c0_226, %c0_227], %262 {strides = array<i32>} : memref<10x18x4xf32, #tpu.memory_space<vmem>>, vector<1x18x4xf32>,
    } else {
    }
    %c1_i32_133 = arith.constant 1 : i32
    %158 = arith.cmpi eq, %arg1, %c1_i32_133 : i32
    %159 = arith.extui %158 : i1 to i32
    %c0_i32_134 = arith.constant 0 : i32
    %160 = arith.cmpi ne, %159, %c0_i32_134 : i32
    scf.if %160 {
      %cst_224 = arith.constant 0.000000e+00 : f32
      %262 = vector.broadcast %cst_224 : f32 to vector<1x18x4xf32>
      %c9 = arith.constant 9 : index
      %c0_225 = arith.constant 0 : index
      %c0_226 = arith.constant 0 : index
      %263 = vector.load %arg15[%c9, %c0_225, %c0_226] : memref<10x18x4xf32, #tpu.memory_space<vmem>>, vector<1x18x4xf32>
      tpu.vector_store %arg15[%c9, %c0_225, %c0_226], %262 {strides = array<i32>} : memref<10x18x4xf32, #tpu.memory_space<vmem>>, vector<1x18x4xf32>,
    } else {
    }
    %cst_135 = arith.constant 0.000000e+00 : f32
    %161 = vector.broadcast %cst_135 : f32 to vector<128x4xf32>
    %c0_136 = arith.constant 0 : index
    %c0_137 = arith.constant 0 : index
    %c0_138 = arith.constant 0 : index
    %162 = vector.load %arg15[%c0_136, %c0_137, %c0_138] : memref<10x18x4xf32, #tpu.memory_space<vmem>>, vector<8x16x4xf32>
    %163 = vector.shape_cast %162 : vector<8x16x4xf32> to vector<128x4xf32>
    %c0_139 = arith.constant 0 : index
    %c0_140 = arith.constant 0 : index
    %c0_141 = arith.constant 0 : index
    %164 = vector.load %arg8[%c0_139, %c0_140, %c0_141] : memref<9x4x4xf32, #tpu.memory_space<vmem>>, vector<1x4x4xf32>
    %165 = vector.shape_cast %164 : vector<1x4x4xf32> to vector<4x4xf32>
    %cst_142 = arith.constant dense<0.000000e+00> : vector<128x4xf32>
    %166 = tpu.matmul %163, %165, %cst_142 {dimension_numbers = #tpu.dot_dimension_numbers<[1], [0], [0], [1], [0, 0, 1, 1], [], []>} : vector<128x4xf32>, vector<4x4xf32>, vector<128x4xf32> -> vector<128x4xf32>
    %167 = arith.addf %161, %166 : vector<128x4xf32>
    %c0_143 = arith.constant 0 : index
    %c1_144 = arith.constant 1 : index
    %c0_145 = arith.constant 0 : index
    %168 = vector.load %arg15[%c0_143, %c1_144, %c0_145] : memref<10x18x4xf32, #tpu.memory_space<vmem>>, vector<8x16x4xf32>
    %169 = vector.shape_cast %168 : vector<8x16x4xf32> to vector<128x4xf32>
    %c1_146 = arith.constant 1 : index
    %c0_147 = arith.constant 0 : index
    %c0_148 = arith.constant 0 : index
    %170 = vector.load %arg8[%c1_146, %c0_147, %c0_148] : memref<9x4x4xf32, #tpu.memory_space<vmem>>, vector<1x4x4xf32>
    %171 = vector.shape_cast %170 : vector<1x4x4xf32> to vector<4x4xf32>
    %cst_149 = arith.constant dense<0.000000e+00> : vector<128x4xf32>
    %172 = tpu.matmul %169, %171, %cst_149 {dimension_numbers = #tpu.dot_dimension_numbers<[1], [0], [0], [1], [0, 0, 1, 1], [], []>} : vector<128x4xf32>, vector<4x4xf32>, vector<128x4xf32> -> vector<128x4xf32>
    %173 = arith.addf %167, %172 : vector<128x4xf32>
    %c0_150 = arith.constant 0 : index
    %c2_151 = arith.constant 2 : index
    %c0_152 = arith.constant 0 : index
    %174 = vector.load %arg15[%c0_150, %c2_151, %c0_152] : memref<10x18x4xf32, #tpu.memory_space<vmem>>, vector<8x16x4xf32>
    %175 = vector.shape_cast %174 : vector<8x16x4xf32> to vector<128x4xf32>
    %c2_153 = arith.constant 2 : index
    %c0_154 = arith.constant 0 : index
    %c0_155 = arith.constant 0 : index
    %176 = vector.load %arg8[%c2_153, %c0_154, %c0_155] : memref<9x4x4xf32, #tpu.memory_space<vmem>>, vector<1x4x4xf32>
    %177 = vector.shape_cast %176 : vector<1x4x4xf32> to vector<4x4xf32>
    %cst_156 = arith.constant dense<0.000000e+00> : vector<128x4xf32>
    %178 = tpu.matmul %175, %177, %cst_156 {dimension_numbers = #tpu.dot_dimension_numbers<[1], [0], [0], [1], [0, 0, 1, 1], [], []>} : vector<128x4xf32>, vector<4x4xf32>, vector<128x4xf32> -> vector<128x4xf32>
    %179 = arith.addf %173, %178 : vector<128x4xf32>
    %c1_157 = arith.constant 1 : index
    %c0_158 = arith.constant 0 : index
    %c0_159 = arith.constant 0 : index
    %180 = vector.load %arg15[%c1_157, %c0_158, %c0_159] : memref<10x18x4xf32, #tpu.memory_space<vmem>>, vector<8x16x4xf32>
    %181 = vector.shape_cast %180 : vector<8x16x4xf32> to vector<128x4xf32>
    %c3_160 = arith.constant 3 : index
    %c0_161 = arith.constant 0 : index
    %c0_162 = arith.constant 0 : index
    %182 = vector.load %arg8[%c3_160, %c0_161, %c0_162] : memref<9x4x4xf32, #tpu.memory_space<vmem>>, vector<1x4x4xf32>
    %183 = vector.shape_cast %182 : vector<1x4x4xf32> to vector<4x4xf32>
    %cst_163 = arith.constant dense<0.000000e+00> : vector<128x4xf32>
    %184 = tpu.matmul %181, %183, %cst_163 {dimension_numbers = #tpu.dot_dimension_numbers<[1], [0], [0], [1], [0, 0, 1, 1], [], []>} : vector<128x4xf32>, vector<4x4xf32>, vector<128x4xf32> -> vector<128x4xf32>
    %185 = arith.addf %179, %184 : vector<128x4xf32>
    %c1_164 = arith.constant 1 : index
    %c1_165 = arith.constant 1 : index
    %c0_166 = arith.constant 0 : index
    %186 = vector.load %arg15[%c1_164, %c1_165, %c0_166] : memref<10x18x4xf32, #tpu.memory_space<vmem>>, vector<8x16x4xf32>
    %187 = vector.shape_cast %186 : vector<8x16x4xf32> to vector<128x4xf32>
    %c4_167 = arith.constant 4 : index
    %c0_168 = arith.constant 0 : index
    %c0_169 = arith.constant 0 : index
    %188 = vector.load %arg8[%c4_167, %c0_168, %c0_169] : memref<9x4x4xf32, #tpu.memory_space<vmem>>, vector<1x4x4xf32>
    %189 = vector.shape_cast %188 : vector<1x4x4xf32> to vector<4x4xf32>
    %cst_170 = arith.constant dense<0.000000e+00> : vector<128x4xf32>
    %190 = tpu.matmul %187, %189, %cst_170 {dimension_numbers = #tpu.dot_dimension_numbers<[1], [0], [0], [1], [0, 0, 1, 1], [], []>} : vector<128x4xf32>, vector<4x4xf32>, vector<128x4xf32> -> vector<128x4xf32>
    %191 = arith.addf %185, %190 : vector<128x4xf32>
    %c1_171 = arith.constant 1 : index
    %c2_172 = arith.constant 2 : index
    %c0_173 = arith.constant 0 : index
    %192 = vector.load %arg15[%c1_171, %c2_172, %c0_173] : memref<10x18x4xf32, #tpu.memory_space<vmem>>, vector<8x16x4xf32>
    %193 = vector.shape_cast %192 : vector<8x16x4xf32> to vector<128x4xf32>
    %c5_174 = arith.constant 5 : index
    %c0_175 = arith.constant 0 : index
    %c0_176 = arith.constant 0 : index
    %194 = vector.load %arg8[%c5_174, %c0_175, %c0_176] : memref<9x4x4xf32, #tpu.memory_space<vmem>>, vector<1x4x4xf32>
    %195 = vector.shape_cast %194 : vector<1x4x4xf32> to vector<4x4xf32>
    %cst_177 = arith.constant dense<0.000000e+00> : vector<128x4xf32>
    %196 = tpu.matmul %193, %195, %cst_177 {dimension_numbers = #tpu.dot_dimension_numbers<[1], [0], [0], [1], [0, 0, 1, 1], [], []>} : vector<128x4xf32>, vector<4x4xf32>, vector<128x4xf32> -> vector<128x4xf32>
    %197 = arith.addf %191, %196 : vector<128x4xf32>
    %c2_178 = arith.constant 2 : index
    %c0_179 = arith.constant 0 : index
    %c0_180 = arith.constant 0 : index
    %198 = vector.load %arg15[%c2_178, %c0_179, %c0_180] : memref<10x18x4xf32, #tpu.memory_space<vmem>>, vector<8x16x4xf32>
    %199 = vector.shape_cast %198 : vector<8x16x4xf32> to vector<128x4xf32>
    %c6_181 = arith.constant 6 : index
    %c0_182 = arith.constant 0 : index
    %c0_183 = arith.constant 0 : index
    %200 = vector.load %arg8[%c6_181, %c0_182, %c0_183] : memref<9x4x4xf32, #tpu.memory_space<vmem>>, vector<1x4x4xf32>
    %201 = vector.shape_cast %200 : vector<1x4x4xf32> to vector<4x4xf32>
    %cst_184 = arith.constant dense<0.000000e+00> : vector<128x4xf32>
    %202 = tpu.matmul %199, %201, %cst_184 {dimension_numbers = #tpu.dot_dimension_numbers<[1], [0], [0], [1], [0, 0, 1, 1], [], []>} : vector<128x4xf32>, vector<4x4xf32>, vector<128x4xf32> -> vector<128x4xf32>
    %203 = arith.addf %197, %202 : vector<128x4xf32>
    %c2_185 = arith.constant 2 : index
    %c1_186 = arith.constant 1 : index
    %c0_187 = arith.constant 0 : index
    %204 = vector.load %arg15[%c2_185, %c1_186, %c0_187] : memref<10x18x4xf32, #tpu.memory_space<vmem>>, vector<8x16x4xf32>
    %205 = vector.shape_cast %204 : vector<8x16x4xf32> to vector<128x4xf32>
    %c7_188 = arith.constant 7 : index
    %c0_189 = arith.constant 0 : index
    %c0_190 = arith.constant 0 : index
    %206 = vector.load %arg8[%c7_188, %c0_189, %c0_190] : memref<9x4x4xf32, #tpu.memory_space<vmem>>, vector<1x4x4xf32>
    %207 = vector.shape_cast %206 : vector<1x4x4xf32> to vector<4x4xf32>
    %cst_191 = arith.constant dense<0.000000e+00> : vector<128x4xf32>
    %208 = tpu.matmul %205, %207, %cst_191 {dimension_numbers = #tpu.dot_dimension_numbers<[1], [0], [0], [1], [0, 0, 1, 1], [], []>} : vector<128x4xf32>, vector<4x4xf32>, vector<128x4xf32> -> vector<128x4xf32>
    %209 = arith.addf %203, %208 : vector<128x4xf32>
    %c2_192 = arith.constant 2 : index
    %c2_193 = arith.constant 2 : index
    %c0_194 = arith.constant 0 : index
    %210 = vector.load %arg15[%c2_192, %c2_193, %c0_194] : memref<10x18x4xf32, #tpu.memory_space<vmem>>, vector<8x16x4xf32>
    %211 = vector.shape_cast %210 : vector<8x16x4xf32> to vector<128x4xf32>
    %c8_195 = arith.constant 8 : index
    %c0_196 = arith.constant 0 : index
    %c0_197 = arith.constant 0 : index
    %212 = vector.load %arg8[%c8_195, %c0_196, %c0_197] : memref<9x4x4xf32, #tpu.memory_space<vmem>>, vector<1x4x4xf32>
    %213 = vector.shape_cast %212 : vector<1x4x4xf32> to vector<4x4xf32>
    %cst_198 = arith.constant dense<0.000000e+00> : vector<128x4xf32>
    %214 = tpu.matmul %211, %213, %cst_198 {dimension_numbers = #tpu.dot_dimension_numbers<[1], [0], [0], [1], [0, 0, 1, 1], [], []>} : vector<128x4xf32>, vector<4x4xf32>, vector<128x4xf32> -> vector<128x4xf32>
    %215 = arith.addf %209, %214 : vector<128x4xf32>
    %c0_199 = arith.constant 0 : index
    %c0_200 = arith.constant 0 : index
    %216 = vector.load %arg9[%c0_199, %c0_200] : memref<1x4xf32, #tpu.memory_space<vmem>>, vector<1x4xf32>
    %217 = vector.broadcast %216 : vector<1x4xf32> to vector<128x4xf32>
    %218 = arith.addf %215, %217 : vector<128x4xf32>
    %cst_201 = arith.constant 5.000000e-01 : f32
    %219 = vector.broadcast %cst_201 : f32 to vector<128x4xf32>
    %220 = arith.mulf %219, %218 : vector<128x4xf32>
    %cst_202 = arith.constant 0.707106769 : f32
    %221 = vector.broadcast %cst_202 : f32 to vector<128x4xf32>
    %222 = arith.mulf %218, %221 : vector<128x4xf32>
    %223 = math.erf %222 : vector<128x4xf32>
    %cst_203 = arith.constant 1.000000e+00 : f32
    %224 = vector.broadcast %cst_203 : f32 to vector<128x4xf32>
    %225 = arith.addf %224, %223 : vector<128x4xf32>
    %226 = arith.mulf %220, %225 : vector<128x4xf32>
    %cst_204 = arith.constant 0.000000e+00 : f32
    %227 = vector.broadcast %cst_204 : f32 to vector<128x4xf32>
    %228 = arith.cmpf oge, %218, %227 : vector<128x4xf32>
    %cst_205 = arith.constant 2.000000e-01 : f32
    %229 = vector.broadcast %cst_205 : f32 to vector<128x4xf32>
    %230 = arith.mulf %229, %218 : vector<128x4xf32>
    %231 = arith.select %228, %218, %230 : vector<128x4xi1>, vector<128x4xf32>
    %cst_206 = arith.constant 5.267000e-01 : f32
    %232 = vector.broadcast %cst_206 : f32 to vector<128x4xf32>
    %233 = arith.mulf %232, %231 : vector<128x4xf32>
    %cst_207 = arith.constant 4.733000e-01 : f32
    %234 = vector.broadcast %cst_207 : f32 to vector<128x4xf32>
    %235 = arith.mulf %234, %226 : vector<128x4xf32>
    %cst_208 = arith.constant 5.497000e-01 : f32
    %236 = vector.broadcast %cst_208 : f32 to vector<128x4xf32>
    %237 = arith.mulf %236, %226 : vector<128x4xf32>
    %238 = arith.addf %233, %235 : vector<128x4xf32>
    %cst_209 = arith.constant 0.000000e+00 : f32
    %239 = vector.broadcast %cst_209 : f32 to vector<128x4xf32>
    %240 = arith.cmpf oge, %238, %239 : vector<128x4xf32>
    %cst_210 = arith.constant 2.000000e-01 : f32
    %241 = vector.broadcast %cst_210 : f32 to vector<128x4xf32>
    %242 = arith.mulf %241, %238 : vector<128x4xf32>
    %243 = arith.select %240, %238, %242 : vector<128x4xi1>, vector<128x4xf32>
    %cst_211 = arith.constant 4.591000e-01 : f32
    %244 = vector.broadcast %cst_211 : f32 to vector<128x4xf32>
    %245 = arith.mulf %244, %243 : vector<128x4xf32>
    %246 = arith.addf %245, %237 : vector<128x4xf32>
    %247 = vector.shape_cast %49 : vector<8x16x4xf32> to vector<128x4xf32>
    %c0_212 = arith.constant 0 : index
    %c0_213 = arith.constant 0 : index
    %248 = vector.load %arg10[%c0_212, %c0_213] : memref<4x4xf32, #tpu.memory_space<vmem>>, vector<4x4xf32>
    %cst_214 = arith.constant dense<0.000000e+00> : vector<128x4xf32>
    %249 = tpu.matmul %247, %248, %cst_214 {dimension_numbers = #tpu.dot_dimension_numbers<[1], [0], [0], [1], [0, 0, 1, 1], [], []>} : vector<128x4xf32>, vector<4x4xf32>, vector<128x4xf32> -> vector<128x4xf32>
    %250 = vector.shape_cast %52 : vector<8x16x4xf32> to vector<128x4xf32>
    %c0_215 = arith.constant 0 : index
    %c0_216 = arith.constant 0 : index
    %251 = vector.load %arg11[%c0_215, %c0_216] : memref<4x4xf32, #tpu.memory_space<vmem>>, vector<4x4xf32>
    %cst_217 = arith.constant dense<0.000000e+00> : vector<128x4xf32>
    %252 = tpu.matmul %250, %251, %cst_217 {dimension_numbers = #tpu.dot_dimension_numbers<[1], [0], [0], [1], [0, 0, 1, 1], [], []>} : vector<128x4xf32>, vector<4x4xf32>, vector<128x4xf32> -> vector<128x4xf32>
    %253 = arith.addf %249, %252 : vector<128x4xf32>
    %c0_218 = arith.constant 0 : index
    %c0_219 = arith.constant 0 : index
    %254 = vector.load %arg12[%c0_218, %c0_219] : memref<1x4xf32, #tpu.memory_space<vmem>>, vector<1x4xf32>
    %255 = vector.broadcast %254 : vector<1x4xf32> to vector<128x4xf32>
    %256 = arith.addf %253, %255 : vector<128x4xf32>
    %257 = arith.addf %246, %256 : vector<128x4xf32>
    %258 = vector.shape_cast %257 : vector<128x4xf32> to vector<8x16x4xf32>
    %c0_220 = arith.constant 0 : index
    %c0_221 = arith.constant 0 : index
    %c0_222 = arith.constant 0 : index
    %c0_223 = arith.constant 0 : index
    %259 = vector.load %arg13[%c0_220, %c0_221, %c0_222, %c0_223] : memref<1x8x16x4xf32, #tpu.memory_space<vmem>>, vector<1x8x16x4xf32>
    %260 = vector.shape_cast %259 : vector<1x8x16x4xf32> to vector<8x16x4xf32>
    %261 = vector.shape_cast %258 : vector<8x16x4xf32> to vector<1x8x16x4xf32>
    tpu.vector_store %arg13[%c0_220, %c0_221, %c0_222, %c0_223], %261 {strides = array<i32>} : memref<1x8x16x4xf32, #tpu.memory_space<vmem>>, vector<1x8x16x4xf32>,
    return
  }
  func.func @transform_0(%arg0: i32, %arg1: i32) -> (i32, i32, i32, i32) {
    %c0_i32 = arith.constant 0 : i32
    %c0_i32_0 = arith.constant 0 : i32
    %c0_i32_1 = arith.constant 0 : i32
    %c0_i32_2 = arith.constant 0 : i32
    return %arg0, %c0_i32, %c0_i32_0, %c0_i32_1 : i32, i32, i32, i32
  }
  func.func @transform_1(%arg0: i32, %arg1: i32) -> (i32, i32, i32, i32) {
    %c0_i32 = arith.constant 0 : i32
    %c0_i32_0 = arith.constant 0 : i32
    %c0_i32_1 = arith.constant 0 : i32
    %c0_i32_2 = arith.constant 0 : i32
    return %arg0, %c0_i32, %c0_i32_0, %c0_i32_1 : i32, i32, i32, i32
  }
  func.func @transform_2(%arg0: i32, %arg1: i32) -> (i32, i32, i32, i32) {
    %c0_i32 = arith.constant 0 : i32
    %c0_i32_0 = arith.constant 0 : i32
    %c0_i32_1 = arith.constant 0 : i32
    %c0_i32_2 = arith.constant 0 : i32
    %c0_i32_3 = arith.constant 0 : i32
    return %c0_i32, %c0_i32_0, %c0_i32_1, %c0_i32_2 : i32, i32, i32, i32
  }
  func.func @transform_3(%arg0: i32, %arg1: i32) -> (i32, i32) {
    %c0_i32 = arith.constant 0 : i32
    %c0_i32_0 = arith.constant 0 : i32
    %c0_i32_1 = arith.constant 0 : i32
    return %c0_i32, %c0_i32_0 : i32, i32
  }
  func.func @transform_4(%arg0: i32, %arg1: i32) -> (i32, i32, i32) {
    %c0_i32 = arith.constant 0 : i32
    %c0_i32_0 = arith.constant 0 : i32
    %c0_i32_1 = arith.constant 0 : i32
    %c0_i32_2 = arith.constant 0 : i32
    return %c0_i32, %c0_i32_0, %c0_i32_1 : i32, i32, i32
  }
  func.func @transform_5(%arg0: i32, %arg1: i32) -> (i32, i32) {
    %c0_i32 = arith.constant 0 : i32
    %c0_i32_0 = arith.constant 0 : i32
    %c0_i32_1 = arith.constant 0 : i32
    return %c0_i32, %c0_i32_0 : i32, i32
  }
  func.func @transform_6(%arg0: i32, %arg1: i32) -> (i32, i32, i32) {
    %c0_i32 = arith.constant 0 : i32
    %c0_i32_0 = arith.constant 0 : i32
    %c0_i32_1 = arith.constant 0 : i32
    %c0_i32_2 = arith.constant 0 : i32
    return %c0_i32, %c0_i32_0, %c0_i32_1 : i32, i32, i32
  }
  func.func @transform_7(%arg0: i32, %arg1: i32) -> (i32, i32) {
    %c0_i32 = arith.constant 0 : i32
    %c0_i32_0 = arith.constant 0 : i32
    %c0_i32_1 = arith.constant 0 : i32
    return %c0_i32, %c0_i32_0 : i32, i32
  }
  func.func @transform_8(%arg0: i32, %arg1: i32) -> (i32, i32) {
    %c0_i32 = arith.constant 0 : i32
    %c0_i32_0 = arith.constant 0 : i32
    %c0_i32_1 = arith.constant 0 : i32
    return %c0_i32, %c0_i32_0 : i32, i32
  }
  func.func @transform_9(%arg0: i32, %arg1: i32) -> (i32, i32) {
    %c0_i32 = arith.constant 0 : i32
    %c0_i32_0 = arith.constant 0 : i32
    %c0_i32_1 = arith.constant 0 : i32
    return %c0_i32, %c0_i32_0 : i32, i32
  }
  func.func @transform_10(%arg0: i32, %arg1: i32) -> (i32, i32) {
    %c0_i32 = arith.constant 0 : i32
    %c0_i32_0 = arith.constant 0 : i32
    %c0_i32_1 = arith.constant 0 : i32
    return %c0_i32, %c0_i32_0 : i32, i32
  }
  func.func @transform_11(%arg0: i32, %arg1: i32) -> (i32, i32, i32, i32) {
    %c0_i32 = arith.constant 0 : i32
    %c0_i32_0 = arith.constant 0 : i32
    %c0_i32_1 = arith.constant 0 : i32
    return %arg0, %arg1, %c0_i32, %c0_i32_0 : i32, i32, i32, i32
  }
}

</mosaic_0001>

<bundles_post_ra>
// kernel: _lambda_.1
= control target key start
LH: loop header
LB: loop body
LE: loop exit
PB: predicated region body
PF: predicated region fallthrough
CT: control target
= control target key end

     0   :  { %s8035_s17 = smov 0   ;;  %s8037_s18 = smov 0   ;;  %s11792_s0 = inlined_call_operand.vmem [shape: f32[2,8,8,8], index: 0, kind: input, shape index: {}]   ;;  %s11793_s1 = inlined_call_operand.vmem [shape: f32[2,16,16,4], index: 1, kind: input, shape index: {}]   ;;  %s11794_s2 = inlined_call_operand.vmem [shape: f32[2,2,8,4], index: 2, kind: input, shape index: {}]   ;;  %s11795_s3 = inlined_call_operand.vmem [shape: f32[1,4], index: 3, kind: input, shape index: {}]   ;;  %s11796_s4 = inlined_call_operand.vmem [shape: f32[9,8,4], index: 4, kind: input, shape index: {}]   ;;  %s11797_s5 = inlined_call_operand.vmem [shape: f32[1,4], index: 5, kind: input, shape index: {}]   ;;  %s11798_s6 = inlined_call_operand.vmem [shape: f32[9,4,4], index: 6, kind: input, shape index: {}]   ;;  %s11799_s7 = inlined_call_operand.vmem [shape: f32[1,4], index: 7, kind: input, shape index: {}]   ;;  %s11800_s8 = inlined_call_operand.vmem [shape: f32[4,4], index: 8, kind: input, shape index: {}]   ;;  %s11801_s9 = inlined_call_operand.vmem [shape: f32[4,4], index: 9, kind: input, shape index: {}]   ;;  %s11802_s10 = inlined_call_operand.vmem [shape: f32[1,4], index: 10, kind: input, shape index: {}]   ;;  %s11803_s11 = inlined_call_operand.vmem [shape: f32[2,16,16,4], index: 11, kind: output, shape index: {}]  }
   0x1   :  { %11887 = sst [smem:[#allocation107_spill]] %s11792_s0  ;;  %s8039_s19 = smov 0  }
   0x2   :  { %11888 = sst [smem:[#allocation108_spill]] %s11793_s1  ;;  %s8041_s20 = smov 0  }
   0x3   :  { %11889 = sst [smem:[#allocation109_spill]] %s11803_s11  ;;  %s8043_s21 = smov 0  }
   0x4 LB: > { %s30_s22 = sadd.s32 1, %s7957_s19  ;;  %s33_s23 = sadd.s32 1, %s7961_s20  ;;  %s7965_s21 = sphi %s8043_s21, %s21_s21   ;;  %s7961_s20 = sphi %s8041_s20, %s12121_s20   ;;  %s7957_s19 = sphi %s8039_s19, %s12120_s19   ;;  %s7953_s18 = sphi %s8037_s18, %s12119_s18   ;;  %s7949_s17 = sphi %s8035_s17, %s12118_s17  }
   0x5   : > { %p31_p0 = scmp.ge.s32.totalorder %s30_s22, 2  ;;  %p7302_p1 = scmp.ge.s32.totalorder %s7965_s21, 1 }
   0x6   : > { %p361_p2 = scmp.lt.s32.totalorder %s7965_s21, 5 }
   0x7   : > { %s12123_s22 = smov (%p31_p0, %s30_s22), 0  ;;  %s12125_s23 = smov (!%p31_p0, %s33_s23), %s7961_s20 }
   0x8   : > { %11890 = sst [smem:[#allocation4_spill]] %s12123_s22  ;;  %p362_p3 = pnand %p7302_p1, %p361_p2 }
   0x9   : > { %p35_p4 = scmp.ge.s32.totalorder %s12125_s23, 2 }
   0xa   : > { %365 = sbr.rel (%p362_p3) target bundleno = 2115 (0x843), region = 64 }
   0xb   : > { %s12127_s23 = smov (%p35_p4, %s12125_s23), 0 }
   0xc   : > { %11891 = sst [smem:[#allocation5_spill]] %s12127_s23 }
   0xf   : > { %v7318_v0 = vld [vmem:[%s11794_s2 + $0x8] sm:$0xff]  ;;  %p411_p5 = scmp.lt.s32.totalorder %s7953_s18, 1  ;;  %s8071_s26 = sshll.u32 %s7949_s17, 3  ;;  %vm434_vm0 = vcmask 57344   ;;  %v7967_v1 = vmov 0.0   ;;  %v486_v2 = vld [vmem:[%s11794_s2] sm:$0xff] }
  0x10   : > { %610 = vmatpush.msra.mxu1 %v7318_v0  ;;  %p424_p6 = scmp.lt.s32.totalorder %s8071_s26, 15  ;;  %s7790_s27 = sshll.u32 %s7949_s17, 5  ;;  %435 = vst.msk [vmem:[#allocation2] sm:$0x1] %vm434_vm0, %v7967_v1  ;;  %519 = vmatpush.msra.mxu0 %v486_v2  ;;  %v7328_v3 = vld [vmem:[%s11794_s2 + $0x18] sm:$0xff]  ;;  %v7323_v4 = vld [vmem:[%s11794_s2 + $0x10] sm:$0xff] }
  0x11   : > { %s12129_s18 = smov (!%p411_p5, %s7953_s18), 1  ;;  %436 = vst.msk [vmem:[#allocation2 + $0x18] sm:$0x1] %vm434_vm0, %v7967_v1  ;;  %861 = vmatpush.msra.mxu3 %v7328_v3  ;;  %770 = vmatpush.msra.mxu2 %v7323_v4  ;;  %s11892_s0 = sld [smem:[#allocation107_spill]]  ;;  %vm491_vm1 = vcmask 64512   ;;  %vm459_vm2 = vcmask 24576  }
  0x12   : > { %s425_s15 = scalar_select %p424_p6, %s8071_s26, 15  ;;  %437 = vst.msk [vmem:[#allocation2 + $0x30] sm:$0x1] %vm434_vm0, %v7967_v1  ;;  %v8299_v25 = vld [vmem:[%s11795_s3] ss:$0 sm:$0xff]  ;;  %vm720_vm3 = vcmask 1040384  }
  0x13   : > { %s7788_s16 = sshll.u32 %s12129_s18, 6  ;;  %s7789_s24 = sshll.u32 %s12129_s18, 8  ;;  %438 = vst.msk [vmem:[#allocation2 + $0x48] sm:$0x1] %vm434_vm0, %v7967_v1  ;;  %vm1189_vm4 = vcmask 31744   ;;  %vm1270_vm5 = vcmask 64544  }
  0x14   : > { %s11893_s1 = sld [smem:[#allocation108_spill]]  ;;  %439 = vst.msk [vmem:[#allocation2 + $0x60] sm:$0x1] %vm434_vm0, %v7967_v1  ;;  %s7308_s14 = sshll.u32 %s425_s15, 1 }
  0x15   : > { %s7309_s23 = sshll.u32 %s12129_s18, 5  ;;  %440 = vst.msk [vmem:[#allocation2 + $0x78] sm:$0x1] %vm434_vm0, %v7967_v1  ;;  %s7791_s28 = sshll.u32 %s7949_s17, 7 }
  0x16   : > { %s428_s25 = sadd.s32 %s7309_s23, %s7308_s14  ;;  %441 = vst.msk [vmem:[#allocation2 + $0x90] sm:$0x1] %vm434_vm0, %v7967_v1  ;;  %s11894_s11 = sld [smem:[#allocation109_spill]] }
  0x17   : > { %s8096_s29 = scalar_lea.vmem %s11892_s0, %s7788_s16  ;;  %442 = vst.msk [vmem:[#allocation2 + $0xa8] sm:$0x1] %vm434_vm0, %v7967_v1  ;;  %s7968_s12 = smov 4  }
  0x18   : > { %s8108_s16 = scalar_lea.vmem %s8096_s29, %s7790_s27  ;;  %443 = vst.msk [vmem:[#allocation2 + $0xc0] sm:$0x1] %vm434_vm0, %v7967_v1  ;;  %s7311_s27 = sshll.u32 %s7949_s17, 2 }
  0x19   : > { %v482_v5 = vld [vmem:[%s8108_s16] sm:$0xff]  ;;  %444 = vst.msk [vmem:[#allocation2 + $0xd8] sm:$0x1] %vm434_vm0, %v7967_v1  ;;  %v483_v8 = vld [vmem:[%s8108_s16 + $0x8] sm:$0xff]  ;;  %v484_v13 = vld [vmem:[%s8108_s16 + $0x10] sm:$0xff]  ;;  %p7334_p7 = scmp.le.s32.totalorder %s7949_s17, 0 }
  0x1a   : > { %s8101_s13 = scalar_lea.vmem %s11893_s1, %s7789_s24  ;;  %s7310_s24 = sshll.u32 %s428_s25, 3  ;;  %7319 = vmatmul.msk.f32.vlgmr.msra.gmra.mxu1 %vm491_vm1, %v482_v5  ;;  %7314 = vmatmul.msk.f32.vlgmr.msra.gmra.mxu0 %vm491_vm1, %v482_v5  ;;  %445 = vst.msk [vmem:[#allocation2 + $0xf0] sm:$0x1] %vm434_vm0, %v7967_v1  ;;  %v485_v17 = vld [vmem:[%s8108_s16 + $0x18] sm:$0xff] }
  0x1b   : > { %s8123_s23 = scalar_lea.vmem %s8101_s13, %s7791_s28  ;;  %7329 = vmatmul.msk.f32.vlgmr.msra.gmra.mxu3 %vm491_vm1, %v482_v5  ;;  %7324 = vmatmul.msk.f32.vlgmr.msra.gmra.mxu2 %vm491_vm1, %v482_v5  ;;  %446 = vst.msk [vmem:[#allocation2 + $0x108] sm:$0x1] %vm434_vm0, %v7967_v1  ;;  %s7335_s15 = sadd.s32 (!%p7334_p7), 4294967295, %s7311_s27 }
  0x1c   : > { %s8119_s18 = scalar_lea.vmem %s11894_s11, %s7310_s24  ;;  %v8138_v6 = vld [vmem:[%s8123_s23] sm:$0xff]  ;;  %v8141_v7 = vld [vmem:[%s8123_s23 + $0x10] sm:$0xff]  ;;  %447 = vst.msk [vmem:[#allocation2 + $0x11] sm:$0x1] %vm434_vm0, %v7967_v1  ;;  %v8170_v10 = vld [vmem:[%s8123_s23 + $0x8] sm:$0xff]  ;;  %s7344_s0 = sadd.s32 (!%p7334_p7), 4294967294, %s8071_s26 }
  0x1d   : > { %11895 = vst [vmem:[#allocation6_spill] sm:$0xff] %v8138_v6  ;;  %1222 = vrot.lane.b32.xlu0 %v8138_v6, %s7968_s12  ;;  %1226 = vrot.lane.b32.xlu1 %v8141_v7, %s7968_s12  ;;  %v8155_v9 = vld [vmem:[%s8123_s23 + $0x20] sm:$0xff]  ;;  %v8173_v11 = vld [vmem:[%s8123_s23 + $0x18] sm:$0xff]  ;;  %s7336_s1 = sshll.u32 (!%p7334_p7), %s7335_s15, 3  ;;  %s7345_s11 = sshll.u32 (!%p7334_p7), %s7344_s0, 4 }
  0x1e   : > { %11896 = vst [vmem:[#allocation7_spill] sm:$0xff] %v8141_v7  ;;  %1230 = vrot.lane.b32.xlu2 %v8155_v9, %s7968_s12  ;;  %v8186_v12 = vld [vmem:[%s8123_s23 + $0x28] sm:$0xff]  ;;  %v8206_v14 = vld [vmem:[%s8123_s23 + $0x30] sm:$0xff]  ;;  %v8209_v15 = vld [vmem:[%s8123_s23 + $0x38] sm:$0xff]  ;;  %s1293_s22 = scalar_lea.vmem (!%p7334_p7), %s8096_s29, %s7336_s1  ;;  %s1533_s27 = scalar_lea.vmem (!%p7334_p7), %s8101_s13, %s7345_s11 }
  0x1f   : > { %448 = vst.msk [vmem:[#allocation2 + $0x29] sm:$0x1] %vm434_vm0, %v7967_v1  ;;  %v8222_v16 = vld [vmem:[%s8123_s23 + $0x40] sm:$0xff]  ;;  %v8242_v18 = vld [vmem:[%s8123_s23 + $0x48] sm:$0xff]  ;;  %v8245_v19 = vld [vmem:[%s8123_s23 + $0x50] sm:$0xff]  ;;  %s7969_s26 = smov (!%p7334_p7), 4  }
  0x20   : > { %449 = vst.msk [vmem:[#allocation2 + $0x41] sm:$0x1] %vm434_vm0, %v7967_v1  ;;  %v8258_v20 = vld [vmem:[%s8123_s23 + $0x58] sm:$0xff]  ;;  %v8273_v21 = vld [vmem:[%s8123_s23 + $0x60] sm:$0xff]  ;;  %v8276_v22 = vld [vmem:[%s8123_s23 + $0x68] sm:$0xff] }
  0x21   : > { %11897 = vst [vmem:[#allocation8_spill] sm:$0xff] %v8155_v9  ;;  %v8287_v23 = vld [vmem:[%s8123_s23 + $0x70] sm:$0xff]  ;;  %v8292_v24 = vld [vmem:[%s8123_s23 + $0x78] sm:$0xff] }
  0x22   : > { %450 = vst.msk [vmem:[#allocation2 + $0x59] sm:$0x1] %vm434_vm0, %v7967_v1  ;;  %7320 = vmatmul.msk.f32.gmra.mxu1 %vm491_vm1, %v483_v8  ;;  %7315 = vmatmul.msk.f32.gmra.mxu0 %vm491_vm1, %v483_v8 }
  0x23   : > { %451 = vst.msk [vmem:[#allocation2 + $0x71] sm:$0x1] %vm434_vm0, %v7967_v1  ;;  %7330 = vmatmul.msk.f32.gmra.mxu3 %vm491_vm1, %v483_v8  ;;  %7325 = vmatmul.msk.f32.gmra.mxu2 %vm491_vm1, %v483_v8 }
  0x24   : > { %452 = vst.msk [vmem:[#allocation2 + $0x89] sm:$0x1] %vm434_vm0, %v7967_v1 }
  0x25   : > { %11898 = vst [vmem:[#allocation9_spill] sm:$0xff] %v8170_v10  ;;  %1224 = vrot.lane.b32.xlu0 %v8170_v10, %s7968_s12  ;;  %1228 = vrot.lane.b32.xlu1 %v8173_v11, %s7968_s12 }
  0x26   : > { %11899 = vst [vmem:[#allocation10_spill] sm:$0xff] %v8173_v11  ;;  %1232 = vrot.lane.b32.xlu2 %v8186_v12, %s7968_s12 }
  0x27   : > { %453 = vst.msk [vmem:[#allocation2 + $0xa1] sm:$0x1] %vm434_vm0, %v7967_v1 }
  0x28   : > { %454 = vst.msk [vmem:[#allocation2 + $0xb9] sm:$0x1] %vm434_vm0, %v7967_v1 }
  0x29   : > { %455 = vst.msk [vmem:[#allocation2 + $0xd1] sm:$0x1] %vm434_vm0, %v7967_v1 }
  0x2a   : > { %11900 = vst [vmem:[#allocation11_spill] sm:$0xff] %v8186_v12  ;;  %7321 = vmatmul.msk.f32.gmra.mxu1 %vm491_vm1, %v484_v13  ;;  %7316 = vmatmul.msk.f32.gmra.mxu0 %vm491_vm1, %v484_v13 }
  0x2b   : > { %456 = vst.msk [vmem:[#allocation2 + $0xe9] sm:$0x1] %vm434_vm0, %v7967_v1  ;;  %7331 = vmatmul.msk.f32.gmra.mxu3 %vm491_vm1, %v484_v13  ;;  %7326 = vmatmul.msk.f32.gmra.mxu2 %vm491_vm1, %v484_v13 }
  0x2c   : > { %457 = vst.msk [vmem:[#allocation2 + $0x101] sm:$0x1] %vm434_vm0, %v7967_v1 }
  0x2d   : > { %458 = vst.msk [vmem:[#allocation2 + $0x119] sm:$0x1] %vm434_vm0, %v7967_v1  ;;  %1234 = vrot.lane.b32.xlu0 %v8206_v14, %s7968_s12  ;;  %1236 = vrot.lane.b32.xlu1 %v8209_v15, %s7968_s12 }
  0x2e   : > { %460 = vst.msk [vmem:[#allocation3] sm:$0x1] %vm459_vm2, %v7967_v1  ;;  %1238 = vrot.lane.b32.xlu2 %v8222_v16, %s7968_s12 }
  0x2f   : > { %461 = vst.msk [vmem:[#allocation3 + $0x18] sm:$0x1] %vm459_vm2, %v7967_v1 }
  0x30   : > { %11901 = vst [vmem:[#allocation12_spill] sm:$0xff] %v8206_v14 }
  0x31   : > { %11902 = vst [vmem:[#allocation13_spill] sm:$0xff] %v8209_v15 }
  0x32   : > { %462 = vst.msk [vmem:[#allocation3 + $0x30] sm:$0x1] %vm459_vm2, %v7967_v1  ;;  %7322 = vmatmul.msk.f32.gmra.mxu1 %vm491_vm1, %v485_v17  ;;  %7317 = vmatmul.msk.f32.gmra.mxu0 %vm491_vm1, %v485_v17 }
  0x33   : > { %463 = vst.msk [vmem:[#allocation3 + $0x48] sm:$0x1] %vm459_vm2, %v7967_v1  ;;  %7332 = vmatmul.msk.f32.gmra.mxu3 %vm491_vm1, %v485_v17  ;;  %7327 = vmatmul.msk.f32.gmra.mxu2 %vm491_vm1, %v485_v17 }
  0x34   : > { %464 = vst.msk [vmem:[#allocation3 + $0x60] sm:$0x1] %vm459_vm2, %v7967_v1 }
  0x35   : > { %11903 = vst [vmem:[#allocation14_spill] sm:$0xff] %v8222_v16  ;;  %1240 = vrot.lane.b32.xlu0 %v8242_v18, %s7968_s12  ;;  %1242 = vrot.lane.b32.xlu1 %v8245_v19, %s7968_s12 }
  0x36   : > { %465 = vst.msk [vmem:[#allocation3 + $0x78] sm:$0x1] %vm459_vm2, %v7967_v1  ;;  %1244 = vrot.lane.b32.xlu2 %v8258_v20, %s7968_s12 }
  0x37   : > { %466 = vst.msk [vmem:[#allocation3 + $0x90] sm:$0x1] %vm459_vm2, %v7967_v1 }
  0x38   : > { %467 = vst.msk [vmem:[#allocation3 + $0xa8] sm:$0x1] %vm459_vm2, %v7967_v1 }
  0x39   : > { %468 = vst.msk [vmem:[#allocation3 + $0xc0] sm:$0x1] %vm459_vm2, %v7967_v1 }
  0x3a   : > { %469 = vst.msk [vmem:[#allocation3 + $0xd8] sm:$0x1] %vm459_vm2, %v7967_v1 }
  0x3b   : > { %11904 = vst [vmem:[#allocation15_spill] sm:$0xff] %v8242_v18 }
  0x3c   : > { %11905 = vst [vmem:[#allocation16_spill] sm:$0xff] %v8245_v19 }
  0x3d   : > { %470 = vst.msk [vmem:[#allocation3 + $0x11] sm:$0x1] %vm459_vm2, %v7967_v1  ;;  %1246 = vrot.lane.b32.xlu0 %v8273_v21, %s7968_s12  ;;  %1248 = vrot.lane.b32.xlu1 %v8276_v22, %s7968_s12 }
  0x3e   : > { %471 = vst.msk [vmem:[#allocation3 + $0x29] sm:$0x1] %vm459_vm2, %v7967_v1  ;;  %1250 = vrot.lane.b32.xlu2 %v8287_v23, %s7968_s12 }
  0x3f   : > { %472 = vst.msk [vmem:[#allocation3 + $0x41] sm:$0x1] %vm459_vm2, %v7967_v1 }
  0x40   : > { %11906 = vst [vmem:[#allocation17_spill] sm:$0xff] %v8258_v20 }
  0x41   : > { %473 = vst.msk [vmem:[#allocation3 + $0x59] sm:$0x1] %vm459_vm2, %v7967_v1 }
  0x42   : > { %474 = vst.msk [vmem:[#allocation3 + $0x71] sm:$0x1] %vm459_vm2, %v7967_v1 }
  0x43   : > { %475 = vst.msk [vmem:[#allocation3 + $0x89] sm:$0x1] %vm459_vm2, %v7967_v1 }
  0x44   : > { %476 = vst.msk [vmem:[#allocation3 + $0xa1] sm:$0x1] %vm459_vm2, %v7967_v1 }
  0x45   : > { %477 = vst.msk [vmem:[#allocation3 + $0xb9] sm:$0x1] %vm459_vm2, %v7967_v1  ;;  %1252 = vrot.lane.b32.xlu0 %v8292_v24, %s7968_s12 }
  0x46   : > { %11907 = vst [vmem:[#allocation18_spill] sm:$0xff] %v8273_v21 }
  0x47   : > { %11908 = vst [vmem:[#allocation19_spill] sm:$0xff] %v8276_v22 }
  0x48   : > { %478 = vst.msk [vmem:[#allocation3 + $0xd1] sm:$0x1] %vm459_vm2, %v7967_v1 }
  0x49   : > { %479 = vst.msk [vmem:[#allocation3 + $0xe9] sm:$0x1] %vm459_vm2, %v7967_v1 }
  0x4a   : > { %11909 = vst [vmem:[#allocation20_spill] sm:$0xff] %v8287_v23 }
  0x4b   : > { %11910 = vst [vmem:[#allocation21_spill] sm:$0xff] %v8292_v24 }
  0x97   : > { %v612_v26 = vpop.f32.mrf.mxu1  ;;  %v521_v27 = vpop.f32.mrf.mxu0 }
  0x98   : > { %v613_v28 = vadd.f32 %v8299_v25, %v612_v26  ;;  %v522_v29 = vadd.f32 %v8299_v25, %v521_v27 }
  0x9a   : > { %v628_v30 = vrot.slane %v613_v28, 1  ;;  %v629_v31 = vrot.slane %v613_v28, 2  ;;  %v630_v32 = vrot.slane %v613_v28, 3  ;;  %v631_v33 = vrot.slane %v613_v28, 4 }
  0x9b   : > { %v632_v34 = vrot.slane %v613_v28, 5  ;;  %v633_v35 = vrot.slane %v613_v28, 6  ;;  %v656_v36 = vperm.slane %v613_v28, 0  ;;  %v634_v37 = vrot.slane %v613_v28, 7 }
  0x9c   : > { %v657_v38 = vperm.slane %v628_v30, 0  ;;  %v658_v39 = vperm.slane %v629_v31, 0  ;;  %v659_v40 = vperm.slane %v630_v32, 0  ;;  %v660_v41 = vperm.slane %v631_v33, 0 }
  0x9d   : > { %v661_v42 = vperm.slane %v632_v34, 0  ;;  %v537_v43 = vrot.slane %v522_v29, 1  ;;  %v538_v44 = vrot.slane %v522_v29, 2  ;;  %v539_v45 = vrot.slane %v522_v29, 3 }
  0x9e   : > { %v540_v46 = vrot.slane %v522_v29, 4  ;;  %v541_v47 = vrot.slane %v522_v29, 5  ;;  %v863_v48 = vpop.f32.mrf.mxu3  ;;  %v662_v49 = vperm.slane %v633_v35, 0  ;;  %v542_v50 = vrot.slane %v522_v29, 6  ;;  %v772_v53 = vpop.f32.mrf.mxu2 }
  0x9f   : > { %v8304_v51 = vsel %vm720_vm3, %v522_v29, %v656_v36  ;;  %v8307_v52 = vsel %vm720_vm3, %v537_v43, %v657_v38  ;;  %v663_v54 = vperm.slane %v634_v37, 0  ;;  %v543_v55 = vrot.slane %v522_v29, 7  ;;  %v615_v62 = vpop.f32.mrf.mxu1  ;;  %v524_v29 = vpop.f32.mrf.mxu0 }
  0xa0   : > { %11911 = vst [vmem:[#allocation22_spill] sm:$0xff] %v8304_v51  ;;  %v8310_v56 = vsel %vm720_vm3, %v538_v44, %v658_v39  ;;  %v8313_v57 = vsel %vm720_vm3, %v539_v45, %v659_v40  ;;  %v8317_v58 = vsel %vm720_vm3, %v540_v46, %v660_v41  ;;  %v864_v59 = vadd.f32 %v8299_v25, %v863_v48 }
  0xa1   : > { %11912 = vst [vmem:[#allocation23_spill] sm:$0xff] %v8307_v52  ;;  %v8322_v60 = vsel %vm720_vm3, %v541_v47, %v661_v42  ;;  %v773_v61 = vadd.f32 %v8299_v25, %v772_v53  ;;  %v8327_v63 = vsel %vm720_vm3, %v542_v50, %v662_v49  ;;  %v8331_v3 = vsel %vm720_vm3, %v543_v55, %v663_v54 }
  0xa2   : > { %11913 = vst [vmem:[#allocation24_spill] sm:$0xff] %v8310_v56  ;;  %v879_v0 = vrot.slane %v864_v59, 1  ;;  %v880_v1 = vrot.slane %v864_v59, 2  ;;  %v881_v2 = vrot.slane %v864_v59, 3  ;;  %v882_v4 = vrot.slane %v864_v59, 4 }
  0xa3   : > { %11914 = vst [vmem:[#allocation25_spill] sm:$0xff] %v8313_v57  ;;  %v883_v5 = vrot.slane %v864_v59, 5  ;;  %v8336_v13 = vadd.f32 %v8299_v25, %v615_v62  ;;  %v884_v17 = vrot.slane %v864_v59, 6  ;;  %v907_v26 = vperm.slane %v864_v59, 0 }
  0xa4   : > { %1085 = vst [vmem:[#allocation1] ss:$4 sm:$0xff] %v8304_v51  ;;  %v908_v8 = vperm.slane %v879_v0, 0  ;;  %v909_v27 = vperm.slane %v880_v1, 0  ;;  %v788_v28 = vrot.slane %v773_v61, 1  ;;  %v885_v30 = vrot.slane %v864_v59, 7 }
  0xa5   : > { %11915 = vst [vmem:[#allocation26_spill] sm:$0xff] %v8317_v58  ;;  %v910_v31 = vperm.slane %v881_v2, 0  ;;  %v789_v32 = vrot.slane %v773_v61, 2  ;;  %v790_v33 = vrot.slane %v773_v61, 3  ;;  %v911_v34 = vperm.slane %v882_v4, 0 }
  0xa6   : > { %1087 = vst [vmem:[#allocation1 + $0x1] ss:$4 sm:$0xff] %v8307_v52  ;;  %v791_v35 = vrot.slane %v773_v61, 4  ;;  %v912_v36 = vperm.slane %v883_v5, 0  ;;  %v792_v37 = vrot.slane %v773_v61, 5  ;;  %v8341_v38 = vsel %vm720_vm3, %v788_v28, %v908_v8  ;;  %v866_v55 = vpop.f32.mrf.mxu3 }
  0xa7   : > { %11916 = vst [vmem:[#allocation27_spill] sm:$0xff] %v8322_v60  ;;  %v8344_v39 = vadd.f32 %v8299_v25, %v524_v29  ;;  %v913_v41 = vperm.slane %v884_v17, 0  ;;  %v793_v42 = vrot.slane %v773_v61, 6  ;;  %v8347_v43 = vsel %vm720_vm3, %v773_v61, %v907_v26 }
  0xa8   : > { %1089 = vst [vmem:[#allocation1 + $0x2] ss:$4 sm:$0xff] %v8310_v56  ;;  %v8350_v44 = vsel %vm720_vm3, %v789_v32, %v909_v27  ;;  %v914_v45 = vperm.slane %v885_v30, 0  ;;  %v794_v46 = vrot.slane %v773_v61, 7  ;;  %v8353_v47 = vsel %vm720_vm3, %v790_v33, %v910_v31  ;;  %v775_v30 = vpop.f32.mrf.mxu2 }
  0xa9   : > { %11917 = vst [vmem:[#allocation28_spill] sm:$0xff] %v8327_v63  ;;  %v635_v48 = vrot.slane %v8336_v13, 1  ;;  %v8358_v49 = vsel %vm720_vm3, %v791_v35, %v911_v34  ;;  %v636_v50 = vrot.slane %v8336_v13, 2  ;;  %v637_v53 = vrot.slane %v8336_v13, 3 }
  0xaa   : > { %1091 = vst [vmem:[#allocation1 + $0x3] ss:$4 sm:$0xff] %v8313_v57  ;;  %v638_v54 = vrot.slane %v8336_v13, 4  ;;  %v8365_v59 = vsel %vm720_vm3, %v792_v37, %v912_v36  ;;  %v639_v61 = vrot.slane %v8336_v13, 5  ;;  %v640_v62 = vrot.slane %v8336_v13, 6 }
  0xab   : > { %11918 = vst [vmem:[#allocation29_spill] sm:$0xff] %v8331_v3  ;;  %v641_v0 = vrot.slane %v8336_v13, 7  ;;  %v8372_v2 = vsel %vm720_vm3, %v793_v42, %v913_v41  ;;  %v664_v4 = vperm.slane %v8336_v13, 0  ;;  %v8377_v5 = vsel %vm720_vm3, %v794_v46, %v914_v45 }
  0xac   : > { %1093 = vst [vmem:[#allocation1 + $0x20] ss:$4 sm:$0xff] %v8317_v58  ;;  %v665_v8 = vperm.slane %v635_v48, 0  ;;  %v8381_v17 = vadd.f32 %v8299_v25, %v866_v55  ;;  %v666_v26 = vperm.slane %v636_v50, 0  ;;  %v667_v27 = vperm.slane %v637_v53, 0  ;;  %v618_v55 = vpop.f32.mrf.mxu1 }
  0xad   : > { %1095 = vst [vmem:[#allocation1 + $0x21] ss:$4 sm:$0xff] %v8322_v60  ;;  %v668_v28 = vperm.slane %v638_v54, 0  ;;  %v544_v29 = vrot.slane %v8344_v39, 1  ;;  %v669_v13 = vperm.slane %v639_v61, 0  ;;  %v670_v31 = vperm.slane %v640_v62, 0 }
  0xae   : > { %1097 = vst [vmem:[#allocation1 + $0x22] ss:$4 sm:$0xff] %v8327_v63  ;;  %v545_v32 = vrot.slane %v8344_v39, 2  ;;  %v546_v33 = vrot.slane %v8344_v39, 3  ;;  %v671_v34 = vperm.slane %v641_v0, 0  ;;  %v547_v35 = vrot.slane %v8344_v39, 4  ;;  %v869_v21 = vpop.f32.mrf.mxu3 }
  0xaf   : > { %1099 = vst [vmem:[#allocation1 + $0x23] ss:$4 sm:$0xff] %v8331_v3  ;;  %v548_v36 = vrot.slane %v8344_v39, 5  ;;  %v8393_v37 = vsel %vm720_vm3, %v8344_v39, %v664_v4  ;;  %v886_v41 = vrot.slane %v8381_v17, 1  ;;  %v887_v42 = vrot.slane %v8381_v17, 2 }
  0xb0   : > { %11919 = vst [vmem:[#allocation30_spill] sm:$0xff] %v8341_v38  ;;  %v888_v45 = vrot.slane %v8381_v17, 3  ;;  %v8399_v46 = vadd.f32 %v8299_v25, %v775_v30  ;;  %v549_v48 = vrot.slane %v8344_v39, 6  ;;  %v8404_v50 = vsel %vm720_vm3, %v544_v29, %v665_v8 }
  0xb1   : > { %v1100_v40 = vld.sshfl [vmem:[#allocation1] sm:$0xff pattern:$0x73625140]  ;;  %11920 = vst [vmem:[#allocation31_spill] sm:$0xff] %v8347_v43  ;;  %v889_v53 = vrot.slane %v8381_v17, 4  ;;  %v890_v54 = vrot.slane %v8381_v17, 5  ;;  %v8411_v0 = vsel %vm720_vm3, %v545_v32, %v666_v26  ;;  %v8418_v8 = vsel %vm720_vm3, %v547_v35, %v668_v28 }
  0xb2   : > { %11921 = vst [vmem:[#allocation32_spill] sm:$0xff] %v8350_v44  ;;  %v550_v62 = vrot.slane %v8344_v39, 7  ;;  %v891_v4 = vrot.slane %v8381_v17, 6  ;;  %v8421_v29 = vsel %vm720_vm3, %v548_v36, %v669_v13  ;;  %v915_v39 = vperm.slane %v8381_v17, 0 }
  0xb3   : > { %11922 = vst [vmem:[#allocation33_spill] sm:$0xff] %v8353_v47  ;;  %v916_v26 = vperm.slane %v886_v41, 0  ;;  %v917_v30 = vperm.slane %v887_v42, 0  ;;  %v8428_v32 = vadd.f32 %v8299_v25, %v618_v55  ;;  %v919_v28 = vperm.slane %v889_v53, 0 }
  0xb4   : > { %1102 = vst [vmem:[#allocation1] ss:$4 sm:$0xff] %v8347_v43  ;;  %v795_v13 = vrot.slane %v8399_v46, 1  ;;  %v796_v35 = vrot.slane %v8399_v46, 2  ;;  %v8434_v24 = vsel %vm720_vm3, %v549_v48, %v670_v31  ;;  %v921_v41 = vperm.slane %v891_v4, 0 }
  0xb5   : > { %11923 = vst [vmem:[#allocation34_spill] sm:$0xff] %v8358_v49  ;;  %v798_v53 = vrot.slane %v8399_v46, 4  ;;  %v800_v31 = vrot.slane %v8399_v46, 6  ;;  %v801_v48 = vrot.slane %v8399_v46, 7  ;;  %v642_v55 = vrot.slane %v8428_v32, 1 }
  0xb6   : > { %1103 = vst [vmem:[#allocation1 + $0x1] ss:$4 sm:$0xff] %v8341_v38  ;;  %v1101_v1 = vld.sshfl [vmem:[#allocation1 + $0x20] sm:$0xff pattern:$0x73625140]  ;;  %v8451_v4 = vsel %vm720_vm3, %v8399_v46, %v915_v39  ;;  %v8457_v23 = vsel %vm720_vm3, %v796_v35, %v917_v30  ;;  %v643_v22 = vrot.slane %v8428_v32, 2 }
  0xb7   : > { %11924 = vst [vmem:[#allocation35_spill] sm:$0xff] %v8365_v59  ;;  %v644_v20 = vrot.slane %v8428_v32, 3  ;;  %v645_v19 = vrot.slane %v8428_v32, 4  ;;  %v646_v18 = vrot.slane %v8428_v32, 5  ;;  %v648_v30 = vrot.slane %v8428_v32, 7 }
  0xb8   : > { %1104 = vst [vmem:[#allocation1 + $0x2] ss:$4 sm:$0xff] %v8350_v44  ;;  %v672_v16 = vperm.slane %v8428_v32, 0 }
  0xb9   : > { %11925 = vst [vmem:[#allocation36_spill] sm:$0xff] %v8372_v2 }
  0xba   : > { %1105 = vst [vmem:[#allocation1 + $0x3] ss:$4 sm:$0xff] %v8353_v47 }
  0xbb   : > { %11926 = vst [vmem:[#allocation37_spill] sm:$0xff] %v8377_v5 }
  0xbc   : > { %1106 = vst [vmem:[#allocation1 + $0x20] ss:$4 sm:$0xff] %v8358_v49 }
  0xbd   : > { %1107 = vst [vmem:[#allocation1 + $0x21] ss:$4 sm:$0xff] %v8365_v59 }
  0xbe   : > { %1108 = vst [vmem:[#allocation1 + $0x22] ss:$4 sm:$0xff] %v8372_v2 }
  0xbf   : > { %1109 = vst [vmem:[#allocation1 + $0x23] ss:$4 sm:$0xff] %v8377_v5 }
  0xc0   : > { %11927 = vst [vmem:[#allocation38_spill] sm:$0xff] %v8393_v37 }
  0xc1   : > { %1190 = vst.msk [vmem:[#allocation2 + $0x31] sm:$0xff] %vm1189_vm4, %v1100_v40  ;;  %v1110_v61 = vld.sshfl [vmem:[#allocation1] sm:$0xff pattern:$0x73625140]  ;;  %v8414_v40 = vsel %vm720_vm3, %v546_v33, %v667_v27  ;;  %v918_v27 = vperm.slane %v888_v45, 0  ;;  %v920_v33 = vperm.slane %v890_v54, 0 }
  0xc2   : > { %11928 = vst [vmem:[#allocation39_spill] sm:$0xff] %v8404_v50  ;;  %v797_v45 = vrot.slane %v8399_v46, 3  ;;  %v799_v54 = vrot.slane %v8399_v46, 5  ;;  %v647_v46 = vrot.slane %v8428_v32, 6  ;;  %v676_v32 = vperm.slane %v645_v19, 0 }
  0xc3   : > { %1191 = vst.msk [vmem:[#allocation2 + $0x39] sm:$0xff] %vm1189_vm4, %v1101_v1  ;;  %v892_v1 = vrot.slane %v8381_v17, 7  ;;  %v8437_v17 = vsel %vm720_vm3, %v550_v62, %v671_v34  ;;  %v1223_v34 = vpop.permute.xlu0 %1222  ;;  %v527_v62 = vpop.f32.mrf.mxu0 }
  0xc4   : > { %11929 = vst [vmem:[#allocation40_spill] sm:$0xff] %v8411_v0  ;;  %v8466_v39 = vsel %vm720_vm3, %v797_v45, %v918_v27  ;;  %v8477_v35 = vsel %vm720_vm3, %v799_v54, %v920_v33  ;;  %v8482_v27 = vadd.f32 %v8299_v25, %v869_v21  ;;  %v8485_v45 = vsel %vm720_vm3, %v800_v31, %v921_v41  ;;  %v778_v21 = vpop.f32.mrf.mxu2 }
  0xc5   : > { %11930 = vst [vmem:[#allocation41_spill] sm:$0xff] %v8414_v40  ;;  %v922_v42 = vperm.slane %v892_v1, 0  ;;  %v8454_v1 = vsel %vm720_vm3, %v795_v13, %v916_v26  ;;  %v8469_v26 = vsel %vm720_vm3, %v798_v53, %v919_v28  ;;  %v8474_v13 = vadd.f32 %v8299_v25, %v527_v62 }
  0xc6   : > { %11931 = vst [vmem:[#allocation42_spill] sm:$0xff] %v8418_v8  ;;  %v1111_v36 = vld.sshfl [vmem:[#allocation1 + $0x20] sm:$0xff pattern:$0x73625140]  ;;  %v677_v54 = vperm.slane %v646_v18, 0  ;;  %v679_v62 = vperm.slane %v648_v30, 0 }
  0xc7   : > { %11932 = vst [vmem:[#allocation43_spill] sm:$0xff] %v8421_v29  ;;  %v8488_v53 = vsel %vm720_vm3, %v801_v48, %v922_v42  ;;  %v551_v33 = vrot.slane %v8474_v13, 1  ;;  %v552_v41 = vrot.slane %v8474_v13, 2  ;;  %v553_v42 = vrot.slane %v8474_v13, 3 }
  0xc8   : > { %1112 = vst [vmem:[#allocation1] ss:$4 sm:$0xff] %v8393_v37  ;;  %v554_v31 = vrot.slane %v8474_v13, 4  ;;  %v557_v19 = vrot.slane %v8474_v13, 7  ;;  %v893_v18 = vrot.slane %v8482_v27, 1  ;;  %v8505_v48 = vsel %vm720_vm3, %v8474_v13, %v672_v16 }
  0xc9   : > { %1113 = vst [vmem:[#allocation1 + $0x1] ss:$4 sm:$0xff] %v8404_v50  ;;  %v894_v30 = vrot.slane %v8482_v27, 2  ;;  %v898_v16 = vrot.slane %v8482_v27, 6 }
  0xca   : > { %1114 = vst [vmem:[#allocation1 + $0x2] ss:$4 sm:$0xff] %v8411_v0 }
  0xcb   : > { %11933 = vst [vmem:[#allocation44_spill] sm:$0xff] %v8434_v24 }
  0xcc   : > { %11934 = vst [vmem:[#allocation45_spill] sm:$0xff] %v8437_v17 }
  0xcd   : > { %1115 = vst [vmem:[#allocation1 + $0x3] ss:$4 sm:$0xff] %v8414_v40 }
  0xce   : > { %1116 = vst [vmem:[#allocation1 + $0x20] ss:$4 sm:$0xff] %v8418_v8 }
  0xcf   : > { %1117 = vst [vmem:[#allocation1 + $0x21] ss:$4 sm:$0xff] %v8421_v29 }
  0xd0   : > { %1118 = vst [vmem:[#allocation1 + $0x22] ss:$4 sm:$0xff] %v8434_v24  ;;  %v896_v24 = vrot.slane %v8482_v27, 4 }
  0xd1   : > { %11935 = vst [vmem:[#allocation46_spill] sm:$0xff] %v8451_v4 }
  0xd2   : > { %11936 = vst [vmem:[#allocation47_spill] sm:$0xff] %v8454_v1 }
  0xd3   : > { %11937 = vst [vmem:[#allocation48_spill] sm:$0xff] %v8457_v23 }
  0xd4   : > { %1119 = vst [vmem:[#allocation1 + $0x23] ss:$4 sm:$0xff] %v8437_v17  ;;  %v673_v17 = vperm.slane %v642_v55, 0  ;;  %v1120_v28 = vld.sshfl [vmem:[#allocation1] sm:$0xff pattern:$0x73625140] }
  0xd5   : > { %11938 = vst [vmem:[#allocation49_spill] sm:$0xff] %v8466_v39  ;;  %v678_v55 = vperm.slane %v647_v46, 0 }
  0xd6   : > { %11939 = vst [vmem:[#allocation50_spill] sm:$0xff] %v8469_v26  ;;  %v8508_v46 = vsel %vm720_vm3, %v551_v33, %v673_v17  ;;  %v8527_v33 = vsel %vm720_vm3, %v554_v31, %v676_v32  ;;  %v924_v32 = vperm.slane %v893_v18, 0  ;;  %v8544_v31 = vperm.slane %v896_v24, 0 }
  0xd7   : > { %1271 = vst.msk [vmem:[#allocation2 + $0x31] sm:$0xff] %vm1270_vm5, %v1223_v34  ;;  %v674_v34 = vperm.slane %v643_v22, 0  ;;  %v555_v22 = vrot.slane %v8474_v13, 5 }
  0xd8   : > { %11940 = vst [vmem:[#allocation51_spill] sm:$0xff] %v8477_v35 }
  0xd9   : > { %1192 = vst.msk [vmem:[#allocation2 + $0x49] sm:$0xff] %vm1189_vm4, %v1110_v61  ;;  %v675_v61 = vperm.slane %v644_v20, 0  ;;  %v8521_v17 = vsel %vm720_vm3, %v552_v41, %v674_v34  ;;  %v925_v41 = vperm.slane %v894_v30, 0 }
  0xda   : > { %11941 = vst [vmem:[#allocation52_spill] sm:$0xff] %v8485_v45 }
  0xdb   : > { %11942 = vst [vmem:[#allocation53_spill] sm:$0xff] %v8488_v53  ;;  %v1121_v20 = vld.sshfl [vmem:[#allocation1 + $0x20] sm:$0xff pattern:$0x73625140] }
  0xdc   : > { %1193 = vst.msk [vmem:[#allocation2 + $0x51] sm:$0xff] %vm1189_vm4, %v1111_v36  ;;  %v556_v36 = vrot.slane %v8474_v13, 6  ;;  %v8524_v13 = vsel %vm720_vm3, %v553_v42, %v675_v61  ;;  %v1231_v61 = vpop.permute.xlu2 %1230 }
  0xdd   : > { %1122 = vst [vmem:[#allocation1] ss:$4 sm:$0xff] %v8451_v4  ;;  %v895_v4 = vrot.slane %v8482_v27, 3 }
  0xde   : > { %1123 = vst [vmem:[#allocation1 + $0x1] ss:$4 sm:$0xff] %v8454_v1  ;;  %v621_v1 = vpop.f32.mrf.mxu1  ;;  %v8535_v29 = vsel %vm720_vm3, %v556_v36, %v678_v55  ;;  %v8549_v55 = vperm.slane %v898_v16, 0  ;;  %v1227_v36 = vpop.permute.xlu1 %1226 }
  0xdf   : > { %1124 = vst [vmem:[#allocation1 + $0x2] ss:$4 sm:$0xff] %v8457_v23  ;;  %v8512_v23 = vadd.f32 %v8299_v25, %v778_v21  ;;  %v899_v21 = vrot.slane %v8482_v27, 7  ;;  %v8539_v34 = vadd.f32 %v8299_v25, %v621_v1  ;;  %v8542_v42 = vperm.slane %v895_v4, 0  ;;  %v781_v4 = vpop.f32.mrf.mxu2 }
  0xe0   : > { %1125 = vst [vmem:[#allocation1 + $0x3] ss:$4 sm:$0xff] %v8466_v39  ;;  %v897_v39 = vrot.slane %v8482_v27, 5 }
  0xe1   : > { %11943 = vst [vmem:[#allocation54_spill] sm:$0xff] %v8505_v48  ;;  %v802_v1 = vrot.slane %v8512_v23, 1  ;;  %v649_v16 = vrot.slane %v8539_v34, 1  ;;  %v651_v24 = vrot.slane %v8539_v34, 3  ;;  %v654_v30 = vrot.slane %v8539_v34, 6 }
  0xe2   : > { %11944 = vst [vmem:[#allocation55_spill] sm:$0xff] %v8508_v46 }
  0xe3   : > { %1126 = vst [vmem:[#allocation1 + $0x20] ss:$4 sm:$0xff] %v8469_v26  ;;  %v8532_v26 = vsel %vm720_vm3, %v555_v22, %v677_v54  ;;  %v8547_v54 = vperm.slane %v897_v39, 0  ;;  %v8551_v22 = vperm.slane %v899_v21, 0  ;;  %v8560_v39 = vsel %vm720_vm3, %v557_v19, %v679_v62  ;;  %v530_v19 = vpop.f32.mrf.mxu0 }
  0xe4   : > { %1127 = vst [vmem:[#allocation1 + $0x21] ss:$4 sm:$0xff] %v8477_v35  ;;  %v923_v35 = vperm.slane %v8482_v27, 0  ;;  %v803_v27 = vrot.slane %v8512_v23, 2  ;;  %v650_v21 = vrot.slane %v8539_v34, 2  ;;  %v652_v62 = vrot.slane %v8539_v34, 4 }
  0xe5   : > { %11945 = vst [vmem:[#allocation56_spill] sm:$0xff] %v8521_v17  ;;  %v683_v8 = vperm.slane %v651_v24, 0  ;;  %v686_v37 = vperm.slane %v654_v30, 0  ;;  %v1233_v30 = vpop.permute.xlu2 %1232 }
  0xe6   : > { %11946 = vst [vmem:[#allocation57_spill] sm:$0xff] %v8524_v13  ;;  %v684_v15 = vperm.slane %v652_v62, 0  ;;  %v8585_v0 = vsel %vm720_vm3, %v803_v27, %v925_v41 }
  0xe7   : > { %11947 = vst [vmem:[#allocation58_spill] sm:$0xff] %v8527_v33  ;;  %v1130_v18 = vld.sshfl [vmem:[#allocation1] sm:$0xff pattern:$0x73625140] }
  0xe8   : > { %1128 = vst [vmem:[#allocation1 + $0x22] ss:$4 sm:$0xff] %v8485_v45  ;;  %v682_v45 = vperm.slane %v650_v21, 0  ;;  %v8591_v21 = vadd.f32 %v8299_v25, %v781_v4 }
  0xe9   : > { %11948 = vst [vmem:[#allocation59_spill] sm:$0xff] %v8532_v26 }
  0xea   : > { %11949 = vst [vmem:[#allocation60_spill] sm:$0xff] %v8535_v29 }
  0xeb   : > { %1129 = vst [vmem:[#allocation1 + $0x23] ss:$4 sm:$0xff] %v8488_v53  ;;  %v681_v53 = vperm.slane %v649_v16, 0 }
  0xec   : > { %1194 = vst.msk [vmem:[#allocation2 + $0x61] sm:$0xff] %vm1189_vm4, %v1120_v28  ;;  %v680_v28 = vperm.slane %v8539_v34, 0 }
  0xed   : > { %1195 = vst.msk [vmem:[#allocation2 + $0x69] sm:$0xff] %vm1189_vm4, %v1121_v20  ;;  %v8567_v20 = vsel %vm720_vm3, %v8512_v23, %v923_v35  ;;  %v655_v35 = vrot.slane %v8539_v34, 7 }
  0xee   : > { %11950 = vst [vmem:[#allocation61_spill] sm:$0xff] %v8560_v39 }
  0xef   : > { %1275 = vst.msk [vmem:[#allocation2 + $0x61] sm:$0xff] %vm1270_vm5, %v1231_v61  ;;  %v653_v61 = vrot.slane %v8539_v34, 5  ;;  %v531_v34 = vadd.f32 %v8299_v25, %v530_v19  ;;  %v687_v16 = vperm.slane %v655_v35, 0 }
  0xf0   : > { %11951 = vst [vmem:[#allocation62_spill] sm:$0xff] %v8567_v20 }
  0xf1   : > { %1196 = vst.msk [vmem:[#allocation2 + $0x79] sm:$0xff] %vm1189_vm4, %v1130_v18  ;;  %v872_v18 = vpop.f32.mrf.mxu3  ;;  %v685_v50 = vperm.slane %v653_v61, 0  ;;  %v560_v62 = vrot.slane %v531_v34, 3  ;;  %v561_v41 = vrot.slane %v531_v34, 4  ;;  %v562_v27 = vrot.slane %v531_v34, 5 }
  0xf2   : > { %1132 = vst [vmem:[#allocation1] ss:$4 sm:$0xff] %v8505_v48  ;;  %v1131_v40 = vld.sshfl [vmem:[#allocation1 + $0x20] sm:$0xff pattern:$0x73625140]  ;;  %v8582_v48 = vsel %vm720_vm3, %v802_v1, %v924_v32  ;;  %v873_v24 = vadd.f32 %v8299_v25, %v872_v18  ;;  %v558_v32 = vrot.slane %v531_v34, 1 }
  0xf3   : > { %1133 = vst [vmem:[#allocation1 + $0x1] ss:$4 sm:$0xff] %v8508_v46  ;;  %v1225_v46 = vpop.permute.xlu0 %1224  ;;  %v559_v1 = vrot.slane %v531_v34, 2  ;;  %v563_v19 = vrot.slane %v531_v34, 6  ;;  %v564_v61 = vrot.slane %v531_v34, 7  ;;  %v8606_v35 = vsel %vm720_vm3, %v560_v62, %v683_v8 }
  0xf4   : > { %1134 = vst [vmem:[#allocation1 + $0x2] ss:$4 sm:$0xff] %v8521_v17  ;;  %v8600_v25 = vsel %vm720_vm3, %v558_v32, %v681_v53  ;;  %v8609_v18 = vsel %vm720_vm3, %v561_v41, %v684_v15  ;;  %v900_v32 = vrot.slane %v873_v24, 1  ;;  %v902_v8 = vrot.slane %v873_v24, 3 }
  0xf5   : > { %11952 = vst [vmem:[#allocation63_spill] sm:$0xff] %v8582_v48  ;;  %v8603_v4 = vsel %vm720_vm3, %v559_v1, %v682_v45  ;;  %v8619_v53 = vsel %vm720_vm3, %v564_v61, %v687_v16  ;;  %v901_v45 = vrot.slane %v873_v24, 2  ;;  %v903_v1 = vrot.slane %v873_v24, 4 }
  0xf6   : > { %11953 = vst [vmem:[#allocation64_spill] sm:$0xff] %v8585_v0  ;;  %v904_v62 = vrot.slane %v873_v24, 5  ;;  %v905_v15 = vrot.slane %v873_v24, 6  ;;  %v906_v41 = vrot.slane %v873_v24, 7 }
  0xf7   : > { %1197 = vst.msk [vmem:[#allocation2 + $0x81] sm:$0xff] %vm1189_vm4, %v1131_v40  ;;  %v8596_v40 = vsel %vm720_vm3, %v531_v34, %v680_v28  ;;  %v8613_v28 = vsel %vm720_vm3, %v562_v27, %v685_v50  ;;  %v8616_v34 = vsel %vm720_vm3, %v563_v19, %v686_v37  ;;  %v932_v50 = vperm.slane %v900_v32, 0 }
  0xf8   : > { %1135 = vst [vmem:[#allocation1 + $0x3] ss:$4 sm:$0xff] %v8524_v13  ;;  %v933_v37 = vperm.slane %v901_v45, 0  ;;  %v934_v27 = vperm.slane %v902_v8, 0  ;;  %v935_v19 = vperm.slane %v903_v1, 0  ;;  %v936_v16 = vperm.slane %v904_v62, 0 }
  0xf9   : > { %1136 = vst [vmem:[#allocation1 + $0x20] ss:$4 sm:$0xff] %v8527_v33  ;;  %v937_v33 = vperm.slane %v905_v15, 0  ;;  %v938_v13 = vperm.slane %v906_v41, 0  ;;  %v810_v32 = vrot.slane %v8591_v21, 2  ;;  %v811_v45 = vrot.slane %v8591_v21, 3 }
  0xfa   : > { %11954 = vst [vmem:[#allocation65_spill] sm:$0xff] %v8596_v40  ;;  %v813_v8 = vrot.slane %v8591_v21, 5  ;;  %v814_v1 = vrot.slane %v8591_v21, 6  ;;  %v815_v62 = vrot.slane %v8591_v21, 7 }
  0xfb   : > { %1137 = vst [vmem:[#allocation1 + $0x21] ss:$4 sm:$0xff] %v8532_v26  ;;  %v8655_v41 = vsel %vm720_vm3, %v810_v32, %v933_v37  ;;  %v11978_v32 = vrot.slane %v8512_v23, 7 }
  0xfc   : > { %11955 = vst [vmem:[#allocation66_spill] sm:$0xff] %v8600_v25  ;;  %v8674_v37 = vsel %vm720_vm3, %v814_v1, %v937_v33 }
  0xfd   : > { %11956 = vst [vmem:[#allocation67_spill] sm:$0xff] %v8603_v4 }
  0xfe   : > { %11957 = vst [vmem:[#allocation68_spill] sm:$0xff] %v8606_v35 }
  0xff   : > { %11958 = vst [vmem:[#allocation69_spill] sm:$0xff] %v8609_v18  ;;  %v1140_v61 = vld.sshfl [vmem:[#allocation1] sm:$0xff pattern:$0x73625140] }
 0x100   : > { %1138 = vst [vmem:[#allocation1 + $0x22] ss:$4 sm:$0xff] %v8535_v29  ;;  %v931_v29 = vperm.slane %v873_v24, 0 }
 0x101   : > { %11959 = vst [vmem:[#allocation70_spill] sm:$0xff] %v8613_v28 }
 0x102   : > { %11960 = vst [vmem:[#allocation71_spill] sm:$0xff] %v8616_v34  ;;  %v8633_v24 = vsel %vm720_vm3, %v8591_v21, %v931_v29  ;;  %v1235_v29 = vpop.permute.xlu0 %1234 }
 0x103   : > { %11961 = vst [vmem:[#allocation72_spill] sm:$0xff] %v8619_v53 }
 0x104   : > { %1139 = vst [vmem:[#allocation1 + $0x23] ss:$4 sm:$0xff] %v8560_v39  ;;  %v11962_v39 = vrot.slane %v8512_v23, 3 }
 0x105   : > { %1273 = vst.msk [vmem:[#allocation2 + $0x49] sm:$0xff] %vm1270_vm5, %v1227_v36  ;;  %v1229_v36 = vpop.permute.xlu1 %1228 }
 0x106   : > { %1272 = vst.msk [vmem:[#allocation2 + $0x39] sm:$0xff] %vm1270_vm5, %v1225_v46  ;;  %v8628_v26 = vsel %vm720_vm3, %v11962_v39, %v8542_v42  ;;  %v809_v46 = vrot.slane %v8591_v21, 1  ;;  %v812_v42 = vrot.slane %v8591_v21, 4  ;;  %v11965_v39 = vrot.slane %v8512_v23, 4 }
 0x107   : > { %11963 = vst [vmem:[#allocation73_spill] sm:$0xff] %v8628_v26 }
 0x108   : > { %1276 = vst.msk [vmem:[#allocation2 + $0x69] sm:$0xff] %vm1270_vm5, %v1233_v30  ;;  %v8644_v30 = vsel %vm720_vm3, %v11965_v39, %v8544_v31  ;;  %v8652_v15 = vsel %vm720_vm3, %v809_v46, %v932_v50  ;;  %v8658_v31 = vsel %vm720_vm3, %v811_v45, %v934_v27  ;;  %v11971_v39 = vrot.slane %v8512_v23, 5 }
 0x109   : > { %11964 = vst [vmem:[#allocation74_spill] sm:$0xff] %v8633_v24  ;;  %v8671_v50 = vsel %vm720_vm3, %v813_v8, %v936_v16  ;;  %v8677_v27 = vsel %vm720_vm3, %v815_v62, %v938_v13  ;;  %v8690_v16 = vsel %vm720_vm3, %v11978_v32, %v8551_v22 }
 0x10a   : > { %1198 = vst.msk [vmem:[#allocation2 + $0x91] sm:$0xff] %vm1189_vm4, %v1140_v61  ;;  %v8661_v61 = vsel %vm720_vm3, %v812_v42, %v935_v19  ;;  %v11976_v19 = vrot.slane %v8512_v23, 6  ;;  %v1241_v33 = vpop.permute.xlu0 %1240 }
 0x10b   : > { %11966 = vst [vmem:[#allocation75_spill] sm:$0xff] %v8644_v30  ;;  %v1141_v21 = vld.sshfl [vmem:[#allocation1 + $0x20] sm:$0xff pattern:$0x73625140] }
 0x10c   : > { %1142 = vst [vmem:[#allocation1] ss:$4 sm:$0xff] %v8567_v20  ;;  %v8667_v20 = vsel %vm720_vm3, %v11971_v39, %v8547_v54  ;;  %v8683_v46 = vsel %vm720_vm3, %v11976_v19, %v8549_v55  ;;  %v1239_v54 = vpop.permute.xlu2 %1238 }
 0x10d   : > { %1143 = vst [vmem:[#allocation1 + $0x1] ss:$4 sm:$0xff] %v8582_v48  ;;  %v1237_v13 = vpop.permute.xlu1 %1236 }
 0x10e   : > { %11967 = vst [vmem:[#allocation76_spill] sm:$0xff] %v8652_v15 }
 0x10f   : > { %11968 = vst [vmem:[#allocation77_spill] sm:$0xff] %v8655_v41 }
 0x110   : > { %11969 = vst [vmem:[#allocation78_spill] sm:$0xff] %v8658_v31 }
 0x111   : > { %11970 = vst [vmem:[#allocation79_spill] sm:$0xff] %v8661_v61 }
 0x112   : > { %11972 = vst [vmem:[#allocation80_spill] sm:$0xff] %v8667_v20  ;;  %v1247_v42 = vpop.permute.xlu0 %1246 }
 0x113   : > { %1144 = vst [vmem:[#allocation1 + $0x2] ss:$4 sm:$0xff] %v8585_v0 }
 0x114   : > { %11973 = vst [vmem:[#allocation81_spill] sm:$0xff] %v8671_v50  ;;  %v1245_v55 = vpop.permute.xlu2 %1244 }
 0x115   : > { %11974 = vst [vmem:[#allocation82_spill] sm:$0xff] %v8674_v37 }
 0x116   : > { %11975 = vst [vmem:[#allocation83_spill] sm:$0xff] %v8677_v27 }
 0x117   : > { %11977 = vst [vmem:[#allocation84_spill] sm:$0xff] %v8683_v46 }
 0x118   : > { %1145 = vst [vmem:[#allocation1 + $0x3] ss:$4 sm:$0xff] %v8628_v26 }
 0x119   : > { %11979 = vst [vmem:[#allocation85_spill] sm:$0xff] %v8690_v16 }
 0x11a   : > { %1146 = vst [vmem:[#allocation1 + $0x20] ss:$4 sm:$0xff] %v8644_v30  ;;  %v1253_v1 = vpop.permute.xlu0 %1252 }
 0x11b   : > { %1147 = vst [vmem:[#allocation1 + $0x21] ss:$4 sm:$0xff] %v8667_v20 }
 0x11c   : > { %1148 = vst [vmem:[#allocation1 + $0x22] ss:$4 sm:$0xff] %v8683_v46  ;;  %v1251_v39 = vpop.permute.xlu2 %1250 }
 0x11d   : > { %1149 = vst [vmem:[#allocation1 + $0x23] ss:$4 sm:$0xff] %v8690_v16 }
 0x11e   : > { %1199 = vst.msk [vmem:[#allocation2 + $0x99] sm:$0xff] %vm1189_vm4, %v1141_v21 }
 0x11f   : > { %1274 = vst.msk [vmem:[#allocation2 + $0x51] sm:$0xff] %vm1270_vm5, %v1229_v36  ;;  %v1150_v23 = vld.sshfl [vmem:[#allocation1] sm:$0xff pattern:$0x73625140]  ;;  %v1243_v36 = vpop.permute.xlu1 %1242 }
 0x120   : > { %1277 = vst.msk [vmem:[#allocation2 + $0x79] sm:$0xff] %vm1270_vm5, %v1235_v29 }
 0x121   : > { %1279 = vst.msk [vmem:[#allocation2 + $0x91] sm:$0xff] %vm1270_vm5, %v1239_v54 }
 0x122   : > { %1278 = vst.msk [vmem:[#allocation2 + $0x81] sm:$0xff] %vm1270_vm5, %v1237_v13 }
 0x123   : > { %1280 = vst.msk [vmem:[#allocation2 + $0x99] sm:$0xff] %vm1270_vm5, %v1241_v33 }
 0x124   : > { %v1151_v22 = vld.sshfl [vmem:[#allocation1 + $0x20] sm:$0xff pattern:$0x73625140]  ;;  %1200 = vst.msk [vmem:[#allocation2 + $0xa9] sm:$0xff] %vm1189_vm4, %v1150_v23 }
 0x125   : > { %1201 = vst.msk [vmem:[#allocation2 + $0xb1] sm:$0xff] %vm1189_vm4, %v1151_v22 }
 0x126   : > { %1282 = vst.msk [vmem:[#allocation2 + $0xb1] sm:$0xff] %vm1270_vm5, %v1245_v55 }
 0x127   : > { %1156 = vst [vmem:[#allocation1 + $0x20] ss:$4 sm:$0xff] %v8609_v18  ;;  %v1249_v8 = vpop.permute.xlu1 %1248 }
 0x128   : > { %1157 = vst [vmem:[#allocation1 + $0x21] ss:$4 sm:$0xff] %v8613_v28 }
 0x129   : > { %1158 = vst [vmem:[#allocation1 + $0x22] ss:$4 sm:$0xff] %v8616_v34 }
 0x12a   : > { %1159 = vst [vmem:[#allocation1 + $0x23] ss:$4 sm:$0xff] %v8619_v53 }
 0x12b   : > { %1281 = vst.msk [vmem:[#allocation2 + $0xa9] sm:$0xff] %vm1270_vm5, %v1243_v36 }
 0x12c   : > { %1152 = vst [vmem:[#allocation1] ss:$4 sm:$0xff] %v8596_v40 }
 0x12d   : > { %1153 = vst [vmem:[#allocation1 + $0x1] ss:$4 sm:$0xff] %v8600_v25 }
 0x12e   : > { %1154 = vst [vmem:[#allocation1 + $0x2] ss:$4 sm:$0xff] %v8603_v4 }
 0x12f   : > { %1155 = vst [vmem:[#allocation1 + $0x3] ss:$4 sm:$0xff] %v8606_v35 }
 0x131   : > { %v1161_v45 = vld.sshfl [vmem:[#allocation1 + $0x20] sm:$0xff pattern:$0x73625140] }
 0x132   : > { %1166 = vst [vmem:[#allocation1 + $0x20] ss:$4 sm:$0xff] %v8661_v61 }
 0x133   : > { %1167 = vst [vmem:[#allocation1 + $0x21] ss:$4 sm:$0xff] %v8671_v50 }
 0x134   : > { %1168 = vst [vmem:[#allocation1 + $0x22] ss:$4 sm:$0xff] %v8674_v37 }
 0x135   : > { %1169 = vst [vmem:[#allocation1 + $0x23] ss:$4 sm:$0xff] %v8677_v27 }
 0x136   : > { %v1160_v29 = vld.sshfl [vmem:[#allocation1] sm:$0xff pattern:$0x73625140]  ;;  %1203 = vst.msk [vmem:[#allocation2 + $0xc9] sm:$0xff] %vm1189_vm4, %v1161_v45 }
 0x137   : > { %1162 = vst [vmem:[#allocation1] ss:$4 sm:$0xff] %v8633_v24 }
 0x138   : > { %1163 = vst [vmem:[#allocation1 + $0x1] ss:$4 sm:$0xff] %v8652_v15 }
 0x139   : > { %1164 = vst [vmem:[#allocation1 + $0x2] ss:$4 sm:$0xff] %v8655_v41 }
 0x13a   : > { %1165 = vst [vmem:[#allocation1 + $0x3] ss:$4 sm:$0xff] %v8658_v31 }
 0x13b   : > { %1202 = vst.msk [vmem:[#allocation2 + $0xc1] sm:$0xff] %vm1189_vm4, %v1160_v29 }
 0x13c   : > { %1283 = vst.msk [vmem:[#allocation2 + $0xc1] sm:$0xff] %vm1270_vm5, %v1247_v42  ;;  %v1171_v62 = vld.sshfl [vmem:[#allocation1 + $0x20] sm:$0xff pattern:$0x73625140] }
 0x13d   : > { %1284 = vst.msk [vmem:[#allocation2 + $0xc9] sm:$0xff] %vm1270_vm5, %v1249_v8 }
 0x13e   : > { %1205 = vst.msk [vmem:[#allocation2 + $0xe1] sm:$0xff] %vm1189_vm4, %v1171_v62 }
 0x13f   : > { %1286 = vst.msk [vmem:[#allocation2 + $0xe1] sm:$0xff] %vm1270_vm5, %v1253_v1  ;;  %1290 = sbr.rel (%p7334_p7) target bundleno = 491 (0x1eb), region = 68 }
 0x141   : > { %v1170_v21 = vld.sshfl [vmem:[#allocation1] sm:$0xff pattern:$0x73625140] }
 0x142   : > { %1204 = vst.msk [vmem:[#allocation2 + $0xd9] sm:$0xff] %vm1189_vm4, %v1170_v21 }
 0x143   : > { %1285 = vst.msk [vmem:[#allocation2 + $0xd9] sm:$0xff] %vm1270_vm5, %v1251_v39 }
 0x144   : > { %v7338_v19 = vld [vmem:[%s11794_s2 + $0x8] sm:$0xff]  ;;  %v1295_v54 = vld [vmem:[%s11794_s2] sm:$0xff]  ;;  %v7342_v32 = vld [vmem:[%s11794_s2 + $0x18] sm:$0xff] }
 0x145   : > { %1354 = vmatpush.msra.mxu1 %v7338_v19  ;;  %1318 = vmatpush.msra.mxu0 %v1295_v54  ;;  %v7340_v13 = vld [vmem:[%s11794_s2 + $0x10] sm:$0xff]  ;;  %v1294_v33 = vld [vmem:[%s1293_s22] sm:$0xff]  ;;  %v1537_v22 = vld [vmem:[%s1533_s27 + $0x18] sm:$0xff] }
 0x146   : > { %1443 = vmatpush.msra.mxu3 %v7342_v32  ;;  %1407 = vmatpush.msra.mxu2 %v7340_v13  ;;  %v1536_v23 = vld [vmem:[%s1533_s27 + $0x10] sm:$0xff]  ;;  %v1534_v55 = vld [vmem:[%s1533_s27] sm:$0xff]  ;;  %v1535_v36 = vld [vmem:[%s1533_s27 + $0x8] sm:$0xff] }
 0x147   : > { %7339 = vmatmul.msk.f32.vlgmr.msra.gmra.mxu1 %vm491_vm1, %v1294_v33  ;;  %7337 = vmatmul.msk.f32.vlgmr.msra.gmra.mxu0 %vm491_vm1, %v1294_v33  ;;  %v7846_v45 = vld [vmem:[%s11795_s3] ss:$0 sm:$0xff] }
 0x148   : > { %7343 = vmatmul.msk.f32.vlgmr.msra.gmra.mxu3 %vm491_vm1, %v1294_v33  ;;  %7341 = vmatmul.msk.f32.vlgmr.msra.gmra.mxu2 %vm491_vm1, %v1294_v33 }
 0x149   : > { %1546 = vrot.lane.b32.xlu1 %v1536_v23, %s7969_s26  ;;  %1542 = vrot.lane.b32.xlu0 %v1534_v55, %s7969_s26 }
 0x151   : > { %1548 = vrot.lane.b32.xlu1 %v1537_v22, %s7969_s26  ;;  %1544 = vrot.lane.b32.xlu0 %v1535_v36, %s7969_s26 }
 0x1c4   : > { %v1356_v42 = vpop.f32.mrf.mxu1  ;;  %v1320_v29 = vpop.f32.mrf.mxu0 }
 0x1c5   : > { %v1357_v8 = vadd.f32 %v7846_v45, %v1356_v42  ;;  %v1321_v1 = vadd.f32 %v7846_v45, %v1320_v29 }
 0x1c7   : > { %v1360_v62 = vrot.slane %v1357_v8, 1  ;;  %v1361_v39 = vrot.slane %v1357_v8, 2  ;;  %v1362_v21 = vrot.slane %v1357_v8, 3  ;;  %v1363_v19 = vrot.slane %v1357_v8, 4 }
 0x1c8   : > { %v1364_v54 = vrot.slane %v1357_v8, 5  ;;  %v1365_v32 = vrot.slane %v1357_v8, 6  ;;  %v1367_v13 = vperm.slane %v1357_v8, 0  ;;  %v1366_v33 = vrot.slane %v1357_v8, 7 }
 0x1c9   : > { %v1368_v23 = vperm.slane %v1360_v62, 0  ;;  %v1369_v55 = vperm.slane %v1361_v39, 0  ;;  %v1370_v22 = vperm.slane %v1362_v21, 0  ;;  %v1371_v36 = vperm.slane %v1363_v19, 0 }
 0x1ca   : > { %v1372_v27 = vperm.slane %v1364_v54, 0  ;;  %v1324_v37 = vrot.slane %v1321_v1, 1  ;;  %v1325_v50 = vrot.slane %v1321_v1, 2  ;;  %v1326_v61 = vrot.slane %v1321_v1, 3 }
 0x1cb   : > { %v1327_v31 = vrot.slane %v1321_v1, 4  ;;  %v1328_v41 = vrot.slane %v1321_v1, 5  ;;  %v1445_v42 = vpop.f32.mrf.mxu3  ;;  %v1373_v29 = vperm.slane %v1365_v32, 0  ;;  %v1329_v15 = vrot.slane %v1321_v1, 6  ;;  %v1409_v34 = vpop.f32.mrf.mxu2 }
 0x1cc   : > { %v1383_v24 = vsel %vm720_vm3, %v1321_v1, %v1367_v13  ;;  %v1384_v53 = vsel %vm720_vm3, %v1324_v37, %v1368_v23  ;;  %v1374_v28 = vperm.slane %v1366_v33, 0  ;;  %v1330_v8 = vrot.slane %v1321_v1, 7 }
 0x1cd   : > { %v1385_v62 = vsel %vm720_vm3, %v1325_v50, %v1369_v55  ;;  %v1386_v39 = vsel %vm720_vm3, %v1326_v61, %v1370_v22  ;;  %1496 = vst [vmem:[#allocation1] ss:$4 sm:$0xff] %v1383_v24  ;;  %v1387_v21 = vsel %vm720_vm3, %v1327_v31, %v1371_v36  ;;  %v1446_v19 = vadd.f32 %v7846_v45, %v1445_v42 }
 0x1ce   : > { %1498 = vst [vmem:[#allocation1 + $0x1] ss:$4 sm:$0xff] %v1384_v53  ;;  %v1388_v54 = vsel %vm720_vm3, %v1328_v41, %v1372_v27  ;;  %v1410_v32 = vadd.f32 %v7846_v45, %v1409_v34  ;;  %v1389_v13 = vsel %vm720_vm3, %v1329_v15, %v1373_v29  ;;  %v1390_v1 = vsel %vm720_vm3, %v1330_v8, %v1374_v28 }
 0x1cf   : > { %1500 = vst [vmem:[#allocation1 + $0x2] ss:$4 sm:$0xff] %v1385_v62  ;;  %v1449_v37 = vrot.slane %v1446_v19, 1  ;;  %v1450_v23 = vrot.slane %v1446_v19, 2  ;;  %v1451_v33 = vrot.slane %v1446_v19, 3  ;;  %v1452_v24 = vrot.slane %v1446_v19, 4 }
 0x1d0   : > { %1502 = vst [vmem:[#allocation1 + $0x3] ss:$4 sm:$0xff] %v1386_v39  ;;  %v1456_v31 = vperm.slane %v1446_v19, 0  ;;  %v1413_v50 = vrot.slane %v1410_v32, 1  ;;  %v1453_v41 = vrot.slane %v1446_v19, 5  ;;  %v1414_v34 = vrot.slane %v1410_v32, 2 }
 0x1d1   : > { %1504 = vst [vmem:[#allocation1 + $0x20] ss:$4 sm:$0xff] %v1387_v21  ;;  %v1457_v61 = vperm.slane %v1449_v37, 0  ;;  %v1458_v53 = vperm.slane %v1450_v23, 0  ;;  %v1459_v27 = vperm.slane %v1451_v33, 0  ;;  %v1415_v45 = vrot.slane %v1410_v32, 3 }
 0x1d2   : > { %1506 = vst [vmem:[#allocation1 + $0x21] ss:$4 sm:$0xff] %v1388_v54  ;;  %v1454_v15 = vrot.slane %v1446_v19, 6  ;;  %v1455_v55 = vrot.slane %v1446_v19, 7  ;;  %v1460_v36 = vperm.slane %v1452_v24, 0  ;;  %v1416_v42 = vrot.slane %v1410_v32, 4  ;;  %v1543_v54 = vpop.permute.xlu0 %1542 }
 0x1d3   : > { %1508 = vst [vmem:[#allocation1 + $0x22] ss:$4 sm:$0xff] %v1389_v13  ;;  %v1473_v22 = vsel %vm720_vm3, %v1413_v50, %v1457_v61  ;;  %v1472_v28 = vsel %vm720_vm3, %v1410_v32, %v1456_v31  ;;  %v1474_v29 = vsel %vm720_vm3, %v1414_v34, %v1458_v53  ;;  %v1461_v62 = vperm.slane %v1453_v41, 0  ;;  %v1547_v31 = vpop.permute.xlu1 %1546 }
 0x1d4   : > { %1510 = vst [vmem:[#allocation1 + $0x23] ss:$4 sm:$0xff] %v1390_v1  ;;  %v1417_v39 = vrot.slane %v1410_v32, 5  ;;  %v1475_v21 = vsel %vm720_vm3, %v1415_v45, %v1459_v27  ;;  %v1462_v13 = vperm.slane %v1454_v15, 0  ;;  %v1418_v37 = vrot.slane %v1410_v32, 6 }
 0x1d5   : > { %v1463_v23 = vperm.slane %v1455_v55, 0  ;;  %v1419_v19 = vrot.slane %v1410_v32, 7  ;;  %v1476_v33 = vsel %vm720_vm3, %v1416_v42, %v1460_v36 }
 0x1d6   : > { %v1477_v61 = vsel %vm720_vm3, %v1417_v39, %v1461_v62  ;;  %v1478_v24 = vsel %vm720_vm3, %v1418_v37, %v1462_v13 }
 0x1d7   : > { %v1511_v8 = vld.sshfl [vmem:[#allocation1] sm:$0xff pattern:$0x73625140]  ;;  %v1479_v53 = vsel %vm720_vm3, %v1419_v19, %v1463_v23 }
 0x1d8   : > { %1513 = vst [vmem:[#allocation1] ss:$4 sm:$0xff] %v1472_v28 }
 0x1d9   : > { %1514 = vst [vmem:[#allocation1 + $0x1] ss:$4 sm:$0xff] %v1473_v22 }
 0x1da   : > { %1515 = vst [vmem:[#allocation1 + $0x2] ss:$4 sm:$0xff] %v1474_v29  ;;  %v1545_v50 = vpop.permute.xlu0 %1544 }
 0x1db   : > { %1516 = vst [vmem:[#allocation1 + $0x3] ss:$4 sm:$0xff] %v1475_v21  ;;  %v1512_v1 = vld.sshfl [vmem:[#allocation1 + $0x20] sm:$0xff pattern:$0x73625140]  ;;  %v1549_v41 = vpop.permute.xlu1 %1548 }
 0x1dc   : > { %1527 = vst.msk [vmem:[#allocation2 + $0x1] sm:$0xff] %vm1189_vm4, %v1511_v8 }
 0x1dd   : > { %1554 = vst.msk [vmem:[#allocation2 + $0x1] sm:$0xff] %vm1270_vm5, %v1543_v54 }
 0x1de   : > { %1517 = vst [vmem:[#allocation1 + $0x20] ss:$4 sm:$0xff] %v1476_v33 }
 0x1df   : > { %1518 = vst [vmem:[#allocation1 + $0x21] ss:$4 sm:$0xff] %v1477_v61 }
 0x1e0   : > { %1519 = vst [vmem:[#allocation1 + $0x22] ss:$4 sm:$0xff] %v1478_v24 }
 0x1e1   : > { %1520 = vst [vmem:[#allocation1 + $0x23] ss:$4 sm:$0xff] %v1479_v53 }
 0x1e2   : > { %v1521_v32 = vld.sshfl [vmem:[#allocation1] sm:$0xff pattern:$0x73625140]  ;;  %1528 = vst.msk [vmem:[#allocation2 + $0x9] sm:$0xff] %vm1189_vm4, %v1512_v1 }
 0x1e3   : > { %1529 = vst.msk [vmem:[#allocation2 + $0x19] sm:$0xff] %vm1189_vm4, %v1521_v32 }
 0x1e4   : > { %1556 = vst.msk [vmem:[#allocation2 + $0x19] sm:$0xff] %vm1270_vm5, %v1547_v31 }
 0x1e5   : > { %1555 = vst.msk [vmem:[#allocation2 + $0x9] sm:$0xff] %vm1270_vm5, %v1545_v50 }
 0x1e8   : > { %v1522_v27 = vld.sshfl [vmem:[#allocation1 + $0x20] sm:$0xff pattern:$0x73625140] }
 0x1e9   : > { %1530 = vst.msk [vmem:[#allocation2 + $0x21] sm:$0xff] %vm1189_vm4, %v1522_v27 }
 0x1ea   : > { %1557 = vst.msk [vmem:[#allocation2 + $0x21] sm:$0xff] %vm1270_vm5, %v1549_v41 }
 0x1eb PF: > { %p7346_p8 = scmp.ne.s32.totalorder %s7949_s17, 0 }
 0x1ed   : > { %1561 = sbr.rel (%p7346_p8) target bundleno = 505 (0x1f9), region = 72 }
 0x1f2   : > { %v7970_v34 = vmov 0.0   ;;  %vm1564_vm6 = vcmask 58368  }
 0x1f3   : > { %1562 = vst.msk [vmem:[#allocation2] sm:$0xff] %vm491_vm1, %v7970_v34 }
 0x1f4   : > { %1563 = vst.msk [vmem:[#allocation2 + $0x8] sm:$0xff] %vm491_vm1, %v7970_v34 }
 0x1f5   : > { %1566 = vst.msk [vmem:[#allocation2 + $0x18] sm:$0xff] %vm491_vm1, %v7970_v34 }
 0x1f6   : > { %1567 = vst.msk [vmem:[#allocation2 + $0x20] sm:$0xff] %vm491_vm1, %v7970_v34 }
 0x1f7   : > { %1565 = vst.msk [vmem:[#allocation2 + $0x10] sm:$0x3] %vm1564_vm6, %v7970_v34 }
 0x1f8   : > { %1568 = vst.msk [vmem:[#allocation2 + $0x28] sm:$0x3] %vm1564_vm6, %v7970_v34 }
 0x1f9 PF: > { %p7347_p9 = scmp.ge.s32.totalorder %s7949_s17, 1 }
 0x1fb   : > { %1572 = sbr.rel (%p7347_p9) target bundleno = 678 (0x2a6), region = 76 }
 0x200   : > { %v7352_v45 = vld [vmem:[%s11794_s2 + $0x8] sm:$0xff]  ;;  %v7350_v15 = vld [vmem:[%s8108_s16 + $0x20] sm:$0xff]  ;;  %v7356_v22 = vld [vmem:[%s11794_s2 + $0x18] sm:$0xff]  ;;  %s7971_s16 = smov 4  }
 0x201   : > { %v1577_v55 = vld [vmem:[%s11794_s2] sm:$0xff]  ;;  %1636 = vmatpush.msra.mxu1 %v7352_v45  ;;  %v7354_v36 = vld [vmem:[%s11794_s2 + $0x10] sm:$0xff]  ;;  %1725 = vmatpush.msra.mxu3 %v7356_v22  ;;  %v7363_v29 = vld [vmem:[%s8123_s23 + $0x98] sm:$0xff] }
 0x202   : > { %1600 = vmatpush.msra.mxu0 %v1577_v55  ;;  %v7362_v42 = vld [vmem:[%s8123_s23 + $0x90] sm:$0xff]  ;;  %7353 = vmatmul.msk.f32.vlgmr.msra.gmra.mxu1 %vm491_vm1, %v7350_v15  ;;  %v7360_v28 = vld [vmem:[%s8123_s23 + $0x80] sm:$0xff]  ;;  %v7361_v8 = vld [vmem:[%s8123_s23 + $0x88] sm:$0xff] }
 0x203   : > { %7351 = vmatmul.msk.f32.vlgmr.msra.gmra.mxu0 %vm491_vm1, %v7350_v15  ;;  %7357 = vmatmul.msk.f32.vlgmr.msra.gmra.mxu3 %vm491_vm1, %v7350_v15  ;;  %v7847_v62 = vld [vmem:[%s11795_s3] ss:$0 sm:$0xff] }
 0x204   : > { %1689 = vmatpush.msra.mxu2 %v7354_v36  ;;  %1829 = vrot.lane.b32.xlu1 %v7362_v42, %s7971_s16 }
 0x205   : > { %7355 = vmatmul.msk.f32.vlgmr.msra.gmra.mxu2 %vm491_vm1, %v7350_v15  ;;  %1825 = vrot.lane.b32.xlu0 %v7360_v28, %s7971_s16 }
 0x20c   : > { %1831 = vrot.lane.b32.xlu1 %v7363_v29, %s7971_s16 }
 0x20d   : > { %1827 = vrot.lane.b32.xlu0 %v7361_v8, %s7971_s16 }
 0x27f   : > { %v1638_v39 = vpop.f32.mrf.mxu1 }
 0x280   : > { %v1639_v21 = vadd.f32 %v7847_v62, %v1638_v39  ;;  %v1602_v54 = vpop.f32.mrf.mxu0 }
 0x281   : > { %v1603_v13 = vadd.f32 %v7847_v62, %v1602_v54 }
 0x282   : > { %v1642_v37 = vrot.slane %v1639_v21, 1  ;;  %v1643_v23 = vrot.slane %v1639_v21, 2  ;;  %v1644_v19 = vrot.slane %v1639_v21, 3  ;;  %v1645_v33 = vrot.slane %v1639_v21, 4 }
 0x283   : > { %v1646_v1 = vrot.slane %v1639_v21, 5  ;;  %v1647_v61 = vrot.slane %v1639_v21, 6  ;;  %v1649_v24 = vperm.slane %v1639_v21, 0  ;;  %v1648_v31 = vrot.slane %v1639_v21, 7 }
 0x284   : > { %v1650_v53 = vperm.slane %v1642_v37, 0  ;;  %v1651_v32 = vperm.slane %v1643_v23, 0  ;;  %v1652_v50 = vperm.slane %v1644_v19, 0  ;;  %v1653_v41 = vperm.slane %v1645_v33, 0 }
 0x285   : > { %v1654_v27 = vperm.slane %v1646_v1, 0  ;;  %v1606_v34 = vrot.slane %v1603_v13, 1  ;;  %v1607_v45 = vrot.slane %v1603_v13, 2  ;;  %v1608_v15 = vrot.slane %v1603_v13, 3 }
 0x286   : > { %v1609_v55 = vrot.slane %v1603_v13, 4  ;;  %v1610_v22 = vrot.slane %v1603_v13, 5  ;;  %v1727_v36 = vpop.f32.mrf.mxu3  ;;  %v1655_v42 = vperm.slane %v1647_v61, 0  ;;  %v1611_v28 = vrot.slane %v1603_v13, 6 }
 0x287   : > { %v1665_v29 = vsel %vm720_vm3, %v1603_v13, %v1649_v24  ;;  %v1666_v8 = vsel %vm720_vm3, %v1606_v34, %v1650_v53  ;;  %v1656_v39 = vperm.slane %v1648_v31, 0  ;;  %v1612_v54 = vrot.slane %v1603_v13, 7 }
 0x288   : > { %v1667_v21 = vsel %vm720_vm3, %v1607_v45, %v1651_v32  ;;  %v1668_v37 = vsel %vm720_vm3, %v1608_v15, %v1652_v50  ;;  %1778 = vst [vmem:[#allocation1] ss:$4 sm:$0xff] %v1665_v29  ;;  %v1691_v23 = vpop.f32.mrf.mxu2  ;;  %v1669_v19 = vsel %vm720_vm3, %v1609_v55, %v1653_v41  ;;  %v1728_v33 = vadd.f32 %v7847_v62, %v1727_v36 }
 0x289   : > { %1780 = vst [vmem:[#allocation1 + $0x1] ss:$4 sm:$0xff] %v1666_v8  ;;  %v1670_v1 = vsel %vm720_vm3, %v1610_v22, %v1654_v27  ;;  %v1692_v61 = vadd.f32 %v7847_v62, %v1691_v23  ;;  %v1671_v24 = vsel %vm720_vm3, %v1611_v28, %v1655_v42  ;;  %v1672_v32 = vsel %vm720_vm3, %v1612_v54, %v1656_v39 }
 0x28a   : > { %1782 = vst [vmem:[#allocation1 + $0x2] ss:$4 sm:$0xff] %v1667_v21  ;;  %v1731_v53 = vrot.slane %v1728_v33, 1  ;;  %v1732_v31 = vrot.slane %v1728_v33, 2  ;;  %v1733_v13 = vrot.slane %v1728_v33, 3  ;;  %v1734_v34 = vrot.slane %v1728_v33, 4 }
 0x28b   : > { %1784 = vst [vmem:[#allocation1 + $0x3] ss:$4 sm:$0xff] %v1668_v37  ;;  %v1738_v41 = vperm.slane %v1728_v33, 0  ;;  %v1695_v15 = vrot.slane %v1692_v61, 1  ;;  %v1735_v27 = vrot.slane %v1728_v33, 5  ;;  %v1696_v62 = vrot.slane %v1692_v61, 2 }
 0x28c   : > { %1786 = vst [vmem:[#allocation1 + $0x20] ss:$4 sm:$0xff] %v1669_v19  ;;  %v1739_v50 = vperm.slane %v1731_v53, 0  ;;  %v1740_v45 = vperm.slane %v1732_v31, 0  ;;  %v1741_v55 = vperm.slane %v1733_v13, 0  ;;  %v1697_v22 = vrot.slane %v1692_v61, 3 }
 0x28d   : > { %1788 = vst [vmem:[#allocation1 + $0x21] ss:$4 sm:$0xff] %v1670_v1  ;;  %v1736_v36 = vrot.slane %v1728_v33, 6  ;;  %v1737_v42 = vrot.slane %v1728_v33, 7  ;;  %v1742_v29 = vperm.slane %v1734_v34, 0  ;;  %v1698_v8 = vrot.slane %v1692_v61, 4  ;;  %v1826_v1 = vpop.permute.xlu0 %1825 }
 0x28e   : > { %1790 = vst [vmem:[#allocation1 + $0x22] ss:$4 sm:$0xff] %v1671_v24  ;;  %v1755_v28 = vsel %vm720_vm3, %v1695_v15, %v1739_v50  ;;  %v1754_v39 = vsel %vm720_vm3, %v1692_v61, %v1738_v41  ;;  %v1756_v54 = vsel %vm720_vm3, %v1696_v62, %v1740_v45  ;;  %v1743_v37 = vperm.slane %v1735_v27, 0  ;;  %v1830_v41 = vpop.permute.xlu1 %1829 }
 0x28f   : > { %1792 = vst [vmem:[#allocation1 + $0x23] ss:$4 sm:$0xff] %v1672_v32  ;;  %v1699_v23 = vrot.slane %v1692_v61, 5  ;;  %v1757_v19 = vsel %vm720_vm3, %v1697_v22, %v1741_v55  ;;  %v1744_v24 = vperm.slane %v1736_v36, 0  ;;  %v1700_v53 = vrot.slane %v1692_v61, 6 }
 0x290   : > { %v1745_v31 = vperm.slane %v1737_v42, 0  ;;  %v1701_v33 = vrot.slane %v1692_v61, 7  ;;  %v1758_v13 = vsel %vm720_vm3, %v1698_v8, %v1742_v29 }
 0x291   : > { %v1759_v50 = vsel %vm720_vm3, %v1699_v23, %v1743_v37  ;;  %v1760_v34 = vsel %vm720_vm3, %v1700_v53, %v1744_v24 }
 0x292   : > { %v1793_v21 = vld.sshfl [vmem:[#allocation1] sm:$0xff pattern:$0x73625140]  ;;  %v1761_v45 = vsel %vm720_vm3, %v1701_v33, %v1745_v31 }
 0x293   : > { %1795 = vst [vmem:[#allocation1] ss:$4 sm:$0xff] %v1754_v39 }
 0x294   : > { %1796 = vst [vmem:[#allocation1 + $0x1] ss:$4 sm:$0xff] %v1755_v28 }
 0x295   : > { %1797 = vst [vmem:[#allocation1 + $0x2] ss:$4 sm:$0xff] %v1756_v54  ;;  %v1828_v15 = vpop.permute.xlu0 %1827 }
 0x296   : > { %1798 = vst [vmem:[#allocation1 + $0x3] ss:$4 sm:$0xff] %v1757_v19  ;;  %v1794_v32 = vld.sshfl [vmem:[#allocation1 + $0x20] sm:$0xff pattern:$0x73625140]  ;;  %v1832_v27 = vpop.permute.xlu1 %1831 }
 0x297   : > { %1810 = vst.msk [vmem:[#allocation2 + $0xf1] sm:$0xff] %vm1189_vm4, %v1793_v21 }
 0x298   : > { %1837 = vst.msk [vmem:[#allocation2 + $0xf1] sm:$0xff] %vm1270_vm5, %v1826_v1 }
 0x299   : > { %1799 = vst [vmem:[#allocation1 + $0x20] ss:$4 sm:$0xff] %v1758_v13 }
 0x29a   : > { %1800 = vst [vmem:[#allocation1 + $0x21] ss:$4 sm:$0xff] %v1759_v50 }
 0x29b   : > { %1801 = vst [vmem:[#allocation1 + $0x22] ss:$4 sm:$0xff] %v1760_v34 }
 0x29c   : > { %1802 = vst [vmem:[#allocation1 + $0x23] ss:$4 sm:$0xff] %v1761_v45 }
 0x29d   : > { %v1803_v61 = vld.sshfl [vmem:[#allocation1] sm:$0xff pattern:$0x73625140]  ;;  %1811 = vst.msk [vmem:[#allocation2 + $0xf9] sm:$0xff] %vm1189_vm4, %v1794_v32 }
 0x29e   : > { %1812 = vst.msk [vmem:[#allocation2 + $0x109] sm:$0xff] %vm1189_vm4, %v1803_v61 }
 0x29f   : > { %1839 = vst.msk [vmem:[#allocation2 + $0x109] sm:$0xff] %vm1270_vm5, %v1830_v41 }
 0x2a0   : > { %1838 = vst.msk [vmem:[#allocation2 + $0xf9] sm:$0xff] %vm1270_vm5, %v1828_v15 }
 0x2a3   : > { %v1804_v55 = vld.sshfl [vmem:[#allocation1 + $0x20] sm:$0xff pattern:$0x73625140] }
 0x2a4   : > { %1813 = vst.msk [vmem:[#allocation2 + $0x111] sm:$0xff] %vm1189_vm4, %v1804_v55 }
 0x2a5   : > { %1840 = vst.msk [vmem:[#allocation2 + $0x111] sm:$0xff] %vm1270_vm5, %v1832_v27 }
 0x2a6 PF: > { %p7364_p10 = scmp.ne.s32.totalorder %s7949_s17, 1 }
 0x2a8   : > { %1844 = sbr.rel (%p7364_p10) target bundleno = 692 (0x2b4), region = 80 }
 0x2ad   : > { %v7972_v62 = vmov 0.0   ;;  %vm1848_vm7 = vcmask 58368  }
 0x2ae   : > { %1846 = vst.msk [vmem:[#allocation2 + $0xf0] sm:$0xff] %vm491_vm1, %v7972_v62 }
 0x2af   : > { %1847 = vst.msk [vmem:[#allocation2 + $0xf8] sm:$0xff] %vm491_vm1, %v7972_v62 }
 0x2b0   : > { %1850 = vst.msk [vmem:[#allocation2 + $0x108] sm:$0xff] %vm491_vm1, %v7972_v62 }
 0x2b1   : > { %1851 = vst.msk [vmem:[#allocation2 + $0x110] sm:$0xff] %vm491_vm1, %v7972_v62 }
 0x2b2   : > { %1849 = vst.msk [vmem:[#allocation2 + $0x100] sm:$0x3] %vm1848_vm7, %v7972_v62 }
 0x2b3   : > { %1852 = vst.msk [vmem:[#allocation2 + $0x118] sm:$0x3] %vm1848_vm7, %v7972_v62 }
 0x2b4 PF: > { %v7365_v22 = vld [vmem:[%s11796_s4 + $0x8] sm:$0xff]  ;;  %v8845_v42 = vld [vmem:[#allocation2 + $0xc9] sm:$0xff]  ;;  %v7448_v29 = vld [vmem:[%s11796_s4 + $0x20] sm:$0xff] }
 0x2b5   : > { %v1874_v36 = vld [vmem:[#allocation2 + $0x1] sm:$0xff]  ;;  %1971 = vmatpush.msra.mxu0 %v7365_v22  ;;  %7794 = vmatpush.msra.mxu1 %v7365_v22  ;;  %v8847_v28 = vld [vmem:[#allocation2 + $0xd9] sm:$0xff]  ;;  %v7427_v21 = vld [vmem:[%s11796_s4 + $0x18] sm:$0xff] }
 0x2b6   : > { %7795 = vmatpush.msra.mxu2 %v7365_v22  ;;  %7366 = vmatmul.msk.f32.vlgmr.msra.gmra.mxu0 %vm491_vm1, %v1874_v36  ;;  %v8853_v8 = vld [vmem:[#allocation2 + $0xe1] sm:$0xff]  ;;  %v1873_v39 = vld [vmem:[%s11796_s4] sm:$0xff]  ;;  %v1875_v37 = vld [vmem:[#allocation2 + $0x9] sm:$0xff] }
 0x2b7   : > { %7383 = vmatmul.msk.f32.vlgmr.msra.gmra.mxu1 %vm491_vm1, %v8845_v42  ;;  %7384 = vmatmul.msk.f32.vlgmr.msra.gmra.mxu2 %vm491_vm1, %v8847_v28  ;;  %v7406_v54 = vld [vmem:[%s11796_s4 + $0x10] sm:$0xff]  ;;  %v1853_v23 = vld [vmem:[#allocation2] sm:$0xff]  ;;  %v2350_v1 = vld [vmem:[#allocation2 + $0x18] sm:$0xff] }
 0x2b8   : > { %2626 = vmatpush.msrb.mxu0 %v7448_v29  ;;  %7796 = vmatpush.msra.mxu3 %v7365_v22  ;;  %v2170_v19 = vld [vmem:[#allocation2 + $0x2] sm:$0xff]  ;;  %v8874_v24 = vld [vmem:[#allocation2 + $0x19] sm:$0xff]  ;;  %v2171_v31 = vld [vmem:[#allocation2 + $0xa] sm:$0xff] }
 0x2b9   : > { %7385 = vmatmul.msk.f32.vlgmr.msra.gmra.mxu3 %vm491_vm1, %v8853_v8  ;;  %2108 = vmatpush.msrb.mxu1 %v1873_v39  ;;  %v1854_v53 = vld [vmem:[#allocation2 + $0x8] sm:$0xff]  ;;  %v2351_v33 = vld [vmem:[#allocation2 + $0x20] sm:$0xff]  ;;  %v8887_v50 = vld [vmem:[#allocation2 + $0x30] sm:$0xff] }
 0x2ba   : > { %2267 = vmatpush.msrb.mxu2 %v7406_v54  ;;  %2447 = vmatpush.msrb.mxu3 %v7427_v21  ;;  %v8881_v13 = vld [vmem:[#allocation2 + $0x21] sm:$0xff]  ;;  %v8894_v34 = vld [vmem:[#allocation2 + $0x31] sm:$0xff]  ;;  %v8907_v61 = vld [vmem:[#allocation2 + $0x39] sm:$0xff] }
 0x2bb   : > { %v8883_v32 = vld [vmem:[#allocation2 + $0x1a] sm:$0xff]  ;;  %v8896_v41 = vld [vmem:[#allocation2 + $0x22] sm:$0xff]  ;;  %v8909_v15 = vld [vmem:[#allocation2 + $0x32] sm:$0xff] }
 0x2bc   : > { %v8900_v45 = vld [vmem:[#allocation2 + $0x38] sm:$0xff]  ;;  %v8913_v27 = vld [vmem:[#allocation2 + $0x48] sm:$0xff]  ;;  %v8927_v22 = vld [vmem:[#allocation2 + $0x50] sm:$0xff] }
 0x2bd   : > { %v8921_v55 = vld [vmem:[#allocation2 + $0x49] sm:$0xff]  ;;  %v8923_v62 = vld [vmem:[#allocation2 + $0x3a] sm:$0xff]  ;;  %v8935_v36 = vld [vmem:[#allocation2 + $0x51] sm:$0xff] }
 0x2be   : > { %7367 = vmatmul.msk.f32.gmra.mxu0 %vm491_vm1, %v1875_v37  ;;  %v8937_v29 = vld [vmem:[#allocation2 + $0x4a] sm:$0xff]  ;;  %v8941_v39 = vld [vmem:[#allocation2 + $0x60] sm:$0xff]  ;;  %v8951_v21 = vld [vmem:[#allocation2 + $0x52] sm:$0xff] }
 0x2bf   : > { %7386 = vmatmul.msk.f32.vlgmr.msrb.gmra.mxu1 %vm491_vm1, %v1853_v23  ;;  %7407 = vmatmul.msk.f32.vlgmr.msrb.gmra.mxu2 %vm491_vm1, %v2170_v19  ;;  %v8949_v54 = vld [vmem:[#allocation2 + $0x61] sm:$0xff]  ;;  %v8963_v23 = vld [vmem:[#allocation2 + $0x69] sm:$0xff]  ;;  %v9005_v25 = vld [vmem:[#allocation2 + $0x91] sm:$0xff] }
 0x2c0   : > { %v8955_v37 = vld [vmem:[#allocation2 + $0x68] sm:$0xff]  ;;  %v8993_v35 = vld [vmem:[#allocation2 + $0x7a] sm:$0xff]  ;;  %v8997_v4 = vld [vmem:[#allocation2 + $0x90] sm:$0xff] }
 0x2c1   : > { %7428 = vmatmul.msk.f32.vlgmr.msrb.gmra.mxu3 %vm491_vm1, %v2350_v1  ;;  %v8965_v19 = vld [vmem:[#allocation2 + $0x62] sm:$0xff]  ;;  %v9014_v46 = vld [vmem:[#allocation2 + $0x98] sm:$0xff]  ;;  %v7511_v20 = vld [vmem:[%s11796_s4 + $0x38] sm:$0xff] }
 0x2c2   : > { %v8991_v18 = vld [vmem:[#allocation2 + $0x81] sm:$0xff]  ;;  %3163 = vmatpush.msra.mxu3 %v7511_v20  ;;  %v9028_v30 = vld [vmem:[#allocation2 + $0x99] sm:$0xff]  ;;  %v9051_v17 = vld [vmem:[#allocation2 + $0xb0] sm:$0xff] }
 0x2c3   : > { %v9007_v40 = vld [vmem:[#allocation2 + $0x82] sm:$0xff]  ;;  %v9030_v26 = vld [vmem:[#allocation2 + $0x92] sm:$0xff]  ;;  %v9047_v48 = vld [vmem:[#allocation2 + $0x9a] sm:$0xff] }
 0x2c4   : > { %v7490_v16 = vld [vmem:[%s11796_s4 + $0x30] sm:$0xff]  ;;  %v7532_v20 = vld [vmem:[%s11796_s4 + $0x40] sm:$0xff]  ;;  %v9065_v5 = vld [vmem:[#allocation2 + $0xc0] sm:$0xff] }
 0x2c5   : > { %2984 = vmatpush.msra.mxu2 %v7490_v16  ;;  %v7469_v16 = vld [vmem:[%s11796_s4 + $0x28] sm:$0xff]  ;;  %v9034_v0 = vld [vmem:[#allocation2 + $0xa8] sm:$0xff]  ;;  %3342 = vmatpush.msra.mxu0 %v7532_v20  ;;  %v9059_v20 = vld [vmem:[#allocation2 + $0xb1] sm:$0xff] }
 0x2c6   : > { %7368 = vmatmul.msk.f32.gmra.mxu0 %vm491_vm1, %v8874_v24  ;;  %2805 = vmatpush.msra.mxu1 %v7469_v16  ;;  %v9045_v16 = vld [vmem:[#allocation2 + $0xa9] sm:$0xff]  ;;  %v9073_v59 = vld [vmem:[#allocation2 + $0xc1] sm:$0xff]  ;;  %v9077_v12 = vld [vmem:[#allocation2 + $0xb2] sm:$0xff] }
 0x2c7   : > { %7387 = vmatmul.msk.f32.gmra.mxu1 %vm491_vm1, %v1854_v53  ;;  %7408 = vmatmul.msk.f32.gmra.mxu2 %vm491_vm1, %v2171_v31  ;;  %v8977_v53 = vld [vmem:[#allocation2 + $0x79] sm:$0xff]  ;;  %v8979_v31 = vld [vmem:[#allocation2 + $0x6a] sm:$0xff]  ;;  %v9093_v11 = vld [vmem:[#allocation2 + $0xc2] sm:$0xff] }
 0x2c8   : > { %v9061_v14 = vld [vmem:[#allocation2 + $0xaa] sm:$0xff]  ;;  %v9097_v7 = vld [vmem:[#allocation2 + $0xd8] sm:$0xff]  ;;  %v9111_v56 = vld [vmem:[#allocation2 + $0xe0] sm:$0xff] }
 0x2c9   : > { %7429 = vmatmul.msk.f32.gmra.mxu3 %vm491_vm1, %v2351_v33  ;;  %v9081_v47 = vld [vmem:[#allocation2 + $0xc8] sm:$0xff]  ;;  %v9119_v52 = vld [vmem:[#allocation2 + $0xda] sm:$0xff]  ;;  %v9125_v51 = vld [vmem:[#allocation2 + $0xf0] sm:$0xff] }
 0x2ca   : > { %v9105_v57 = vld [vmem:[#allocation2 + $0xca] sm:$0xff] }
 0x2ce   : > { %7369 = vmatmul.msk.f32.gmra.mxu0 %vm491_vm1, %v8881_v13 }
 0x2cf   : > { %7388 = vmatmul.msk.f32.gmra.mxu1 %vm491_vm1, %v2350_v1  ;;  %7409 = vmatmul.msk.f32.gmra.mxu2 %vm491_vm1, %v8883_v32  ;;  %v8969_v1 = vld [vmem:[#allocation2 + $0x78] sm:$0xff] }
 0x2d1   : > { %7430 = vmatmul.msk.f32.gmra.mxu3 %vm491_vm1, %v8887_v50 }
 0x2d6   : > { %7370 = vmatmul.msk.f32.gmra.mxu0 %vm491_vm1, %v8894_v34 }
 0x2d7   : > { %7389 = vmatmul.msk.f32.gmra.mxu1 %vm491_vm1, %v2351_v33  ;;  %7410 = vmatmul.msk.f32.gmra.mxu2 %vm491_vm1, %v8896_v41  ;;  %v8983_v33 = vld [vmem:[#allocation2 + $0x80] sm:$0xff] }
 0x2d9   : > { %7431 = vmatmul.msk.f32.gmra.mxu3 %vm491_vm1, %v8900_v45 }
 0x2de   : > { %7371 = vmatmul.msk.f32.gmra.mxu0 %vm491_vm1, %v8907_v61 }
 0x2df   : > { %7390 = vmatmul.msk.f32.gmra.mxu1 %vm491_vm1, %v8887_v50  ;;  %7411 = vmatmul.msk.f32.gmra.mxu2 %vm491_vm1, %v8909_v15 }
 0x2e1   : > { %7432 = vmatmul.msk.f32.gmra.mxu3 %vm491_vm1, %v8913_v27 }
 0x2e6   : > { %7372 = vmatmul.msk.f32.gmra.mxu0 %vm491_vm1, %v8921_v55 }
 0x2e7   : > { %7391 = vmatmul.msk.f32.gmra.mxu1 %vm491_vm1, %v8900_v45  ;;  %7412 = vmatmul.msk.f32.gmra.mxu2 %vm491_vm1, %v8923_v62 }
 0x2e9   : > { %7433 = vmatmul.msk.f32.gmra.mxu3 %vm491_vm1, %v8927_v22 }
 0x2ee   : > { %7373 = vmatmul.msk.f32.gmra.mxu0 %vm491_vm1, %v8935_v36 }
 0x2ef   : > { %7392 = vmatmul.msk.f32.gmra.mxu1 %vm491_vm1, %v8913_v27  ;;  %7413 = vmatmul.msk.f32.gmra.mxu2 %vm491_vm1, %v8937_v29 }
 0x2f1   : > { %7434 = vmatmul.msk.f32.gmra.mxu3 %vm491_vm1, %v8941_v39 }
 0x2f6   : > { %7374 = vmatmul.msk.f32.gmra.mxu0 %vm491_vm1, %v8949_v54 }
 0x2f7   : > { %7393 = vmatmul.msk.f32.gmra.mxu1 %vm491_vm1, %v8927_v22  ;;  %7414 = vmatmul.msk.f32.gmra.mxu2 %vm491_vm1, %v8951_v21 }
 0x2f9   : > { %7435 = vmatmul.msk.f32.gmra.mxu3 %vm491_vm1, %v8955_v37 }
 0x2fe   : > { %7375 = vmatmul.msk.f32.gmra.mxu0 %vm491_vm1, %v8963_v23 }
 0x2ff   : > { %7394 = vmatmul.msk.f32.gmra.mxu1 %vm491_vm1, %v8941_v39  ;;  %7415 = vmatmul.msk.f32.gmra.mxu2 %vm491_vm1, %v8965_v19 }
 0x301   : > { %7436 = vmatmul.msk.f32.gmra.mxu3 %vm491_vm1, %v8969_v1 }
 0x306   : > { %7376 = vmatmul.msk.f32.gmra.mxu0 %vm491_vm1, %v8977_v53 }
 0x307   : > { %7395 = vmatmul.msk.f32.gmra.mxu1 %vm491_vm1, %v8955_v37  ;;  %7416 = vmatmul.msk.f32.gmra.mxu2 %vm491_vm1, %v8979_v31 }
 0x309   : > { %7437 = vmatmul.msk.f32.gmra.mxu3 %vm491_vm1, %v8983_v33 }
 0x30e   : > { %7377 = vmatmul.msk.f32.gmra.mxu0 %vm491_vm1, %v8991_v18 }
 0x30f   : > { %7396 = vmatmul.msk.f32.gmra.mxu1 %vm491_vm1, %v8969_v1  ;;  %7417 = vmatmul.msk.f32.gmra.mxu2 %vm491_vm1, %v8993_v35 }
 0x311   : > { %7438 = vmatmul.msk.f32.gmra.mxu3 %vm491_vm1, %v8997_v4 }
 0x316   : > { %7378 = vmatmul.msk.f32.gmra.mxu0 %vm491_vm1, %v9005_v25 }
 0x317   : > { %7397 = vmatmul.msk.f32.gmra.mxu1 %vm491_vm1, %v8983_v33  ;;  %7418 = vmatmul.msk.f32.gmra.mxu2 %vm491_vm1, %v9007_v40 }
 0x319   : > { %7439 = vmatmul.msk.f32.gmra.mxu3 %vm491_vm1, %v9014_v46 }
 0x31e   : > { %7379 = vmatmul.msk.f32.gmra.mxu0 %vm491_vm1, %v9028_v30 }
 0x31f   : > { %7398 = vmatmul.msk.f32.gmra.mxu1 %vm491_vm1, %v8997_v4  ;;  %7419 = vmatmul.msk.f32.gmra.mxu2 %vm491_vm1, %v9030_v26 }
 0x321   : > { %7440 = vmatmul.msk.f32.gmra.mxu3 %vm491_vm1, %v9034_v0 }
 0x326   : > { %7380 = vmatmul.msk.f32.gmra.mxu0 %vm491_vm1, %v9045_v16 }
 0x327   : > { %7399 = vmatmul.msk.f32.gmra.mxu1 %vm491_vm1, %v9014_v46  ;;  %7420 = vmatmul.msk.f32.gmra.mxu2 %vm491_vm1, %v9047_v48 }
 0x329   : > { %7441 = vmatmul.msk.f32.gmra.mxu3 %vm491_vm1, %v9051_v17 }
 0x32e   : > { %7381 = vmatmul.msk.f32.gmra.mxu0 %vm491_vm1, %v9059_v20 }
 0x32f   : > { %7400 = vmatmul.msk.f32.gmra.mxu1 %vm491_vm1, %v9034_v0  ;;  %7421 = vmatmul.msk.f32.gmra.mxu2 %vm491_vm1, %v9061_v14 }
 0x331   : > { %7442 = vmatmul.msk.f32.gmra.mxu3 %vm491_vm1, %v9065_v5 }
 0x333   : > { %v1973_v2 = vpop.f32.mrf.mxu0 }
 0x334   : > { %v9075_v49 = vpop.f32.mrf.mxu1 }
 0x336   : > { %7382 = vmatmul.msk.f32.gmra.mxu0 %vm491_vm1, %v9073_v59 }
 0x337   : > { %7401 = vmatmul.msk.f32.gmra.mxu1 %vm491_vm1, %v9051_v17  ;;  %7422 = vmatmul.msk.f32.gmra.mxu2 %vm491_vm1, %v9077_v12 }
 0x339   : > { %7443 = vmatmul.msk.f32.gmra.mxu3 %vm491_vm1, %v9081_v47 }
 0x33a   : > { %v9089_v44 = vpop.f32.mrf.mxu2 }
 0x33b   : > { %v1976_v38 = vpop.f32.mrf.mxu0 }
 0x33c   : > { %v9091_v43 = vpop.f32.mrf.mxu3  ;;  %v2110_v9 = vpop.f32.mrf.mxu1 }
 0x33d   : > { %11980 = vst [vmem:[#allocation86_spill] sm:$0xff] %v9091_v43  ;;  %v2111_v10 = vadd.f32 %v2110_v9, %v1973_v2  ;;  %v9139_v43 = vld [vmem:[#allocation2 + $0xf8] sm:$0xff] }
 0x33e   : > { %7449 = vmatmul.msk.f32.vlgmr.msrb.gmra.mxu0 %vm491_vm1, %v8874_v24  ;;  %11985 = vst [vmem:[#allocation91_spill] sm:$0xff] %v9139_v43 }
 0x33f   : > { %7402 = vmatmul.msk.f32.gmra.mxu1 %vm491_vm1, %v9065_v5  ;;  %7423 = vmatmul.msk.f32.gmra.mxu2 %vm491_vm1, %v9093_v11 }
 0x341   : > { %7444 = vmatmul.msk.f32.gmra.mxu3 %vm491_vm1, %v9097_v7 }
 0x342   : > { %v2269_v6 = vpop.f32.mrf.mxu2 }
 0x343   : > { %v2329_v3 = vadd.f32 %v2269_v6, %v2111_v10  ;;  %v1979_v63 = vpop.f32.mrf.mxu0 }
 0x344   : > { %v2113_v60 = vpop.f32.mrf.mxu1  ;;  %v2449_v58 = vpop.f32.mrf.mxu3 }
 0x345   : > { %v9107_v24 = vadd.f32 %v2449_v58, %v2329_v3  ;;  %v2114_v9 = vadd.f32 %v2113_v60, %v1976_v38 }
 0x346   : > { %7450 = vmatmul.msk.f32.gmra.mxu0 %vm491_vm1, %v8881_v13 }
 0x347   : > { %11981 = vst [vmem:[#allocation87_spill] sm:$0xff] %v9107_v24  ;;  %7403 = vmatmul.msk.f32.gmra.mxu1 %vm491_vm1, %v9081_v47  ;;  %7424 = vmatmul.msk.f32.gmra.mxu2 %vm491_vm1, %v9105_v57 }
 0x349   : > { %7445 = vmatmul.msk.f32.gmra.mxu3 %vm491_vm1, %v9111_v56 }
 0x34a   : > { %v2272_v6 = vpop.f32.mrf.mxu2 }
 0x34b   : > { %v2330_v10 = vadd.f32 %v2272_v6, %v2114_v9  ;;  %v1982_v2 = vpop.f32.mrf.mxu0 }
 0x34c   : > { %v2116_v58 = vpop.f32.mrf.mxu1  ;;  %v2452_v3 = vpop.f32.mrf.mxu3 }
 0x34d   : > { %v9121_v13 = vadd.f32 %v2452_v3, %v2330_v10  ;;  %v2117_v60 = vadd.f32 %v2116_v58, %v1979_v63 }
 0x34e   : > { %7451 = vmatmul.msk.f32.gmra.mxu0 %vm491_vm1, %v8894_v34 }
 0x34f   : > { %11982 = vst [vmem:[#allocation88_spill] sm:$0xff] %v9121_v13  ;;  %7404 = vmatmul.msk.f32.gmra.mxu1 %vm491_vm1, %v9097_v7  ;;  %7425 = vmatmul.msk.f32.gmra.mxu2 %vm491_vm1, %v9119_v52  ;;  %v9133_v13 = vld [vmem:[#allocation2 + $0xe2] sm:$0xff] }
 0x350   : > { %11983 = vst [vmem:[#allocation89_spill] sm:$0xff] %v9133_v13 }
 0x351   : > { %7446 = vmatmul.msk.f32.gmra.mxu3 %vm491_vm1, %v9125_v51 }
 0x352   : > { %v2275_v38 = vpop.f32.mrf.mxu2 }
 0x353   : > { %v2331_v9 = vadd.f32 %v2275_v38, %v2117_v60  ;;  %v1985_v6 = vpop.f32.mrf.mxu0 }
 0x354   : > { %v2119_v10 = vpop.f32.mrf.mxu1  ;;  %v2455_v3 = vpop.f32.mrf.mxu3 }
 0x355   : > { %v9135_v24 = vadd.f32 %v2455_v3, %v2331_v9  ;;  %v2120_v63 = vadd.f32 %v2119_v10, %v1982_v2 }
 0x356   : > { %7452 = vmatmul.msk.f32.gmra.mxu0 %vm491_vm1, %v8907_v61 }
 0x357   : > { %11984 = vst [vmem:[#allocation90_spill] sm:$0xff] %v9135_v24  ;;  %7405 = vmatmul.msk.f32.gmra.mxu1 %vm491_vm1, %v9111_v56  ;;  %7426 = vmatmul.msk.f32.gmra.mxu2 %vm491_vm1, %v9133_v13 }
 0x359   : > { %7447 = vmatmul.msk.f32.gmra.mxu3 %vm491_vm1, %v9139_v43 }
 0x35a   : > { %v2278_v58 = vpop.f32.mrf.mxu2 }
 0x35b   : > { %v2332_v60 = vadd.f32 %v2278_v58, %v2120_v63  ;;  %v1988_v38 = vpop.f32.mrf.mxu0 }
 0x35c   : > { %v2122_v9 = vpop.f32.mrf.mxu1  ;;  %v2458_v3 = vpop.f32.mrf.mxu3 }
 0x35d   : > { %v9147_v24 = vadd.f32 %v2458_v3, %v2332_v60  ;;  %v2123_v2 = vadd.f32 %v2122_v9, %v1985_v6 }
 0x35e   : > { %7453 = vmatmul.msk.f32.gmra.mxu0 %vm491_vm1, %v8921_v55 }
 0x35f   : > { %7470 = vmatmul.msk.f32.vlgmr.msra.gmra.mxu1 %vm491_vm1, %v8883_v32  ;;  %7491 = vmatmul.msk.f32.vlgmr.msra.gmra.mxu2 %vm491_vm1, %v8887_v50 }
 0x361   : > { %7512 = vmatmul.msk.f32.vlgmr.msra.gmra.mxu3 %vm491_vm1, %v8894_v34 }
 0x362   : > { %v2281_v10 = vpop.f32.mrf.mxu2 }
 0x363   : > { %v2333_v63 = vadd.f32 %v2281_v10, %v2123_v2  ;;  %v1991_v58 = vpop.f32.mrf.mxu0 }
 0x364   : > { %v2125_v43 = vpop.f32.mrf.mxu1  ;;  %v2461_v13 = vpop.f32.mrf.mxu3 }
 0x365   : > { %v9157_v60 = vadd.f32 %v2461_v13, %v2333_v63  ;;  %v2126_v32 = vadd.f32 %v2125_v43, %v1988_v38 }
 0x366   : > { %7454 = vmatmul.msk.f32.gmra.mxu0 %vm491_vm1, %v8935_v36 }
 0x367   : > { %7471 = vmatmul.msk.f32.gmra.mxu1 %vm491_vm1, %v8896_v41  ;;  %7492 = vmatmul.msk.f32.gmra.mxu2 %vm491_vm1, %v8900_v45 }
 0x369   : > { %7513 = vmatmul.msk.f32.gmra.mxu3 %vm491_vm1, %v8907_v61 }
 0x36a   : > { %v2284_v50 = vpop.f32.mrf.mxu2 }
 0x36b   : > { %v2334_v34 = vadd.f32 %v2284_v50, %v2126_v32  ;;  %v1994_v6 = vpop.f32.mrf.mxu0 }
 0x36c   : > { %v2128_v9 = vpop.f32.mrf.mxu1  ;;  %v2464_v3 = vpop.f32.mrf.mxu3 }
 0x36d   : > { %v9167_v13 = vadd.f32 %v2464_v3, %v2334_v34  ;;  %v2129_v43 = vadd.f32 %v2128_v9, %v1991_v58 }
 0x36e   : > { %7455 = vmatmul.msk.f32.gmra.mxu0 %vm491_vm1, %v8949_v54 }
 0x36f   : > { %7472 = vmatmul.msk.f32.gmra.mxu1 %vm491_vm1, %v8909_v15  ;;  %7493 = vmatmul.msk.f32.gmra.mxu2 %vm491_vm1, %v8913_v27 }
 0x371   : > { %7514 = vmatmul.msk.f32.gmra.mxu3 %vm491_vm1, %v8921_v55 }
 0x372   : > { %v2287_v41 = vpop.f32.mrf.mxu2 }
 0x373   : > { %v2335_v45 = vadd.f32 %v2287_v41, %v2129_v43  ;;  %v1997_v61 = vpop.f32.mrf.mxu0 }
 0x374   : > { %v2131_v38 = vpop.f32.mrf.mxu1  ;;  %v2467_v2 = vpop.f32.mrf.mxu3 }
 0x375   : > { %v9177_v10 = vadd.f32 %v2467_v2, %v2335_v45  ;;  %v2132_v27 = vadd.f32 %v2131_v38, %v1994_v6 }
 0x376   : > { %7456 = vmatmul.msk.f32.gmra.mxu0 %vm491_vm1, %v8963_v23 }
 0x377   : > { %7473 = vmatmul.msk.f32.gmra.mxu1 %vm491_vm1, %v8923_v62  ;;  %7494 = vmatmul.msk.f32.gmra.mxu2 %vm491_vm1, %v8927_v22 }
 0x379   : > { %7515 = vmatmul.msk.f32.gmra.mxu3 %vm491_vm1, %v8935_v36 }
 0x37a   : > { %v2290_v55 = vpop.f32.mrf.mxu2 }
 0x37b   : > { %v2336_v63 = vadd.f32 %v2290_v55, %v2132_v27  ;;  %v2000_v58 = vpop.f32.mrf.mxu0 }
 0x37c   : > { %v2134_v32 = vpop.f32.mrf.mxu1  ;;  %v2470_v50 = vpop.f32.mrf.mxu3 }
 0x37d   : > { %v9187_v34 = vadd.f32 %v2470_v50, %v2336_v63  ;;  %v2135_v22 = vadd.f32 %v2134_v32, %v1997_v61 }
 0x37e   : > { %7457 = vmatmul.msk.f32.gmra.mxu0 %vm491_vm1, %v8977_v53 }
 0x37f   : > { %7474 = vmatmul.msk.f32.gmra.mxu1 %vm491_vm1, %v8937_v29  ;;  %7495 = vmatmul.msk.f32.gmra.mxu2 %vm491_vm1, %v8941_v39 }
 0x381   : > { %7516 = vmatmul.msk.f32.gmra.mxu3 %vm491_vm1, %v8949_v54 }
 0x382   : > { %v2293_v36 = vpop.f32.mrf.mxu2 }
 0x383   : > { %v2337_v6 = vadd.f32 %v2293_v36, %v2135_v22  ;;  %v2003_v9 = vpop.f32.mrf.mxu0 }
 0x384   : > { %v2137_v3 = vpop.f32.mrf.mxu1  ;;  %v2473_v43 = vpop.f32.mrf.mxu3 }
 0x385   : > { %v9197_v41 = vadd.f32 %v2473_v43, %v2337_v6  ;;  %v2138_v39 = vadd.f32 %v2137_v3, %v2000_v58 }
 0x386   : > { %7458 = vmatmul.msk.f32.gmra.mxu0 %vm491_vm1, %v8991_v18 }
 0x387   : > { %7475 = vmatmul.msk.f32.gmra.mxu1 %vm491_vm1, %v8951_v21  ;;  %7496 = vmatmul.msk.f32.gmra.mxu2 %vm491_vm1, %v8955_v37 }
 0x389   : > { %7517 = vmatmul.msk.f32.gmra.mxu3 %vm491_vm1, %v8963_v23 }
 0x38a   : > { %v2296_v54 = vpop.f32.mrf.mxu2 }
 0x38b   : > { %v2338_v45 = vadd.f32 %v2296_v54, %v2138_v39  ;;  %v2006_v61 = vpop.f32.mrf.mxu0 }
 0x38c   : > { %v2140_v38 = vpop.f32.mrf.mxu1  ;;  %v2476_v2 = vpop.f32.mrf.mxu3 }
 0x38d   : > { %v9207_v27 = vadd.f32 %v2476_v2, %v2338_v45  ;;  %v2141_v37 = vadd.f32 %v2140_v38, %v2003_v9 }
 0x38e   : > { %7459 = vmatmul.msk.f32.gmra.mxu0 %vm491_vm1, %v9005_v25 }
 0x38f   : > { %7476 = vmatmul.msk.f32.gmra.mxu1 %vm491_vm1, %v8965_v19  ;;  %7497 = vmatmul.msk.f32.gmra.mxu2 %vm491_vm1, %v8969_v1 }
 0x391   : > { %7518 = vmatmul.msk.f32.gmra.mxu3 %vm491_vm1, %v8977_v53 }
 0x392   : > { %v2299_v23 = vpop.f32.mrf.mxu2 }
 0x393   : > { %v2339_v55 = vadd.f32 %v2299_v23, %v2141_v37  ;;  %v2009_v63 = vpop.f32.mrf.mxu0 }
 0x394   : > { %v2143_v58 = vpop.f32.mrf.mxu1  ;;  %v2479_v32 = vpop.f32.mrf.mxu3 }
 0x395   : > { %v9217_v50 = vadd.f32 %v2479_v32, %v2339_v55  ;;  %v2144_v1 = vadd.f32 %v2143_v58, %v2006_v61 }
 0x396   : > { %7460 = vmatmul.msk.f32.gmra.mxu0 %vm491_vm1, %v9028_v30 }
 0x397   : > { %7477 = vmatmul.msk.f32.gmra.mxu1 %vm491_vm1, %v8979_v31  ;;  %7498 = vmatmul.msk.f32.gmra.mxu2 %vm491_vm1, %v8983_v33 }
 0x399   : > { %7519 = vmatmul.msk.f32.gmra.mxu3 %vm491_vm1, %v8991_v18 }
 0x39a   : > { %v2302_v53 = vpop.f32.mrf.mxu2 }
 0x39b   : > { %v2340_v22 = vadd.f32 %v2302_v53, %v2144_v1  ;;  %v2012_v36 = vpop.f32.mrf.mxu0 }
 0x39c   : > { %v2146_v6 = vpop.f32.mrf.mxu1  ;;  %v2482_v9 = vpop.f32.mrf.mxu3 }
 0x39d   : > { %v9227_v3 = vadd.f32 %v2482_v9, %v2340_v22  ;;  %v2147_v33 = vadd.f32 %v2146_v6, %v2009_v63 }
 0x39e   : > { %7461 = vmatmul.msk.f32.gmra.mxu0 %vm491_vm1, %v9045_v16 }
 0x39f   : > { %7478 = vmatmul.msk.f32.gmra.mxu1 %vm491_vm1, %v8993_v35  ;;  %7499 = vmatmul.msk.f32.gmra.mxu2 %vm491_vm1, %v8997_v4 }
 0x3a1   : > { %7520 = vmatmul.msk.f32.gmra.mxu3 %vm491_vm1, %v9005_v25 }
 0x3a2   : > { %v2305_v18 = vpop.f32.mrf.mxu2 }
 0x3a3   : > { %v2341_v43 = vadd.f32 %v2305_v18, %v2147_v33  ;;  %v2015_v39 = vpop.f32.mrf.mxu0 }
 0x3a4   : > { %v2149_v54 = vpop.f32.mrf.mxu1  ;;  %v2485_v45 = vpop.f32.mrf.mxu3 }
 0x3a5   : > { %v9237_v61 = vadd.f32 %v2485_v45, %v2341_v43  ;;  %v2150_v4 = vadd.f32 %v2149_v54, %v2012_v36 }
 0x3a6   : > { %7462 = vmatmul.msk.f32.gmra.mxu0 %vm491_vm1, %v9059_v20 }
 0x3a7   : > { %11986 = vst [vmem:[#allocation92_spill] sm:$0xff] %v9237_v61  ;;  %7479 = vmatmul.msk.f32.gmra.mxu1 %vm491_vm1, %v9007_v40  ;;  %7500 = vmatmul.msk.f32.gmra.mxu2 %vm491_vm1, %v9014_v46 }
 0x3a9   : > { %7521 = vmatmul.msk.f32.gmra.mxu3 %vm491_vm1, %v9028_v30 }
 0x3aa   : > { %v2308_v25 = vpop.f32.mrf.mxu2 }
 0x3ab   : > { %v2342_v38 = vadd.f32 %v2308_v25, %v2150_v4  ;;  %v2018_v2 = vpop.f32.mrf.mxu0 }
 0x3ac   : > { %v2152_v37 = vpop.f32.mrf.mxu1  ;;  %v2488_v23 = vpop.f32.mrf.mxu3 }
 0x3ad   : > { %v9247_v55 = vadd.f32 %v2488_v23, %v2342_v38  ;;  %v2153_v46 = vadd.f32 %v2152_v37, %v2015_v39  ;;  %v2547_v38 = vld [vmem:[#allocation2 + $0xf1] sm:$0xff] }
 0x3ae   : > { %7463 = vmatmul.msk.f32.gmra.mxu0 %vm491_vm1, %v9073_v59 }
 0x3af   : > { %11987 = vst [vmem:[#allocation93_spill] sm:$0xff] %v9247_v55  ;;  %7480 = vmatmul.msk.f32.gmra.mxu1 %vm491_vm1, %v9030_v26  ;;  %7501 = vmatmul.msk.f32.gmra.mxu2 %vm491_vm1, %v9034_v0 }
 0x3b1   : > { %7522 = vmatmul.msk.f32.gmra.mxu3 %vm491_vm1, %v9045_v16 }
 0x3b2   : > { %v2311_v30 = vpop.f32.mrf.mxu2 }
 0x3b3   : > { %v2343_v63 = vadd.f32 %v2311_v30, %v2153_v46  ;;  %v2021_v58 = vpop.f32.mrf.mxu0  ;;  %v2548_v30 = vld [vmem:[#allocation2 + $0xf9] sm:$0xff] }
 0x3b4   : > { %v2155_v32 = vpop.f32.mrf.mxu1  ;;  %v2491_v1 = vpop.f32.mrf.mxu3 }
 0x3b5   : > { %v9257_v53 = vadd.f32 %v2491_v1, %v2343_v63  ;;  %v2156_v0 = vadd.f32 %v2155_v32, %v2018_v2 }
 0x3b6   : > { %7464 = vmatmul.msk.f32.gmra.mxu0 %vm491_vm1, %v8845_v42 }
 0x3b7   : > { %11988 = vst [vmem:[#allocation94_spill] sm:$0xff] %v9257_v53  ;;  %7481 = vmatmul.msk.f32.gmra.mxu1 %vm491_vm1, %v9047_v48  ;;  %7502 = vmatmul.msk.f32.gmra.mxu2 %vm491_vm1, %v9051_v17 }
 0x3b9   : > { %7523 = vmatmul.msk.f32.gmra.mxu3 %vm491_vm1, %v9059_v20 }
 0x3ba   : > { %v2314_v16 = vpop.f32.mrf.mxu2 }
 0x3bb   : > { %v2344_v22 = vadd.f32 %v2314_v16, %v2156_v0  ;;  %v9267_v36 = vpop.f32.mrf.mxu0 }
 0x3bc   : > { %v2158_v6 = vpop.f32.mrf.mxu1  ;;  %v2494_v9 = vpop.f32.mrf.mxu3 }
 0x3bd   : > { %v2159_v33 = vadd.f32 %v2158_v6, %v2021_v58  ;;  %v9269_v18 = vadd.f32 %v2494_v9, %v2344_v22 }
 0x3be   : > { %7465 = vmatmul.msk.f32.gmra.mxu0 %vm491_vm1, %v8847_v28 }
 0x3bf   : > { %11989 = vst [vmem:[#allocation95_spill] sm:$0xff] %v9269_v18  ;;  %7482 = vmatmul.msk.f32.gmra.mxu1 %vm491_vm1, %v9061_v14  ;;  %7503 = vmatmul.msk.f32.gmra.mxu2 %vm491_vm1, %v9065_v5 }
 0x3c1   : > { %7524 = vmatmul.msk.f32.gmra.mxu3 %vm491_vm1, %v9073_v59 }
 0x3c2   : > { %v2317_v17 = vpop.f32.mrf.mxu2 }
 0x3c3   : > { %v2345_v20 = vadd.f32 %v2317_v17, %v2159_v33  ;;  %v9279_v43 = vpop.f32.mrf.mxu0  ;;  %v11992_v17 = vld [vmem:[#allocation91_spill] sm:$0xff] }
 0x3c4   : > { %v2161_v39 = vpop.f32.mrf.mxu1  ;;  %v2497_v54 = vpop.f32.mrf.mxu3 }
 0x3c5   : > { %v9281_v45 = vadd.f32 %v2497_v54, %v2345_v20  ;;  %v2162_v5 = vadd.f32 %v2161_v39, %v9075_v49  ;;  %v9348_v39 = vld [vmem:[#allocation2 + $0xf2] sm:$0xff]  ;;  %v2905_v54 = vld [vmem:[#allocation2 + $0x108] sm:$0xff] }
 0x3c6   : > { %7466 = vmatmul.msk.f32.gmra.mxu0 %vm491_vm1, %v8853_v8 }
 0x3c7   : > { %7483 = vmatmul.msk.f32.gmra.mxu1 %vm491_vm1, %v9077_v12  ;;  %7504 = vmatmul.msk.f32.gmra.mxu2 %vm491_vm1, %v9081_v47 }
 0x3c9   : > { %7525 = vmatmul.msk.f32.gmra.mxu3 %vm491_vm1, %v8845_v42 }
 0x3ca   : > { %v2320_v59 = vpop.f32.mrf.mxu2 }
 0x3cb   : > { %v2346_v4 = vadd.f32 %v2320_v59, %v2162_v5  ;;  %v9292_v25 = vpop.f32.mrf.mxu0 }
 0x3cc   : > { %v2164_v2 = vpop.f32.mrf.mxu1  ;;  %v2500_v37 = vpop.f32.mrf.mxu3 }
 0x3cd   : > { %v9294_v23 = vadd.f32 %v2500_v37, %v2346_v4  ;;  %v2165_v47 = vadd.f32 %v2164_v2, %v9089_v44  ;;  %v9364_v2 = vld [vmem:[#allocation2 + $0xfa] sm:$0xff]  ;;  %v2906_v37 = vld [vmem:[#allocation2 + $0x110] sm:$0xff] }
 0x3ce   : > { %7467 = vmatmul.msk.f32.gmra.mxu0 %vm491_vm1, %v2547_v38 }
 0x3cf   : > { %7484 = vmatmul.msk.f32.gmra.mxu1 %vm491_vm1, %v9093_v11  ;;  %7505 = vmatmul.msk.f32.gmra.mxu2 %vm491_vm1, %v9097_v7  ;;  %v11990_v7 = vld [vmem:[#allocation86_spill] sm:$0xff] }
 0x3d1   : > { %7526 = vmatmul.msk.f32.gmra.mxu3 %vm491_vm1, %v8847_v28 }
 0x3d2   : > { %v2323_v49 = vpop.f32.mrf.mxu2 }
 0x3d3   : > { %v2347_v42 = vadd.f32 %v2323_v49, %v2165_v47  ;;  %v9304_v46 = vpop.f32.mrf.mxu0  ;;  %v3085_v47 = vld [vmem:[#allocation2 + $0x111] sm:$0xff] }
 0x3d4   : > { %v2167_v63 = vpop.f32.mrf.mxu1  ;;  %v2503_v58 = vpop.f32.mrf.mxu3 }
 0x3d5   : > { %v9306_v32 = vadd.f32 %v2503_v58, %v2347_v42  ;;  %v2168_v44 = vadd.f32 %v2167_v63, %v11990_v7 }
 0x3d6   : > { %7468 = vmatmul.msk.f32.gmra.mxu0 %vm491_vm1, %v2548_v30 }
 0x3d7   : > { %7485 = vmatmul.msk.f32.gmra.mxu1 %vm491_vm1, %v9105_v57  ;;  %7506 = vmatmul.msk.f32.gmra.mxu2 %vm491_vm1, %v9111_v56 }
 0x3d9   : > { %7527 = vmatmul.msk.f32.gmra.mxu3 %vm491_vm1, %v8853_v8 }
 0x3da   : > { %v2326_v28 = vpop.f32.mrf.mxu2 }
 0x3db   : > { %v2348_v1 = vadd.f32 %v2326_v28, %v2168_v44  ;;  %v9316_v0 = vpop.f32.mrf.mxu0 }
 0x3dc   : > { %v2506_v16 = vpop.f32.mrf.mxu3  ;;  %v9318_v22 = vpop.f32.mrf.mxu1 }
 0x3dd   : > { %v9320_v6 = vadd.f32 %v2506_v16, %v2348_v1 }
 0x3de   : > { %7533 = vmatmul.msk.f32.vlgmr.msra.gmra.mxu0 %vm491_vm1, %v8909_v15  ;;  %v11991_v15 = vld [vmem:[#allocation89_spill] sm:$0xff] }
 0x3df   : > { %7486 = vmatmul.msk.f32.gmra.mxu1 %vm491_vm1, %v9119_v52  ;;  %7507 = vmatmul.msk.f32.gmra.mxu2 %vm491_vm1, %v9125_v51 }
 0x3e1   : > { %7528 = vmatmul.msk.f32.gmra.mxu3 %vm491_vm1, %v2547_v38 }
 0x3e2   : > { %v9329_v56 = vpop.f32.mrf.mxu2 }
 0x3e3   : > { %v9331_v8 = vpop.f32.mrf.mxu0 }
 0x3e4   : > { %v9333_v9 = vpop.f32.mrf.mxu1  ;;  %v9335_v33 = vpop.f32.mrf.mxu3 }
 0x3e6   : > { %7534 = vmatmul.msk.f32.gmra.mxu0 %vm491_vm1, %v8923_v62  ;;  %v3084_v62 = vld [vmem:[#allocation2 + $0x109] sm:$0xff] }
 0x3e7   : > { %7487 = vmatmul.msk.f32.gmra.mxu1 %vm491_vm1, %v11991_v15  ;;  %7508 = vmatmul.msk.f32.gmra.mxu2 %vm491_vm1, %v11992_v17 }
 0x3e9   : > { %7529 = vmatmul.msk.f32.gmra.mxu3 %vm491_vm1, %v2548_v30 }
 0x3ea   : > { %v9344_v51 = vpop.f32.mrf.mxu2 }
 0x3eb   : > { %v9346_v20 = vpop.f32.mrf.mxu0 }
 0x3ec   : > { %v9350_v5 = vpop.f32.mrf.mxu1  ;;  %v9352_v59 = vpop.f32.mrf.mxu3 }
 0x3ee   : > { %7535 = vmatmul.msk.f32.gmra.mxu0 %vm491_vm1, %v8937_v29 }
 0x3ef   : > { %7488 = vmatmul.msk.f32.gmra.mxu1 %vm491_vm1, %v9348_v39  ;;  %7509 = vmatmul.msk.f32.gmra.mxu2 %vm491_vm1, %v2905_v54 }
 0x3f1   : > { %7530 = vmatmul.msk.f32.gmra.mxu3 %vm491_vm1, %v3084_v62 }
 0x3f2   : > { %v9360_v4 = vpop.f32.mrf.mxu2 }
 0x3f3   : > { %v9362_v38 = vpop.f32.mrf.mxu0 }
 0x3f4   : > { %v9368_v29 = vpop.f32.mrf.mxu1  ;;  %v9373_v49 = vpop.f32.mrf.mxu3 }
 0x3f6   : > { %7536 = vmatmul.msk.f32.gmra.mxu0 %vm491_vm1, %v8951_v21 }
 0x3f7   : > { %7489 = vmatmul.msk.f32.gmra.mxu1 %vm491_vm1, %v9364_v2  ;;  %7510 = vmatmul.msk.f32.gmra.mxu2 %vm491_vm1, %v2906_v37 }
 0x3f9   : > { %7531 = vmatmul.msk.f32.gmra.mxu3 %vm491_vm1, %v3085_v47 }
 0x3fa   : > { %v9376_v42 = vpop.f32.mrf.mxu2 }
 0x3fb   : > { %v9378_v30 = vpop.f32.mrf.mxu0 }
 0x3fc   : > { %v9382_v21 = vpop.f32.mrf.mxu1  ;;  %v9384_v63 = vpop.f32.mrf.mxu3 }
 0x3fe   : > { %7537 = vmatmul.msk.f32.gmra.mxu0 %vm491_vm1, %v8965_v19 }
 0x402   : > { %v9388_v7 = vpop.f32.mrf.mxu2 }
 0x403   : > { %v9386_v58 = vpop.f32.mrf.mxu0 }
 0x404   : > { %v9392_v44 = vpop.f32.mrf.mxu1  ;;  %v9396_v1 = vpop.f32.mrf.mxu3 }
 0x406   : > { %7538 = vmatmul.msk.f32.gmra.mxu0 %vm491_vm1, %v8979_v31 }
 0x40a   : > { %v9398_v16 = vpop.f32.mrf.mxu2 }
 0x40b   : > { %v9394_v28 = vpop.f32.mrf.mxu0 }
 0x40c   : > { %v9404_v17 = vpop.f32.mrf.mxu1  ;;  %v9406_v54 = vpop.f32.mrf.mxu3 }
 0x40e   : > { %7539 = vmatmul.msk.f32.gmra.mxu0 %vm491_vm1, %v8993_v35 }
 0x412   : > { %v9410_v31 = vpop.f32.mrf.mxu2 }
 0x413   : > { %v9402_v19 = vpop.f32.mrf.mxu0 }
 0x414   : > { %v9416_v37 = vpop.f32.mrf.mxu1  ;;  %v9418_v47 = vpop.f32.mrf.mxu3 }
 0x415   : > { %11994 = vst [vmem:[#allocation89_spill] sm:$0xff] %v9418_v47 }
 0x416   : > { %7540 = vmatmul.msk.f32.gmra.mxu0 %vm491_vm1, %v9007_v40 }
 0x41a   : > { %v9420_v35 = vpop.f32.mrf.mxu2 }
 0x41b   : > { %v9412_v62 = vpop.f32.mrf.mxu0 }
 0x41c   : > { %11993 = vst [vmem:[#allocation86_spill] sm:$0xff] %v9412_v62  ;;  %v9426_v53 = vpop.f32.mrf.mxu1  ;;  %v9428_v40 = vpop.f32.mrf.mxu3 }
 0x41d   : > { %11996 = vst [vmem:[#allocation96_spill] sm:$0xff] %v9428_v40 }
 0x41e   : > { %7541 = vmatmul.msk.f32.gmra.mxu0 %vm491_vm1, %v9030_v26 }
 0x422   : > { %v9432_v62 = vpop.f32.mrf.mxu2 }
 0x423   : > { %v9422_v18 = vpop.f32.mrf.mxu0  ;;  %11998 = vst [vmem:[#allocation98_spill] sm:$0xff] %v9432_v62 }
 0x424   : > { %11995 = vst [vmem:[#allocation91_spill] sm:$0xff] %v9422_v18  ;;  %v9436_v26 = vpop.f32.mrf.mxu1  ;;  %v9440_v47 = vpop.f32.mrf.mxu3 }
 0x425   : > { %12000 = vst [vmem:[#allocation100_spill] sm:$0xff] %v9440_v47 }
 0x426   : > { %7542 = vmatmul.msk.f32.gmra.mxu0 %vm491_vm1, %v9047_v48 }
 0x42a   : > { %v9442_v18 = vpop.f32.mrf.mxu2 }
 0x42b   : > { %v9430_v55 = vpop.f32.mrf.mxu0 }
 0x42c   : > { %11997 = vst [vmem:[#allocation97_spill] sm:$0xff] %v9430_v55  ;;  %v9449_v55 = vpop.f32.mrf.mxu1  ;;  %v9451_v62 = vpop.f32.mrf.mxu3 }
 0x42d   : > { %12002 = vst [vmem:[#allocation102_spill] sm:$0xff] %v9451_v62 }
 0x42e   : > { %7543 = vmatmul.msk.f32.gmra.mxu0 %vm491_vm1, %v9061_v14 }
 0x432   : > { %v9455_v14 = vpop.f32.mrf.mxu2 }
 0x433   : > { %v9438_v61 = vpop.f32.mrf.mxu0  ;;  %12003 = vst [vmem:[#allocation103_spill] sm:$0xff] %v9455_v14 }
 0x434   : > { %11999 = vst [vmem:[#allocation99_spill] sm:$0xff] %v9438_v61 }
 0x436   : > { %7544 = vmatmul.msk.f32.gmra.mxu0 %vm491_vm1, %v9077_v12  ;;  %v9462_v12 = vpop.f32.mrf.mxu1 }
 0x43b   : > { %v2676_v48 = vpop.f32.mrf.mxu0 }
 0x43c   : > { %v9447_v40 = vadd.f32 %v2676_v48, %v9281_v45  ;;  %v9464_v45 = vpop.f32.mrf.mxu3  ;;  %v9466_v48 = vpop.f32.mrf.mxu2 }
 0x43d   : > { %12005 = vst [vmem:[#allocation105_spill] sm:$0xff] %v9464_v45 }
 0x43e   : > { %12001 = vst [vmem:[#allocation101_spill] sm:$0xff] %v9447_v40  ;;  %7545 = vmatmul.msk.f32.gmra.mxu0 %vm491_vm1, %v9093_v11  ;;  %v9473_v11 = vpop.f32.mrf.mxu1 }
 0x43f   : > { %12006 = vst [vmem:[#allocation106_spill] sm:$0xff] %v9466_v48 }
 0x443   : > { %v2679_v61 = vpop.f32.mrf.mxu0 }
 0x444   : > { %v9458_v47 = vadd.f32 %v2679_v61, %v9294_v23  ;;  %v12007_v61 = vld [vmem:[#allocation87_spill] sm:$0xff]  ;;  %v9480_v45 = vpop.f32.mrf.mxu2 }
 0x445   : > { %v2688_v23 = vadd.f32 %v9267_v36, %v12007_v61  ;;  %v9494_v61 = vld [vmem:[%s11797_s5] ss:$0 sm:$0xff] }
 0x446   : > { %12004 = vst [vmem:[#allocation104_spill] sm:$0xff] %v9458_v47  ;;  %7546 = vmatmul.msk.f32.gmra.mxu0 %vm491_vm1, %v9105_v57  ;;  %v9477_v47 = vpop.f32.mrf.mxu3 }
 0x447   : > { %v2867_v14 = vadd.f32 %v9318_v22, %v2688_v23  ;;  %v9496_v22 = vpop.f32.mrf.mxu1 }
 0x44b   : > { %v2682_v40 = vpop.f32.mrf.mxu0 }
 0x44c   : > { %v9469_v62 = vadd.f32 %v2682_v40, %v9306_v32  ;;  %v3046_v32 = vadd.f32 %v9329_v56, %v2867_v14  ;;  %v12009_v14 = vld [vmem:[#allocation90_spill] sm:$0xff] }
 0x44e   : > { %7547 = vmatmul.msk.f32.gmra.mxu0 %vm491_vm1, %v9119_v52  ;;  %v12008_v52 = vld [vmem:[#allocation88_spill] sm:$0xff]  ;;  %v3225_v36 = vadd.f32 %v9335_v33, %v3046_v32  ;;  %v9506_v32 = vpop.f32.mrf.mxu2 }
 0x44f   : > { %v2689_v40 = vadd.f32 %v9279_v43, %v12008_v52  ;;  %v2691_v43 = vadd.f32 %v9304_v46, %v9147_v24  ;;  %v2693_v24 = vadd.f32 %v9331_v8, %v9167_v13 }
 0x453   : > { %v2685_v57 = vpop.f32.mrf.mxu0 }
 0x454   : > { %v9483_v48 = vadd.f32 %v2685_v57, %v9320_v6  ;;  %v2868_v6 = vadd.f32 %v9333_v9, %v2689_v40  ;;  %v9499_v57 = vpop.f32.mrf.mxu3  ;;  %v2692_v9 = vadd.f32 %v9316_v0, %v9157_v60  ;;  %v2872_v0 = vadd.f32 %v9392_v44, %v2693_v24  ;;  %v3263_v24 = vld [vmem:[#allocation2 + $0x10a] sm:$0xff] }
 0x456   : > { %7548 = vmatmul.msk.f32.gmra.mxu0 %vm491_vm1, %v11991_v15  ;;  %v2690_v15 = vadd.f32 %v9292_v25, %v12009_v14  ;;  %v3047_v33 = vadd.f32 %v9344_v51, %v2868_v6  ;;  %v2870_v25 = vadd.f32 %v9368_v29, %v2691_v43  ;;  %v3051_v29 = vadd.f32 %v9398_v16, %v2872_v0  ;;  %v9569_v14 = vpop.f32.mrf.mxu2  ;;  %v12012_v43 = vld [vmem:[#allocation86_spill] sm:$0xff] }
 0x458   : > { %v2869_v40 = vadd.f32 %v9350_v5, %v2690_v15  ;;  %v3226_v60 = vadd.f32 %v9352_v59, %v3047_v33  ;;  %v2696_v59 = vadd.f32 %v9378_v30, %v9197_v41  ;;  %v2697_v41 = vadd.f32 %v9386_v58, %v9207_v27 }
 0x45a   : > { %v3048_v51 = vadd.f32 %v9360_v4, %v2869_v40  ;;  %v2875_v58 = vadd.f32 %v9426_v53, %v2696_v59 }
 0x45b   : > { %v3344_v23 = vpop.f32.mrf.mxu0 }
 0x45c   : > { %v3404_v56 = vadd.f32 %v3344_v23, %v3225_v36  ;;  %v3049_v36 = vadd.f32 %v9376_v42, %v2870_v25  ;;  %v2871_v23 = vadd.f32 %v9382_v21, %v2692_v9  ;;  %v9547_v6 = vpop.f32.mrf.mxu3  ;;  %v12013_v9 = vld [vmem:[#allocation98_spill] sm:$0xff] }
 0x45d   : > { %v3054_v40 = vadd.f32 %v12013_v9, %v2875_v58  ;;  %v12024_v58 = vld [vmem:[#allocation99_spill] sm:$0xff] }
 0x45e   : > { %v9509_v52 = vadd.f32 %v9494_v61, %v3404_v56  ;;  %7549 = vmatmul.msk.f32.gmra.mxu0 %vm491_vm1, %v9348_v39  ;;  %v2694_v39 = vadd.f32 %v9346_v20, %v9177_v10  ;;  %v3050_v13 = vadd.f32 %v9388_v7, %v2871_v23  ;;  %v2695_v10 = vadd.f32 %v9362_v38, %v9187_v34  ;;  %v9544_v7 = vpop.f32.mrf.mxu1 }
 0x45f   : > { %v3227_v20 = vadd.f32 %v9373_v49, %v3048_v51  ;;  %v9542_v44 = vadd.f32 %v9384_v63, %v3049_v36  ;;  %v2698_v49 = vadd.f32 %v9394_v28, %v9217_v50  ;;  %v9565_v63 = vadd.f32 %v9406_v54, %v3051_v29  ;;  %v12010_v28 = vld [vmem:[#allocation89_spill] sm:$0xff]  ;;  %v12011_v54 = vld [vmem:[#allocation92_spill] sm:$0xff]  ;;  %v12017_v29 = vld [vmem:[#allocation103_spill] sm:$0xff] }
 0x460   : > { %v9520_v46 = vmul.f32 0.70710677, %v9509_v52  ;;  %v2873_v4 = vadd.f32 %v9404_v17, %v2694_v39  ;;  %v9559_v38 = vadd.f32 %v9396_v1, %v3050_v13  ;;  %v2874_v30 = vadd.f32 %v9416_v37, %v2695_v10  ;;  %v12016_v13 = vld [vmem:[#allocation91_spill] sm:$0xff] }
 0x461   : > { %v2876_v1 = vadd.f32 %v9436_v26, %v2697_v41  ;;  %v2700_v33 = vadd.f32 %v12012_v43, %v12011_v54  ;;  %v2877_v53 = vadd.f32 %v9449_v55, %v2698_v49  ;;  %v12018_v55 = vld [vmem:[#allocation106_spill] sm:$0xff]  ;;  %vm4328_vm8 = vcmp.ge.f32.partialorder %v9509_v52, 0.0 }
 0x462   : > { %v3488_v5 = vmul.f32 %v9520_v46, %v9520_v46  ;;  %v3052_v16 = vadd.f32 %v9410_v31, %v2873_v4  ;;  %v2699_v31 = vadd.f32 %v9402_v19, %v9227_v3  ;;  %v3053_v27 = vadd.f32 %v9420_v35, %v2874_v30 }
 0x463   : > { %v3347_v8 = vpop.f32.mrf.mxu0  ;;  %v3055_v35 = vadd.f32 %v9442_v18, %v2876_v1  ;;  %v3056_v18 = vadd.f32 %v12017_v29, %v2877_v53  ;;  %v12025_v53 = vld [vmem:[#allocation105_spill] sm:$0xff] }
 0x464   : > { %v9534_v42 = vmin.f32 %v3488_v5, 16.0  ;;  %v3405_v21 = vadd.f32 %v3347_v8, %v3226_v60  ;;  %v9578_v37 = vadd.f32 %v12010_v28, %v3052_v16  ;;  %v2878_v51 = vadd.f32 %v9462_v12, %v2699_v31  ;;  %v12014_v60 = vld [vmem:[#allocation96_spill] sm:$0xff]  ;;  %v12015_v5 = vld [vmem:[#allocation93_spill] sm:$0xff]  ;;  %v3207_v28 = vpop.f32.mrf.mxu3 }
 0x465   : > { %v9591_v0 = vadd.f32 %v12014_v60, %v3053_v27  ;;  %v2701_v8 = vadd.f32 %v12016_v13, %v12015_v5  ;;  %v12023_v27 = vld [vmem:[#allocation95_spill] sm:$0xff] }
 0x466   : > { %v3490_v17 = vmul.f32 2.1237322e-06, %v9534_v42  ;;  %v3501_v56 = vmul.f32 3.8918573e-05, %v9534_v42  ;;  %v9552_v34 = vadd.f32 %v9494_v61, %v3405_v21  ;;  %7550 = vmatmul.msk.f32.gmra.mxu0 %vm491_vm1, %v9364_v2  ;;  %v3057_v21 = vadd.f32 %v12018_v55, %v2878_v51  ;;  %v2852_v49 = vpop.f32.mrf.mxu1  ;;  %v3264_v60 = vld [vmem:[#allocation2 + $0x112] sm:$0xff] }
 0x467   : > { %v2703_v1 = vadd.f32 %v12024_v58, %v12023_v27 }
 0x468   : > { %v3491_v2 = vadd.f32 0.00028619796, %v3490_v17  ;;  %v3502_v15 = vadd.f32 0.001143296, %v3501_v56  ;;  %v9575_v50 = vmul.f32 0.70710677, %v9552_v34 }
 0x469   : > { %v12020_v17 = vld [vmem:[#allocation94_spill] sm:$0xff]  ;;  %v12021_v56 = vld [vmem:[#allocation97_spill] sm:$0xff]  ;;  %vm4329_vm9 = vcmp.ge.f32.partialorder %v9552_v34, 0.0 }
 0x46a   : > { %v3492_v3 = vmul.f32 %v3491_v2, %v9534_v42  ;;  %v3503_v19 = vmul.f32 %v3502_v15, %v9534_v42  ;;  %v3528_v26 = vmul.f32 %v9575_v50, %v9575_v50  ;;  %v2702_v41 = vadd.f32 %v12021_v56, %v12020_v17  ;;  %v12022_v2 = vld [vmem:[#allocation102_spill] sm:$0xff] }
 0x46b   : > { %v3350_v25 = vpop.f32.mrf.mxu0  ;;  %v9613_v15 = vadd.f32 %v12022_v2, %v3055_v35  ;;  %v2880_v35 = vadd.f32 %v9496_v22, %v2701_v8  ;;  %v4349_v17 = vmul.f32 0.2, %v9552_v34 }
 0x46c   : > { %v3493_v36 = vadd.f32 0.0036580483, %v3492_v3  ;;  %v3504_v23 = vadd.f32 0.014752088, %v3503_v19  ;;  %v3406_v39 = vadd.f32 %v3350_v25, %v3227_v20  ;;  %v9596_v4 = vmin.f32 %v3528_v26, 16.0  ;;  %v12019_v20 = vld [vmem:[#allocation100_spill] sm:$0xff]  ;;  %v3210_v58 = vpop.f32.mrf.mxu3 }
 0x46d   : > { %v9606_v16 = vadd.f32 %v12019_v20, %v3054_v40  ;;  %v2879_v3 = vadd.f32 %v9473_v11, %v2700_v33  ;;  %v9622_v26 = vadd.f32 %v12025_v53, %v3056_v18  ;;  %v9625_v25 = vadd.f32 %v9477_v47, %v3057_v21 }
 0x46e   : > { %v3494_v10 = vmul.f32 %v3493_v36, %v9534_v42  ;;  %v3505_v59 = vmul.f32 %v3504_v23, %v9534_v42  ;;  %v9602_v12 = vadd.f32 %v9494_v61, %v3406_v39  ;;  %7551 = vmatmul.msk.f32.gmra.mxu0 %vm491_vm1, %v3263_v24  ;;  %v3530_v30 = vmul.f32 2.1237322e-06, %v9596_v4  ;;  %v3031_v24 = vpop.f32.mrf.mxu2 }
 0x46f   : > { %v3541_v31 = vmul.f32 3.8918573e-05, %v9596_v4  ;;  %v3058_v36 = vadd.f32 %v9480_v45, %v2879_v3  ;;  %v3059_v5 = vadd.f32 %v9506_v32, %v2880_v35  ;;  %v2881_v47 = vadd.f32 %v9544_v7, %v2702_v41 }
 0x470   : > { %v3495_v54 = vadd.f32 0.05243302, %v3494_v10  ;;  %v3506_v43 = vadd.f32 0.112945676, %v3505_v59  ;;  %v3531_v19 = vadd.f32 0.00028619796, %v3530_v30  ;;  %v2882_v21 = vadd.f32 %v2852_v49, %v2703_v1  ;;  %v2855_v49 = vpop.f32.mrf.mxu1 }
 0x471   : > { %v3542_v9 = vadd.f32 0.001143296, %v3541_v31  ;;  %v9619_v40 = vmul.f32 0.70710677, %v9602_v12  ;;  %v3060_v55 = vadd.f32 %v9569_v14, %v2881_v47  ;;  %v4348_v32 = vmul.f32 0.2, %v9509_v52 }
 0x472   : > { %v3507_v51 = vmul.f32 %v3506_v43, %v9534_v42  ;;  %v3532_v11 = vmul.f32 %v3531_v19, %v9596_v4  ;;  %v3496_v8 = vmul.f32 %v3495_v54, %v9534_v42  ;;  %v3061_v41 = vadd.f32 %v3031_v24, %v2882_v21 }
 0x473   : > { %v3543_v33 = vmul.f32 %v3542_v9, %v9596_v4  ;;  %v3568_v23 = vmul.f32 %v9619_v40, %v9619_v40  ;;  %v3353_v39 = vpop.f32.mrf.mxu0  ;;  %v9656_v27 = vadd.f32 %v9499_v57, %v3058_v36  ;;  %v9661_v54 = vadd.f32 %v9547_v6, %v3059_v5  ;;  %v12026_v9 = vld [vmem:[#allocation101_spill] sm:$0xff] }
 0x474   : > { %v3508_v13 = vadd.f32 0.4994258, %v3507_v51  ;;  %v3407_v22 = vadd.f32 %v3353_v39, %v9542_v44  ;;  %v3533_v29 = vadd.f32 0.0036580483, %v3532_v11  ;;  %v3497_v30 = vadd.f32 0.18741608, %v3496_v8 }
 0x475   : > { %v3544_v45 = vadd.f32 0.014752088, %v3543_v33  ;;  %v9638_v18 = vmin.f32 %v3568_v23, 16.0  ;;  %v9663_v43 = vadd.f32 %v3207_v28, %v3060_v55  ;;  %v2883_v53 = vadd.f32 %v2855_v49, %v12026_v9 }
 0x476   : > { %v3509_v10 = vmul.f32 %v3508_v13, %v9534_v42  ;;  %7552 = vmatmul.msk.f32.gmra.mxu0 %vm491_vm1, %v3264_v60  ;;  %v3534_v7 = vmul.f32 %v3533_v29, %v9596_v4  ;;  %v9653_v56 = vadd.f32 %v9494_v61, %v3407_v22  ;;  %v4368_v57 = vsel %vm4328_vm8, %v9509_v52, %v4348_v32  ;;  %v3034_v35 = vpop.f32.mrf.mxu2 }
 0x477   : > { %v3545_v44 = vmul.f32 %v3544_v45, %v9596_v4  ;;  %v3570_v59 = vmul.f32 2.1237322e-06, %v9638_v18  ;;  %v3581_v14 = vmul.f32 3.8918573e-05, %v9638_v18  ;;  %v9674_v36 = vadd.f32 %v3210_v58, %v3061_v41 }
 0x478   : > { %v9648_v20 = vadd.f32 1.0, %v3509_v10  ;;  %v3535_v1 = vadd.f32 0.05243302, %v3534_v7  ;;  %v9672_v51 = vmul.f32 0.70710677, %v9653_v56  ;;  %v3498_v6 = vmul.f32 %v3497_v30, %v9534_v42 }
 0x479   : > { %v3546_v31 = vadd.f32 0.112945676, %v3545_v44  ;;  %v3571_v2 = vadd.f32 0.00028619796, %v3570_v59  ;;  %v3582_v24 = vadd.f32 0.001143296, %v3581_v14  ;;  %v4369_v11 = vsel %vm4329_vm9, %v9552_v34, %v4349_v17 }
 0x47a   : > { %7849 = vrcp.f32 %v9648_v20  ;;  %v3536_v33 = vmul.f32 %v3535_v1, %v9596_v4  ;;  %v3608_v60 = vmul.f32 %v9672_v51, %v9672_v51  ;;  %v9683_v5 = vmul.f32 0.5, %v9509_v52 }
 0x47b   : > { %v3547_v3 = vmul.f32 %v3546_v31, %v9596_v4  ;;  %v3572_v19 = vmul.f32 %v3571_v2, %v9638_v18  ;;  %v3583_v39 = vmul.f32 %v3582_v24, %v9638_v18  ;;  %v9685_v47 = vmul.f32 0.5267, %v4368_v57  ;;  %v3356_v7 = vpop.f32.mrf.mxu0 }
 0x47c   : > { %v9687_v13 = vadd.f32 %v3034_v35, %v2883_v53  ;;  %v9691_v8 = vmul.f32 0.5, %v9552_v34  ;;  %v9694_v55 = vmin.f32 %v3608_v60, 16.0  ;;  %v3499_v21 = vadd.f32 1.1283791, %v3498_v6 }
 0x47d   : > { %v3548_v28 = vadd.f32 0.4994258, %v3547_v3  ;;  %v3573_v23 = vadd.f32 0.0036580483, %v3572_v19  ;;  %v3584_v45 = vadd.f32 0.014752088, %v3583_v39  ;;  %v3408_v2 = vadd.f32 %v3356_v7, %v9559_v38 }
 0x47e   : > { %v9699_v32 = vmul.f32 0.5267, %v4369_v11  ;;  %v3537_v44 = vadd.f32 0.18741608, %v3536_v33  ;;  %v3610_v17 = vmul.f32 2.1237322e-06, %v9694_v55  ;;  %v3500_v19 = vmul.f32 %v3499_v21, %v9520_v46 }
 0x47f   : > { %v3549_v42 = vmul.f32 %v3548_v28, %v9596_v4  ;;  %v3574_v29 = vmul.f32 %v3573_v23, %v9638_v18  ;;  %v3585_v59 = vmul.f32 %v3584_v45, %v9638_v18  ;;  %v3621_v34 = vmul.f32 3.8918573e-05, %v9694_v55 }
 0x480   : > { %v7850_v22 = vpop.eup %7849  ;;  %v3520_v41 = vand.u32 2147483647, %v9648_v20  ;;  %vm4330_vm10 = vcmp.ge.f32.partialorder %v9602_v12, 0.0  ;;  %v3522_v49 = vand.u32 2147483648, %v9648_v20  ;;  %v3611_v1 = vadd.f32 0.00028619796, %v3610_v17 }
 0x481   : > { %v3512_v10 = vmul.f32 %v7850_v22, %v9648_v20  ;;  %v9697_v52 = vadd.f32 1.0, %v3549_v42  ;;  %v3575_v30 = vadd.f32 0.05243302, %v3574_v29  ;;  %v3586_v31 = vadd.f32 0.112945676, %v3585_v59 }
 0x482   : > { %vm3517_vm11 = vweird.f32 %v7850_v22  ;;  %v3622_v3 = vadd.f32 0.001143296, %v3621_v34  ;;  %v3538_v9 = vmul.f32 %v3537_v44, %v9596_v4  ;;  %v4350_v57 = vmul.f32 0.2, %v9602_v12 }
 0x483   : > { %v3513_v14 = vsub.f32 1.0, %v3512_v10  ;;  %7851 = vrcp.f32 %v9697_v52  ;;  %v3587_v53 = vmul.f32 %v3586_v31, %v9638_v18  ;;  %vm3516_vm12 = vweird.f32 %v9648_v20 }
 0x484   : > { %v3612_v24 = vmul.f32 %v3611_v1, %v9694_v55  ;;  %v3623_v6 = vmul.f32 %v3622_v3, %v9694_v55  ;;  %vm3518_vm13 = vmor %vm3516_vm12, %vm3517_vm11  ;;  %v3523_v38 = vor.u32 1.1754944e-38, %v3522_v49  ;;  %v3576_v28 = vmul.f32 %v3575_v30, %v9638_v18 }
 0x485   : > { %v3514_v58 = vmul.f32 %v7850_v22, %v3513_v14  ;;  %v3588_v11 = vadd.f32 0.4994258, %v3587_v53  ;;  %v9718_v46 = vadd.f32 %v9494_v61, %v3408_v2  ;;  %vm3521_vm14 = vcmp.eq.f32.partialorder %v3520_v41, 8.507059e+37 }
 0x486   : > { %v3613_v23 = vadd.f32 0.0036580483, %v3612_v24  ;;  %v3624_v39 = vadd.f32 0.014752088, %v3623_v6  ;;  %v3539_v42 = vadd.f32 1.1283791, %v3538_v9  ;;  %v4370_v29 = vsel %vm4330_vm10, %v9602_v12, %v4350_v57  ;;  %v3359_v6 = vpop.f32.mrf.mxu0 }
 0x487   : > { %v3515_v35 = vadd.f32 %v7850_v22, %v3514_v58  ;;  %v3589_v21 = vmul.f32 %v3588_v11, %v9638_v18  ;;  %v3577_v59 = vadd.f32 0.18741608, %v3576_v28  ;;  %v9729_v17 = vmul.f32 0.70710677, %v9718_v46 }
 0x488   : > { %v3614_v10 = vmul.f32 %v3613_v23, %v9694_v55  ;;  %v3625_v7 = vmul.f32 %v3624_v39, %v9694_v55  ;;  %v3560_v31 = vand.u32 2147483647, %v9697_v52  ;;  %v9737_v1 = vmul.f32 0.5, %v9602_v12 }
 0x489   : > { %v7852_v4 = vpop.eup %7851  ;;  %v3519_v33 = vsel %vm3518_vm13, %v7850_v22, %v3515_v35  ;;  %v3562_v22 = vand.u32 2147483648, %v9697_v52  ;;  %v9731_v14 = vadd.f32 1.0, %v3589_v21  ;;  %v3648_v2 = vmul.f32 %v9729_v17, %v9729_v17 }
 0x48a   : > { %v3524_v60 = vsel %vm3521_vm14, %v3523_v38, %v3519_v33  ;;  %v3552_v20 = vmul.f32 %v7852_v4, %v9697_v52  ;;  %v3615_v41 = vadd.f32 0.05243302, %v3614_v10  ;;  %v3626_v49 = vadd.f32 0.112945676, %v3625_v7 }
 0x48b   : > { %v3525_v45 = vmul.f32 %v3524_v60, %v3500_v19  ;;  %vm3557_vm15 = vweird.f32 %v7852_v4  ;;  %7853 = vrcp.f32 %v9731_v14  ;;  %v9740_v3 = vmul.f32 0.5267, %v4370_v29 }
 0x48c   : > { %v3553_v44 = vsub.f32 1.0, %v3552_v20  ;;  %vm3556_vm0 = vweird.f32 %v9697_v52  ;;  %v3563_v9 = vor.u32 1.1754944e-38, %v3562_v22  ;;  %v3627_v53 = vmul.f32 %v3626_v49, %v9694_v55 }
 0x48d   : > { %v7553_v34 = vclamps-f32 %v3525_v45, 1.0  ;;  %vm4331_vm1 = vcmp.ge.f32.partialorder %v9653_v56, 0.0  ;;  %vm3558_vm2 = vmor %vm3556_vm0, %vm3557_vm15  ;;  %v3578_v35 = vmul.f32 %v3577_v59, %v9638_v18  ;;  %v3616_v12 = vmul.f32 %v3615_v41, %v9694_v55 }
 0x48e   : > { %v3554_v30 = vmul.f32 %v7852_v4, %v3553_v44  ;;  %v9748_v24 = vmin.f32 %v3648_v2, 16.0  ;;  %v3540_v38 = vmul.f32 %v3539_v42, %v9575_v50  ;;  %vm3561_vm3 = vcmp.eq.f32.partialorder %v3560_v31, 8.507059e+37 }
 0x48f   : > { %v4288_v58 = vadd.f32 1.0, %v7553_v34  ;;  %v3628_v52 = vadd.f32 0.4994258, %v3627_v53  ;;  %v4351_v23 = vmul.f32 0.2, %v9653_v56  ;;  %v3409_v20 = vadd.f32 %v3359_v6, %v9565_v63 }
 0x490   : > { %v3555_v19 = vadd.f32 %v7852_v4, %v3554_v30  ;;  %v3650_v39 = vmul.f32 2.1237322e-06, %v9748_v24  ;;  %v3661_v18 = vmul.f32 3.8918573e-05, %v9748_v24  ;;  %v3579_v50 = vadd.f32 1.1283791, %v3578_v35 }
 0x491   : > { %v4308_v57 = vmul.f32 %v4288_v58, %v9683_v5  ;;  %v3629_v60 = vmul.f32 %v3628_v52, %v9694_v55  ;;  %v7854_v29 = vpop.eup %7853  ;;  %v3600_v7 = vand.u32 2147483647, %v9731_v14  ;;  %v3602_v44 = vand.u32 2147483648, %v9731_v14 }
 0x492   : > { %v3559_v28 = vsel %vm3558_vm2, %v7852_v4, %v3555_v19  ;;  %v3617_v4 = vadd.f32 0.18741608, %v3616_v12  ;;  %v3651_v42 = vadd.f32 0.00028619796, %v3650_v39  ;;  %v3592_v10 = vmul.f32 %v7854_v29, %v9731_v14  ;;  %v3362_v39 = vpop.f32.mrf.mxu0 }
 0x493   : > { %v4408_v11 = vmul.f32 0.4733, %v4308_v57  ;;  %v3564_v33 = vsel %vm3561_vm3, %v3563_v9, %v3559_v28  ;;  %v9760_v59 = vadd.f32 1.0, %v3629_v60  ;;  %v4428_v63 = vmul.f32 0.5497, %v4308_v57 }
 0x494   : > { %v3565_v5 = vmul.f32 %v3564_v33, %v3540_v38  ;;  %v3652_v34 = vmul.f32 %v3651_v42, %v9748_v24  ;;  %v3593_v49 = vsub.f32 1.0, %v3592_v10  ;;  %v3618_v31 = vmul.f32 %v3617_v4, %v9694_v55 }
 0x495   : > { %v4448_v45 = vadd.f32 %v4408_v11, %v9685_v47  ;;  %v3662_v47 = vadd.f32 0.001143296, %v3661_v18  ;;  %7855 = vrcp.f32 %v9760_v59  ;;  %v9766_v2 = vadd.f32 %v9494_v61, %v3409_v20 }
 0x496   : > { %v7554_v21 = vclamps-f32 %v3565_v5, 1.0  ;;  %v3594_v9 = vmul.f32 %v7854_v29, %v3593_v49  ;;  %vm3597_vm6 = vweird.f32 %v7854_v29  ;;  %v3580_v53 = vmul.f32 %v3579_v50, %v9619_v40 }
 0x497   : > { %vm4468_vm5 = vcmp.ge.f32.partialorder %v4448_v45, 0.0  ;;  %v4488_v22 = vmul.f32 0.2, %v4448_v45  ;;  %v9773_v57 = vsel %vm4331_vm1, %v9653_v56, %v4351_v23  ;;  %v3653_v35 = vadd.f32 0.0036580483, %v3652_v34 }
 0x498   : > { %v4289_v41 = vadd.f32 1.0, %v7554_v21  ;;  %v3663_v55 = vmul.f32 %v3662_v47, %v9748_v24  ;;  %v3595_v38 = vadd.f32 %v7854_v29, %v3594_v9  ;;  %vm3596_vm7 = vweird.f32 %v9731_v14 }
 0x499   : > { %v4508_v30 = vsel %vm4468_vm5, %v4448_v45, %v4488_v22  ;;  %vm3598_vm8 = vmor %vm3596_vm7, %vm3597_vm6  ;;  %v3603_v28 = vor.u32 1.1754944e-38, %v3602_v44  ;;  %v9779_v40 = vmul.f32 0.70710677, %v9766_v2  ;;  %vm3601_vm9 = vcmp.eq.f32.partialorder %v3600_v7, 8.507059e+37 }
 0x49a   : > { %v4528_v58 = vmul.f32 0.4591, %v4508_v30  ;;  %v4309_v19 = vmul.f32 %v4289_v41, %v9691_v8  ;;  %v3654_v8 = vmul.f32 %v3653_v35, %v9748_v24  ;;  %v3664_v52 = vadd.f32 0.014752088, %v3663_v55 }
 0x49b   : > { %v3599_v33 = vsel %vm3598_vm8, %v7854_v29, %v3595_v38  ;;  %v3619_v23 = vadd.f32 1.1283791, %v3618_v31  ;;  %v7856_v5 = vpop.eup %7855  ;;  %v3640_v14 = vand.u32 2147483647, %v9760_v59  ;;  %v3688_v20 = vmul.f32 %v9779_v40, %v9779_v40 }
 0x49c   : > { %v4548_v12 = vadd.f32 %v4528_v58, %v4428_v63  ;;  %v4409_v6 = vmul.f32 0.4733, %v4309_v19  ;;  %v3604_v60 = vsel %vm3601_vm9, %v3603_v28, %v3599_v33  ;;  %v3665_v18 = vmul.f32 %v3664_v52, %v9748_v24 }
 0x49d   : > { %v3605_v50 = vmul.f32 %v3604_v60, %v3580_v53  ;;  %v3632_v4 = vmul.f32 %v7856_v5, %v9760_v59  ;;  %vm3636_vm11 = vweird.f32 %v9760_v59  ;;  %v9789_v42 = vmin.f32 %v3688_v20, 16.0 }
 0x49e   : > { %4568 = vst.msk [vmem:[#allocation3 + $0x1] sm:$0xff] %vm1189_vm4, %v4548_v12  ;;  %v4449_v11 = vadd.f32 %v4409_v6, %v9699_v32  ;;  %v3655_v32 = vadd.f32 0.05243302, %v3654_v8  ;;  %v3666_v29 = vadd.f32 0.112945676, %v3665_v18  ;;  %v3642_v44 = vand.u32 2147483648, %v9760_v59  ;;  %v2858_v6 = vpop.f32.mrf.mxu1 }
 0x49f   : > { %v7555_v10 = vclamps-f32 %v3605_v50, 1.0  ;;  %v3633_v7 = vsub.f32 1.0, %v3632_v4  ;;  %v4429_v22 = vmul.f32 0.5497, %v4309_v19  ;;  %v3690_v41 = vmul.f32 2.1237322e-06, %v9789_v42 }
 0x4a0   : > { %vm4469_vm10 = vcmp.ge.f32.partialorder %v4449_v11, 0.0  ;;  %v4489_v45 = vmul.f32 0.2, %v4449_v11  ;;  %v3667_v63 = vmul.f32 %v3666_v29, %v9748_v24  ;;  %vm3637_vm12 = vweird.f32 %v7856_v5  ;;  %v12027_v4 = vld [vmem:[#allocation104_spill] sm:$0xff] }
 0x4a1   : > { %v4290_v49 = vadd.f32 1.0, %v7555_v10  ;;  %v3634_v47 = vmul.f32 %v7856_v5, %v3633_v7  ;;  %v3701_v30 = vmul.f32 3.8918573e-05, %v9789_v42  ;;  %v3656_v58 = vmul.f32 %v3655_v32, %v9748_v24  ;;  %vm3638_vm13 = vmor %vm3636_vm11, %vm3637_vm12 }
 0x4a2   : > { %v4509_v21 = vsel %vm4469_vm10, %v4449_v11, %v4489_v45  ;;  %v3668_v9 = vadd.f32 0.4994258, %v3667_v63  ;;  %v3691_v53 = vadd.f32 0.00028619796, %v3690_v41  ;;  %v3410_v19 = vadd.f32 %v3362_v39, %v9578_v37  ;;  %v3213_v11 = vpop.f32.mrf.mxu3  ;;  %v3365_v37 = vpop.f32.mrf.mxu0 }
 0x4a3   : > { %v4529_v34 = vmul.f32 0.4591, %v4509_v21  ;;  %v4310_v35 = vmul.f32 %v4290_v49, %v9737_v1  ;;  %v3635_v55 = vadd.f32 %v7856_v5, %v3634_v47  ;;  %v3702_v12 = vadd.f32 0.001143296, %v3701_v30 }
 0x4a4   : > { %v3620_v38 = vmul.f32 %v3619_v23, %v9672_v51  ;;  %v3643_v28 = vor.u32 1.1754944e-38, %v3642_v44  ;;  %v3669_v8 = vmul.f32 %v3668_v9, %v9748_v24  ;;  %v3692_v52 = vmul.f32 %v3691_v53, %v9789_v42 }
 0x4a5   : > { %v4549_v31 = vadd.f32 %v4529_v34, %v4429_v22  ;;  %v4410_v33 = vmul.f32 0.4733, %v4310_v35  ;;  %v3639_v1 = vsel %vm3638_vm13, %v7856_v5, %v3635_v55  ;;  %vm3641_vm14 = vcmp.eq.f32.partialorder %v3640_v14, 8.507059e+37 }
 0x4a6   : > { %v3703_v60 = vmul.f32 %v3702_v12, %v9789_v42  ;;  %v3644_v39 = vsel %vm3641_vm14, %v3643_v28, %v3639_v1  ;;  %v3657_v18 = vadd.f32 0.18741608, %v3656_v58  ;;  %v9805_v20 = vadd.f32 1.0, %v3669_v8 }
 0x4a7   : > { %4569 = vst.msk [vmem:[#allocation3 + $0x9] sm:$0xff] %vm1189_vm4, %v4549_v31  ;;  %v3693_v51 = vadd.f32 0.0036580483, %v3692_v52  ;;  %v4450_v59 = vadd.f32 %v4410_v33, %v9740_v3  ;;  %v3645_v23 = vmul.f32 %v3644_v39, %v3620_v38  ;;  %v9809_v50 = vadd.f32 %v9494_v61, %v3410_v19 }
 0x4a8   : > { %v3704_v45 = vadd.f32 0.014752088, %v3703_v60  ;;  %v9812_v32 = vadd.f32 %v2858_v6, %v12027_v4  ;;  %v9815_v5 = vadd.f32 %v3213_v11, %v9687_v13  ;;  %7857 = vrcp.f32 %v9805_v20 }
 0x4a9   : > { %v3411_v14 = vadd.f32 %v3365_v37, %v9591_v0  ;;  %vm4470_vm15 = vcmp.ge.f32.partialorder %v4450_v59, 0.0  ;;  %v4490_v29 = vmul.f32 0.2, %v4450_v59  ;;  %v7556_v21 = vclamps-f32 %v3645_v23, 1.0 }
 0x4aa   : > { %v3694_v3 = vmul.f32 %v3693_v51, %v9789_v42  ;;  %v3451_v10 = vmul.f32 0.5, %v9653_v56  ;;  %v4391_v7 = vmul.f32 0.5267, %v9773_v57  ;;  %v3658_v44 = vmul.f32 %v3657_v18, %v9748_v24 }
 0x4ab   : > { %v3705_v22 = vmul.f32 %v3704_v45, %v9789_v42  ;;  %v4510_v34 = vsel %vm4470_vm15, %v4450_v59, %v4490_v29  ;;  %v4291_v13 = vadd.f32 1.0, %v7556_v21  ;;  %v9825_v41 = vmul.f32 0.70710677, %v9809_v50 }
 0x4ac   : > { %v3695_v63 = vadd.f32 0.05243302, %v3694_v3  ;;  %v4430_v0 = vmul.f32 0.5497, %v4310_v35  ;;  %v4530_v49 = vmul.f32 0.4591, %v4510_v34  ;;  %v9828_v30 = vadd.f32 %v9494_v61, %v3411_v14 }
 0x4ad   : > { %v3706_v47 = vadd.f32 0.112945676, %v3705_v22  ;;  %v4311_v31 = vmul.f32 %v4291_v13, %v3451_v10  ;;  %v4352_v56 = vmul.f32 0.2, %v9718_v46  ;;  %v9832_v57 = vmul.f32 0.2, %v9766_v2 }
 0x4ae   : > { %v3728_v24 = vmul.f32 %v9825_v41, %v9825_v41  ;;  %v7858_v58 = vpop.eup %7857  ;;  %v4550_v9 = vadd.f32 %v4530_v49, %v4430_v0  ;;  %vm4332_vm0 = vcmp.ge.f32.partialorder %v9718_v46, 0.0  ;;  %v3696_v53 = vmul.f32 %v3695_v63, %v9789_v42  ;;  %v3368_v63 = vpop.f32.mrf.mxu0 }
 0x4af   : > { %v3707_v35 = vmul.f32 %v3706_v47, %v9789_v42  ;;  %v9840_v55 = vmul.f32 0.70710677, %v9828_v30  ;;  %v4411_v12 = vmul.f32 0.4733, %v4311_v31  ;;  %v3659_v19 = vadd.f32 1.1283791, %v3658_v44 }
 0x4b0   : > { %v3672_v6 = vmul.f32 %v7858_v58, %v9805_v20  ;;  %v3680_v38 = vand.u32 2147483647, %v9805_v20  ;;  %4570 = vst.msk [vmem:[#allocation3 + $0x19] sm:$0xff] %vm1189_vm4, %v4550_v9  ;;  %v3682_v28 = vand.u32 2147483648, %v9805_v20  ;;  %vm4333_vm1 = vcmp.ge.f32.partialorder %v9766_v2, 0.0 }
 0x4b1   : > { %v3708_v8 = vadd.f32 0.4994258, %v3707_v35  ;;  %v9847_v52 = vmin.f32 %v3728_v24, 16.0  ;;  %v4451_v11 = vadd.f32 %v4411_v12, %v4391_v7  ;;  %vm3677_vm2 = vweird.f32 %v7858_v58  ;;  %v3037_v7 = vpop.f32.mrf.mxu2 }
 0x4b2   : > { %v3673_v33 = vsub.f32 1.0, %v3672_v6  ;;  %v3768_v1 = vmul.f32 %v9840_v55, %v9840_v55  ;;  %v3697_v60 = vadd.f32 0.18741608, %v3696_v53  ;;  %v3660_v45 = vmul.f32 %v3659_v19, %v9729_v17 }
 0x4b3   : > { %v3709_v37 = vmul.f32 %v3708_v8, %v9789_v42  ;;  %v3730_v39 = vmul.f32 2.1237322e-06, %v9847_v52  ;;  %v3741_v18 = vmul.f32 3.8918573e-05, %v9847_v52  ;;  %vm4471_vm3 = vcmp.ge.f32.partialorder %v4451_v11, 0.0 }
 0x4b4   : > { %v4491_v51 = vmul.f32 0.2, %v4451_v11  ;;  %v3674_v59 = vmul.f32 %v7858_v58, %v3673_v33  ;;  %v9854_v23 = vmin.f32 %v3768_v1, 16.0  ;;  %vm3676_vm5 = vweird.f32 %v9805_v20 }
 0x4b5   : > { %v9858_v4 = vadd.f32 1.0, %v3709_v37  ;;  %v3731_v14 = vadd.f32 0.00028619796, %v3730_v39  ;;  %v3742_v3 = vadd.f32 0.001143296, %v3741_v18  ;;  %vm3678_vm6 = vmor %vm3676_vm5, %vm3677_vm2  ;;  %v3683_v34 = vor.u32 1.1754944e-38, %v3682_v28 }
 0x4b6   : > { %v4511_v29 = vsel %vm4471_vm3, %v4451_v11, %v4491_v51  ;;  %v3675_v21 = vadd.f32 %v7858_v58, %v3674_v59  ;;  %v3770_v10 = vmul.f32 2.1237322e-06, %v9854_v23  ;;  %v4431_v44 = vmul.f32 0.5497, %v4311_v31 }
 0x4b7   : > { %v4531_v22 = vmul.f32 0.4591, %v4511_v29  ;;  %7859 = vrcp.f32 %v9858_v4  ;;  %vm3681_vm7 = vcmp.eq.f32.partialorder %v3680_v38, 8.507059e+37  ;;  %v3698_v17 = vmul.f32 %v3697_v60, %v9789_v42 }
 0x4b8   : > { %v3679_v13 = vsel %vm3678_vm6, %v7858_v58, %v3675_v21  ;;  %v3732_v20 = vmul.f32 %v3731_v14, %v9847_v52  ;;  %v3743_v47 = vmul.f32 %v3742_v3, %v9847_v52  ;;  %v3771_v24 = vadd.f32 0.00028619796, %v3770_v10 }
 0x4b9   : > { %v4551_v0 = vadd.f32 %v4531_v22, %v4431_v44  ;;  %v3684_v49 = vsel %vm3681_vm7, %v3683_v34, %v3679_v13  ;;  %v9867_v31 = vadd.f32 %v3037_v7, %v9812_v32  ;;  %v4372_v53 = vsel %vm4332_vm0, %v9718_v46, %v4352_v56 }
 0x4ba   : > { %v3685_v9 = vmul.f32 %v3684_v49, %v3660_v45  ;;  %v3733_v58 = vadd.f32 0.0036580483, %v3732_v20  ;;  %v3744_v42 = vadd.f32 0.014752088, %v3743_v47  ;;  %v3772_v35 = vmul.f32 %v3771_v24, %v9854_v23 }
 0x4bb   : > { %4571 = vst.msk [vmem:[#allocation3 + $0x21] sm:$0xff] %vm1189_vm4, %v4551_v0  ;;  %v3781_v12 = vmul.f32 3.8918573e-05, %v9854_v23  ;;  %v3412_v19 = vadd.f32 %v3368_v63, %v9606_v16  ;;  %v3452_v6 = vmul.f32 0.5, %v9718_v46  ;;  %v4373_v32 = vsel %vm4333_vm1, %v9766_v2, %v9832_v57 }
 0x4bc   : > { %v7557_v38 = vclamps-f32 %v3685_v9, 1.0  ;;  %v3734_v56 = vmul.f32 %v3733_v58, %v9847_v52  ;;  %v3699_v8 = vadd.f32 1.1283791, %v3698_v17  ;;  %v3745_v11 = vmul.f32 %v3744_v42, %v9847_v52  ;;  %v3371_v42 = vpop.f32.mrf.mxu0 }
 0x4bd   : > { %v7860_v28 = vpop.eup %7859  ;;  %v3773_v33 = vadd.f32 0.0036580483, %v3772_v35  ;;  %v3782_v1 = vadd.f32 0.001143296, %v3781_v12  ;;  %v4392_v37 = vmul.f32 0.5267, %v4372_v53  ;;  %v9890_v51 = vadd.f32 %v9494_v61, %v3412_v19 }
 0x4be   : > { %v4292_v60 = vadd.f32 1.0, %v7557_v38  ;;  %v9884_v16 = vmul.f32 0.5, %v9766_v2  ;;  %v3712_v46 = vmul.f32 %v7860_v28, %v9858_v4  ;;  %v3746_v39 = vadd.f32 0.112945676, %v3745_v11 }
 0x4bf   : > { %v3774_v18 = vmul.f32 %v3773_v33, %v9854_v23  ;;  %v3783_v57 = vmul.f32 %v3782_v1, %v9854_v23  ;;  %v9892_v14 = vmul.f32 0.5267, %v4373_v32  ;;  %v3735_v29 = vadd.f32 0.05243302, %v3734_v56 }
 0x4c0   : > { %v4312_v59 = vmul.f32 %v4292_v60, %v3452_v6  ;;  %v3713_v45 = vsub.f32 1.0, %v3712_v46  ;;  %v3700_v21 = vmul.f32 %v3699_v8, %v9779_v40  ;;  %v3722_v2 = vand.u32 2147483648, %v9858_v4 }
 0x4c1   : > { %v3747_v3 = vmul.f32 %v3746_v39, %v9847_v52  ;;  %v3784_v10 = vadd.f32 0.014752088, %v3783_v57  ;;  %vm3717_vm8 = vweird.f32 %v7860_v28  ;;  %v3720_v22 = vand.u32 2147483647, %v9858_v4 }
 0x4c2   : > { %v4412_v7 = vmul.f32 0.4733, %v4312_v59  ;;  %v3714_v44 = vmul.f32 %v7860_v28, %v3713_v45  ;;  %v3775_v13 = vadd.f32 0.05243302, %v3774_v18  ;;  %v9900_v20 = vmul.f32 0.70710677, %v9890_v51 }
 0x4c3   : > { %v3748_v34 = vadd.f32 0.4994258, %v3747_v3  ;;  %v3785_v17 = vmul.f32 %v3784_v10, %v9854_v23  ;;  %vm3716_vm9 = vweird.f32 %v9858_v4  ;;  %v3736_v40 = vmul.f32 %v3735_v29, %v9847_v52 }
 0x4c4   : > { %v4452_v63 = vadd.f32 %v4412_v7, %v4392_v37  ;;  %v3715_v0 = vadd.f32 %v7860_v28, %v3714_v44  ;;  %vm3718_vm10 = vmor %vm3716_vm9, %vm3717_vm8  ;;  %v3723_v49 = vor.u32 1.1754944e-38, %v3722_v2  ;;  %v3808_v9 = vmul.f32 %v9900_v20, %v9900_v20 }
 0x4c5   : > { %v3749_v47 = vmul.f32 %v3748_v34, %v9847_v52  ;;  %v3786_v24 = vadd.f32 0.112945676, %v3785_v17  ;;  %vm3721_vm12 = vcmp.eq.f32.partialorder %v3720_v22, 8.507059e+37  ;;  %v3776_v4 = vmul.f32 %v3775_v13, %v9854_v23 }
 0x4c6   : > { %vm4472_vm11 = vcmp.ge.f32.partialorder %v4452_v63, 0.0  ;;  %v4492_v53 = vmul.f32 0.2, %v4452_v63  ;;  %v3719_v58 = vsel %vm3718_vm10, %v7860_v28, %v3715_v0  ;;  %v3737_v32 = vadd.f32 0.18741608, %v3736_v40  ;;  %v3374_v0 = vpop.f32.mrf.mxu0 }
 0x4c7   : > { %v3724_v35 = vsel %vm3721_vm12, %v3723_v49, %v3719_v58  ;;  %v9907_v12 = vadd.f32 1.0, %v3749_v47  ;;  %v3787_v19 = vmul.f32 %v3786_v24, %v9854_v23  ;;  %v9911_v56 = vmin.f32 %v3808_v9, 16.0 }
 0x4c8   : > { %v4512_v6 = vsel %vm4472_vm11, %v4452_v63, %v4492_v53  ;;  %v3725_v38 = vmul.f32 %v3724_v35, %v3700_v21  ;;  %v4432_v8 = vmul.f32 0.5497, %v4312_v59  ;;  %v3413_v28 = vadd.f32 %v3371_v42, %v9613_v15 }
 0x4c9   : > { %v4532_v11 = vmul.f32 0.4591, %v4512_v6  ;;  %7861 = vrcp.f32 %v9907_v12  ;;  %vm4334_vm13 = vcmp.ge.f32.partialorder %v9809_v50, 0.0  ;;  %v4354_v1 = vmul.f32 0.2, %v9809_v50 }
 0x4ca   : > { %v7558_v33 = vclamps-f32 %v3725_v38, 1.0  ;;  %v3788_v60 = vadd.f32 0.4994258, %v3787_v19  ;;  %v3777_v46 = vadd.f32 0.18741608, %v3776_v4  ;;  %v3738_v59 = vmul.f32 %v3737_v32, %v9847_v52 }
 0x4cb   : > { %v4552_v37 = vadd.f32 %v4532_v11, %v4432_v8  ;;  %v3810_v39 = vmul.f32 2.1237322e-06, %v9911_v56  ;;  %v3821_v18 = vmul.f32 3.8918573e-05, %v9911_v56  ;;  %v4355_v29 = vmul.f32 0.2, %v9828_v30 }
 0x4cc   : > { %v4293_v57 = vadd.f32 1.0, %v7558_v33  ;;  %v3789_v45 = vmul.f32 %v3788_v60, %v9854_v23  ;;  %vm4335_vm14 = vcmp.ge.f32.partialorder %v9828_v30, 0.0  ;;  %v9925_v2 = vadd.f32 %v9494_v61, %v3413_v28 }
 0x4cd   : > { %4572 = vst.msk [vmem:[#allocation3 + $0x31] sm:$0xff] %vm1189_vm4, %v4552_v37  ;;  %v3811_v15 = vadd.f32 0.00028619796, %v3810_v39  ;;  %v3822_v21 = vadd.f32 0.001143296, %v3821_v18  ;;  %v9929_v10 = vmul.f32 0.5, %v9809_v50  ;;  %v9934_v52 = vsel %vm4334_vm13, %v9809_v50, %v4354_v1 }
 0x4ce   : > { %v4313_v3 = vmul.f32 %v4293_v57, %v9884_v16  ;;  %v9936_v7 = vadd.f32 1.0, %v3789_v45  ;;  %v3778_v22 = vmul.f32 %v3777_v46, %v9854_v23  ;;  %v9942_v13 = vmul.f32 0.70710677, %v9925_v2 }
 0x4cf   : > { %v7862_v44 = vpop.eup %7861  ;;  %v3812_v34 = vmul.f32 %v3811_v15, %v9911_v56  ;;  %v3823_v61 = vmul.f32 %v3822_v21, %v9911_v56  ;;  %v3739_v17 = vadd.f32 1.1283791, %v3738_v59  ;;  %v9948_v50 = vsel %vm4335_vm14, %v9828_v30, %v4355_v29  ;;  %v9976_v59 = vld [vmem:[%s11797_s5] ss:$0 sm:$0xff] }
 0x4d0   : > { %v4413_v16 = vmul.f32 0.4733, %v4313_v3  ;;  %v3752_v63 = vmul.f32 %v7862_v44, %v9907_v12  ;;  %vm3756_vm15 = vweird.f32 %v9907_v12  ;;  %v3760_v23 = vand.u32 2147483647, %v9907_v12 }
 0x4d1   : > { %v3762_v40 = vand.u32 2147483648, %v9907_v12  ;;  %7863 = vrcp.f32 %v9936_v7  ;;  %v3813_v24 = vadd.f32 0.0036580483, %v3812_v34  ;;  %v3824_v9 = vadd.f32 0.014752088, %v3823_v61 }
 0x4d2   : > { %v4453_v49 = vadd.f32 %v4413_v16, %v9892_v14  ;;  %v3753_v47 = vsub.f32 1.0, %v3752_v63  ;;  %vm3757_vm0 = vweird.f32 %v7862_v44  ;;  %v3779_v53 = vadd.f32 1.1283791, %v3778_v22 }
 0x4d3   : > { %v3848_v58 = vmul.f32 %v9942_v13, %v9942_v13  ;;  %v3414_v42 = vadd.f32 %v3374_v0, %v9622_v26  ;;  %v3814_v19 = vmul.f32 %v3813_v24, %v9911_v56  ;;  %vm9959_vm2 = vcmp.eq.f32.partialorder %v3760_v23, 8.507059e+37  ;;  %vm3758_vm3 = vmor %vm3756_vm15, %vm3757_vm0  ;;  %v2861_v24 = vpop.f32.mrf.mxu1 }
 0x4d4   : > { %vm4473_vm1 = vcmp.ge.f32.partialorder %v4453_v49, 0.0  ;;  %v4493_v35 = vmul.f32 0.2, %v4453_v49  ;;  %v3754_v4 = vmul.f32 %v7862_v44, %v3753_v47  ;;  %v3763_v14 = vor.u32 1.1754944e-38, %v3762_v40 }
 0x4d5   : > { %v3825_v38 = vmul.f32 %v3824_v9, %v9911_v56  ;;  %v9964_v32 = vmin.f32 %v3848_v58, 16.0  ;;  %v4433_v8 = vmul.f32 0.5497, %v4313_v3  ;;  %v3815_v33 = vadd.f32 0.05243302, %v3814_v19 }
 0x4d6   : > { %v4513_v11 = vsel %vm4473_vm1, %v4453_v49, %v4493_v35  ;;  %v3755_v28 = vadd.f32 %v7862_v44, %v3754_v4  ;;  %v3740_v60 = vmul.f32 %v3739_v17, %v9825_v41  ;;  %v9979_v45 = vadd.f32 %v9976_v59, %v3414_v42 }
 0x4d7   : > { %v7864_v1 = vpop.eup %7863  ;;  %v4533_v26 = vmul.f32 0.4591, %v4513_v11  ;;  %v3826_v37 = vadd.f32 0.112945676, %v3825_v38  ;;  %v3850_v46 = vmul.f32 2.1237322e-06, %v9964_v32  ;;  %v3816_v57 = vmul.f32 %v3815_v33, %v9911_v56 }
 0x4d8   : > { %v3759_v39 = vsel %vm3758_vm3, %v7862_v44, %v3755_v28  ;;  %v3792_v18 = vmul.f32 %v7864_v1, %v9936_v7  ;;  %v3861_v22 = vmul.f32 3.8918573e-05, %v9964_v32  ;;  %v3800_v34 = vand.u32 2147483647, %v9936_v7 }
 0x4d9   : > { %v4553_v41 = vadd.f32 %v4533_v26, %v4433_v8  ;;  %v3764_v12 = vsel %vm9959_vm2, %v3763_v14, %v3759_v39  ;;  %v3827_v29 = vmul.f32 %v3826_v37, %v9911_v56  ;;  %v3851_v15 = vadd.f32 0.00028619796, %v3850_v46 }
 0x4da   : > { %v3765_v21 = vmul.f32 %v3764_v12, %v3740_v60  ;;  %v3793_v3 = vsub.f32 1.0, %v3792_v18  ;;  %v3817_v44 = vadd.f32 0.18741608, %v3816_v57  ;;  %v3802_v61 = vand.u32 2147483648, %v9936_v7  ;;  %v3377_v60 = vpop.f32.mrf.mxu0 }
 0x4db   : > { %4573 = vst.msk [vmem:[#allocation3 + $0x39] sm:$0xff] %vm1189_vm4, %v4553_v41  ;;  %v3828_v16 = vadd.f32 0.4994258, %v3827_v29  ;;  %v3852_v17 = vmul.f32 %v3851_v15, %v9964_v32  ;;  %vm3797_vm5 = vweird.f32 %v7864_v1  ;;  %v3862_v23 = vadd.f32 0.001143296, %v3861_v22 }
 0x4dc   : > { %v7559_v63 = vclamps-f32 %v3765_v21, 1.0  ;;  %v3794_v0 = vmul.f32 %v7864_v1, %v3793_v3  ;;  %v3780_v40 = vmul.f32 %v3779_v53, %v9840_v55  ;;  %vm3796_vm6 = vweird.f32 %v9936_v7 }
 0x4dd   : > { %v3829_v49 = vmul.f32 %v3828_v16, %v9911_v56  ;;  %v9993_v47 = vmul.f32 0.70710677, %v9979_v45  ;;  %v3818_v42 = vmul.f32 %v3817_v44, %v9911_v56  ;;  %v3863_v35 = vmul.f32 %v3862_v23, %v9964_v32  ;;  %vm3798_vm7 = vmor %vm3796_vm6, %vm3797_vm5 }
 0x4de   : > { %v4294_v9 = vadd.f32 1.0, %v7559_v63  ;;  %v3795_v58 = vadd.f32 %v7864_v1, %v3794_v0  ;;  %v3803_v4 = vor.u32 1.1754944e-38, %v3802_v61  ;;  %v3853_v6 = vadd.f32 0.0036580483, %v3852_v17 }
 0x4df   : > { %v9997_v19 = vadd.f32 1.0, %v3829_v49  ;;  %v3888_v55 = vmul.f32 %v9993_v47, %v9993_v47  ;;  %vm3801_vm8 = vcmp.eq.f32.partialorder %v3800_v34, 8.507059e+37  ;;  %v3864_v14 = vadd.f32 0.014752088, %v3863_v35 }
 0x4e0   : > { %v4314_v7 = vmul.f32 %v4294_v9, %v9929_v10  ;;  %v3799_v53 = vsel %vm3798_vm7, %v7864_v1, %v3795_v58  ;;  %v10003_v38 = vadd.f32 %v2861_v24, %v9469_v62  ;;  %v3455_v56 = vmul.f32 0.5, %v9828_v30 }
 0x4e1   : > { %v3804_v8 = vsel %vm3801_vm8, %v3803_v4, %v3799_v53  ;;  %7865 = vrcp.f32 %v9997_v19  ;;  %v4394_v11 = vmul.f32 0.5267, %v9934_v52  ;;  %v3819_v26 = vadd.f32 1.1283791, %v3818_v42 }
 0x4e2   : > { %v4414_v28 = vmul.f32 0.4733, %v4314_v7  ;;  %v3805_v33 = vmul.f32 %v3804_v8, %v3780_v40  ;;  %v4395_v37 = vmul.f32 0.5267, %v9948_v50  ;;  %v3854_v10 = vmul.f32 %v3853_v6, %v9964_v32  ;;  %v3216_v8 = vpop.f32.mrf.mxu3 }
 0x4e3   : > { %v3865_v1 = vmul.f32 %v3864_v14, %v9964_v32  ;;  %v10011_v46 = vmin.f32 %v3888_v55, 16.0  ;;  %v10014_v30 = vmul.f32 0.2, %v9890_v51  ;;  %v10017_v18 = vmul.f32 0.2, %v9925_v2 }
 0x4e4   : > { %v4454_v62 = vadd.f32 %v4414_v28, %v4394_v11  ;;  %v7560_v39 = vclamps-f32 %v3805_v33, 1.0  ;;  %v3415_v50 = vadd.f32 %v3377_v60, %v9625_v25  ;;  %v3820_v15 = vmul.f32 %v3819_v26, %v9900_v20 }
 0x4e5   : > { %v3866_v52 = vadd.f32 0.112945676, %v3865_v1  ;;  %v3890_v57 = vmul.f32 2.1237322e-06, %v10011_v46  ;;  %v3901_v41 = vmul.f32 3.8918573e-05, %v10011_v46  ;;  %vm3836_vm13 = vweird.f32 %v9997_v19 }
 0x4e6   : > { %vm4474_vm9 = vcmp.ge.f32.partialorder %v4454_v62, 0.0  ;;  %v4494_v12 = vmul.f32 0.2, %v4454_v62  ;;  %v4295_v29 = vadd.f32 1.0, %v7560_v39  ;;  %vm4336_vm10 = vcmp.ge.f32.partialorder %v9890_v51, 0.0 }
 0x4e7   : > { %v7866_v21 = vpop.eup %7865  ;;  %v3855_v3 = vadd.f32 0.05243302, %v3854_v10  ;;  %v3867_v44 = vmul.f32 %v3866_v52, %v9964_v32  ;;  %vm4337_vm11 = vcmp.ge.f32.partialorder %v9925_v2, 0.0  ;;  %v3891_v22 = vadd.f32 0.00028619796, %v3890_v57  ;;  %v3380_v52 = vpop.f32.mrf.mxu0 }
 0x4e8   : > { %v3902_v34 = vadd.f32 0.001143296, %v3901_v41  ;;  %v4514_v61 = vsel %vm4474_vm9, %v4454_v62, %v4494_v12  ;;  %v4315_v16 = vmul.f32 %v4295_v29, %v3455_v56  ;;  %v3832_v17 = vmul.f32 %v7866_v21, %v9997_v19  ;;  %v3040_v41 = vpop.f32.mrf.mxu2  ;;  %v2864_v12 = vpop.f32.mrf.mxu1 }
 0x4e9   : > { %v3840_v25 = vand.u32 2147483647, %v9997_v19  ;;  %v4434_v63 = vmul.f32 0.5497, %v4314_v7  ;;  %v4534_v0 = vmul.f32 0.4591, %v4514_v61  ;;  %v3892_v20 = vmul.f32 %v3891_v22, %v10011_v46 }
 0x4ea   : > { %v3868_v23 = vadd.f32 0.4994258, %v3867_v44  ;;  %v4415_v40 = vmul.f32 0.4733, %v4315_v16  ;;  %v3833_v49 = vsub.f32 1.0, %v3832_v17  ;;  %v3842_v24 = vand.u32 2147483648, %v9997_v19 }
 0x4eb   : > { %v3903_v9 = vmul.f32 %v3902_v34, %v10011_v46  ;;  %v4554_v58 = vadd.f32 %v4534_v0, %v4434_v63  ;;  %v3856_v42 = vmul.f32 %v3855_v3, %v9964_v32  ;;  %v3893_v4 = vadd.f32 0.0036580483, %v3892_v20 }
 0x4ec   : > { %v3869_v35 = vmul.f32 %v3868_v23, %v9964_v32  ;;  %v4455_v6 = vadd.f32 %v4415_v40, %v4395_v37  ;;  %v3834_v55 = vmul.f32 %v7866_v21, %v3833_v49  ;;  %vm3837_vm12 = vweird.f32 %v7866_v21 }
 0x4ed   : > { %v3904_v7 = vadd.f32 0.014752088, %v3903_v9  ;;  %4574 = vst.msk [vmem:[#allocation3 + $0x49] sm:$0xff] %vm1189_vm4, %v4554_v58  ;;  %vm10035_vm14 = vcmp.eq.f32.partialorder %v3840_v25, 8.507059e+37  ;;  %v3894_v56 = vmul.f32 %v3893_v4, %v10011_v46  ;;  %vm10043_vm0 = vmor %vm3836_vm13, %vm3837_vm12  ;;  %v3843_v60 = vor.u32 1.1754944e-38, %v3842_v24 }
 0x4ee   : > { %v10039_v14 = vadd.f32 1.0, %v3869_v35  ;;  %vm4475_vm15 = vcmp.ge.f32.partialorder %v4455_v6, 0.0  ;;  %v4495_v11 = vmul.f32 0.2, %v4455_v6  ;;  %v3835_v28 = vadd.f32 %v7866_v21, %v3834_v55 }
 0x4ef   : > { %v3905_v33 = vmul.f32 %v3904_v7, %v10011_v46  ;;  %v3857_v19 = vadd.f32 0.18741608, %v3856_v42  ;;  %v10049_v37 = vadd.f32 %v9976_v59, %v3415_v50  ;;  %v3895_v62 = vadd.f32 0.05243302, %v3894_v56 }
 0x4f0   : > { %7867 = vrcp.f32 %v10039_v14  ;;  %v4515_v10 = vsel %vm4475_vm15, %v4455_v6, %v4495_v11  ;;  %v3839_v1 = vsel %vm10043_vm0, %v7866_v21, %v3835_v28  ;;  %v10054_v57 = vadd.f32 %v3216_v8, %v9867_v31  ;;  %v3383_v11 = vpop.f32.mrf.mxu0 }
 0x4f1   : > { %v3906_v39 = vadd.f32 0.112945676, %v3905_v33  ;;  %v4435_v29 = vmul.f32 0.5497, %v4315_v16  ;;  %v4535_v3 = vmul.f32 0.4591, %v4515_v10  ;;  %v3844_v44 = vsel %vm10035_vm14, %v3843_v60, %v3839_v1 }
 0x4f2   : > { %v3845_v22 = vmul.f32 %v3844_v44, %v3820_v15  ;;  %v4376_v50 = vsel %vm4336_vm10, %v9890_v51, %v10014_v30  ;;  %v4377_v21 = vsel %vm4337_vm11, %v9925_v2, %v10017_v18  ;;  %v3858_v61 = vmul.f32 %v3857_v19, %v9964_v32 }
 0x4f3   : > { %v3907_v31 = vmul.f32 %v3906_v39, %v10011_v46  ;;  %v4555_v34 = vadd.f32 %v4535_v3, %v4435_v29  ;;  %v3896_v16 = vmul.f32 %v3895_v62, %v10011_v46  ;;  %v10070_v17 = vmul.f32 0.70710677, %v10049_v37 }
 0x4f4   : > { %v10073_v15 = vadd.f32 %v3040_v41, %v10003_v38  ;;  %v10076_v30 = vadd.f32 %v2864_v12, %v9483_v48  ;;  %v7561_v25 = vclamps-f32 %v3845_v22, 1.0  ;;  %v3456_v18 = vmul.f32 0.5, %v9890_v51 }
 0x4f5   : > { %v3908_v63 = vadd.f32 0.4994258, %v3907_v31  ;;  %4575 = vst.msk [vmem:[#allocation3 + $0x51] sm:$0xff] %vm1189_vm4, %v4555_v34  ;;  %v10081_v32 = vmul.f32 0.5, %v9925_v2  ;;  %v3928_v23 = vmul.f32 %v10070_v17, %v10070_v17  ;;  %v3416_v20 = vadd.f32 %v3380_v52, %v9656_v27 }
 0x4f6   : > { %v7868_v0 = vpop.eup %7867  ;;  %v4296_v38 = vadd.f32 1.0, %v7561_v25  ;;  %v4396_v40 = vmul.f32 0.5267, %v4376_v50  ;;  %v10087_v49 = vmul.f32 0.5267, %v4377_v21  ;;  %v3882_v4 = vand.u32 2147483648, %v10039_v14 }
 0x4f7   : > { %v3872_v48 = vmul.f32 %v7868_v0, %v10039_v14  ;;  %v3859_v24 = vadd.f32 1.1283791, %v3858_v61  ;;  %v3897_v9 = vadd.f32 0.18741608, %v3896_v16  ;;  %v3909_v58 = vmul.f32 %v3908_v63, %v10011_v46 }
 0x4f8   : > { %v10090_v42 = vmin.f32 %v3928_v23, 16.0  ;;  %v4316_v51 = vmul.f32 %v4296_v38, %v3456_v18  ;;  %v3880_v35 = vand.u32 2147483647, %v10039_v14  ;;  %v10099_v7 = vadd.f32 %v9976_v59, %v3416_v20 }
 0x4f9   : > { %v3873_v2 = vsub.f32 1.0, %v3872_v48  ;;  %v10094_v6 = vadd.f32 1.0, %v3909_v58  ;;  %vm3877_vm1 = vweird.f32 %v7868_v0  ;;  %v10102_v8 = vmul.f32 0.2, %v9979_v45 }
 0x4fa   : > { %v3930_v27 = vmul.f32 2.1237322e-06, %v10090_v42  ;;  %v3941_v55 = vmul.f32 3.8918573e-05, %v10090_v42  ;;  %v4416_v53 = vmul.f32 0.4733, %v4316_v51  ;;  %v3860_v28 = vmul.f32 %v3859_v24, %v9942_v13 }
 0x4fb   : > { %v3874_v56 = vmul.f32 %v7868_v0, %v3873_v2  ;;  %vm3876_vm2 = vweird.f32 %v10039_v14  ;;  %v3898_v33 = vmul.f32 %v3897_v9, %v10011_v46  ;;  %7869 = vrcp.f32 %v10094_v6 }
 0x4fc   : > { %v4456_v26 = vadd.f32 %v4416_v53, %v4396_v40  ;;  %v3931_v19 = vadd.f32 0.00028619796, %v3930_v27  ;;  %v3942_v10 = vadd.f32 0.001143296, %v3941_v55  ;;  %vm3878_vm3 = vmor %vm3876_vm2, %vm3877_vm1  ;;  %vm3881_vm5 = vcmp.eq.f32.partialorder %v3880_v35, 8.507059e+37 }
 0x4fd   : > { %v3875_v60 = vadd.f32 %v7868_v0, %v3874_v56  ;;  %v3883_v1 = vor.u32 1.1754944e-38, %v3882_v4  ;;  %v10109_v62 = vmul.f32 0.70710677, %v10099_v7  ;;  %v3417_v39 = vadd.f32 %v3383_v11, %v9661_v54 }
 0x4fe   : > { %vm4476_vm6 = vcmp.ge.f32.partialorder %v4456_v26, 0.0  ;;  %v4496_v13 = vmul.f32 0.2, %v4456_v26  ;;  %v3932_v14 = vmul.f32 %v3931_v19, %v10090_v42  ;;  %v3899_v41 = vadd.f32 1.1283791, %v3898_v33 }
 0x4ff   : > { %v3879_v52 = vsel %vm3878_vm3, %v7868_v0, %v3875_v60  ;;  %v3943_v12 = vmul.f32 %v3942_v10, %v10090_v42  ;;  %v3968_v29 = vmul.f32 %v10109_v62, %v10109_v62  ;;  %v4436_v3 = vmul.f32 0.5497, %v4316_v51 }
 0x500   : > { %v3884_v46 = vsel %vm3881_vm5, %v3883_v1, %v3879_v52  ;;  %v4516_v44 = vsel %vm4476_vm6, %v4456_v26, %v4496_v13  ;;  %v3933_v50 = vadd.f32 0.0036580483, %v3932_v14  ;;  %v10117_v54 = vmul.f32 0.5, %v9979_v45  ;;  %v3386_v52 = vpop.f32.mrf.mxu0 }
 0x501   : > { %v3885_v22 = vmul.f32 %v3884_v46, %v3860_v28  ;;  %v7870_v21 = vpop.eup %7869  ;;  %v4536_v31 = vmul.f32 0.4591, %v4516_v44  ;;  %v3944_v34 = vadd.f32 0.014752088, %v3943_v12  ;;  %v10119_v61 = vmin.f32 %v3968_v29, 16.0 }
 0x502   : > { %v3912_v25 = vmul.f32 %v7870_v21, %v10094_v6  ;;  %v3934_v63 = vmul.f32 %v3933_v50, %v10090_v42  ;;  %v10124_v0 = vadd.f32 %v9976_v59, %v3417_v39  ;;  %v3920_v24 = vand.u32 2147483647, %v10094_v6 }
 0x503   : > { %v7562_v16 = vclamps-f32 %v3885_v22, 1.0  ;;  %v4556_v18 = vadd.f32 %v4536_v31, %v4436_v3  ;;  %v3945_v23 = vmul.f32 %v3944_v34, %v10090_v42  ;;  %v3970_v20 = vmul.f32 2.1237322e-06, %v10119_v61 }
 0x504   : > { %v3981_v38 = vmul.f32 3.8918573e-05, %v10119_v61  ;;  %v3913_v48 = vsub.f32 1.0, %v3912_v25  ;;  %v3935_v9 = vadd.f32 0.05243302, %v3934_v63  ;;  %vm3917_vm7 = vweird.f32 %v7870_v21 }
 0x505   : > { %v4297_v40 = vadd.f32 1.0, %v7562_v16  ;;  %4576 = vst.msk [vmem:[#allocation3 + $0x61] sm:$0xff] %vm1189_vm4, %v4556_v18  ;;  %v3922_v58 = vand.u32 2147483648, %v10094_v6  ;;  %v3946_v51 = vadd.f32 0.112945676, %v3945_v23  ;;  %v3900_v53 = vmul.f32 %v3899_v41, %v9993_v47 }
 0x506   : > { %v3971_v2 = vadd.f32 0.00028619796, %v3970_v20  ;;  %v3914_v4 = vmul.f32 %v7870_v21, %v3913_v48  ;;  %v3936_v27 = vmul.f32 %v3935_v9, %v10090_v42  ;;  %v3982_v55 = vadd.f32 0.001143296, %v3981_v38 }
 0x507   : > { %v4317_v35 = vmul.f32 %v4297_v40, %v10081_v32  ;;  %v3947_v56 = vmul.f32 %v3946_v51, %v10090_v42  ;;  %v10138_v28 = vmul.f32 0.70710677, %v10124_v0  ;;  %vm3916_vm8 = vweird.f32 %v10094_v6 }
 0x508   : > { %v3972_v11 = vmul.f32 %v3971_v2, %v10119_v61  ;;  %v3915_v26 = vadd.f32 %v7870_v21, %v3914_v4  ;;  %v3937_v60 = vadd.f32 0.18741608, %v3936_v27  ;;  %vm3918_vm9 = vmor %vm3916_vm8, %vm3917_vm7  ;;  %v3923_v32 = vor.u32 1.1754944e-38, %v3922_v58 }
 0x509   : > { %v4417_v33 = vmul.f32 0.4733, %v4317_v35  ;;  %v3948_v19 = vadd.f32 0.4994258, %v3947_v56  ;;  %v3983_v10 = vmul.f32 %v3982_v55, %v10119_v61  ;;  %v4008_v47 = vmul.f32 %v10138_v28, %v10138_v28 }
 0x50a   : > { %v3919_v39 = vsel %vm3918_vm9, %v7870_v21, %v3915_v26  ;;  %vm3921_vm10 = vcmp.eq.f32.partialorder %v3920_v24, 8.507059e+37  ;;  %v3973_v13 = vadd.f32 0.0036580483, %v3972_v11  ;;  %vm4338_vm11 = vcmp.ge.f32.partialorder %v9979_v45, 0.0 }
 0x50b   : > { %v4457_v1 = vadd.f32 %v4417_v33, %v10087_v49  ;;  %v3924_v14 = vsel %vm3921_vm10, %v3923_v32, %v3919_v39  ;;  %v3949_v6 = vmul.f32 %v3948_v19, %v10090_v42  ;;  %v3984_v46 = vadd.f32 0.014752088, %v3983_v10  ;;  %v3389_v33 = vpop.f32.mrf.mxu0 }
 0x50c   : > { %v3925_v12 = vmul.f32 %v3924_v14, %v3900_v53  ;;  %v3938_v29 = vmul.f32 %v3937_v60, %v10090_v42  ;;  %v10152_v49 = vmin.f32 %v4008_v47, 16.0  ;;  %v3418_v22 = vadd.f32 %v3386_v52, %v9663_v43 }
 0x50d   : > { %vm4477_vm12 = vcmp.ge.f32.partialorder %v4457_v1, 0.0  ;;  %v4497_v41 = vmul.f32 0.2, %v4457_v1  ;;  %v10149_v3 = vadd.f32 1.0, %v3949_v6  ;;  %v3985_v44 = vmul.f32 %v3984_v46, %v10119_v61 }
 0x50e   : > { %v7563_v21 = vclamps-f32 %v3925_v12, 1.0  ;;  %v4378_v31 = vsel %vm4338_vm11, %v9979_v45, %v10102_v8  ;;  %v3974_v34 = vmul.f32 %v3973_v13, %v10119_v61  ;;  %v4437_v16 = vmul.f32 0.5497, %v4317_v35 }
 0x50f   : > { %v4517_v50 = vsel %vm4477_vm12, %v4457_v1, %v4497_v41  ;;  %7871 = vrcp.f32 %v10149_v3  ;;  %v4359_v42 = vmul.f32 0.2, %v10049_v37  ;;  %v3939_v18 = vadd.f32 1.1283791, %v3938_v29 }
 0x510   : > { %v4537_v25 = vmul.f32 0.4591, %v4517_v50  ;;  %v4298_v63 = vadd.f32 1.0, %v7563_v21  ;;  %vm4339_vm13 = vcmp.ge.f32.partialorder %v10049_v37, 0.0  ;;  %v3986_v23 = vadd.f32 0.112945676, %v3985_v44 }
 0x511   : > { %v4010_v43 = vmul.f32 2.1237322e-06, %v10152_v49  ;;  %v4021_v38 = vmul.f32 3.8918573e-05, %v10152_v49  ;;  %v10164_v45 = vadd.f32 %v9976_v59, %v3418_v22  ;;  %v4398_v40 = vmul.f32 0.5267, %v4378_v31 }
 0x512   : > { %v4557_v20 = vadd.f32 %v4537_v25, %v4437_v16  ;;  %v4318_v8 = vmul.f32 %v4298_v63, %v10117_v54  ;;  %v3975_v48 = vadd.f32 0.05243302, %v3974_v34  ;;  %v3987_v24 = vmul.f32 %v3986_v23, %v10119_v61 }
 0x513   : > { %v10170_v9 = vmul.f32 0.5, %v10049_v37  ;;  %v4379_v58 = vsel %vm4339_vm13, %v10049_v37, %v4359_v42  ;;  %v4011_v51 = vadd.f32 0.00028619796, %v4010_v43  ;;  %v4022_v2 = vadd.f32 0.001143296, %v4021_v38 }
 0x514   : > { %4577 = vst.msk [vmem:[#allocation3 + $0x69] sm:$0xff] %vm1189_vm4, %v4557_v20  ;;  %v4418_v35 = vmul.f32 0.4733, %v4318_v8  ;;  %v3940_v4 = vmul.f32 %v3939_v18, %v10070_v17  ;;  %v3988_v27 = vadd.f32 0.4994258, %v3987_v24  ;;  %vm3956_vm14 = vweird.f32 %v10149_v3 }
 0x515   : > { %v4360_v55 = vmul.f32 0.2, %v10099_v7  ;;  %v7872_v54 = vpop.eup %7871  ;;  %v4012_v53 = vmul.f32 %v4011_v51, %v10152_v49  ;;  %v4023_v56 = vmul.f32 %v4022_v2, %v10152_v49  ;;  %v10179_v11 = vmul.f32 0.70710677, %v10164_v45 }
 0x516   : > { %v4458_v37 = vadd.f32 %v4418_v35, %v4398_v40  ;;  %v3952_v26 = vmul.f32 %v7872_v54, %v10149_v3  ;;  %v3962_v60 = vand.u32 2147483648, %v10149_v3  ;;  %v3976_v17 = vmul.f32 %v3975_v48, %v10119_v61 }
 0x517   : > { %v3989_v32 = vmul.f32 %v3988_v27, %v10119_v61  ;;  %v4013_v19 = vadd.f32 0.0036580483, %v4012_v53  ;;  %v4024_v10 = vadd.f32 0.014752088, %v4023_v56  ;;  %v4048_v47 = vmul.f32 %v10179_v11, %v10179_v11 }
 0x518   : > { %vm4478_vm15 = vcmp.ge.f32.partialorder %v4458_v37, 0.0  ;;  %v4498_v1 = vmul.f32 0.2, %v4458_v37  ;;  %v3953_v39 = vsub.f32 1.0, %v3952_v26  ;;  %v3419_v13 = vadd.f32 %v3389_v33, %v9674_v36 }
 0x519   : > { %v10188_v52 = vadd.f32 1.0, %v3989_v32  ;;  %v4014_v14 = vmul.f32 %v4013_v19, %v10152_v49  ;;  %v4025_v6 = vmul.f32 %v4024_v10, %v10152_v49  ;;  %v10192_v46 = vmin.f32 %v4048_v47, 16.0 }
 0x51a   : > { %v4518_v41 = vsel %vm4478_vm15, %v4458_v37, %v4498_v1  ;;  %v3954_v12 = vmul.f32 %v7872_v54, %v3953_v39  ;;  %vm3957_vm0 = vweird.f32 %v7872_v54  ;;  %v3960_v29 = vand.u32 2147483647, %v10149_v3 }
 0x51b   : > { %v4438_v44 = vmul.f32 0.5497, %v4318_v8  ;;  %v4538_v22 = vmul.f32 0.4591, %v4518_v41  ;;  %v3963_v50 = vor.u32 1.1754944e-38, %v3962_v60  ;;  %7873 = vrcp.f32 %v10188_v52  ;;  %vm3958_vm1 = vmor %vm3956_vm14, %vm3957_vm0 }
 0x51c   : > { %v3955_v21 = vadd.f32 %v7872_v54, %v3954_v12  ;;  %v3977_v36 = vadd.f32 0.18741608, %v3976_v17  ;;  %v4015_v31 = vadd.f32 0.05243302, %v4014_v14  ;;  %v4026_v34 = vadd.f32 0.112945676, %v4025_v6 }
 0x51d   : > { %v4558_v16 = vadd.f32 %v4538_v22, %v4438_v44  ;;  %v4050_v25 = vmul.f32 2.1237322e-06, %v10192_v46  ;;  %v4061_v42 = vmul.f32 3.8918573e-05, %v10192_v46  ;;  %v10201_v63 = vadd.f32 %v9976_v59, %v3419_v13 }
 0x51e   : > { %v3959_v18 = vsel %vm3958_vm1, %v7872_v54, %v3955_v21  ;;  %vm3961_vm2 = vcmp.eq.f32.partialorder %v3960_v29, 8.507059e+37  ;;  %v4016_v23 = vmul.f32 %v4015_v31, %v10152_v49  ;;  %v4027_v20 = vmul.f32 %v4026_v34, %v10152_v49 }
 0x51f   : > { %4578 = vst.msk [vmem:[#allocation3 + $0x79] sm:$0xff] %vm1189_vm4, %v4558_v16  ;;  %v3964_v43 = vsel %vm3961_vm2, %v3963_v50, %v3959_v18  ;;  %vm4340_vm3 = vcmp.ge.f32.partialorder %v10099_v7, 0.0  ;;  %v4051_v3 = vadd.f32 0.00028619796, %v4050_v25  ;;  %v4062_v38 = vadd.f32 0.001143296, %v4061_v42 }
 0x520   : > { %v3965_v8 = vmul.f32 %v3964_v43, %v3940_v4  ;;  %v4399_v40 = vmul.f32 0.5267, %v4379_v58  ;;  %v3978_v48 = vmul.f32 %v3977_v36, %v10119_v61  ;;  %v4028_v24 = vadd.f32 0.4994258, %v4027_v20 }
 0x521   : > { %v7874_v51 = vpop.eup %7873  ;;  %v10209_v2 = vmul.f32 0.5, %v10099_v7  ;;  %v4052_v35 = vmul.f32 %v4051_v3, %v10192_v46  ;;  %v4063_v27 = vmul.f32 %v4062_v38, %v10192_v46  ;;  %v10214_v54 = vmul.f32 0.70710677, %v10201_v63 }
 0x522   : > { %v7564_v53 = vclamps-f32 %v3965_v8, 1.0  ;;  %v3992_v56 = vmul.f32 %v7874_v51, %v10188_v52  ;;  %v4380_v4 = vsel %vm4340_vm3, %v10099_v7, %v4360_v55  ;;  %v4017_v58 = vadd.f32 0.18741608, %v4016_v23  ;;  %v3392_v8 = vpop.f32.mrf.mxu0 }
 0x523   : > { %v4029_v61 = vmul.f32 %v4028_v24, %v10152_v49  ;;  %v4053_v33 = vadd.f32 0.0036580483, %v4052_v35  ;;  %v4064_v37 = vadd.f32 0.014752088, %v4063_v27  ;;  %v4088_v26 = vmul.f32 %v10214_v54, %v10214_v54 }
 0x524   : > { %v4299_v60 = vadd.f32 1.0, %v7564_v53  ;;  %v3979_v17 = vadd.f32 1.1283791, %v3978_v48  ;;  %v3993_v32 = vsub.f32 1.0, %v3992_v56  ;;  %v4000_v19 = vand.u32 2147483647, %v10188_v52 }
 0x525   : > { %v4002_v10 = vand.u32 2147483648, %v10188_v52  ;;  %v10223_v47 = vadd.f32 1.0, %v4029_v61  ;;  %v4065_v1 = vmul.f32 %v4064_v37, %v10192_v46  ;;  %v10226_v7 = vmin.f32 %v4088_v26, 16.0 }
 0x526   : > { %v4319_v55 = vmul.f32 %v4299_v60, %v10170_v9  ;;  %v3994_v39 = vmul.f32 %v7874_v51, %v3993_v32  ;;  %vm3997_vm5 = vweird.f32 %v7874_v51  ;;  %v4018_v13 = vmul.f32 %v4017_v58, %v10152_v49 }
 0x527   : > { %v10230_v14 = vmul.f32 0.5267, %v4380_v4  ;;  %7875 = vrcp.f32 %v10223_v47  ;;  %v4361_v6 = vmul.f32 0.2, %v10124_v0  ;;  %v4054_v41 = vmul.f32 %v4053_v33, %v10192_v46 }
 0x528   : > { %v4419_v12 = vmul.f32 0.4733, %v4319_v55  ;;  %v3980_v29 = vmul.f32 %v3979_v17, %v10109_v62  ;;  %v3995_v44 = vadd.f32 %v7874_v51, %v3994_v39  ;;  %vm3996_vm6 = vweird.f32 %v10188_v52 }
 0x529   : > { %vm4341_vm7 = vcmp.ge.f32.partialorder %v10124_v0, 0.0  ;;  %vm3998_vm8 = vmor %vm3996_vm6, %vm3997_vm5  ;;  %vm4001_vm9 = vcmp.eq.f32.partialorder %v4000_v19, 8.507059e+37  ;;  %v4003_v9 = vor.u32 1.1754944e-38, %v4002_v10  ;;  %v4066_v49 = vadd.f32 0.112945676, %v4065_v1 }
 0x52a   : > { %v4090_v22 = vmul.f32 2.1237322e-06, %v10226_v7  ;;  %v4459_v50 = vadd.f32 %v4419_v12, %v4399_v40  ;;  %v3999_v21 = vsel %vm3998_vm8, %v7874_v51, %v3995_v44  ;;  %v4019_v36 = vadd.f32 1.1283791, %v4018_v13 }
 0x52b   : > { %v4101_v31 = vmul.f32 3.8918573e-05, %v10226_v7  ;;  %v4004_v34 = vsel %vm4001_vm9, %v4003_v9, %v3999_v21  ;;  %v4055_v16 = vadd.f32 0.05243302, %v4054_v41  ;;  %v4067_v62 = vmul.f32 %v4066_v49, %v10192_v46 }
 0x52c   : > { %v4091_v25 = vadd.f32 0.00028619796, %v4090_v22  ;;  %vm4479_vm10 = vcmp.ge.f32.partialorder %v4459_v50, 0.0  ;;  %v4499_v52 = vmul.f32 0.2, %v4459_v50  ;;  %v4005_v42 = vmul.f32 %v4004_v34, %v3980_v29 }
 0x52d   : > { %v4040_v18 = vand.u32 2147483647, %v10223_v47  ;;  %v7876_v23 = vpop.eup %7875  ;;  %v4042_v20 = vand.u32 2147483648, %v10223_v47  ;;  %v4068_v43 = vadd.f32 0.4994258, %v4067_v62  ;;  %v4056_v27 = vmul.f32 %v4055_v16, %v10192_v46 }
 0x52e   : > { %v4092_v3 = vmul.f32 %v4091_v25, %v10226_v7  ;;  %v4102_v38 = vadd.f32 0.001143296, %v4101_v31  ;;  %v4439_v40 = vmul.f32 0.5497, %v4319_v55  ;;  %v4519_v48 = vsel %vm4479_vm10, %v4459_v50, %v4499_v52  ;;  %v3395_v31 = vpop.f32.mrf.mxu0 }
 0x52f   : > { %v7565_v24 = vclamps-f32 %v4005_v42, 1.0  ;;  %v4032_v51 = vmul.f32 %v7876_v23, %v10223_v47  ;;  %v4539_v35 = vmul.f32 0.4591, %v4519_v48  ;;  %v4069_v53 = vmul.f32 %v4068_v43, %v10192_v46 }
 0x530   : > { %v4093_v56 = vadd.f32 0.0036580483, %v4092_v3  ;;  %v4103_v61 = vmul.f32 %v4102_v38, %v10226_v7  ;;  %v3420_v33 = vadd.f32 %v3392_v8, %v9815_v5  ;;  %vm4037_vm11 = vweird.f32 %v7876_v23 }
 0x531   : > { %v4300_v4 = vadd.f32 1.0, %v7565_v24  ;;  %v4033_v58 = vsub.f32 1.0, %v4032_v51  ;;  %v4559_v37 = vadd.f32 %v4539_v35, %v4439_v40  ;;  %v10249_v26 = vadd.f32 1.0, %v4069_v53 }
 0x532   : > { %v4094_v60 = vmul.f32 %v4093_v56, %v10226_v7  ;;  %v4104_v19 = vadd.f32 0.014752088, %v4103_v61  ;;  %v10254_v10 = vadd.f32 %v9976_v59, %v3420_v33  ;;  %v4381_v1 = vsel %vm4341_vm7, %v10124_v0, %v4361_v6  ;;  %v3219_v33 = vpop.f32.mrf.mxu3 }
 0x533   : > { %v4320_v17 = vmul.f32 %v4300_v4, %v10209_v2  ;;  %v4034_v32 = vmul.f32 %v7876_v23, %v4033_v58  ;;  %4579 = vst.msk [vmem:[#allocation3 + $0x81] sm:$0xff] %vm1189_vm4, %v4559_v37  ;;  %v4057_v5 = vadd.f32 0.18741608, %v4056_v27  ;;  %7877 = vrcp.f32 %v10249_v26 }
 0x534   : > { %vm4342_vm12 = vcmp.ge.f32.partialorder %v10164_v45, 0.0  ;;  %vm4036_vm13 = vweird.f32 %v10223_v47  ;;  %v4362_v2 = vmul.f32 0.2, %v10164_v45  ;;  %v4020_v13 = vmul.f32 %v4019_v36, %v10138_v28 }
 0x535   : > { %v4420_v55 = vmul.f32 0.4733, %v4320_v17  ;;  %v4035_v39 = vadd.f32 %v7876_v23, %v4034_v32  ;;  %vm4038_vm14 = vmor %vm4036_vm13, %vm4037_vm11  ;;  %vm4041_vm15 = vcmp.eq.f32.partialorder %v4040_v18, 8.507059e+37  ;;  %v4043_v41 = vor.u32 1.1754944e-38, %v4042_v20 }
 0x536   : > { %v4105_v12 = vmul.f32 %v4104_v19, %v10226_v7  ;;  %v4095_v44 = vadd.f32 0.05243302, %v4094_v60  ;;  %v10269_v9 = vmul.f32 0.70710677, %v10254_v10  ;;  %v3461_v49 = vmul.f32 0.5, %v10124_v0 }
 0x537   : > { %v4460_v6 = vadd.f32 %v4420_v55, %v10230_v14  ;;  %v4039_v29 = vsel %vm4038_vm14, %v7876_v23, %v4035_v39  ;;  %v4058_v22 = vmul.f32 %v4057_v5, %v10192_v46  ;;  %v4440_v14 = vmul.f32 0.5497, %v4320_v17 }
 0x538   : > { %v4044_v47 = vsel %vm4041_vm15, %v4043_v41, %v4039_v29  ;;  %v4106_v50 = vadd.f32 0.112945676, %v4105_v12  ;;  %v4128_v36 = vmul.f32 %v10269_v9, %v10269_v9  ;;  %v4401_v16 = vmul.f32 0.5267, %v4381_v1  ;;  %v3398_v29 = vpop.f32.mrf.mxu0 }
 0x539   : > { %vm4480_vm0 = vcmp.ge.f32.partialorder %v4460_v6, 0.0  ;;  %v4500_v28 = vmul.f32 0.2, %v4460_v6  ;;  %v4045_v21 = vmul.f32 %v4044_v47, %v4020_v13  ;;  %v7878_v34 = vpop.eup %7877  ;;  %v4382_v62 = vsel %vm4342_vm12, %v10164_v45, %v4362_v2 }
 0x53a   : > { %v4107_v0 = vmul.f32 %v4106_v50, %v10226_v7  ;;  %v4072_v46 = vmul.f32 %v7878_v34, %v10249_v26  ;;  %v4096_v42 = vmul.f32 %v4095_v44, %v10226_v7  ;;  %v10281_v20 = vmin.f32 %v4128_v36, 16.0 }
 0x53b   : > { %v4520_v25 = vsel %vm4480_vm0, %v4460_v6, %v4500_v28  ;;  %v7566_v52 = vclamps-f32 %v4045_v21, 1.0  ;;  %v3421_v43 = vadd.f32 %v3395_v31, %v10054_v57  ;;  %v4059_v38 = vadd.f32 1.1283791, %v4058_v22 }
 0x53c   : > { %v4540_v18 = vmul.f32 0.4591, %v4520_v25  ;;  %v4108_v23 = vadd.f32 0.4994258, %v4107_v0  ;;  %v4073_v8 = vsub.f32 1.0, %v4072_v46  ;;  %v4082_v24 = vand.u32 2147483648, %v10249_v26 }
 0x53d   : > { %v4301_v3 = vadd.f32 1.0, %v7566_v52  ;;  %v4080_v40 = vand.u32 2147483647, %v10249_v26  ;;  %v4130_v35 = vmul.f32 2.1237322e-06, %v10281_v20  ;;  %vm4077_vm1 = vweird.f32 %v7878_v34 }
 0x53e   : > { %v4560_v48 = vadd.f32 %v4540_v18, %v4440_v14  ;;  %v4109_v51 = vmul.f32 %v4108_v23, %v10226_v7  ;;  %v4074_v53 = vmul.f32 %v7878_v34, %v4073_v8  ;;  %v4141_v56 = vmul.f32 3.8918573e-05, %v10281_v20 }
 0x53f   : > { %v4321_v27 = vmul.f32 %v4301_v3, %v3461_v49  ;;  %v4097_v57 = vadd.f32 0.18741608, %v4096_v42  ;;  %v4131_v58 = vadd.f32 0.00028619796, %v4130_v35  ;;  %v10293_v61 = vadd.f32 %v9976_v59, %v3421_v43 }
 0x540   : > { %4580 = vst.msk [vmem:[#allocation3 + $0x91] sm:$0xff] %vm1189_vm4, %v4560_v48  ;;  %v10290_v4 = vadd.f32 1.0, %v4109_v51  ;;  %v4075_v60 = vadd.f32 %v7878_v34, %v4074_v53  ;;  %vm4076_vm2 = vweird.f32 %v10249_v26  ;;  %v4142_v17 = vadd.f32 0.001143296, %v4141_v56 }
 0x541   : > { %v4421_v37 = vmul.f32 0.4733, %v4321_v27  ;;  %v4060_v32 = vmul.f32 %v4059_v38, %v10179_v11  ;;  %vm4078_vm3 = vmor %vm4076_vm2, %vm4077_vm1  ;;  %vm4081_vm5 = vcmp.eq.f32.partialorder %v4080_v40, 8.507059e+37  ;;  %v4083_v19 = vor.u32 1.1754944e-38, %v4082_v24 }
 0x542   : > { %7879 = vrcp.f32 %v10290_v4  ;;  %v4079_v5 = vsel %vm4078_vm3, %v7878_v34, %v4075_v60  ;;  %v4132_v55 = vmul.f32 %v4131_v58, %v10281_v20  ;;  %v4143_v39 = vmul.f32 %v4142_v17, %v10281_v20 }
 0x543   : > { %v4461_v1 = vadd.f32 %v4421_v37, %v4401_v16  ;;  %v3243_v2 = vadd.f32 %v3219_v33, %v10073_v15  ;;  %v4084_v13 = vsel %vm4081_vm5, %v4083_v19, %v4079_v5  ;;  %v4098_v41 = vmul.f32 %v4097_v57, %v10226_v7  ;;  %v3043_v57 = vpop.f32.mrf.mxu2 }
 0x544   : > { %v10303_v26 = vmul.f32 0.70710677, %v10293_v61  ;;  %v4085_v12 = vmul.f32 %v4084_v13, %v4060_v32  ;;  %v4133_v6 = vadd.f32 0.0036580483, %v4132_v55  ;;  %v3462_v44 = vmul.f32 0.5, %v10164_v45 }
 0x545   : > { %vm4481_vm6 = vcmp.ge.f32.partialorder %v4461_v1, 0.0  ;;  %v4501_v11 = vmul.f32 0.2, %v4461_v1  ;;  %v4402_v49 = vmul.f32 0.5267, %v4382_v62  ;;  %v3422_v14 = vadd.f32 %v3398_v29, %v3243_v2  ;;  %v3222_v2 = vpop.f32.mrf.mxu3 }
 0x546   : > { %v4144_v47 = vadd.f32 0.014752088, %v4143_v39  ;;  %v4168_v22 = vmul.f32 %v10303_v26, %v10303_v26  ;;  %v4441_v50 = vmul.f32 0.5497, %v4321_v27  ;;  %v7567_v28 = vclamps-f32 %v4085_v12, 1.0 }
 0x547   : > { %v4521_v15 = vsel %vm4481_vm6, %v4461_v1, %v4501_v11  ;;  %v4134_v7 = vmul.f32 %v4133_v6, %v10281_v20  ;;  %v4099_v0 = vadd.f32 1.1283791, %v4098_v41  ;;  %v4120_v62 = vand.u32 2147483647, %v10290_v4 }
 0x548   : > { %v7880_v21 = vpop.eup %7879  ;;  %v4541_v36 = vmul.f32 0.4591, %v4521_v15  ;;  %v4145_v31 = vmul.f32 %v4144_v47, %v10281_v20  ;;  %v10310_v34 = vmin.f32 %v4168_v22, 16.0  ;;  %v4302_v16 = vadd.f32 1.0, %v7567_v28  ;;  %v3401_v22 = vpop.f32.mrf.mxu0 }
 0x549   : > { %v4112_v45 = vmul.f32 %v7880_v21, %v10290_v4  ;;  %v4122_v43 = vand.u32 2147483648, %v10290_v4  ;;  %v4135_v3 = vadd.f32 0.05243302, %v4134_v7  ;;  %v10320_v48 = vadd.f32 %v9976_v59, %v3422_v14 }
 0x54a   : > { %v4561_v25 = vadd.f32 %v4541_v36, %v4441_v50  ;;  %v4146_v52 = vadd.f32 0.112945676, %v4145_v31  ;;  %v4170_v46 = vmul.f32 2.1237322e-06, %v10310_v34  ;;  %v4181_v42 = vmul.f32 3.8918573e-05, %v10310_v34 }
 0x54b   : > { %v4322_v18 = vmul.f32 %v4302_v16, %v3462_v44  ;;  %v4113_v23 = vsub.f32 1.0, %v4112_v45  ;;  %v4100_v51 = vmul.f32 %v4099_v0, %v10214_v54  ;;  %vm4117_vm7 = vweird.f32 %v7880_v21 }
 0x54c   : > { %4581 = vst.msk [vmem:[#allocation3 + $0x99] sm:$0xff] %vm1189_vm4, %v4561_v25  ;;  %v4147_v38 = vmul.f32 %v4146_v52, %v10281_v20  ;;  %v4171_v8 = vadd.f32 0.00028619796, %v4170_v46  ;;  %v4182_v40 = vadd.f32 0.001143296, %v4181_v42  ;;  %vm4116_vm8 = vweird.f32 %v10290_v4 }
 0x54d   : > { %v4422_v24 = vmul.f32 0.4733, %v4322_v18  ;;  %v4114_v35 = vmul.f32 %v7880_v21, %v4113_v23  ;;  %v4136_v37 = vmul.f32 %v4135_v3, %v10281_v20  ;;  %v10328_v59 = vmul.f32 0.70710677, %v10320_v48  ;;  %vm4118_vm9 = vmor %vm4116_vm8, %vm4117_vm7 }
 0x54e   : > { %v4148_v27 = vadd.f32 0.4994258, %v4147_v38  ;;  %v4172_v53 = vmul.f32 %v4171_v8, %v10310_v34  ;;  %v4183_v56 = vmul.f32 %v4182_v40, %v10310_v34  ;;  %vm4121_vm10 = vcmp.eq.f32.partialorder %v4120_v62, 8.507059e+37 }
 0x54f   : > { %v4462_v58 = vadd.f32 %v4422_v24, %v4402_v49  ;;  %v4115_v33 = vadd.f32 %v7880_v21, %v4114_v35  ;;  %v4123_v54 = vor.u32 1.1754944e-38, %v4122_v43  ;;  %v3065_v1 = vadd.f32 %v3043_v57, %v10076_v30 }
 0x550   : > { %v4149_v60 = vmul.f32 %v4148_v27, %v10281_v20  ;;  %v4184_v17 = vadd.f32 0.014752088, %v4183_v56  ;;  %v4173_v19 = vadd.f32 0.0036580483, %v4172_v53  ;;  %v4137_v11 = vadd.f32 0.18741608, %v4136_v37 }
 0x551   : > { %vm4482_vm11 = vcmp.ge.f32.partialorder %v4462_v58, 0.0  ;;  %v4502_v4 = vmul.f32 0.2, %v4462_v58  ;;  %v4119_v32 = vsel %vm4118_vm9, %v7880_v21, %v4115_v33  ;;  %v4208_v12 = vmul.f32 %v10328_v59, %v10328_v59 }
 0x552   : > { %v4124_v5 = vsel %vm4121_vm10, %v4123_v54, %v4119_v32  ;;  %v10332_v55 = vadd.f32 1.0, %v4149_v60  ;;  %v4185_v39 = vmul.f32 %v4184_v17, %v10310_v34  ;;  %v4442_v6 = vmul.f32 0.5497, %v4322_v18 }
 0x553   : > { %v4522_v13 = vsel %vm4482_vm11, %v4462_v58, %v4502_v4  ;;  %v4125_v41 = vmul.f32 %v4124_v5, %v4100_v51  ;;  %v4363_v44 = vmul.f32 0.2, %v10201_v63  ;;  %vm4343_vm12 = vcmp.ge.f32.partialorder %v10201_v63, 0.0 }
 0x554   : > { %v4542_v29 = vmul.f32 0.4591, %v4522_v13  ;;  %7881 = vrcp.f32 %v10332_v55  ;;  %v4174_v30 = vmul.f32 %v4173_v19, %v10310_v34  ;;  %v4186_v47 = vadd.f32 0.112945676, %v4185_v39 }
 0x555   : > { %v7568_v49 = vclamps-f32 %v4125_v41, 1.0  ;;  %v3244_v50 = vadd.f32 %v3222_v2, %v3065_v1  ;;  %v10341_v28 = vmin.f32 %v4208_v12, 16.0  ;;  %v3463_v7 = vmul.f32 0.5, %v10201_v63 }
 0x556   : > { %v4562_v15 = vadd.f32 %v4542_v29, %v4442_v6  ;;  %v4138_v36 = vmul.f32 %v4137_v11, %v10281_v20  ;;  %v4187_v31 = vmul.f32 %v4186_v47, %v10310_v34  ;;  %v4383_v14 = vsel %vm4343_vm12, %v10201_v63, %v4363_v44  ;;  %v7890_v20 = vld [vmem:[%s11797_s5] ss:$0 sm:$0xff] }
 0x557   : > { %v4303_v21 = vadd.f32 1.0, %v7568_v49  ;;  %v4210_v16 = vmul.f32 2.1237322e-06, %v10341_v28  ;;  %v4221_v0 = vmul.f32 3.8918573e-05, %v10341_v28  ;;  %v3423_v45 = vadd.f32 %v3401_v22, %v3244_v50 }
 0x558   : > { %4582 = vst.msk [vmem:[#allocation3 + $0xa9] sm:$0xff] %vm1189_vm4, %v4562_v15  ;;  %v4175_v25 = vadd.f32 0.05243302, %v4174_v30  ;;  %v4188_v52 = vadd.f32 0.4994258, %v4187_v31  ;;  %v4162_v53 = vand.u32 2147483648, %v10332_v55  ;;  %vm4156_vm15 = vweird.f32 %v10332_v55 }
 0x559   : > { %v4323_v62 = vmul.f32 %v4303_v21, %v3463_v7  ;;  %v4211_v42 = vadd.f32 0.00028619796, %v4210_v16  ;;  %v4222_v18 = vadd.f32 0.001143296, %v4221_v0  ;;  %v10353_v23 = vadd.f32 %v7890_v20, %v3423_v45 }
 0x55a   : > { %v7882_v46 = vpop.eup %7881  ;;  %v4403_v43 = vmul.f32 0.5267, %v4383_v14  ;;  %v4139_v63 = vadd.f32 1.1283791, %v4138_v36  ;;  %v4160_v8 = vand.u32 2147483647, %v10332_v55  ;;  %v4189_v40 = vmul.f32 %v4188_v52, %v10310_v34 }
 0x55b   : > { %v4423_v3 = vmul.f32 0.4733, %v4323_v62  ;;  %v4152_v38 = vmul.f32 %v7882_v46, %v10332_v55  ;;  %v4212_v24 = vmul.f32 %v4211_v42, %v10341_v28  ;;  %v4223_v51 = vmul.f32 %v4222_v18, %v10341_v28 }
 0x55c   : > { %v4176_v56 = vmul.f32 %v4175_v25, %v10310_v34  ;;  %vm4157_vm13 = vweird.f32 %v7882_v46  ;;  %v10362_v57 = vadd.f32 1.0, %v4189_v40  ;;  %v10365_v33 = vmul.f32 0.70710677, %v10353_v23 }
 0x55d   : > { %v4463_v35 = vadd.f32 %v4423_v3, %v4403_v43  ;;  %v4153_v27 = vsub.f32 1.0, %v4152_v38  ;;  %v4213_v58 = vadd.f32 0.0036580483, %v4212_v24  ;;  %v4224_v60 = vadd.f32 0.014752088, %v4223_v51  ;;  %vm4158_vm0 = vmor %vm4156_vm15, %vm4157_vm13 }
 0x55e   : > { %7883 = vrcp.f32 %v10362_v57  ;;  %v4163_v32 = vor.u32 1.1754944e-38, %v4162_v53  ;;  %v4177_v19 = vadd.f32 0.18741608, %v4176_v56  ;;  %v4443_v1 = vmul.f32 0.5497, %v4323_v62 }
 0x55f   : > { %vm4483_vm14 = vcmp.ge.f32.partialorder %v4463_v35, 0.0  ;;  %v4503_v37 = vmul.f32 0.2, %v4463_v35  ;;  %v4154_v54 = vmul.f32 %v7882_v46, %v4153_v27  ;;  %v4225_v39 = vmul.f32 %v4224_v60, %v10341_v28 }
 0x560   : > { %v4248_v2 = vmul.f32 %v10365_v33, %v10365_v33  ;;  %v4140_v13 = vmul.f32 %v4139_v63, %v10269_v9  ;;  %vm4161_vm1 = vcmp.eq.f32.partialorder %v4160_v8, 8.507059e+37  ;;  %v4214_v55 = vmul.f32 %v4213_v58, %v10341_v28 }
 0x561   : > { %v4523_v17 = vsel %vm4483_vm14, %v4463_v35, %v4503_v37  ;;  %v4155_v4 = vadd.f32 %v7882_v46, %v4154_v54  ;;  %v4226_v6 = vadd.f32 0.112945676, %v4225_v39  ;;  %v4364_v49 = vmul.f32 0.2, %v10254_v10 }
 0x562   : > { %v4543_v5 = vmul.f32 0.4591, %v4523_v17  ;;  %v10375_v29 = vmin.f32 %v4248_v2, 16.0  ;;  %v4178_v30 = vmul.f32 %v4177_v19, %v10310_v34  ;;  %vm4344_vm2 = vcmp.ge.f32.partialorder %v10254_v10, 0.0 }
 0x563   : > { %v4159_v41 = vsel %vm4158_vm0, %v7882_v46, %v4155_v4  ;;  %v4227_v9 = vmul.f32 %v4226_v6, %v10341_v28  ;;  %v3464_v15 = vmul.f32 0.5, %v10254_v10  ;;  %v4215_v36 = vadd.f32 0.05243302, %v4214_v55 }
 0x564   : > { %v4563_v11 = vadd.f32 %v4543_v5, %v4443_v1  ;;  %v4164_v12 = vsel %vm4161_vm1, %v4163_v32, %v4159_v41  ;;  %v7884_v47 = vpop.eup %7883  ;;  %v4250_v22 = vmul.f32 2.1237322e-06, %v10375_v29  ;;  %v4261_v50 = vmul.f32 3.8918573e-05, %v10375_v29 }
 0x565   : > { %v4165_v44 = vmul.f32 %v4164_v12, %v4140_v13  ;;  %v4192_v21 = vmul.f32 %v7884_v47, %v10362_v57  ;;  %v4228_v31 = vadd.f32 0.4994258, %v4227_v9  ;;  %v4384_v0 = vsel %vm4344_vm2, %v10254_v10, %v4364_v49 }
 0x566   : > { %4583 = vst.msk [vmem:[#allocation3 + $0xb1] sm:$0xff] %vm1189_vm4, %v4563_v11  ;;  %v4251_v14 = vadd.f32 0.00028619796, %v4250_v22  ;;  %v4262_v34 = vadd.f32 0.001143296, %v4261_v50  ;;  %v4202_v25 = vand.u32 2147483648, %v10362_v57  ;;  %vm4197_vm3 = vweird.f32 %v7884_v47 }
 0x567   : > { %v7569_v7 = vclamps-f32 %v4165_v44, 1.0  ;;  %v4179_v45 = vadd.f32 1.1283791, %v4178_v30  ;;  %v4193_v62 = vsub.f32 1.0, %v4192_v21  ;;  %v4229_v52 = vmul.f32 %v4228_v31, %v10341_v28 }
 0x568   : > { %v4252_v46 = vmul.f32 %v4251_v14, %v10375_v29  ;;  %v4263_v42 = vmul.f32 %v4262_v34, %v10375_v29  ;;  %v4200_v43 = vand.u32 2147483647, %v10362_v57  ;;  %v4216_v3 = vmul.f32 %v4215_v36, %v10341_v28 }
 0x569   : > { %v4304_v16 = vadd.f32 1.0, %v7569_v7  ;;  %v4194_v20 = vmul.f32 %v7884_v47, %v4193_v62  ;;  %v4230_v63 = vadd.f32 1.0, %v4229_v52  ;;  %v4404_v10 = vmul.f32 0.5267, %v4384_v0 }
 0x56a   : > { %v4264_v38 = vadd.f32 0.014752088, %v4263_v42  ;;  %vm4196_vm5 = vweird.f32 %v10362_v57  ;;  %v4180_v24 = vmul.f32 %v4179_v45, %v10303_v26  ;;  %v4203_v51 = vor.u32 1.1754944e-38, %v4202_v25 }
 0x56b   : > { %v4324_v18 = vmul.f32 %v4304_v16, %v3464_v15  ;;  %v4195_v40 = vadd.f32 %v7884_v47, %v4194_v20  ;;  %vm4198_vm6 = vmor %vm4196_vm5, %vm4197_vm3  ;;  %7885 = vrcp.f32 %v4230_v63  ;;  %v4253_v35 = vadd.f32 0.0036580483, %v4252_v46 }
 0x56c   : > { %vm4201_vm7 = vcmp.eq.f32.partialorder %v4200_v43, 8.507059e+37  ;;  %v4265_v56 = vmul.f32 %v4264_v38, %v10375_v29  ;;  %v4217_v37 = vadd.f32 0.18741608, %v4216_v3  ;;  %v4365_v17 = vmul.f32 0.2, %v10293_v61 }
 0x56d   : > { %v4424_v8 = vmul.f32 0.4733, %v4324_v18  ;;  %v4199_v53 = vsel %vm4198_vm6, %v7884_v47, %v4195_v40  ;;  %vm4345_vm9 = vcmp.ge.f32.partialorder %v10293_v61, 0.0  ;;  %v4254_v26 = vmul.f32 %v4253_v35, %v10375_v29 }
 0x56e   : > { %v4204_v58 = vsel %vm4201_vm7, %v4203_v51, %v4199_v53  ;;  %v4266_v57 = vadd.f32 0.112945676, %v4265_v56  ;;  %v4444_v1 = vmul.f32 0.5497, %v4324_v18  ;;  %v4218_v39 = vmul.f32 %v4217_v37, %v10341_v28 }
 0x56f   : > { %v4464_v27 = vadd.f32 %v4424_v8, %v4404_v10  ;;  %v4205_v60 = vmul.f32 %v4204_v58, %v4180_v24  ;;  %v3465_v13 = vmul.f32 0.5, %v10293_v61  ;;  %v4385_v55 = vsel %vm4345_vm9, %v10293_v61, %v4365_v17 }
 0x570   : > { %v4267_v2 = vmul.f32 %v4266_v57, %v10375_v29  ;;  %v4255_v6 = vadd.f32 0.05243302, %v4254_v26  ;;  %v4405_v47 = vmul.f32 0.5267, %v4385_v55  ;;  %v4219_v9 = vadd.f32 1.1283791, %v4218_v39 }
 0x571   : > { %vm4484_vm8 = vcmp.ge.f32.partialorder %v4464_v27, 0.0  ;;  %v4504_v54 = vmul.f32 0.2, %v4464_v27  ;;  %v7570_v32 = vclamps-f32 %v4205_v60, 1.0  ;;  %v7886_v19 = vpop.eup %7885  ;;  %v4242_v22 = vand.u32 2147483648, %v4230_v63 }
 0x572   : > { %v4232_v11 = vmul.f32 %v7886_v19, %v4230_v63  ;;  %v4268_v44 = vadd.f32 0.4994258, %v4267_v2  ;;  %vm4237_vm10 = vweird.f32 %v7886_v19  ;;  %v4240_v7 = vand.u32 2147483647, %v4230_v63 }
 0x573   : > { %v4524_v4 = vsel %vm4484_vm8, %v4464_v27, %v4504_v54  ;;  %v4305_v41 = vadd.f32 1.0, %v7570_v32  ;;  %v4256_v21 = vmul.f32 %v4255_v6, %v10375_v29  ;;  %vm4236_vm11 = vweird.f32 %v4230_v63 }
 0x574   : > { %v4544_v5 = vmul.f32 0.4591, %v4524_v4  ;;  %v4233_v30 = vsub.f32 1.0, %v4232_v11  ;;  %v4269_v28 = vmul.f32 %v4268_v44, %v10375_v29  ;;  %v4220_v14 = vmul.f32 %v4219_v9, %v10328_v59  ;;  %vm4238_vm12 = vmor %vm4236_vm11, %vm4237_vm10 }
 0x575   : > { %v4325_v49 = vmul.f32 %v4305_v41, %v3465_v13  ;;  %v4243_v34 = vor.u32 1.1754944e-38, %v4242_v22  ;;  %vm4241_vm14 = vcmp.eq.f32.partialorder %v4240_v7, 8.507059e+37  ;;  %v4257_v62 = vadd.f32 0.18741608, %v4256_v21 }
 0x576   : > { %v4564_v12 = vadd.f32 %v4544_v5, %v4444_v1  ;;  %v4234_v15 = vmul.f32 %v7886_v19, %v4233_v30  ;;  %v4270_v61 = vadd.f32 1.0, %v4269_v28  ;;  %v4366_v46 = vmul.f32 0.2, %v10320_v48 }
 0x577   : > { %v4425_v50 = vmul.f32 0.4733, %v4325_v49  ;;  %v4445_v42 = vmul.f32 0.5497, %v4325_v49  ;;  %vm4346_vm15 = vcmp.ge.f32.partialorder %v10320_v48, 0.0  ;;  %v4258_v3 = vmul.f32 %v4257_v62, %v10375_v29 }
 0x578   : > { %4584 = vst.msk [vmem:[#allocation3 + $0xc1] sm:$0xff] %vm1189_vm4, %v4564_v12  ;;  %v4235_v31 = vadd.f32 %v7886_v19, %v4234_v15  ;;  %7887 = vrcp.f32 %v4270_v61  ;;  %v3466_v63 = vmul.f32 0.5, %v10320_v48  ;;  %v4386_v10 = vsel %vm4346_vm15, %v10320_v48, %v4366_v46 }
 0x579   : > { %v4465_v36 = vadd.f32 %v4425_v50, %v4405_v47  ;;  %v4406_v51 = vmul.f32 0.5267, %v4386_v10  ;;  %v4259_v35 = vadd.f32 1.1283791, %v4258_v3  ;;  %v4282_v27 = vand.u32 2147483648, %v4270_v61 }
 0x57a   : > { %v4239_v0 = vsel %vm4238_vm12, %v7886_v19, %v4235_v31  ;;  %v4280_v58 = vand.u32 2147483647, %v4270_v61  ;;  %vm4276_vm1 = vweird.f32 %v4270_v61  ;;  %v4367_v1 = vmul.f32 0.2, %v10353_v23 }
 0x57b   : > { %vm4485_vm13 = vcmp.ge.f32.partialorder %v4465_v36, 0.0  ;;  %v4505_v16 = vmul.f32 0.2, %v4465_v36  ;;  %v4244_v45 = vsel %vm4241_vm14, %v4243_v34, %v4239_v0  ;;  %v4260_v29 = vmul.f32 %v4259_v35, %v10365_v33 }
 0x57c   : > { %v4245_v52 = vmul.f32 %v4244_v45, %v4220_v14  ;;  %v4283_v60 = vor.u32 1.1754944e-38, %v4282_v27  ;;  %vm4281_vm5 = vcmp.eq.f32.partialorder %v4280_v58, 8.507059e+37  ;;  %vm4347_vm6 = vcmp.ge.f32.partialorder %v10353_v23, 0.0 }
 0x57d   : > { %v4525_v25 = vsel %vm4485_vm13, %v4465_v36, %v4505_v16  ;;  %v3467_v2 = vmul.f32 0.5, %v10353_v23  ;;  %v4387_v13 = vsel %vm4347_vm6, %v10353_v23, %v4367_v1 }
 0x57e   : > { %v4545_v18 = vmul.f32 0.4591, %v4525_v25  ;;  %v7571_v20 = vclamps-f32 %v4245_v52, 1.0  ;;  %v7888_v43 = vpop.eup %7887  ;;  %v4407_v55 = vmul.f32 0.5267, %v4387_v13 }
 0x57f   : > { %v4272_v8 = vmul.f32 %v7888_v43, %v4270_v61  ;;  %vm4277_vm0 = vweird.f32 %v7888_v43 }
 0x580   : > { %v4565_v59 = vadd.f32 %v4545_v18, %v4445_v42  ;;  %v4306_v38 = vadd.f32 1.0, %v7571_v20  ;;  %vm4278_vm2 = vmor %vm4276_vm1, %vm4277_vm0 }
 0x581   : > { %v4273_v24 = vsub.f32 1.0, %v4272_v8 }
 0x582   : > { %4585 = vst.msk [vmem:[#allocation3 + $0xc9] sm:$0xff] %vm1189_vm4, %v4565_v59  ;;  %v4326_v40 = vmul.f32 %v4306_v38, %v3466_v63 }
 0x583   : > { %v4274_v56 = vmul.f32 %v7888_v43, %v4273_v24 }
 0x584   : > { %v4426_v53 = vmul.f32 0.4733, %v4326_v40  ;;  %v4446_v32 = vmul.f32 0.5497, %v4326_v40 }
 0x585   : > { %v4275_v54 = vadd.f32 %v7888_v43, %v4274_v56 }
 0x586   : > { %v4466_v37 = vadd.f32 %v4426_v53, %v4406_v51 }
 0x587   : > { %v4279_v17 = vsel %vm4278_vm2, %v7888_v43, %v4275_v54 }
 0x588   : > { %vm4486_vm3 = vcmp.ge.f32.partialorder %v4466_v37, 0.0  ;;  %v4506_v48 = vmul.f32 0.2, %v4466_v37  ;;  %v4284_v26 = vsel %vm4281_vm5, %v4283_v60, %v4279_v17 }
 0x589   : > { %v4285_v4 = vmul.f32 %v4284_v26, %v4260_v29 }
 0x58a   : > { %v4526_v57 = vsel %vm4486_vm3, %v4466_v37, %v4506_v48 }
 0x58b   : > { %v4546_v19 = vmul.f32 0.4591, %v4526_v57  ;;  %v7572_v5 = vclamps-f32 %v4285_v4, 1.0 }
 0x58d   : > { %v4566_v39 = vadd.f32 %v4546_v19, %v4446_v32  ;;  %v4307_v33 = vadd.f32 1.0, %v7572_v5 }
 0x58f   : > { %4586 = vst.msk [vmem:[#allocation3 + $0xd9] sm:$0xff] %vm1189_vm4, %v4566_v39  ;;  %v4327_v41 = vmul.f32 %v4307_v33, %v3467_v2 }
 0x591   : > { %v4427_v11 = vmul.f32 0.4733, %v4327_v41  ;;  %v4447_v49 = vmul.f32 0.5497, %v4327_v41 }
 0x593   : > { %v4467_v12 = vadd.f32 %v4427_v11, %v4407_v55 }
 0x595   : > { %vm4487_vm7 = vcmp.ge.f32.partialorder %v4467_v12, 0.0  ;;  %v4507_v6 = vmul.f32 0.2, %v4467_v12 }
 0x597   : > { %v4527_v44 = vsel %vm4487_vm7, %v4467_v12, %v4507_v6 }
 0x598   : > { %v4547_v30 = vmul.f32 0.4591, %v4527_v44  ;;  %4590 = sbr.rel (%p7346_p8) target bundleno = 1441 (0x5a1), region = 84 }
 0x59a   : > { %v4567_v47 = vadd.f32 %v4547_v30, %v4447_v49 }
 0x59c   : > { %4587 = vst.msk [vmem:[#allocation3 + $0xe1] sm:$0xff] %vm1189_vm4, %v4567_v47 }
 0x59d   : > { %vm4593_vm8 = vcmask 25600   ;;  %v7973_v9 = vmov 0.0  }
 0x59e   : > { %4591 = vst.msk [vmem:[#allocation3] sm:$0xff] %vm1189_vm4, %v7973_v9 }
 0x59f   : > { %4592 = vst.msk [vmem:[#allocation3 + $0x8] sm:$0xff] %vm1189_vm4, %v7973_v9 }
 0x5a0   : > { %4594 = vst.msk [vmem:[#allocation3 + $0x10] sm:$0x3] %vm4593_vm8, %v7973_v9 }
 0x5a1 PF: > { %4597 = sbr.rel (%p7364_p10) target bundleno = 1450 (0x5aa), region = 88 }
 0x5a6   : > { %vm4601_vm9 = vcmask 25600   ;;  %v7974_v23 = vmov 0.0  }
 0x5a7   : > { %4599 = vst.msk [vmem:[#allocation3 + $0xd8] sm:$0xff] %vm1189_vm4, %v7974_v23 }
 0x5a8   : > { %4600 = vst.msk [vmem:[#allocation3 + $0xe0] sm:$0xff] %vm1189_vm4, %v7974_v23 }
 0x5a9   : > { %4602 = vst.msk [vmem:[#allocation3 + $0xe8] sm:$0x3] %vm4601_vm9, %v7974_v23 }
 0x5aa PF: > { %v7575_v22 = vld [vmem:[%s11798_s6 + $0x4] sm:$0xf]  ;;  %vm4686_vm10 = vcmask 1043456   ;;  %v4619_v28 = vld [vmem:[%s11798_s6] sm:$0xf]  ;;  %v4620_v50 = vld [vmem:[#allocation3 + $0x1] sm:$0xff] }
 0x5ab   : > { %7576 = vmatpush.msk.msrb.mxu1 %vm4686_vm10, %v7575_v22  ;;  %7593 = vmatpush.msk.msrb.mxu2 %vm4686_vm10, %v4619_v28  ;;  %v4603_v15 = vld [vmem:[#allocation3] sm:$0xff]  ;;  %v7646_v7 = vld [vmem:[%s11798_s6 + $0x10] sm:$0xf]  ;;  %v12034_v31 = vld [vmem:[#allocation22_spill] sm:$0xff] }
 0x5ac   : > { %v7610_v21 = vld [vmem:[%s11798_s6 + $0x8] sm:$0xf]  ;;  %7577 = vmatmul.msk.f32.vlgmr.msrb.gmra.mxu1 %vm1189_vm4, %v4620_v50  ;;  %7594 = vmatmul.msk.f32.vlgmr.msrb.gmra.mxu2 %vm1189_vm4, %v4603_v15  ;;  %v7628_v36 = vld [vmem:[%s11798_s6 + $0xc] sm:$0xf]  ;;  %6941 = vst [vmem:[#allocation1] ss:$4 sm:$0xff] %v12034_v31 }
 0x5ad   : > { %v4871_v61 = vld [vmem:[#allocation3 + $0x2] sm:$0xff]  ;;  %7647 = vmatpush.msk.msra.mxu2 %vm4686_vm10, %v7646_v7  ;;  %7611 = vmatpush.msk.msrb.mxu3 %vm4686_vm10, %v7610_v21  ;;  %v12035_v14 = vld [vmem:[#allocation23_spill] sm:$0xff]  ;;  %v12038_v62 = vld [vmem:[#allocation26_spill] sm:$0xff] }
 0x5ae   : > { %6943 = vst [vmem:[#allocation1 + $0x1] ss:$4 sm:$0xff] %v12035_v14  ;;  %7612 = vmatmul.msk.f32.vlgmr.msrb.gmra.mxu3 %vm1189_vm4, %v4871_v61  ;;  %7629 = vmatpush.msk.msra.mxu1 %vm4686_vm10, %v7628_v36  ;;  %v12036_v34 = vld [vmem:[#allocation24_spill] sm:$0xff]  ;;  %v12037_v16 = vld [vmem:[#allocation25_spill] sm:$0xff]  ;;  %v12039_v25 = vld [vmem:[#allocation27_spill] sm:$0xff] }
 0x5af   : > { %6945 = vst [vmem:[#allocation1 + $0x2] ss:$4 sm:$0xff] %v12036_v34  ;;  %v4621_v0 = vld [vmem:[#allocation3 + $0x9] sm:$0xff]  ;;  %v12040_v52 = vld [vmem:[#allocation28_spill] sm:$0xff]  ;;  %v10464_v20 = vld [vmem:[#allocation3 + $0x18] sm:$0xff] }
 0x5b0   : > { %6947 = vst [vmem:[#allocation1 + $0x3] ss:$4 sm:$0xff] %v12037_v16  ;;  %v4604_v45 = vld [vmem:[#allocation3 + $0x8] sm:$0xff]  ;;  %v10462_v18 = vld [vmem:[#allocation3 + $0x19] sm:$0xff]  ;;  %v10490_v10 = vld [vmem:[#allocation3 + $0x31] sm:$0xff] }
 0x5b1   : > { %6949 = vst [vmem:[#allocation1 + $0x20] ss:$4 sm:$0xff] %v12038_v62  ;;  %v4872_v46 = vld [vmem:[#allocation3 + $0xa] sm:$0xff]  ;;  %v10466_v43 = vld [vmem:[#allocation3 + $0x1a] sm:$0xff]  ;;  %v10478_v63 = vld [vmem:[#allocation3 + $0x22] sm:$0xff] }
 0x5b2   : > { %6951 = vst [vmem:[#allocation1 + $0x21] ss:$4 sm:$0xff] %v12039_v25  ;;  %v12041_v42 = vld [vmem:[#allocation29_spill] sm:$0xff]  ;;  %v10476_v3 = vld [vmem:[#allocation3 + $0x20] sm:$0xff]  ;;  %v10492_v8 = vld [vmem:[#allocation3 + $0x30] sm:$0xff] }
 0x5b3   : > { %6953 = vst [vmem:[#allocation1 + $0x22] ss:$4 sm:$0xff] %v12040_v52  ;;  %v10474_v59 = vld [vmem:[#allocation3 + $0x21] sm:$0xff]  ;;  %v7664_v38 = vld [vmem:[%s11798_s6 + $0x14] sm:$0xf]  ;;  %v10494_v40 = vld [vmem:[#allocation3 + $0x32] sm:$0xff] }
 0x5b4   : > { %6955 = vst [vmem:[#allocation1 + $0x23] ss:$4 sm:$0xff] %v12041_v42  ;;  %7578 = vmatmul.msk.f32.gmra.mxu1 %vm1189_vm4, %v4621_v0  ;;  %7595 = vmatmul.msk.f32.gmra.mxu2 %vm1189_vm4, %v4604_v45  ;;  %v10502_v24 = vld [vmem:[#allocation3 + $0x39] sm:$0xff]  ;;  %v10514_v27 = vld [vmem:[#allocation3 + $0x49] sm:$0xff]  ;;  %v10526_v58 = vld [vmem:[#allocation3 + $0x51] sm:$0xff] }
 0x5b5   : > { %7665 = vmatpush.msk.msra.mxu3 %vm4686_vm10, %v7664_v38  ;;  %v10504_v51 = vld [vmem:[#allocation3 + $0x38] sm:$0xff]  ;;  %v10516_v53 = vld [vmem:[#allocation3 + $0x48] sm:$0xff]  ;;  %v10528_v37 = vld [vmem:[#allocation3 + $0x50] sm:$0xff] }
 0x5b6   : > { %7613 = vmatmul.msk.f32.gmra.mxu3 %vm1189_vm4, %v4872_v46  ;;  %v10506_v35 = vld [vmem:[#allocation3 + $0x3a] sm:$0xff]  ;;  %v10518_v56 = vld [vmem:[#allocation3 + $0x4a] sm:$0xff]  ;;  %v10530_v54 = vld [vmem:[#allocation3 + $0x52] sm:$0xff] }
 0x5b7   : > { %v10538_v29 = vld [vmem:[#allocation3 + $0x61] sm:$0xff]  ;;  %v10550_v17 = vld [vmem:[#allocation3 + $0x69] sm:$0xff]  ;;  %v10562_v4 = vld [vmem:[#allocation3 + $0x79] sm:$0xff] }
 0x5b8   : > { %v10540_v60 = vld [vmem:[#allocation3 + $0x60] sm:$0xff]  ;;  %v10552_v26 = vld [vmem:[#allocation3 + $0x68] sm:$0xff]  ;;  %v10564_v32 = vld [vmem:[#allocation3 + $0x78] sm:$0xff] }
 0x5b9   : > { %v10542_v48 = vld [vmem:[#allocation3 + $0x62] sm:$0xff]  ;;  %v10554_v57 = vld [vmem:[#allocation3 + $0x6a] sm:$0xff]  ;;  %v10566_v19 = vld [vmem:[#allocation3 + $0x7a] sm:$0xff] }
 0x5ba   : > { %v10574_v1 = vld [vmem:[#allocation3 + $0x81] sm:$0xff]  ;;  %v10586_v2 = vld [vmem:[#allocation3 + $0x91] sm:$0xff]  ;;  %v10605_v11 = vld [vmem:[#allocation3 + $0x99] sm:$0xff] }
 0x5bb   : > { %v10576_v5 = vld [vmem:[#allocation3 + $0x80] sm:$0xff]  ;;  %v10588_v33 = vld [vmem:[#allocation3 + $0x90] sm:$0xff]  ;;  %v7718_v41 = vld [vmem:[%s11798_s6 + $0x20] sm:$0xf] }
 0x5bc   : > { %7579 = vmatmul.msk.f32.gmra.mxu1 %vm1189_vm4, %v10462_v18  ;;  %7596 = vmatmul.msk.f32.gmra.mxu2 %vm1189_vm4, %v10464_v20  ;;  %v10578_v39 = vld [vmem:[#allocation3 + $0x82] sm:$0xff]  ;;  %v10590_v13 = vld [vmem:[#allocation3 + $0x92] sm:$0xff]  ;;  %v10610_v6 = vld [vmem:[#allocation3 + $0x9a] sm:$0xff] }
 0x5bd   : > { %7719 = vmatpush.msk.msrb.mxu2 %vm4686_vm10, %v7718_v41  ;;  %v7700_v55 = vld [vmem:[%s11798_s6 + $0x1c] sm:$0xf]  ;;  %v10607_v12 = vld [vmem:[#allocation3 + $0x98] sm:$0xff]  ;;  %v7682_v44 = vld [vmem:[%s11798_s6 + $0x18] sm:$0xf] }
 0x5be   : > { %7614 = vmatmul.msk.f32.gmra.mxu3 %vm1189_vm4, %v10466_v43  ;;  %7701 = vmatpush.msk.msrb.mxu1 %vm4686_vm10, %v7700_v55  ;;  %v10624_v49 = vld [vmem:[#allocation3 + $0xa9] sm:$0xff]  ;;  %v10638_v9 = vld [vmem:[#allocation3 + $0xb1] sm:$0xff] }
 0x5bf   : > { %7683 = vmatpush.msk.msrb.mxu0 %vm4686_vm10, %v7682_v44  ;;  %v10626_v30 = vld [vmem:[#allocation3 + $0xa8] sm:$0xff]  ;;  %v10640_v23 = vld [vmem:[#allocation3 + $0xb0] sm:$0xff]  ;;  %v6839_v38 = vld [vmem:[%s11800_s8] sm:$0xf] }
 0x5c0   : > { %7684 = vmatmul.msk.f32.vlgmr.msrb.gmra.mxu0 %vm1189_vm4, %v10492_v8  ;;  %v10628_v47 = vld [vmem:[#allocation3 + $0xaa] sm:$0xff]  ;;  %v10642_v22 = vld [vmem:[#allocation3 + $0xb2] sm:$0xff] }
 0x5c1   : > { %7769 = vmatpush.msk.msra.mxu0 %vm4686_vm10, %v6839_v38 }
 0x5c4   : > { %7580 = vmatmul.msk.f32.gmra.mxu1 %vm1189_vm4, %v10474_v59  ;;  %7597 = vmatmul.msk.f32.gmra.mxu2 %vm1189_vm4, %v10476_v3 }
 0x5c6   : > { %7615 = vmatmul.msk.f32.gmra.mxu3 %vm1189_vm4, %v10478_v63 }
 0x5c8   : > { %7685 = vmatmul.msk.f32.gmra.mxu0 %vm1189_vm4, %v10504_v51 }
 0x5cc   : > { %7581 = vmatmul.msk.f32.gmra.mxu1 %vm1189_vm4, %v10490_v10  ;;  %7598 = vmatmul.msk.f32.gmra.mxu2 %vm1189_vm4, %v10492_v8 }
 0x5ce   : > { %7616 = vmatmul.msk.f32.gmra.mxu3 %vm1189_vm4, %v10494_v40 }
 0x5d0   : > { %7686 = vmatmul.msk.f32.gmra.mxu0 %vm1189_vm4, %v10516_v53 }
 0x5d4   : > { %7582 = vmatmul.msk.f32.gmra.mxu1 %vm1189_vm4, %v10502_v24  ;;  %7599 = vmatmul.msk.f32.gmra.mxu2 %vm1189_vm4, %v10504_v51 }
 0x5d6   : > { %7617 = vmatmul.msk.f32.gmra.mxu3 %vm1189_vm4, %v10506_v35 }
 0x5d8   : > { %7687 = vmatmul.msk.f32.gmra.mxu0 %vm1189_vm4, %v10528_v37 }
 0x5dc   : > { %7583 = vmatmul.msk.f32.gmra.mxu1 %vm1189_vm4, %v10514_v27  ;;  %7600 = vmatmul.msk.f32.gmra.mxu2 %vm1189_vm4, %v10516_v53 }
 0x5de   : > { %7618 = vmatmul.msk.f32.gmra.mxu3 %vm1189_vm4, %v10518_v56 }
 0x5e0   : > { %7688 = vmatmul.msk.f32.gmra.mxu0 %vm1189_vm4, %v10540_v60 }
 0x5e4   : > { %7584 = vmatmul.msk.f32.gmra.mxu1 %vm1189_vm4, %v10526_v58  ;;  %7601 = vmatmul.msk.f32.gmra.mxu2 %vm1189_vm4, %v10528_v37 }
 0x5e6   : > { %7619 = vmatmul.msk.f32.gmra.mxu3 %vm1189_vm4, %v10530_v54 }
 0x5e8   : > { %7689 = vmatmul.msk.f32.gmra.mxu0 %vm1189_vm4, %v10552_v26 }
 0x5ec   : > { %7585 = vmatmul.msk.f32.gmra.mxu1 %vm1189_vm4, %v10538_v29  ;;  %7602 = vmatmul.msk.f32.gmra.mxu2 %vm1189_vm4, %v10540_v60 }
 0x5ee   : > { %7620 = vmatmul.msk.f32.gmra.mxu3 %vm1189_vm4, %v10542_v48 }
 0x5f0   : > { %7690 = vmatmul.msk.f32.gmra.mxu0 %vm1189_vm4, %v10564_v32 }
 0x5f4   : > { %7586 = vmatmul.msk.f32.gmra.mxu1 %vm1189_vm4, %v10550_v17  ;;  %7603 = vmatmul.msk.f32.gmra.mxu2 %vm1189_vm4, %v10552_v26 }
 0x5f6   : > { %7621 = vmatmul.msk.f32.gmra.mxu3 %vm1189_vm4, %v10554_v57 }
 0x5f8   : > { %7691 = vmatmul.msk.f32.gmra.mxu0 %vm1189_vm4, %v10576_v5 }
 0x5fc   : > { %7587 = vmatmul.msk.f32.gmra.mxu1 %vm1189_vm4, %v10562_v4  ;;  %7604 = vmatmul.msk.f32.gmra.mxu2 %vm1189_vm4, %v10564_v32 }
 0x5fe   : > { %7622 = vmatmul.msk.f32.gmra.mxu3 %vm1189_vm4, %v10566_v19 }
 0x600   : > { %7692 = vmatmul.msk.f32.gmra.mxu0 %vm1189_vm4, %v10588_v33 }
 0x604   : > { %7588 = vmatmul.msk.f32.gmra.mxu1 %vm1189_vm4, %v10574_v1  ;;  %7605 = vmatmul.msk.f32.gmra.mxu2 %vm1189_vm4, %v10576_v5 }
 0x606   : > { %7623 = vmatmul.msk.f32.gmra.mxu3 %vm1189_vm4, %v10578_v39 }
 0x608   : > { %7693 = vmatmul.msk.f32.gmra.mxu0 %vm1189_vm4, %v10607_v12 }
 0x60c   : > { %7589 = vmatmul.msk.f32.gmra.mxu1 %vm1189_vm4, %v10586_v2  ;;  %7606 = vmatmul.msk.f32.gmra.mxu2 %vm1189_vm4, %v10588_v33 }
 0x60e   : > { %7624 = vmatmul.msk.f32.gmra.mxu3 %vm1189_vm4, %v10590_v13 }
 0x610   : > { %7694 = vmatmul.msk.f32.gmra.mxu0 %vm1189_vm4, %v10626_v30 }
 0x614   : > { %7590 = vmatmul.msk.f32.gmra.mxu1 %vm1189_vm4, %v10605_v11  ;;  %7607 = vmatmul.msk.f32.gmra.mxu2 %vm1189_vm4, %v10607_v12 }
 0x616   : > { %7625 = vmatmul.msk.f32.gmra.mxu3 %vm1189_vm4, %v10610_v6 }
 0x618   : > { %7695 = vmatmul.msk.f32.gmra.mxu0 %vm1189_vm4, %v10640_v23 }
 0x61c   : > { %7591 = vmatmul.msk.f32.gmra.mxu1 %vm1189_vm4, %v10624_v49  ;;  %7608 = vmatmul.msk.f32.gmra.mxu2 %vm1189_vm4, %v10626_v30 }
 0x61e   : > { %7626 = vmatmul.msk.f32.gmra.mxu3 %vm1189_vm4, %v10628_v47 }
 0x624   : > { %7592 = vmatmul.msk.f32.gmra.mxu1 %vm1189_vm4, %v10638_v9  ;;  %7609 = vmatmul.msk.f32.gmra.mxu2 %vm1189_vm4, %v10640_v23 }
 0x626   : > { %7627 = vmatmul.msk.f32.gmra.mxu3 %vm1189_vm4, %v10642_v22 }
 0x629   : > { %v4707_v28 = vpop.f32.mrf.mxu1 }
 0x62c   : > { %7630 = vmatmul.msk.f32.vlgmr.msra.gmra.mxu1 %vm1189_vm4, %v10464_v20  ;;  %7648 = vmatmul.msk.f32.vlgmr.msra.gmra.mxu2 %vm1189_vm4, %v10462_v18 }
 0x62e   : > { %7666 = vmatmul.msk.f32.vlgmr.msra.gmra.mxu3 %vm1189_vm4, %v10466_v43 }
 0x62f   : > { %v4823_v50 = vpop.f32.mrf.mxu2 }
 0x630   : > { %v4824_v15 = vadd.f32 %v4823_v50, %v4707_v28 }
 0x631   : > { %v4710_v7 = vpop.f32.mrf.mxu1  ;;  %v4957_v21 = vpop.f32.mrf.mxu3 }
 0x632   : > { %v10660_v61 = vadd.f32 %v4957_v21, %v4824_v15 }
 0x634   : > { %7631 = vmatmul.msk.f32.gmra.mxu1 %vm1189_vm4, %v10476_v3  ;;  %7649 = vmatmul.msk.f32.gmra.mxu2 %vm1189_vm4, %v10474_v59  ;;  %v6840_v59 = vld [vmem:[%s11801_s9] sm:$0xf] }
 0x635   : > { %7752 = vmatpush.msk.msrb.mxu3 %vm4686_vm10, %v6840_v59 }
 0x636   : > { %7667 = vmatmul.msk.f32.gmra.mxu3 %vm1189_vm4, %v10478_v63 }
 0x637   : > { %v4826_v36 = vpop.f32.mrf.mxu2 }
 0x638   : > { %v4827_v31 = vadd.f32 %v4826_v36, %v4710_v7 }
 0x639   : > { %v4713_v14 = vpop.f32.mrf.mxu1  ;;  %v4960_v34 = vpop.f32.mrf.mxu3 }
 0x63a   : > { %v10670_v16 = vadd.f32 %v4960_v34, %v4827_v31 }
 0x63c   : > { %7632 = vmatmul.msk.f32.gmra.mxu1 %vm1189_vm4, %v10492_v8  ;;  %7650 = vmatmul.msk.f32.gmra.mxu2 %vm1189_vm4, %v10490_v10 }
 0x63e   : > { %7668 = vmatmul.msk.f32.gmra.mxu3 %vm1189_vm4, %v10494_v40 }
 0x63f   : > { %v4829_v0 = vpop.f32.mrf.mxu2 }
 0x640   : > { %v4830_v45 = vadd.f32 %v4829_v0, %v4713_v14 }
 0x641   : > { %v4716_v62 = vpop.f32.mrf.mxu1  ;;  %v4963_v25 = vpop.f32.mrf.mxu3 }
 0x642   : > { %v10680_v52 = vadd.f32 %v4963_v25, %v4830_v45 }
 0x644   : > { %7633 = vmatmul.msk.f32.gmra.mxu1 %vm1189_vm4, %v10504_v51  ;;  %7651 = vmatmul.msk.f32.gmra.mxu2 %vm1189_vm4, %v10502_v24 }
 0x646   : > { %7669 = vmatmul.msk.f32.gmra.mxu3 %vm1189_vm4, %v10506_v35 }
 0x647   : > { %v4832_v46 = vpop.f32.mrf.mxu2 }
 0x648   : > { %v4833_v42 = vadd.f32 %v4832_v46, %v4716_v62 }
 0x649   : > { %v4719_v18 = vpop.f32.mrf.mxu1  ;;  %v4966_v20 = vpop.f32.mrf.mxu3 }
 0x64a   : > { %v10690_v43 = vadd.f32 %v4966_v20, %v4833_v42 }
 0x64c   : > { %7634 = vmatmul.msk.f32.gmra.mxu1 %vm1189_vm4, %v10516_v53  ;;  %7652 = vmatmul.msk.f32.gmra.mxu2 %vm1189_vm4, %v10514_v27 }
 0x64e   : > { %7670 = vmatmul.msk.f32.gmra.mxu3 %vm1189_vm4, %v10518_v56 }
 0x64f   : > { %v4835_v3 = vpop.f32.mrf.mxu2 }
 0x650   : > { %v4836_v63 = vadd.f32 %v4835_v3, %v4719_v18 }
 0x651   : > { %v4722_v8 = vpop.f32.mrf.mxu1  ;;  %v4969_v51 = vpop.f32.mrf.mxu3 }
 0x652   : > { %v10708_v53 = vadd.f32 %v4969_v51, %v4836_v63 }
 0x654   : > { %7635 = vmatmul.msk.f32.gmra.mxu1 %vm1189_vm4, %v10528_v37  ;;  %7653 = vmatmul.msk.f32.gmra.mxu2 %vm1189_vm4, %v10526_v58 }
 0x656   : > { %7671 = vmatmul.msk.f32.gmra.mxu3 %vm1189_vm4, %v10530_v54 }
 0x657   : > { %v4838_v41 = vpop.f32.mrf.mxu2 }
 0x658   : > { %v4839_v55 = vadd.f32 %v4838_v41, %v4722_v8 }
 0x659   : > { %v4725_v44 = vpop.f32.mrf.mxu1  ;;  %v4972_v28 = vpop.f32.mrf.mxu3 }
 0x65a   : > { %v10718_v50 = vadd.f32 %v4972_v28, %v4839_v55 }
 0x65c   : > { %7636 = vmatmul.msk.f32.gmra.mxu1 %vm1189_vm4, %v10540_v60  ;;  %7654 = vmatmul.msk.f32.gmra.mxu2 %vm1189_vm4, %v10538_v29 }
 0x65e   : > { %7672 = vmatmul.msk.f32.gmra.mxu3 %vm1189_vm4, %v10542_v48 }
 0x65f   : > { %v4841_v37 = vpop.f32.mrf.mxu2 }
 0x660   : > { %v4842_v15 = vadd.f32 %v4841_v37, %v4725_v44 }
 0x661   : > { %v4728_v7 = vpop.f32.mrf.mxu1  ;;  %v4975_v21 = vpop.f32.mrf.mxu3 }
 0x662   : > { %v10728_v36 = vadd.f32 %v4975_v21, %v4842_v15 }
 0x664   : > { %7637 = vmatmul.msk.f32.gmra.mxu1 %vm1189_vm4, %v10552_v26  ;;  %7655 = vmatmul.msk.f32.gmra.mxu2 %vm1189_vm4, %v10550_v17 }
 0x666   : > { %7673 = vmatmul.msk.f32.gmra.mxu3 %vm1189_vm4, %v10554_v57 }
 0x667   : > { %v4844_v60 = vpop.f32.mrf.mxu2 }
 0x668   : > { %v4845_v31 = vadd.f32 %v4844_v60, %v4728_v7 }
 0x669   : > { %v4731_v14 = vpop.f32.mrf.mxu1  ;;  %v4978_v34 = vpop.f32.mrf.mxu3 }
 0x66a   : > { %v10738_v0 = vadd.f32 %v4978_v34, %v4845_v31  ;;  %v10786_v34 = vpop.f32.mrf.mxu0 }
 0x66c   : > { %7638 = vmatmul.msk.f32.gmra.mxu1 %vm1189_vm4, %v10564_v32  ;;  %7656 = vmatmul.msk.f32.gmra.mxu2 %vm1189_vm4, %v10562_v4  ;;  %v5485_v32 = vld [vmem:[#allocation3 + $0xc0] sm:$0xff] }
 0x66d   : > { %7696 = vmatmul.msk.f32.gmra.mxu0 %vm1189_vm4, %v5485_v32 }
 0x66e   : > { %7674 = vmatmul.msk.f32.gmra.mxu3 %vm1189_vm4, %v10566_v19 }
 0x66f   : > { %v4847_v26 = vpop.f32.mrf.mxu2 }
 0x670   : > { %v4848_v45 = vadd.f32 %v4847_v26, %v4731_v14 }
 0x671   : > { %v4734_v62 = vpop.f32.mrf.mxu1  ;;  %v4981_v25 = vpop.f32.mrf.mxu3 }
 0x672   : > { %v10748_v46 = vadd.f32 %v4981_v25, %v4848_v45  ;;  %v10794_v25 = vld [vmem:[#allocation3 + $0xc1] sm:$0xff] }
 0x674   : > { %7639 = vmatmul.msk.f32.gmra.mxu1 %vm1189_vm4, %v10576_v5  ;;  %7657 = vmatmul.msk.f32.gmra.mxu2 %vm1189_vm4, %v10574_v1  ;;  %v5486_v5 = vld [vmem:[#allocation3 + $0xc8] sm:$0xff] }
 0x675   : > { %7697 = vmatmul.msk.f32.gmra.mxu0 %vm1189_vm4, %v5486_v5 }
 0x676   : > { %7675 = vmatmul.msk.f32.gmra.mxu3 %vm1189_vm4, %v10578_v39 }
 0x677   : > { %v4850_v42 = vpop.f32.mrf.mxu2 }
 0x678   : > { %v4851_v18 = vadd.f32 %v4850_v42, %v4734_v62 }
 0x679   : > { %v4737_v20 = vpop.f32.mrf.mxu1  ;;  %v4984_v59 = vpop.f32.mrf.mxu3 }
 0x67a   : > { %v10757_v3 = vadd.f32 %v4984_v59, %v4851_v18  ;;  %v10798_v18 = vld [vmem:[#allocation3 + $0xc2] sm:$0xff] }
 0x67c   : > { %7640 = vmatmul.msk.f32.gmra.mxu1 %vm1189_vm4, %v10588_v33  ;;  %7658 = vmatmul.msk.f32.gmra.mxu2 %vm1189_vm4, %v10586_v2  ;;  %v5487_v33 = vld [vmem:[#allocation3 + $0xd8] sm:$0xff] }
 0x67d   : > { %7698 = vmatmul.msk.f32.gmra.mxu0 %vm1189_vm4, %v5487_v33  ;;  %v10809_v33 = vld [vmem:[#allocation3 + $0xca] sm:$0xff] }
 0x67e   : > { %7676 = vmatmul.msk.f32.gmra.mxu3 %vm1189_vm4, %v10590_v13 }
 0x67f   : > { %v4853_v63 = vpop.f32.mrf.mxu2 }
 0x680   : > { %v4854_v38 = vadd.f32 %v4853_v63, %v4737_v20 }
 0x681   : > { %v4740_v8 = vpop.f32.mrf.mxu1  ;;  %v4987_v51 = vpop.f32.mrf.mxu3 }
 0x682   : > { %v10766_v41 = vadd.f32 %v4987_v51, %v4854_v38 }
 0x684   : > { %7641 = vmatmul.msk.f32.gmra.mxu1 %vm1189_vm4, %v10607_v12  ;;  %7659 = vmatmul.msk.f32.gmra.mxu2 %vm1189_vm4, %v10605_v11  ;;  %v5488_v12 = vld [vmem:[#allocation3 + $0xe0] sm:$0xff] }
 0x685   : > { %7699 = vmatmul.msk.f32.gmra.mxu0 %vm1189_vm4, %v5488_v12 }
 0x686   : > { %7677 = vmatmul.msk.f32.gmra.mxu3 %vm1189_vm4, %v10610_v6 }
 0x687   : > { %v4856_v55 = vpop.f32.mrf.mxu2 }
 0x688   : > { %v4857_v44 = vadd.f32 %v4856_v55, %v4740_v8  ;;  %v10805_v8 = vld [vmem:[#allocation3 + $0xc9] sm:$0xff] }
 0x689   : > { %v4743_v28 = vpop.f32.mrf.mxu1  ;;  %v4990_v37 = vpop.f32.mrf.mxu3 }
 0x68a   : > { %v10775_v15 = vadd.f32 %v4990_v37, %v4857_v44 }
 0x68c   : > { %7642 = vmatmul.msk.f32.gmra.mxu1 %vm1189_vm4, %v10626_v30  ;;  %7660 = vmatmul.msk.f32.gmra.mxu2 %vm1189_vm4, %v10624_v49 }
 0x68e   : > { %7678 = vmatmul.msk.f32.gmra.mxu3 %vm1189_vm4, %v10628_v47 }
 0x68f   : > { %v4859_v7 = vpop.f32.mrf.mxu2 }
 0x690   : > { %v4860_v21 = vadd.f32 %v4859_v7, %v4743_v28  ;;  %v12042_v7 = vld [vmem:[#allocation6_spill] sm:$0xff] }
 0x691   : > { %v4746_v60 = vpop.f32.mrf.mxu1  ;;  %v4993_v31 = vpop.f32.mrf.mxu3 }
 0x692   : > { %v10784_v14 = vadd.f32 %v4993_v31, %v4860_v21 }
 0x694   : > { %7643 = vmatmul.msk.f32.gmra.mxu1 %vm1189_vm4, %v10640_v23  ;;  %7661 = vmatmul.msk.f32.gmra.mxu2 %vm1189_vm4, %v10638_v9  ;;  %v5562_v23 = vpop.f32.mrf.mxu0 }
 0x696   : > { %7679 = vmatmul.msk.f32.gmra.mxu3 %vm1189_vm4, %v10642_v22 }
 0x697   : > { %v4862_v30 = vpop.f32.mrf.mxu2 }
 0x698   : > { %v4863_v26 = vadd.f32 %v4862_v30, %v4746_v60 }
 0x699   : > { %v4749_v45 = vpop.f32.mrf.mxu1  ;;  %v4996_v62 = vpop.f32.mrf.mxu3 }
 0x69a   : > { %v10796_v42 = vadd.f32 %v4996_v62, %v4863_v26 }
 0x69c   : > { %7644 = vmatmul.msk.f32.gmra.mxu1 %vm1189_vm4, %v5485_v32  ;;  %7662 = vmatmul.msk.f32.gmra.mxu2 %vm1189_vm4, %v10794_v25  ;;  %v10816_v32 = vpop.f32.mrf.mxu0 }
 0x69e   : > { %7680 = vmatmul.msk.f32.gmra.mxu3 %vm1189_vm4, %v10798_v18 }
 0x69f   : > { %v4865_v20 = vpop.f32.mrf.mxu2 }
 0x6a0   : > { %v4866_v59 = vadd.f32 %v4865_v20, %v4749_v45 }
 0x6a1   : > { %v4752_v63 = vpop.f32.mrf.mxu1  ;;  %v4999_v38 = vpop.f32.mrf.mxu3 }
 0x6a2   : > { %v10807_v51 = vadd.f32 %v4999_v38, %v4866_v59 }
 0x6a4   : > { %7645 = vmatmul.msk.f32.gmra.mxu1 %vm1189_vm4, %v5486_v5  ;;  %7663 = vmatmul.msk.f32.gmra.mxu2 %vm1189_vm4, %v10805_v8  ;;  %v10829_v31 = vpop.f32.mrf.mxu0 }
 0x6a6   : > { %7681 = vmatmul.msk.f32.gmra.mxu3 %vm1189_vm4, %v10809_v33 }
 0x6a7   : > { %v4868_v55 = vpop.f32.mrf.mxu2 }
 0x6a8   : > { %v4869_v44 = vadd.f32 %v4868_v55, %v4752_v63 }
 0x6a9   : > { %v5002_v28 = vpop.f32.mrf.mxu3  ;;  %v5108_v37 = vpop.f32.mrf.mxu1 }
 0x6aa   : > { %v10818_v12 = vadd.f32 %v5002_v28, %v4869_v44  ;;  %v5156_v5 = vadd.f32 %v5108_v37, %v10660_v61 }
 0x6ac   : > { %7702 = vmatmul.msk.f32.vlgmr.msrb.gmra.mxu1 %vm1189_vm4, %v10490_v10  ;;  %7720 = vmatmul.msk.f32.vlgmr.msrb.gmra.mxu2 %vm1189_vm4, %v10494_v40  ;;  %v12043_v40 = vld [vmem:[#allocation9_spill] sm:$0xff]  ;;  %v10840_v63 = vpop.f32.mrf.mxu0 }
 0x6ae   : > { %7753 = vmatmul.msk.f32.vlgmr.msrb.gmra.mxu3 %vm1189_vm4, %v12042_v7 }
 0x6af   : > { %v5258_v21 = vpop.f32.mrf.mxu2 }
 0x6b0   : > { %v10827_v60 = vadd.f32 %v5258_v21, %v5156_v5 }
 0x6b1   : > { %v5111_v30 = vpop.f32.mrf.mxu1  ;;  %v10831_v26 = vpop.f32.mrf.mxu3 }
 0x6b2   : > { %v5157_v10 = vadd.f32 %v5111_v30, %v10670_v16 }
 0x6b4   : > { %7703 = vmatmul.msk.f32.gmra.mxu1 %vm1189_vm4, %v10502_v24  ;;  %7721 = vmatmul.msk.f32.gmra.mxu2 %vm1189_vm4, %v10506_v35  ;;  %v12044_v35 = vld [vmem:[#allocation7_spill] sm:$0xff] }
 0x6b6   : > { %7754 = vmatmul.msk.f32.gmra.mxu3 %vm1189_vm4, %v12043_v40  ;;  %v6956_v40 = vld.sshfl [vmem:[#allocation1] sm:$0xff pattern:$0x73625140] }
 0x6b7   : > { %v5261_v61 = vpop.f32.mrf.mxu2  ;;  %7770 = vmatmul.msk.f32.vlgmr.msra.gmra.mxu0 %vm1189_vm4, %v6956_v40  ;;  %v12057_v40 = vld [vmem:[#allocation38_spill] sm:$0xff] }
 0x6b8   : > { %v5307_v45 = vadd.f32 %v5261_v61, %v5157_v10 }
 0x6b9   : > { %v5114_v62 = vpop.f32.mrf.mxu1  ;;  %v5411_v20 = vpop.f32.mrf.mxu3 }
 0x6ba   : > { %v5457_v59 = vadd.f32 %v5411_v20, %v5307_v45  ;;  %v5158_v24 = vadd.f32 %v5114_v62, %v10680_v52  ;;  %v12045_v52 = vld [vmem:[#allocation10_spill] sm:$0xff]  ;;  %v12047_v45 = vld [vmem:[#allocation31_spill] sm:$0xff] }
 0x6bb   : > { %6958 = vst [vmem:[#allocation1] ss:$4 sm:$0xff] %v12047_v45 }
 0x6bc   : > { %v10842_v38 = vadd.f32 %v5562_v23, %v5457_v59  ;;  %7704 = vmatmul.msk.f32.gmra.mxu1 %vm1189_vm4, %v10514_v27  ;;  %7722 = vmatmul.msk.f32.gmra.mxu2 %vm1189_vm4, %v10518_v56  ;;  %v10857_v27 = vpop.f32.mrf.mxu0 }
 0x6be   : > { %7755 = vmatmul.msk.f32.gmra.mxu3 %vm1189_vm4, %v12044_v35  ;;  %v12051_v35 = vld [vmem:[#allocation11_spill] sm:$0xff] }
 0x6bf   : > { %v5264_v16 = vpop.f32.mrf.mxu2 }
 0x6c0   : > { %v5308_v55 = vadd.f32 %v5264_v16, %v5158_v24 }
 0x6c1   : > { %v5117_v44 = vpop.f32.mrf.mxu1  ;;  %v5414_v28 = vpop.f32.mrf.mxu3 }
 0x6c2   : > { %v10851_v37 = vadd.f32 %v5414_v28, %v5308_v55  ;;  %v5159_v56 = vadd.f32 %v5117_v44, %v10690_v43  ;;  %v12046_v43 = vld [vmem:[#allocation8_spill] sm:$0xff]  ;;  %v6957_v55 = vld.sshfl [vmem:[#allocation1 + $0x20] sm:$0xff pattern:$0x73625140] }
 0x6c3   : > { %7771 = vmatmul.msk.f32.gmra.mxu0 %vm1189_vm4, %v6957_v55 }
 0x6c4   : > { %7705 = vmatmul.msk.f32.gmra.mxu1 %vm1189_vm4, %v10526_v58  ;;  %7723 = vmatmul.msk.f32.gmra.mxu2 %vm1189_vm4, %v10530_v54  ;;  %v10869_v54 = vpop.f32.mrf.mxu0 }
 0x6c6   : > { %7756 = vmatmul.msk.f32.gmra.mxu3 %vm1189_vm4, %v12045_v52 }
 0x6c7   : > { %v5267_v23 = vpop.f32.mrf.mxu2 }
 0x6c8   : > { %v5309_v5 = vadd.f32 %v5267_v23, %v5159_v56  ;;  %v12052_v56 = vld [vmem:[#allocation34_spill] sm:$0xff] }
 0x6c9   : > { %v5120_v7 = vpop.f32.mrf.mxu1  ;;  %v5417_v21 = vpop.f32.mrf.mxu3  ;;  %6962 = vst [vmem:[#allocation1 + $0x20] ss:$4 sm:$0xff] %v12052_v56  ;;  %v12063_v56 = vld [vmem:[#allocation43_spill] sm:$0xff] }
 0x6ca   : > { %v10862_v30 = vadd.f32 %v5417_v21, %v5309_v5  ;;  %v5160_v58 = vadd.f32 %v5120_v7, %v10708_v53  ;;  %v12050_v53 = vld [vmem:[#allocation33_spill] sm:$0xff]  ;;  %v12056_v21 = vld [vmem:[#allocation12_spill] sm:$0xff] }
 0x6cb   : > { %6961 = vst [vmem:[#allocation1 + $0x3] ss:$4 sm:$0xff] %v12050_v53 }
 0x6cc   : > { %7706 = vmatmul.msk.f32.gmra.mxu1 %vm1189_vm4, %v10538_v29  ;;  %7724 = vmatmul.msk.f32.gmra.mxu2 %vm1189_vm4, %v10542_v48  ;;  %v12048_v29 = vld [vmem:[#allocation30_spill] sm:$0xff]  ;;  %v12049_v48 = vld [vmem:[#allocation32_spill] sm:$0xff]  ;;  %v10887_v28 = vpop.f32.mrf.mxu0 }
 0x6cd   : > { %6959 = vst [vmem:[#allocation1 + $0x1] ss:$4 sm:$0xff] %v12048_v29 }
 0x6ce   : > { %7757 = vmatmul.msk.f32.gmra.mxu3 %vm1189_vm4, %v12046_v43  ;;  %6960 = vst [vmem:[#allocation1 + $0x2] ss:$4 sm:$0xff] %v12049_v48  ;;  %v12061_v48 = vld [vmem:[#allocation13_spill] sm:$0xff] }
 0x6cf   : > { %v5270_v10 = vpop.f32.mrf.mxu2 }
 0x6d0   : > { %v5310_v61 = vadd.f32 %v5270_v10, %v5160_v58 }
 0x6d1   : > { %v5123_v62 = vpop.f32.mrf.mxu1  ;;  %v5420_v20 = vpop.f32.mrf.mxu3 }
 0x6d2   : > { %v10876_v59 = vadd.f32 %v5420_v20, %v5310_v61  ;;  %v5161_v24 = vadd.f32 %v5123_v62, %v10718_v50  ;;  %v12055_v50 = vld [vmem:[#allocation37_spill] sm:$0xff]  ;;  %v12058_v62 = vld [vmem:[#allocation39_spill] sm:$0xff] }
 0x6d3   : > { %6965 = vst [vmem:[#allocation1 + $0x23] ss:$4 sm:$0xff] %v12055_v50 }
 0x6d4   : > { %7707 = vmatmul.msk.f32.gmra.mxu1 %vm1189_vm4, %v10550_v17  ;;  %7725 = vmatmul.msk.f32.gmra.mxu2 %vm1189_vm4, %v10554_v57  ;;  %v12053_v17 = vld [vmem:[#allocation35_spill] sm:$0xff]  ;;  %v12054_v57 = vld [vmem:[#allocation36_spill] sm:$0xff]  ;;  %v5583_v20 = vpop.f32.mrf.mxu0 }
 0x6d5   : > { %6963 = vst [vmem:[#allocation1 + $0x21] ss:$4 sm:$0xff] %v12053_v17  ;;  %v6966_v43 = vld.sshfl [vmem:[#allocation1] sm:$0xff pattern:$0x73625140]  ;;  %v12066_v17 = vld [vmem:[#allocation14_spill] sm:$0xff] }
 0x6d6   : > { %7758 = vmatmul.msk.f32.gmra.mxu3 %vm1189_vm4, %v12051_v35  ;;  %6964 = vst [vmem:[#allocation1 + $0x22] ss:$4 sm:$0xff] %v12054_v57  ;;  %7772 = vmatmul.msk.f32.gmra.mxu0 %vm1189_vm4, %v6966_v43  ;;  %v12068_v43 = vld [vmem:[#allocation47_spill] sm:$0xff] }
 0x6d7   : > { %v5273_v16 = vpop.f32.mrf.mxu2  ;;  %6968 = vst [vmem:[#allocation1] ss:$4 sm:$0xff] %v12057_v40  ;;  %v12069_v40 = vld [vmem:[#allocation48_spill] sm:$0xff] }
 0x6d8   : > { %v5311_v44 = vadd.f32 %v5273_v16, %v5161_v24  ;;  %6969 = vst [vmem:[#allocation1 + $0x1] ss:$4 sm:$0xff] %v12058_v62  ;;  %v12062_v16 = vld [vmem:[#allocation42_spill] sm:$0xff]  ;;  %v12071_v62 = vld [vmem:[#allocation15_spill] sm:$0xff] }
 0x6d9   : > { %v5126_v52 = vpop.f32.mrf.mxu1  ;;  %v5423_v23 = vpop.f32.mrf.mxu3 }
 0x6da   : > { %v10892_v5 = vadd.f32 %v5423_v23, %v5311_v44  ;;  %v5162_v7 = vadd.f32 %v5126_v52, %v10728_v36  ;;  %v12060_v36 = vld [vmem:[#allocation41_spill] sm:$0xff] }
 0x6db   : > { %6971 = vst [vmem:[#allocation1 + $0x3] ss:$4 sm:$0xff] %v12060_v36 }
 0x6dc   : > { %7708 = vmatmul.msk.f32.gmra.mxu1 %vm1189_vm4, %v10562_v4  ;;  %7726 = vmatmul.msk.f32.gmra.mxu2 %vm1189_vm4, %v10566_v19  ;;  %v12059_v19 = vld [vmem:[#allocation40_spill] sm:$0xff]  ;;  %v5586_v23 = vpop.f32.mrf.mxu0 }
 0x6dd   : > { %6970 = vst [vmem:[#allocation1 + $0x2] ss:$4 sm:$0xff] %v12059_v19  ;;  %v6967_v24 = vld.sshfl [vmem:[#allocation1 + $0x20] sm:$0xff pattern:$0x73625140] }
 0x6de   : > { %7759 = vmatmul.msk.f32.gmra.mxu3 %vm1189_vm4, %v12056_v21  ;;  %7773 = vmatmul.msk.f32.gmra.mxu0 %vm1189_vm4, %v6967_v24  ;;  %6972 = vst [vmem:[#allocation1 + $0x20] ss:$4 sm:$0xff] %v12062_v16 }
 0x6df   : > { %v5276_v58 = vpop.f32.mrf.mxu2  ;;  %6973 = vst [vmem:[#allocation1 + $0x21] ss:$4 sm:$0xff] %v12063_v56 }
 0x6e0   : > { %v5312_v10 = vadd.f32 %v5276_v58, %v5162_v7 }
 0x6e1   : > { %v5129_v61 = vpop.f32.mrf.mxu1  ;;  %v5426_v45 = vpop.f32.mrf.mxu3 }
 0x6e2   : > { %v10906_v4 = vadd.f32 %v5426_v45, %v5312_v10  ;;  %v5163_v29 = vadd.f32 %v5129_v61, %v10738_v0  ;;  %v12065_v0 = vld [vmem:[#allocation45_spill] sm:$0xff] }
 0x6e3   : > { %6975 = vst [vmem:[#allocation1 + $0x23] ss:$4 sm:$0xff] %v12065_v0 }
 0x6e4   : > { %7709 = vmatmul.msk.f32.gmra.mxu1 %vm1189_vm4, %v10574_v1  ;;  %7727 = vmatmul.msk.f32.gmra.mxu2 %vm1189_vm4, %v10578_v39  ;;  %v12064_v39 = vld [vmem:[#allocation44_spill] sm:$0xff]  ;;  %v6976_v50 = vld.sshfl [vmem:[#allocation1] sm:$0xff pattern:$0x73625140]  ;;  %v5589_v45 = vpop.f32.mrf.mxu0 }
 0x6e5   : > { %6974 = vst [vmem:[#allocation1 + $0x22] ss:$4 sm:$0xff] %v12064_v39  ;;  %v12077_v39 = vld [vmem:[#allocation54_spill] sm:$0xff] }
 0x6e6   : > { %7760 = vmatmul.msk.f32.gmra.mxu3 %vm1189_vm4, %v12061_v48  ;;  %7774 = vmatmul.msk.f32.gmra.mxu0 %vm1189_vm4, %v6976_v50  ;;  %6979 = vst [vmem:[#allocation1 + $0x1] ss:$4 sm:$0xff] %v12068_v43  ;;  %v12079_v50 = vld [vmem:[#allocation56_spill] sm:$0xff] }
 0x6e7   : > { %v5279_v53 = vpop.f32.mrf.mxu2  ;;  %6980 = vst [vmem:[#allocation1 + $0x2] ss:$4 sm:$0xff] %v12069_v40  ;;  %v12083_v40 = vld [vmem:[#allocation59_spill] sm:$0xff] }
 0x6e8   : > { %v5313_v35 = vadd.f32 %v5279_v53, %v5163_v29  ;;  %v12072_v29 = vld [vmem:[#allocation50_spill] sm:$0xff]  ;;  %v12073_v53 = vld [vmem:[#allocation51_spill] sm:$0xff] }
 0x6e9   : > { %v5132_v55 = vpop.f32.mrf.mxu1  ;;  %v5429_v44 = vpop.f32.mrf.mxu3 }
 0x6ea   : > { %v5164_v1 = vadd.f32 %v5132_v55, %v10748_v46  ;;  %v10921_v52 = vadd.f32 %v5429_v44, %v5313_v35  ;;  %v12067_v46 = vld [vmem:[#allocation46_spill] sm:$0xff]  ;;  %v12074_v35 = vld [vmem:[#allocation52_spill] sm:$0xff] }
 0x6eb   : > { %6978 = vst [vmem:[#allocation1] ss:$4 sm:$0xff] %v12067_v46  ;;  %v12076_v55 = vld [vmem:[#allocation16_spill] sm:$0xff]  ;;  %v12081_v46 = vld [vmem:[#allocation17_spill] sm:$0xff] }
 0x6ec   : > { %7710 = vmatmul.msk.f32.gmra.mxu1 %vm1189_vm4, %v10586_v2  ;;  %7728 = vmatmul.msk.f32.gmra.mxu2 %vm1189_vm4, %v10590_v13  ;;  %v12070_v13 = vld [vmem:[#allocation49_spill] sm:$0xff]  ;;  %v6977_v36 = vld.sshfl [vmem:[#allocation1 + $0x20] sm:$0xff pattern:$0x73625140] }
 0x6ed   : > { %6981 = vst [vmem:[#allocation1 + $0x3] ss:$4 sm:$0xff] %v12070_v13 }
 0x6ee   : > { %7761 = vmatmul.msk.f32.gmra.mxu3 %vm1189_vm4, %v12066_v17  ;;  %7775 = vmatmul.msk.f32.gmra.mxu0 %vm1189_vm4, %v6977_v36  ;;  %6982 = vst [vmem:[#allocation1 + $0x20] ss:$4 sm:$0xff] %v12072_v29  ;;  %v12078_v17 = vld [vmem:[#allocation55_spill] sm:$0xff]  ;;  %v12086_v36 = vld [vmem:[#allocation18_spill] sm:$0xff] }
 0x6ef   : > { %v5282_v57 = vpop.f32.mrf.mxu2  ;;  %6983 = vst [vmem:[#allocation1 + $0x21] ss:$4 sm:$0xff] %v12073_v53 }
 0x6f0   : > { %v5314_v7 = vadd.f32 %v5282_v57, %v5164_v1  ;;  %6984 = vst [vmem:[#allocation1 + $0x22] ss:$4 sm:$0xff] %v12074_v35  ;;  %v12089_v35 = vld [vmem:[#allocation64_spill] sm:$0xff] }
 0x6f1   : > { %v5135_v21 = vpop.f32.mrf.mxu1  ;;  %v5432_v58 = vpop.f32.mrf.mxu3 }
 0x6f2   : > { %v5165_v2 = vadd.f32 %v5135_v21, %v10757_v3  ;;  %v5464_v10 = vadd.f32 %v5432_v58, %v5314_v7 }
 0x6f4   : > { %v10937_v61 = vadd.f32 %v5583_v20, %v5464_v10  ;;  %7711 = vmatmul.msk.f32.gmra.mxu1 %vm1189_vm4, %v10605_v11  ;;  %7729 = vmatmul.msk.f32.gmra.mxu2 %vm1189_vm4, %v10610_v6  ;;  %v12075_v6 = vld [vmem:[#allocation53_spill] sm:$0xff]  ;;  %v6986_v56 = vld.sshfl [vmem:[#allocation1] sm:$0xff pattern:$0x73625140] }
 0x6f5   : > { %6985 = vst [vmem:[#allocation1 + $0x23] ss:$4 sm:$0xff] %v12075_v6 }
 0x6f6   : > { %7762 = vmatmul.msk.f32.gmra.mxu3 %vm1189_vm4, %v12071_v62  ;;  %7776 = vmatmul.msk.f32.gmra.mxu0 %vm1189_vm4, %v6986_v56  ;;  %6988 = vst [vmem:[#allocation1] ss:$4 sm:$0xff] %v12077_v39  ;;  %v12084_v62 = vld [vmem:[#allocation60_spill] sm:$0xff] }
 0x6f7   : > { %v5285_v19 = vpop.f32.mrf.mxu2  ;;  %6989 = vst [vmem:[#allocation1 + $0x1] ss:$4 sm:$0xff] %v12078_v17  ;;  %v5787_v17 = vld [vmem:[#allocation3 + $0xda] sm:$0xff] }
 0x6f8   : > { %v5315_v3 = vadd.f32 %v5285_v19, %v5165_v2  ;;  %6990 = vst [vmem:[#allocation1 + $0x2] ss:$4 sm:$0xff] %v12079_v50  ;;  %v12095_v50 = vld [vmem:[#allocation85_spill] sm:$0xff] }
 0x6f9   : > { %v5138_v48 = vpop.f32.mrf.mxu1  ;;  %v5435_v20 = vpop.f32.mrf.mxu3 }
 0x6fa   : > { %v5166_v11 = vadd.f32 %v5138_v48, %v10766_v41  ;;  %v5465_v24 = vadd.f32 %v5435_v20, %v5315_v3  ;;  %v5592_v41 = vpop.f32.mrf.mxu0  ;;  %v12087_v48 = vld [vmem:[#allocation62_spill] sm:$0xff] }
 0x6fc   : > { %v10951_v16 = vadd.f32 %v5586_v23, %v5465_v24  ;;  %7712 = vmatmul.msk.f32.gmra.mxu1 %vm1189_vm4, %v10624_v49  ;;  %7730 = vmatmul.msk.f32.gmra.mxu2 %vm1189_vm4, %v10628_v47  ;;  %v12080_v47 = vld [vmem:[#allocation57_spill] sm:$0xff]  ;;  %v6987_v58 = vld.sshfl [vmem:[#allocation1 + $0x20] sm:$0xff pattern:$0x73625140] }
 0x6fd   : > { %6991 = vst [vmem:[#allocation1 + $0x3] ss:$4 sm:$0xff] %v12080_v47 }
 0x6fe   : > { %7763 = vmatmul.msk.f32.gmra.mxu3 %vm1189_vm4, %v12076_v55  ;;  %7777 = vmatmul.msk.f32.gmra.mxu0 %vm1189_vm4, %v6987_v58  ;;  %6993 = vst [vmem:[#allocation1 + $0x21] ss:$4 sm:$0xff] %v12083_v40  ;;  %v5638_v40 = vld [vmem:[#allocation3 + $0xe1] sm:$0xff] }
 0x6ff   : > { %v5288_v44 = vpop.f32.mrf.mxu2  ;;  %6994 = vst [vmem:[#allocation1 + $0x22] ss:$4 sm:$0xff] %v12084_v62 }
 0x700   : > { %v5316_v1 = vadd.f32 %v5288_v44, %v5166_v11  ;;  %v12088_v11 = vld [vmem:[#allocation63_spill] sm:$0xff] }
 0x701   : > { %v5141_v0 = vpop.f32.mrf.mxu1  ;;  %v5438_v23 = vpop.f32.mrf.mxu3  ;;  %v12091_v44 = vld [vmem:[#allocation19_spill] sm:$0xff] }
 0x702   : > { %v5167_v49 = vadd.f32 %v5141_v0, %v10775_v15  ;;  %v5466_v57 = vadd.f32 %v5438_v23, %v5316_v1  ;;  %v12082_v15 = vld [vmem:[#allocation58_spill] sm:$0xff]  ;;  %v5637_v23 = vld [vmem:[#allocation3 + $0xd9] sm:$0xff] }
 0x703   : > { %6992 = vst [vmem:[#allocation1 + $0x20] ss:$4 sm:$0xff] %v12082_v15 }
 0x704   : > { %v10965_v7 = vadd.f32 %v5589_v45, %v5466_v57  ;;  %7713 = vmatmul.msk.f32.gmra.mxu1 %vm1189_vm4, %v10638_v9  ;;  %7731 = vmatmul.msk.f32.gmra.mxu2 %vm1189_vm4, %v10642_v22  ;;  %v5595_v45 = vpop.f32.mrf.mxu0  ;;  %v12085_v22 = vld [vmem:[#allocation61_spill] sm:$0xff]  ;;  %v6996_v29 = vld.sshfl [vmem:[#allocation1] sm:$0xff pattern:$0x73625140]  ;;  %v12094_v57 = vld [vmem:[#allocation84_spill] sm:$0xff] }
 0x705   : > { %6995 = vst [vmem:[#allocation1 + $0x23] ss:$4 sm:$0xff] %v12085_v22  ;;  %v12099_v22 = vld [vmem:[#allocation67_spill] sm:$0xff] }
 0x706   : > { %7764 = vmatmul.msk.f32.gmra.mxu3 %vm1189_vm4, %v12081_v46  ;;  %7778 = vmatmul.msk.f32.gmra.mxu0 %vm1189_vm4, %v6996_v29  ;;  %6998 = vst [vmem:[#allocation1] ss:$4 sm:$0xff] %v12087_v48  ;;  %v12101_v29 = vld [vmem:[#allocation21_spill] sm:$0xff] }
 0x707   : > { %v5291_v21 = vpop.f32.mrf.mxu2  ;;  %6999 = vst [vmem:[#allocation1 + $0x1] ss:$4 sm:$0xff] %v12088_v11  ;;  %v12102_v11 = vld [vmem:[#allocation69_spill] sm:$0xff] }
 0x708   : > { %v5317_v43 = vadd.f32 %v5291_v21, %v5167_v49  ;;  %7000 = vst [vmem:[#allocation1 + $0x2] ss:$4 sm:$0xff] %v12089_v35  ;;  %v12093_v49 = vld [vmem:[#allocation80_spill] sm:$0xff]  ;;  %v12103_v35 = vld [vmem:[#allocation70_spill] sm:$0xff] }
 0x709   : > { %v5144_v2 = vpop.f32.mrf.mxu1  ;;  %v5441_v10 = vpop.f32.mrf.mxu3  ;;  %v12096_v21 = vld [vmem:[#allocation20_spill] sm:$0xff] }
 0x70a   : > { %v5168_v13 = vadd.f32 %v5144_v2, %v10784_v14  ;;  %v5467_v9 = vadd.f32 %v5441_v10, %v5317_v43 }
 0x70c   : > { %v10979_v19 = vadd.f32 %v5592_v41, %v5467_v9  ;;  %7714 = vmatmul.msk.f32.gmra.mxu1 %vm1189_vm4, %v10794_v25  ;;  %7732 = vmatmul.msk.f32.gmra.mxu2 %vm1189_vm4, %v10798_v18  ;;  %v12090_v18 = vld [vmem:[#allocation73_spill] sm:$0xff]  ;;  %v5598_v55 = vpop.f32.mrf.mxu0  ;;  %v6997_v1 = vld.sshfl [vmem:[#allocation1 + $0x20] sm:$0xff pattern:$0x73625140]  ;;  %v12098_v9 = vld [vmem:[#allocation66_spill] sm:$0xff] }
 0x70d   : > { %7001 = vst [vmem:[#allocation1 + $0x3] ss:$4 sm:$0xff] %v12090_v18  ;;  %v12092_v41 = vld [vmem:[#allocation75_spill] sm:$0xff] }
 0x70e   : > { %7765 = vmatmul.msk.f32.gmra.mxu3 %vm1189_vm4, %v12086_v36  ;;  %7779 = vmatmul.msk.f32.gmra.mxu0 %vm1189_vm4, %v6997_v1  ;;  %7002 = vst [vmem:[#allocation1 + $0x20] ss:$4 sm:$0xff] %v12092_v41  ;;  %v12100_v36 = vld [vmem:[#allocation68_spill] sm:$0xff] }
 0x70f   : > { %v5294_v3 = vpop.f32.mrf.mxu2  ;;  %7003 = vst [vmem:[#allocation1 + $0x21] ss:$4 sm:$0xff] %v12093_v49  ;;  %v12108_v49 = vld [vmem:[#allocation77_spill] sm:$0xff] }
 0x710   : > { %v5318_v14 = vadd.f32 %v5294_v3, %v5168_v13  ;;  %7004 = vst [vmem:[#allocation1 + $0x22] ss:$4 sm:$0xff] %v12094_v57  ;;  %v5788_v13 = vld [vmem:[#allocation3 + $0xe2] sm:$0xff] }
 0x711   : > { %v5147_v20 = vpop.f32.mrf.mxu1  ;;  %v5444_v53 = vpop.f32.mrf.mxu3  ;;  %7005 = vst [vmem:[#allocation1 + $0x23] ss:$4 sm:$0xff] %v12095_v50 }
 0x712   : > { %v5169_v24 = vadd.f32 %v5147_v20, %v10796_v42  ;;  %v5468_v25 = vadd.f32 %v5444_v53, %v5318_v14  ;;  %v5456_v20 = vadd.f32 %v10831_v26, %v10827_v60  ;;  %v11038_v26 = vld [vmem:[%s11799_s7] ss:$0 sm:$0xff] }
 0x714   : > { %v10993_v6 = vadd.f32 %v5595_v45, %v5468_v25  ;;  %7715 = vmatmul.msk.f32.gmra.mxu1 %vm1189_vm4, %v10805_v8  ;;  %7733 = vmatmul.msk.f32.gmra.mxu2 %vm1189_vm4, %v10809_v33  ;;  %v5601_v46 = vpop.f32.mrf.mxu0  ;;  %v7006_v43 = vld.sshfl [vmem:[#allocation1] sm:$0xff pattern:$0x73625140] }
 0x715   : > { %7009 = vst [vmem:[#allocation1 + $0x1] ss:$4 sm:$0xff] %v12098_v9  ;;  %v12113_v9 = vld [vmem:[#allocation83_spill] sm:$0xff] }
 0x716   : > { %7766 = vmatmul.msk.f32.gmra.mxu3 %vm1189_vm4, %v12091_v44  ;;  %7780 = vmatmul.msk.f32.gmra.mxu0 %vm1189_vm4, %v7006_v43  ;;  %7010 = vst [vmem:[#allocation1 + $0x2] ss:$4 sm:$0xff] %v12099_v22  ;;  %v12105_v44 = vld [vmem:[#allocation72_spill] sm:$0xff] }
 0x717   : > { %v5297_v56 = vpop.f32.mrf.mxu2  ;;  %7011 = vst [vmem:[#allocation1 + $0x3] ss:$4 sm:$0xff] %v12100_v36 }
 0x718   : > { %v5319_v42 = vadd.f32 %v5297_v56, %v5169_v24  ;;  %v7007_v48 = vld.sshfl [vmem:[#allocation1 + $0x20] sm:$0xff pattern:$0x73625140]  ;;  %v5607_v56 = vadd.f32 %v10786_v34, %v5456_v20 }
 0x719   : > { %v5150_v39 = vpop.f32.mrf.mxu1  ;;  %v5447_v0 = vpop.f32.mrf.mxu3  ;;  %7012 = vst [vmem:[#allocation1 + $0x20] ss:$4 sm:$0xff] %v12102_v11 }
 0x71a   : > { %v5170_v8 = vadd.f32 %v5150_v39, %v10807_v51  ;;  %v5469_v33 = vadd.f32 %v5447_v0, %v5319_v42  ;;  %v12097_v51 = vld [vmem:[#allocation65_spill] sm:$0xff]  ;;  %7013 = vst [vmem:[#allocation1 + $0x21] ss:$4 sm:$0xff] %v12103_v35  ;;  %v12106_v0 = vld [vmem:[#allocation74_spill] sm:$0xff] }
 0x71b   : > { %7008 = vst [vmem:[#allocation1] ss:$4 sm:$0xff] %v12097_v51 }
 0x71c   : > { %v11007_v47 = vadd.f32 %v5598_v55, %v5469_v33  ;;  %7716 = vmatmul.msk.f32.gmra.mxu1 %vm1189_vm4, %v5637_v23  ;;  %7734 = vmatmul.msk.f32.gmra.mxu2 %vm1189_vm4, %v5787_v17  ;;  %v5604_v53 = vpop.f32.mrf.mxu0  ;;  %v12104_v55 = vld [vmem:[#allocation71_spill] sm:$0xff]  ;;  %7015 = vst [vmem:[#allocation1 + $0x23] ss:$4 sm:$0xff] %v12105_v44  ;;  %v12107_v17 = vld [vmem:[#allocation76_spill] sm:$0xff] }
 0x71d   : > { %7014 = vst [vmem:[#allocation1 + $0x22] ss:$4 sm:$0xff] %v12104_v55 }
 0x71e   : > { %7767 = vmatmul.msk.f32.gmra.mxu3 %vm1189_vm4, %v12096_v21  ;;  %7781 = vmatmul.msk.f32.gmra.mxu0 %vm1189_vm4, %v7007_v48 }
 0x71f   : > { %v5300_v58 = vpop.f32.mrf.mxu2 }
 0x720   : > { %v5320_v15 = vadd.f32 %v5300_v58, %v5170_v8  ;;  %v12109_v8 = vld [vmem:[#allocation78_spill] sm:$0xff] }
 0x721   : > { %v5153_v2 = vpop.f32.mrf.mxu1  ;;  %v5450_v10 = vpop.f32.mrf.mxu3 }
 0x722   : > { %v5171_v45 = vadd.f32 %v5153_v2, %v10818_v12  ;;  %v5470_v62 = vadd.f32 %v5450_v10, %v5320_v15  ;;  %v7016_v41 = vld.sshfl [vmem:[#allocation1] sm:$0xff pattern:$0x73625140]  ;;  %v12111_v2 = vld [vmem:[#allocation81_spill] sm:$0xff] }
 0x723   : > { %7018 = vst [vmem:[#allocation1] ss:$4 sm:$0xff] %v12106_v0  ;;  %v12110_v15 = vld [vmem:[#allocation79_spill] sm:$0xff] }
 0x724   : > { %v11019_v3 = vadd.f32 %v5601_v46, %v5470_v62  ;;  %7717 = vmatmul.msk.f32.gmra.mxu1 %vm1189_vm4, %v5638_v40  ;;  %7735 = vmatmul.msk.f32.gmra.mxu2 %vm1189_vm4, %v5788_v13  ;;  %7019 = vst [vmem:[#allocation1 + $0x1] ss:$4 sm:$0xff] %v12107_v17  ;;  %v7017_v21 = vld.sshfl [vmem:[#allocation1 + $0x20] sm:$0xff pattern:$0x73625140]  ;;  %v12112_v40 = vld [vmem:[#allocation82_spill] sm:$0xff] }
 0x725   : > { %7020 = vst [vmem:[#allocation1 + $0x2] ss:$4 sm:$0xff] %v12108_v49 }
 0x726   : > { %7768 = vmatmul.msk.f32.gmra.mxu3 %vm1189_vm4, %v12101_v29  ;;  %7782 = vmatmul.msk.f32.gmra.mxu0 %vm1189_vm4, %v7016_v41  ;;  %7021 = vst [vmem:[#allocation1 + $0x3] ss:$4 sm:$0xff] %v12109_v8 }
 0x727   : > { %v5303_v14 = vpop.f32.mrf.mxu2  ;;  %7022 = vst [vmem:[#allocation1 + $0x20] ss:$4 sm:$0xff] %v12110_v15 }
 0x728   : > { %v5321_v12 = vadd.f32 %v5303_v14, %v5171_v45  ;;  %7023 = vst [vmem:[#allocation1 + $0x21] ss:$4 sm:$0xff] %v12111_v2  ;;  %v5609_v45 = vadd.f32 %v10816_v32, %v10851_v37 }
 0x729   : > { %v5453_v24 = vpop.f32.mrf.mxu3  ;;  %v5709_v25 = vpop.f32.mrf.mxu1  ;;  %7024 = vst [vmem:[#allocation1 + $0x22] ss:$4 sm:$0xff] %v12112_v40 }
 0x72a   : > { %v5471_v18 = vadd.f32 %v5453_v24, %v5321_v12  ;;  %v5757_v60 = vadd.f32 %v5709_v25, %v5607_v56  ;;  %7025 = vst [vmem:[#allocation1 + $0x23] ss:$4 sm:$0xff] %v12113_v9 }
 0x72c   : > { %v11033_v1 = vadd.f32 %v5604_v53, %v5471_v18 }
 0x72d   : > { %v7026_v20 = vld.sshfl [vmem:[#allocation1] sm:$0xff pattern:$0x73625140] }
 0x72e   : > { %7783 = vmatmul.msk.f32.gmra.mxu0 %vm1189_vm4, %v7017_v21 }
 0x72f   : > { %v5859_v42 = vpop.f32.mrf.mxu2 }
 0x730   : > { %v5907_v39 = vadd.f32 %v5859_v42, %v5757_v60 }
 0x731   : > { %v5712_v23 = vpop.f32.mrf.mxu1  ;;  %v7027_v49 = vld.sshfl [vmem:[#allocation1 + $0x20] sm:$0xff pattern:$0x73625140] }
 0x732   : > { %v11044_v34 = vadd.f32 %v11038_v26, %v5907_v39  ;;  %v5758_v50 = vadd.f32 %v5712_v23, %v10842_v38  ;;  %v5610_v23 = vadd.f32 %v10829_v31, %v10862_v30 }
 0x734   : > { %v11049_v33 = vmul.f32 0.70710677, %v11044_v34  ;;  %vm6647_vm11 = vcmp.ge.f32.partialorder %v11044_v34, 0.0 }
 0x736   : > { %v5975_v57 = vmul.f32 %v11049_v33, %v11049_v33  ;;  %7784 = vmatmul.msk.f32.gmra.mxu0 %vm1189_vm4, %v7026_v20 }
 0x737   : > { %v5862_v46 = vpop.f32.mrf.mxu2 }
 0x738   : > { %v11054_v58 = vmin.f32 %v5975_v57, 16.0  ;;  %v5908_v43 = vadd.f32 %v5862_v46, %v5758_v50 }
 0x739   : > { %v5715_v51 = vpop.f32.mrf.mxu1 }
 0x73a   : > { %v11060_v10 = vadd.f32 %v11038_v26, %v5908_v43  ;;  %v5977_v13 = vmul.f32 2.1237322e-06, %v11054_v58  ;;  %v5988_v38 = vmul.f32 3.8918573e-05, %v11054_v58  ;;  %v5759_v14 = vadd.f32 %v5715_v51, %v5609_v45 }
 0x73c   : > { %v11069_v62 = vmul.f32 0.70710677, %v11060_v10  ;;  %v5978_v22 = vadd.f32 0.00028619796, %v5977_v13  ;;  %v5989_v36 = vadd.f32 0.001143296, %v5988_v38 }
 0x73d   : > { %vm6648_vm12 = vcmp.ge.f32.partialorder %v11060_v10, 0.0  ;;  %v6664_v20 = vmul.f32 0.2, %v11060_v10 }
 0x73e   : > { %v6015_v29 = vmul.f32 %v11069_v62, %v11069_v62  ;;  %v5979_v12 = vmul.f32 %v5978_v22, %v11054_v58  ;;  %v5990_v53 = vmul.f32 %v5989_v36, %v11054_v58  ;;  %7785 = vmatmul.msk.f32.gmra.mxu0 %vm1189_vm4, %v7027_v49 }
 0x73f   : > { %v5865_v48 = vpop.f32.mrf.mxu2 }
 0x740   : > { %v11075_v11 = vmin.f32 %v6015_v29, 16.0  ;;  %v5909_v24 = vadd.f32 %v5865_v48, %v5759_v14  ;;  %v5980_v37 = vadd.f32 0.0036580483, %v5979_v12  ;;  %v5991_v25 = vadd.f32 0.014752088, %v5990_v53 }
 0x741   : > { %v5718_v32 = vpop.f32.mrf.mxu1  ;;  %v6663_v29 = vmul.f32 0.2, %v11044_v34 }
 0x742   : > { %v11079_v35 = vadd.f32 %v11038_v26, %v5909_v24  ;;  %v6017_v18 = vmul.f32 2.1237322e-06, %v11075_v11  ;;  %v6028_v55 = vmul.f32 3.8918573e-05, %v11075_v11  ;;  %v5992_v44 = vmul.f32 %v5991_v25, %v11054_v58 }
 0x743   : > { %v5981_v60 = vmul.f32 %v5980_v37, %v11054_v58  ;;  %v5760_v21 = vadd.f32 %v5718_v32, %v5610_v23  ;;  %v5611_v37 = vadd.f32 %v10840_v63, %v10876_v59  ;;  %v11119_v25 = vadd.f32 %v10857_v27, %v10892_v5 }
 0x744   : > { %v11085_v56 = vmul.f32 0.70710677, %v11079_v35  ;;  %v5993_v42 = vadd.f32 0.112945676, %v5992_v44  ;;  %v6018_v41 = vadd.f32 0.00028619796, %v6017_v18  ;;  %v6679_v44 = vsel %vm6647_vm11, %v11044_v34, %v6663_v29 }
 0x745   : > { %v6029_v0 = vadd.f32 0.001143296, %v6028_v55  ;;  %v5982_v43 = vadd.f32 0.05243302, %v5981_v60  ;;  %v11123_v55 = vadd.f32 %v10869_v54, %v10906_v4  ;;  %v6680_v63 = vsel %vm6648_vm12, %v11060_v10, %v6664_v20 }
 0x746   : > { %v6055_v39 = vmul.f32 %v11085_v56, %v11085_v56  ;;  %v5994_v8 = vmul.f32 %v5993_v42, %v11054_v58  ;;  %v6019_v57 = vmul.f32 %v6018_v41, %v11075_v11  ;;  %v11131_v41 = vadd.f32 %v10887_v28, %v10921_v52 }
 0x747   : > { %v5868_v17 = vpop.f32.mrf.mxu2  ;;  %v6030_v50 = vmul.f32 %v6029_v0, %v11075_v11  ;;  %v5983_v38 = vmul.f32 %v5982_v43, %v11054_v58  ;;  %vm6649_vm13 = vcmp.ge.f32.partialorder %v11079_v35, 0.0  ;;  %v6665_v27 = vmul.f32 0.2, %v11079_v35 }
 0x748   : > { %v11096_v46 = vmin.f32 %v6055_v39, 16.0  ;;  %v5995_v15 = vadd.f32 0.4994258, %v5994_v8  ;;  %v6020_v2 = vadd.f32 0.0036580483, %v6019_v57  ;;  %v5910_v13 = vadd.f32 %v5868_v17, %v5760_v21 }
 0x749   : > { %v5721_v51 = vpop.f32.mrf.mxu1  ;;  %v6031_v40 = vadd.f32 0.014752088, %v6030_v50  ;;  %v5984_v12 = vadd.f32 0.18741608, %v5983_v38  ;;  %v11140_v23 = vmul.f32 0.5, %v11044_v34  ;;  %v6681_v34 = vsel %vm6649_vm13, %v11079_v35, %v6665_v27 }
 0x74a   : > { %v5996_v31 = vmul.f32 %v5995_v15, %v11054_v58  ;;  %v6057_v45 = vmul.f32 2.1237322e-06, %v11096_v46  ;;  %v6021_v22 = vmul.f32 %v6020_v2, %v11075_v11  ;;  %v11107_v14 = vadd.f32 %v11038_v26, %v5910_v13 }
 0x74b   : > { %v6032_v30 = vmul.f32 %v6031_v40, %v11075_v11  ;;  %v6068_v32 = vmul.f32 3.8918573e-05, %v11096_v46  ;;  %v5985_v54 = vmul.f32 %v5984_v12, %v11054_v58  ;;  %v11143_v52 = vmul.f32 0.5267, %v6679_v44  ;;  %v6893_v12 = vpop.f32.mrf.mxu3 }
 0x74c   : > { %v11101_v9 = vadd.f32 1.0, %v5996_v31  ;;  %v6058_v24 = vadd.f32 0.00028619796, %v6057_v45  ;;  %v6022_v18 = vadd.f32 0.05243302, %v6021_v22  ;;  %v11149_v58 = vmul.f32 0.5, %v11060_v10 }
 0x74d   : > { %v6033_v36 = vadd.f32 0.112945676, %v6032_v30  ;;  %v11127_v60 = vmul.f32 0.70710677, %v11107_v14  ;;  %v6069_v0 = vadd.f32 0.001143296, %v6068_v32  ;;  %v5761_v21 = vadd.f32 %v5721_v51, %v5611_v37 }
 0x74e   : > { %7893 = vrcp.f32 %v11101_v9  ;;  %v6059_v39 = vmul.f32 %v6058_v24, %v11096_v46  ;;  %v6023_v17 = vmul.f32 %v6022_v18, %v11075_v11  ;;  %v11157_v15 = vmul.f32 0.5267, %v6680_v63  ;;  %v7080_v18 = vpop.f32.mrf.mxu0 }
 0x74f   : > { %v5871_v48 = vpop.f32.mrf.mxu2  ;;  %v6034_v53 = vmul.f32 %v6033_v36, %v11075_v11  ;;  %v6095_v49 = vmul.f32 %v11127_v60, %v11127_v60  ;;  %v6070_v50 = vmul.f32 %v6069_v0, %v11096_v46  ;;  %v5986_v2 = vadd.f32 1.1283791, %v5985_v54 }
 0x750   : > { %v6009_v40 = vand.u32 2147483648, %v11101_v9  ;;  %v6060_v13 = vadd.f32 0.0036580483, %v6059_v39  ;;  %v6007_v31 = vand.u32 2147483647, %v11101_v9  ;;  %v5911_v45 = vadd.f32 %v5871_v48, %v5761_v21 }
 0x751   : > { %v6035_v42 = vadd.f32 0.4994258, %v6034_v53  ;;  %v5724_v59 = vpop.f32.mrf.mxu1  ;;  %v6024_v30 = vadd.f32 0.18741608, %v6023_v17  ;;  %v11162_v38 = vmin.f32 %v6095_v49, 16.0  ;;  %v11165_v22 = vmul.f32 0.5, %v11079_v35 }
 0x752   : > { %v6071_v51 = vadd.f32 0.014752088, %v6070_v50  ;;  %vm6650_vm15 = vcmp.ge.f32.partialorder %v11107_v14, 0.0  ;;  %vm6003_vm0 = vweird.f32 %v11101_v9  ;;  %v11169_v29 = vmul.f32 0.5267, %v6681_v34 }
 0x753   : > { %v6036_v4 = vmul.f32 %v6035_v42, %v11075_v11  ;;  %v6666_v20 = vmul.f32 0.2, %v11107_v14  ;;  %v6010_v53 = vor.u32 1.1754944e-38, %v6009_v40  ;;  %v6061_v24 = vmul.f32 %v6060_v13, %v11096_v46 }
 0x754   : > { %v7894_v5 = vpop.eup %7893  ;;  %v6072_v48 = vmul.f32 %v6071_v51, %v11096_v46  ;;  %v5987_v35 = vmul.f32 %v5986_v2, %v11049_v33  ;;  %vm6008_vm2 = vcmp.eq.f32.partialorder %v6007_v31, 8.507059e+37  ;;  %v6025_v44 = vmul.f32 %v6024_v30, %v11075_v11 }
 0x755   : > { %v5999_v28 = vmul.f32 %v7894_v5, %v11101_v9  ;;  %v11151_v57 = vadd.f32 1.0, %v6036_v4  ;;  %vm6004_vm14 = vweird.f32 %v7894_v5  ;;  %v11177_v42 = vadd.f32 %v11038_v26, %v5911_v45 }
 0x756   : > { %vm6005_vm1 = vmor %vm6003_vm0, %vm6004_vm14  ;;  %v6073_v27 = vadd.f32 0.112945676, %v6072_v48  ;;  %v6108_v54 = vmul.f32 3.8918573e-05, %v11162_v38  ;;  %v6097_v33 = vmul.f32 2.1237322e-06, %v11162_v38  ;;  %v11188_v11 = vsel %vm6650_vm15, %v11107_v14, %v6666_v20 }
 0x757   : > { %v5874_v8 = vpop.f32.mrf.mxu2  ;;  %v6000_v43 = vsub.f32 1.0, %v5999_v28  ;;  %7895 = vrcp.f32 %v11151_v57  ;;  %v11182_v28 = vmul.f32 0.5, %v11107_v14  ;;  %v6062_v17 = vadd.f32 0.05243302, %v6061_v24  ;;  %v6896_v24 = vpop.f32.mrf.mxu3 }
 0x758   : > { %v6074_v49 = vmul.f32 %v6073_v27, %v11096_v46  ;;  %v7081_v34 = vadd.f32 %v7080_v18, %v6893_v12  ;;  %v6026_v21 = vadd.f32 1.1283791, %v6025_v44  ;;  %v11193_v2 = vmul.f32 0.70710677, %v11177_v42 }
 0x759   : > { %v6001_v10 = vmul.f32 %v7894_v5, %v6000_v43  ;;  %v5727_v32 = vpop.f32.mrf.mxu1  ;;  %v6047_v30 = vand.u32 2147483647, %v11151_v57  ;;  %v6049_v14 = vand.u32 2147483648, %v11151_v57  ;;  %v6098_v45 = vadd.f32 0.00028619796, %v6097_v33 }
 0x75a   : > { %v6075_v13 = vadd.f32 0.4994258, %v6074_v49  ;;  %vm6043_vm5 = vweird.f32 %v11151_v57  ;;  %vm6651_vm8 = vcmp.ge.f32.partialorder %v11177_v42, 0.0 }
 0x75b   : > { %v6002_v36 = vadd.f32 %v7894_v5, %v6001_v10  ;;  %v6109_v10 = vadd.f32 0.001143296, %v6108_v54  ;;  %v6099_v27 = vmul.f32 %v6098_v45, %v11162_v38  ;;  %vm6048_vm7 = vcmp.eq.f32.partialorder %v6047_v30, 8.507059e+37 }
 0x75c   : > { %v6076_v51 = vmul.f32 %v6075_v13, %v11096_v46 }
 0x75d   : > { %v6006_v37 = vsel %vm6005_vm1, %v7894_v5, %v6002_v36  ;;  %v7896_v9 = vpop.eup %7895  ;;  %v5762_v5 = vadd.f32 %v5724_v59, %v11119_v25  ;;  %v6063_v59 = vmul.f32 %v6062_v17, %v11096_v46  ;;  %v6667_v36 = vmul.f32 0.2, %v11177_v42 }
 0x75e   : > { %v6011_v63 = vsel %vm6008_vm2, %v6010_v53, %v6006_v37  ;;  %v6039_v0 = vmul.f32 %v7896_v9, %v11151_v57  ;;  %vm6044_vm3 = vweird.f32 %v7896_v9  ;;  %v6110_v12 = vmul.f32 %v6109_v10, %v11162_v38 }
 0x75f   : > { %v5877_v4 = vpop.f32.mrf.mxu2  ;;  %v6012_v39 = vmul.f32 %v6011_v63, %v5987_v35  ;;  %v5912_v40 = vadd.f32 %v5874_v8, %v5762_v5  ;;  %v6027_v8 = vmul.f32 %v6026_v21, %v11069_v62  ;;  %v11207_v35 = vadd.f32 1.0, %v6076_v51  ;;  %vm6045_vm6 = vmor %vm6043_vm5, %vm6044_vm3  ;;  %v7083_v63 = vpop.f32.mrf.mxu0 }
 0x760   : > { %v6040_v43 = vsub.f32 1.0, %v6039_v0  ;;  %v5763_v37 = vadd.f32 %v5727_v32, %v11123_v55  ;;  %v6050_v62 = vor.u32 1.1754944e-38, %v6049_v14  ;;  %v6064_v57 = vadd.f32 0.18741608, %v6063_v59 }
 0x761   : > { %v7736_v50 = vclamps-f32 %v6012_v39, 1.0  ;;  %v11204_v53 = vadd.f32 %v11038_v26, %v5912_v40  ;;  %v5730_v18 = vpop.f32.mrf.mxu1  ;;  %7897 = vrcp.f32 %v11207_v35  ;;  %v6135_v55 = vmul.f32 %v11193_v2, %v11193_v2 }
 0x762   : > { %v6041_v25 = vmul.f32 %v7896_v9, %v6040_v43  ;;  %v6111_v33 = vadd.f32 0.014752088, %v6110_v12  ;;  %v5913_v5 = vadd.f32 %v5877_v4, %v5763_v37  ;;  %v7084_v49 = vadd.f32 %v7083_v63, %v6896_v24 }
 0x763   : > { %v6615_v31 = vadd.f32 1.0, %v7736_v50  ;;  %v6100_v50 = vadd.f32 0.0036580483, %v6099_v27  ;;  %v11224_v21 = vmul.f32 0.5, %v11177_v42  ;;  %v11227_v43 = vmul.f32 0.70710677, %v11204_v53 }
 0x764   : > { %v6042_v48 = vadd.f32 %v7896_v9, %v6041_v25  ;;  %v11230_v10 = vmin.f32 %v6135_v55, 16.0  ;;  %v11233_v4 = vsel %vm6651_vm8, %v11177_v42, %v6667_v36  ;;  %v11240_v14 = vadd.f32 %v11038_v26, %v5913_v5 }
 0x765   : > { %v6631_v20 = vmul.f32 %v6615_v31, %v11140_v23  ;;  %v11213_v23 = vld [vmem:[%s11802_s10] ss:$0 sm:$0xff]  ;;  %v11236_v31 = vmul.f32 0.2, %v11204_v53  ;;  %v6101_v42 = vmul.f32 %v6100_v50, %v11162_v38  ;;  %v6175_v36 = vmul.f32 %v11227_v43, %v11227_v43 }
 0x766   : > { %v6046_v54 = vsel %vm6045_vm6, %v7896_v9, %v6042_v48  ;;  %v7132_v9 = vadd.f32 %v11213_v23, %v7081_v34  ;;  %v6112_v34 = vmul.f32 %v6111_v33, %v11162_v38  ;;  %v11243_v59 = vadd.f32 %v11213_v23, %v7084_v49 }
 0x767   : > { %v6711_v44 = vmul.f32 0.4733, %v6631_v20  ;;  %v5880_v32 = vpop.f32.mrf.mxu2  ;;  %v6051_v0 = vsel %vm6048_vm7, %v6050_v62, %v6046_v54  ;;  %v7898_v30 = vpop.eup %7897  ;;  %vm6652_vm10 = vcmp.ge.f32.partialorder %v11204_v53, 0.0  ;;  %v6137_v63 = vmul.f32 2.1237322e-06, %v11230_v10 }
 0x768   : > { %v6052_v17 = vmul.f32 %v6051_v0, %v6027_v8  ;;  %v6079_v8 = vmul.f32 %v7898_v30, %v11207_v35  ;;  %v6113_v48 = vadd.f32 0.112945676, %v6112_v34  ;;  %v11254_v27 = vmul.f32 0.70710677, %v11240_v14 }
 0x769   : > { %v6743_v39 = vadd.f32 %v6711_v44, %v11143_v52  ;;  %v6065_v52 = vmul.f32 %v6064_v57, %v11096_v46  ;;  %v6727_v46 = vmul.f32 0.5497, %v6631_v20  ;;  %v5733_v37 = vpop.f32.mrf.mxu1  ;;  %v6148_v20 = vmul.f32 3.8918573e-05, %v11230_v10 }
 0x76a   : > { %v7737_v13 = vclamps-f32 %v6052_v17, 1.0  ;;  %v6080_v62 = vsub.f32 1.0, %v6079_v8  ;;  %v5764_v54 = vadd.f32 %v5730_v18, %v11131_v41  ;;  %v6087_v0 = vand.u32 2147483647, %v11207_v35 }
 0x76b   : > { %vm6759_vm9 = vcmp.ge.f32.partialorder %v6743_v39, 0.0  ;;  %v6775_v40 = vmul.f32 0.2, %v6743_v39  ;;  %v6066_v24 = vadd.f32 1.1283791, %v6065_v52  ;;  %v6089_v33 = vand.u32 2147483648, %v11207_v35 }
 0x76c   : > { %v6616_v25 = vadd.f32 1.0, %v7737_v13  ;;  %v6102_v5 = vadd.f32 0.05243302, %v6101_v42  ;;  %v6081_v49 = vmul.f32 %v7898_v30, %v6080_v62  ;;  %vm6084_vm11 = vweird.f32 %v7898_v30 }
 0x76d   : > { %v6791_v45 = vsel %vm6759_vm9, %v6743_v39, %v6775_v40  ;;  %v5914_v40 = vadd.f32 %v5880_v32, %v5764_v54  ;;  %v6067_v41 = vmul.f32 %v6066_v24, %v11085_v56  ;;  %v6138_v18 = vadd.f32 0.00028619796, %v6137_v63 }
 0x76e   : > { %v6807_v51 = vmul.f32 0.4591, %v6791_v45  ;;  %v6632_v12 = vmul.f32 %v6616_v25, %v11149_v58  ;;  %v6114_v58 = vmul.f32 %v6113_v48, %v11162_v38  ;;  %v6149_v13 = vadd.f32 0.001143296, %v6148_v20  ;;  %v6899_v48 = vpop.f32.mrf.mxu3  ;;  %v7086_v20 = vpop.f32.mrf.mxu0 }
 0x76f   : > { %v5883_v39 = vpop.f32.mrf.mxu2  ;;  %v6082_v52 = vadd.f32 %v7898_v30, %v6081_v49  ;;  %vm6083_vm13 = vweird.f32 %v11207_v35  ;;  %v5765_v34 = vadd.f32 %v5733_v37, %v10937_v61  ;;  %vm6088_vm15 = vcmp.eq.f32.partialorder %v6087_v0, 8.507059e+37 }
 0x770   : > { %v6823_v44 = vadd.f32 %v6807_v51, %v6727_v46  ;;  %v6712_v57 = vmul.f32 0.4733, %v6632_v12  ;;  %v6115_v50 = vadd.f32 0.4994258, %v6114_v58  ;;  %vm6085_vm14 = vmor %vm6083_vm13, %vm6084_vm11  ;;  %v6103_v46 = vmul.f32 %v6102_v5, %v11162_v38 }
 0x771   : > { %v6086_v32 = vsel %vm6085_vm14, %v7898_v30, %v6082_v52  ;;  %v6150_v56 = vmul.f32 %v6149_v13, %v11230_v10  ;;  %v6728_v51 = vmul.f32 0.5497, %v6632_v12  ;;  %v6139_v24 = vmul.f32 %v6138_v18, %v11230_v10  ;;  %v5736_v62 = vpop.f32.mrf.mxu1 }
 0x772   : > { %v7148_v55 = vadd.f32 %v7132_v9, %v6823_v44  ;;  %v6744_v17 = vadd.f32 %v6712_v57, %v11157_v15  ;;  %v6090_v15 = vor.u32 1.1754944e-38, %v6089_v33  ;;  %v6116_v45 = vmul.f32 %v6115_v50, %v11162_v38 }
 0x773   : > { %v6669_v35 = vmul.f32 0.2, %v11240_v14  ;;  %v11272_v61 = vadd.f32 %v11038_v26, %v5914_v40  ;;  %vm6653_vm0 = vcmp.ge.f32.partialorder %v11240_v14, 0.0  ;;  %v5915_v30 = vadd.f32 %v5883_v39, %v5765_v34 }
 0x774   : > { %7164 = vst.msk [vmem:[%s8119_s18] sm:$0xff] %vm1189_vm4, %v7148_v55  ;;  %vm6760_vm12 = vcmp.ge.f32.partialorder %v6744_v17, 0.0  ;;  %v6776_v9 = vmul.f32 0.2, %v6744_v17  ;;  %v6091_v42 = vsel %vm6088_vm15, %v6090_v15, %v6086_v32  ;;  %v11274_v44 = vadd.f32 1.0, %v6116_v45 }
 0x775   : > { %v6092_v37 = vmul.f32 %v6091_v42, %v6067_v41  ;;  %v6151_v12 = vadd.f32 0.014752088, %v6150_v56  ;;  %v11281_v54 = vsel %vm6652_vm10, %v11204_v53, %v11236_v31  ;;  %v6104_v58 = vadd.f32 0.18741608, %v6103_v46 }
 0x776   : > { %v6792_v25 = vsel %vm6760_vm12, %v6744_v17, %v6776_v9  ;;  %7899 = vrcp.f32 %v11274_v44  ;;  %v11284_v55 = vmin.f32 %v6175_v36, 16.0  ;;  %v6215_v39 = vmul.f32 %v11254_v27, %v11254_v27 }
 0x777   : > { %v6808_v8 = vmul.f32 0.4591, %v6792_v25  ;;  %v7738_v57 = vclamps-f32 %v6092_v37, 1.0  ;;  %v5886_v33 = vpop.f32.mrf.mxu2  ;;  %v6140_v5 = vadd.f32 0.0036580483, %v6139_v24  ;;  %v11290_v17 = vsel %vm6653_vm0, %v11240_v14, %v6669_v35 }
 0x778   : > { %v11293_v31 = vmul.f32 0.70710677, %v11272_v61  ;;  %v7087_v50 = vadd.f32 %v7086_v20, %v6899_v48  ;;  %v6670_v40 = vmul.f32 0.2, %v11272_v61  ;;  %v11297_v36 = vadd.f32 %v11038_v26, %v5915_v30 }
 0x779   : > { %v6824_v63 = vadd.f32 %v6808_v8, %v6728_v51  ;;  %v6617_v49 = vadd.f32 1.0, %v7738_v57  ;;  %v5766_v41 = vadd.f32 %v5736_v62, %v10951_v16  ;;  %vm6654_vm1 = vcmp.ge.f32.partialorder %v11272_v61, 0.0  ;;  %v5739_v48 = vpop.f32.mrf.mxu1 }
 0x77a   : > { %v6105_v13 = vmul.f32 %v6104_v58, %v11162_v38  ;;  %v11307_v9 = vmul.f32 0.5267, %v11188_v11  ;;  %v6141_v34 = vmul.f32 %v6140_v5, %v11230_v10  ;;  %v6177_v45 = vmul.f32 2.1237322e-06, %v11284_v55 }
 0x77b   : > { %v7149_v0 = vadd.f32 %v11243_v59, %v6824_v63  ;;  %v6152_v59 = vmul.f32 %v6151_v12, %v11230_v10  ;;  %v6633_v18 = vmul.f32 %v6617_v49, %v11165_v22  ;;  %v5916_v52 = vadd.f32 %v5886_v33, %v5766_v41 }
 0x77c   : > { %v7900_v16 = vpop.eup %7899  ;;  %v11311_v25 = vmin.f32 %v6215_v39, 16.0  ;;  %v6255_v32 = vmul.f32 %v11293_v31, %v11293_v31  ;;  %v7134_v22 = vadd.f32 %v11213_v23, %v7087_v50  ;;  %v11317_v38 = vsel %vm6654_vm1, %v11272_v61, %v6670_v40 }
 0x77d   : > { %7165 = vst.msk [vmem:[%s8119_s18 + $0x8] sm:$0xff] %vm1189_vm4, %v7149_v0  ;;  %v6153_v15 = vadd.f32 0.112945676, %v6152_v59  ;;  %v6713_v46 = vmul.f32 0.4733, %v6633_v18  ;;  %vm6655_vm2 = vcmp.ge.f32.partialorder %v11297_v36, 0.0  ;;  %v6119_v56 = vmul.f32 %v7900_v16, %v11274_v44 }
 0x77e   : > { %v11320_v11 = vmul.f32 0.70710677, %v11297_v36  ;;  %v6106_v8 = vadd.f32 1.1283791, %v6105_v13  ;;  %v6188_v24 = vmul.f32 3.8918573e-05, %v11284_v55  ;;  %v11328_v35 = vadd.f32 %v11038_v26, %v5916_v52 }
 0x77f   : > { %v6745_v51 = vadd.f32 %v6713_v46, %v11169_v29  ;;  %v6154_v42 = vmul.f32 %v6153_v15, %v11230_v10  ;;  %v6120_v37 = vsub.f32 1.0, %v6119_v56  ;;  %v6142_v30 = vadd.f32 0.05243302, %v6141_v34  ;;  %v5889_v57 = vpop.f32.mrf.mxu2  ;;  %v6902_v46 = vpop.f32.mrf.mxu3 }
 0x780   : > { %v6178_v62 = vadd.f32 0.00028619796, %v6177_v45  ;;  %v6129_v20 = vand.u32 2147483648, %v11274_v44  ;;  %vm6123_vm5 = vweird.f32 %v11274_v44  ;;  %vm6124_vm6 = vweird.f32 %v7900_v16 }
 0x781   : > { %vm6761_vm3 = vcmp.ge.f32.partialorder %v6745_v51, 0.0  ;;  %v6777_v63 = vmul.f32 0.2, %v6745_v51  ;;  %v6155_v12 = vadd.f32 0.4994258, %v6154_v42  ;;  %v6121_v58 = vmul.f32 %v7900_v16, %v6120_v37  ;;  %vm6125_vm7 = vmor %vm6123_vm5, %vm6124_vm6 }
 0x782   : > { %v6127_v29 = vand.u32 2147483647, %v11274_v44  ;;  %v6179_v33 = vmul.f32 %v6178_v62, %v11284_v55  ;;  %v6189_v5 = vadd.f32 0.001143296, %v6188_v24  ;;  %v6729_v49 = vmul.f32 0.5497, %v6633_v18 }
 0x783   : > { %v6793_v39 = vsel %vm6761_vm3, %v6745_v51, %v6777_v63  ;;  %v6156_v0 = vmul.f32 %v6155_v12, %v11230_v10  ;;  %v6122_v40 = vadd.f32 %v7900_v16, %v6121_v58  ;;  %v6143_v41 = vmul.f32 %v6142_v30, %v11230_v10  ;;  %v7089_v51 = vpop.f32.mrf.mxu0  ;;  %v5742_v12 = vpop.f32.mrf.mxu1 }
 0x784   : > { %v6809_v50 = vmul.f32 0.4591, %v6793_v39  ;;  %v6671_v59 = vmul.f32 0.2, %v11297_v36  ;;  %v6130_v13 = vor.u32 1.1754944e-38, %v6129_v20  ;;  %v6190_v34 = vmul.f32 %v6189_v5, %v11284_v55 }
 0x785   : > { %v11337_v52 = vadd.f32 1.0, %v6156_v0  ;;  %v6107_v15 = vmul.f32 %v6106_v8, %v11127_v60  ;;  %v6126_v45 = vsel %vm6125_vm7, %v7900_v16, %v6122_v40  ;;  %vm6128_vm8 = vcmp.eq.f32.partialorder %v6127_v29, 8.507059e+37 }
 0x786   : > { %v6825_v44 = vadd.f32 %v6809_v50, %v6729_v49  ;;  %v6295_v18 = vmul.f32 %v11320_v11, %v11320_v11  ;;  %v6131_v56 = vsel %vm6128_vm8, %v6130_v13, %v6126_v45  ;;  %v6180_v42 = vadd.f32 0.0036580483, %v6179_v33 }
 0x787   : > { %7901 = vrcp.f32 %v11337_v52  ;;  %v11345_v24 = vmul.f32 0.70710677, %v11328_v35  ;;  %v6132_v30 = vmul.f32 %v6131_v56, %v6107_v15  ;;  %v6144_v62 = vadd.f32 0.18741608, %v6143_v41 }
 0x788   : > { %v7150_v37 = vadd.f32 %v7134_v22, %v6825_v44  ;;  %v11347_v63 = vmin.f32 %v6255_v32, 16.0  ;;  %v11352_v60 = vsel %vm6655_vm2, %v11297_v36, %v6671_v59  ;;  %v6672_v16 = vmul.f32 0.2, %v11328_v35 }
 0x789   : > { %v6191_v8 = vadd.f32 0.014752088, %v6190_v34  ;;  %vm6656_vm9 = vcmp.ge.f32.partialorder %v11328_v35, 0.0  ;;  %v5767_v20 = vadd.f32 %v5739_v48, %v10965_v7  ;;  %v7739_v22 = vclamps-f32 %v6132_v30, 1.0  ;;  %v5892_v7 = vpop.f32.mrf.mxu2 }
 0x78a   : > { %7166 = vst.msk [vmem:[%s8119_s18 + $0x10] sm:$0xff] %vm1189_vm4, %v7150_v37  ;;  %v7090_v58 = vadd.f32 %v7089_v51, %v6902_v46  ;;  %v11359_v29 = vmin.f32 %v6295_v18, 16.0  ;;  %v11362_v32 = vmul.f32 0.5267, %v11233_v4  ;;  %v6181_v39 = vmul.f32 %v6180_v42, %v11284_v55 }
 0x78b   : > { %v6192_v0 = vmul.f32 %v6191_v8, %v11284_v55  ;;  %v6335_v33 = vmul.f32 %v11345_v24, %v11345_v24  ;;  %v5917_v5 = vadd.f32 %v5889_v57, %v5767_v20  ;;  %v6618_v49 = vadd.f32 1.0, %v7739_v22 }
 0x78c   : > { %v6145_v48 = vmul.f32 %v6144_v62, %v11230_v10  ;;  %v11372_v40 = vsel %vm6656_vm9, %v11328_v35, %v6672_v16  ;;  %v5768_v4 = vadd.f32 %v5742_v12, %v10979_v19  ;;  %v6217_v59 = vmul.f32 2.1237322e-06, %v11311_v25 }
 0x78d   : > { %v7902_v50 = vpop.eup %7901  ;;  %v6193_v41 = vadd.f32 0.112945676, %v6192_v0  ;;  %v6634_v13 = vmul.f32 %v6618_v49, %v11182_v28  ;;  %v7135_v34 = vadd.f32 %v11213_v23, %v7090_v58  ;;  %v6228_v44 = vmul.f32 3.8918573e-05, %v11311_v25 }
 0x78e   : > { %v6159_v57 = vmul.f32 %v7902_v50, %v11337_v52  ;;  %v5918_v10 = vadd.f32 %v5892_v7, %v5768_v4  ;;  %v6182_v15 = vadd.f32 0.05243302, %v6181_v39  ;;  %v6218_v18 = vadd.f32 0.00028619796, %v6217_v59 }
 0x78f   : > { %v6194_v45 = vmul.f32 %v6193_v41, %v11284_v55  ;;  %v11382_v46 = vadd.f32 %v11038_v26, %v5917_v5  ;;  %v6714_v19 = vmul.f32 0.4733, %v6634_v13  ;;  %v6146_v56 = vadd.f32 1.1283791, %v6145_v48 }
 0x790   : > { %v6160_v51 = vsub.f32 1.0, %v6159_v57  ;;  %vm6164_vm10 = vweird.f32 %v7902_v50  ;;  %v6167_v28 = vand.u32 2147483647, %v11337_v52  ;;  %v6169_v42 = vand.u32 2147483648, %v11337_v52 }
 0x791   : > { %v6195_v37 = vadd.f32 0.4994258, %v6194_v45  ;;  %v6746_v30 = vadd.f32 %v6714_v19, %v11307_v9  ;;  %v6219_v16 = vmul.f32 %v6218_v18, %v11311_v25  ;;  %v6229_v8 = vadd.f32 0.001143296, %v6228_v44  ;;  %v7092_v18 = vpop.f32.mrf.mxu0 }
 0x792   : > { %v6161_v62 = vmul.f32 %v7902_v50, %v6160_v51  ;;  %v11389_v20 = vadd.f32 %v11038_v26, %v5918_v10  ;;  %vm6163_vm11 = vweird.f32 %v11337_v52  ;;  %v6183_v12 = vmul.f32 %v6182_v15, %v11284_v55  ;;  %v5745_v52 = vpop.f32.mrf.mxu1  ;;  %v6905_v15 = vpop.f32.mrf.mxu3 }
 0x793   : > { %v6196_v22 = vmul.f32 %v6195_v37, %v11284_v55  ;;  %vm6762_vm12 = vcmp.ge.f32.partialorder %v6746_v30, 0.0  ;;  %v6778_v58 = vmul.f32 0.2, %v6746_v30  ;;  %v6220_v0 = vadd.f32 0.0036580483, %v6219_v16  ;;  %vm6165_vm13 = vmor %vm6163_vm11, %vm6164_vm10  ;;  %v5895_v37 = vpop.f32.mrf.mxu2 }
 0x794   : > { %v6162_v39 = vadd.f32 %v7902_v50, %v6161_v62  ;;  %v6147_v5 = vmul.f32 %v6146_v56, %v11193_v2  ;;  %v6170_v9 = vor.u32 1.1754944e-38, %v6169_v42  ;;  %v6230_v7 = vmul.f32 %v6229_v8, %v11311_v25 }
 0x795   : > { %v11396_v49 = vadd.f32 1.0, %v6196_v22  ;;  %v6730_v48 = vmul.f32 0.5497, %v6634_v13  ;;  %v6794_v4 = vsel %vm6762_vm12, %v6746_v30, %v6778_v58  ;;  %vm6168_vm14 = vcmp.eq.f32.partialorder %v6167_v28, 8.507059e+37 }
 0x796   : > { %v6166_v41 = vsel %vm6165_vm13, %v7902_v50, %v6162_v39  ;;  %v6810_v59 = vmul.f32 0.4591, %v6794_v4  ;;  %v6221_v44 = vmul.f32 %v6220_v0, %v11311_v25  ;;  %v11401_v10 = vmin.f32 %v6335_v33, 16.0 }
 0x797   : > { %v6171_v57 = vsel %vm6168_vm14, %v6170_v9, %v6166_v41  ;;  %7903 = vrcp.f32 %v11396_v49  ;;  %v11404_v2 = vmul.f32 0.70710677, %v11382_v46  ;;  %v6184_v19 = vadd.f32 0.18741608, %v6183_v12 }
 0x798   : > { %v6172_v45 = vmul.f32 %v6171_v57, %v6147_v5  ;;  %vm6657_vm15 = vcmp.ge.f32.partialorder %v11382_v46, 0.0  ;;  %v6826_v13 = vadd.f32 %v6810_v59, %v6730_v48  ;;  %v6231_v50 = vadd.f32 0.014752088, %v6230_v7 }
 0x799   : > { %v6257_v56 = vmul.f32 2.1237322e-06, %v11347_v63  ;;  %v6673_v51 = vmul.f32 0.2, %v11382_v46  ;;  %v11410_v28 = vmul.f32 0.70710677, %v11389_v20  ;;  %v5769_v33 = vadd.f32 %v5745_v52, %v10993_v6 }
 0x79a   : > { %v7740_v42 = vclamps-f32 %v6172_v45, 1.0  ;;  %v7151_v30 = vadd.f32 %v7135_v34, %v6826_v13  ;;  %v7093_v62 = vadd.f32 %v7092_v18, %v6905_v15  ;;  %v6222_v16 = vadd.f32 0.05243302, %v6221_v44  ;;  %v5748_v44 = vpop.f32.mrf.mxu1 }
 0x79b   : > { %v6232_v8 = vmul.f32 %v6231_v50, %v11311_v25  ;;  %v11415_v22 = vmul.f32 0.5, %v11204_v53  ;;  %v6185_v58 = vmul.f32 %v6184_v19, %v11284_v55  ;;  %v6258_v39 = vadd.f32 0.00028619796, %v6257_v56 }
 0x79c   : > { %v6619_v12 = vadd.f32 1.0, %v7740_v42  ;;  %v6375_v5 = vmul.f32 %v11404_v2, %v11404_v2  ;;  %7167 = vst.msk [vmem:[%s8119_s18 + $0x18] sm:$0xff] %vm1189_vm4, %v7151_v30  ;;  %v5919_v6 = vadd.f32 %v5895_v37, %v5769_v33  ;;  %v6268_v34 = vmul.f32 3.8918573e-05, %v11347_v63 }
 0x79d   : > { %v7904_v0 = vpop.eup %7903  ;;  %v6233_v9 = vadd.f32 0.112945676, %v6232_v8  ;;  %v11426_v7 = vsel %vm6657_vm15, %v11382_v46, %v6673_v51  ;;  %v11429_v53 = vmul.f32 0.2, %v11389_v20  ;;  %v6415_v4 = vmul.f32 %v11410_v28, %v11410_v28 }
 0x79e   : > { %v6635_v55 = vmul.f32 %v6619_v12, %v11224_v21  ;;  %v6199_v48 = vmul.f32 %v7904_v0, %v11396_v49  ;;  %v7136_v52 = vadd.f32 %v11213_v23, %v7093_v62  ;;  %v6223_v41 = vmul.f32 %v6222_v16, %v11311_v25 }
 0x79f   : > { %v6234_v59 = vmul.f32 %v6233_v9, %v11311_v25  ;;  %v6186_v15 = vadd.f32 1.1283791, %v6185_v58  ;;  %v6259_v18 = vmul.f32 %v6258_v39, %v11347_v63  ;;  %v11440_v19 = vadd.f32 %v11038_v26, %v5919_v6 }
 0x7a0   : > { %v6715_v57 = vmul.f32 0.4733, %v6635_v55  ;;  %v6200_v45 = vsub.f32 1.0, %v6199_v48  ;;  %v6209_v21 = vand.u32 2147483648, %v11396_v49  ;;  %v6269_v50 = vadd.f32 0.001143296, %v6268_v34 }
 0x7a1   : > { %v6235_v13 = vadd.f32 0.4994258, %v6234_v59  ;;  %vm6204_vm0 = vweird.f32 %v7904_v0  ;;  %v6207_v33 = vand.u32 2147483647, %v11396_v49  ;;  %v5770_v42 = vadd.f32 %v5748_v44, %v11007_v47 }
 0x7a2   : > { %v6747_v56 = vadd.f32 %v6715_v57, %v11362_v32  ;;  %v6201_v51 = vmul.f32 %v7904_v0, %v6200_v45  ;;  %vm6203_vm1 = vweird.f32 %v11396_v49  ;;  %v6224_v37 = vadd.f32 0.18741608, %v6223_v41  ;;  %v5898_v32 = vpop.f32.mrf.mxu2  ;;  %v6908_v41 = vpop.f32.mrf.mxu3 }
 0x7a3   : > { %v6236_v30 = vmul.f32 %v6235_v13, %v11311_v25  ;;  %v6260_v16 = vadd.f32 0.0036580483, %v6259_v18  ;;  %v6187_v8 = vmul.f32 %v6186_v15, %v11227_v43  ;;  %vm6205_vm3 = vmor %vm6203_vm1, %vm6204_vm0  ;;  %v6210_v12 = vor.u32 1.1754944e-38, %v6209_v21  ;;  %v7095_v43 = vpop.f32.mrf.mxu0 }
 0x7a4   : > { %vm6763_vm2 = vcmp.ge.f32.partialorder %v6747_v56, 0.0  ;;  %v6779_v26 = vmul.f32 0.2, %v6747_v56  ;;  %v6202_v62 = vadd.f32 %v7904_v0, %v6201_v51  ;;  %v6270_v39 = vmul.f32 %v6269_v50, %v11347_v63 }
 0x7a5   : > { %v11449_v58 = vadd.f32 1.0, %v6236_v30  ;;  %vm6208_vm5 = vcmp.eq.f32.partialorder %v6207_v33, 8.507059e+37  ;;  %v6297_v49 = vmul.f32 2.1237322e-06, %v11359_v29  ;;  %v6731_v9 = vmul.f32 0.5497, %v6635_v55 }
 0x7a6   : > { %v6795_v6 = vsel %vm6763_vm2, %v6747_v56, %v6779_v26  ;;  %v6206_v47 = vsel %vm6205_vm3, %v7904_v0, %v6202_v62  ;;  %v5920_v57 = vadd.f32 %v5898_v32, %v5770_v42  ;;  %v6225_v44 = vmul.f32 %v6224_v37, %v11311_v25  ;;  %v11468_v37 = vld [vmem:[%s11799_s7] ss:$0 sm:$0xff] }
 0x7a7   : > { %v6811_v34 = vmul.f32 0.4591, %v6795_v6  ;;  %v6211_v48 = vsel %vm6208_vm5, %v6210_v12, %v6206_v47  ;;  %7905 = vrcp.f32 %v11449_v58  ;;  %v6261_v15 = vmul.f32 %v6260_v16, %v11347_v63 }
 0x7a8   : > { %v6212_v59 = vmul.f32 %v6211_v48, %v6187_v8  ;;  %v6271_v18 = vadd.f32 0.014752088, %v6270_v39  ;;  %v6298_v21 = vadd.f32 0.00028619796, %v6297_v49  ;;  %v6308_v0 = vmul.f32 3.8918573e-05, %v11359_v29 }
 0x7a9   : > { %v6827_v45 = vadd.f32 %v6811_v34, %v6731_v9  ;;  %v11457_v13 = vmin.f32 %v6375_v5, 16.0  ;;  %vm6658_vm6 = vcmp.ge.f32.partialorder %v11389_v20, 0.0  ;;  %v11461_v55 = vmul.f32 0.70710677, %v11440_v19 }
 0x7aa   : > { %v7741_v50 = vclamps-f32 %v6212_v59, 1.0  ;;  %v7096_v51 = vadd.f32 %v7095_v43, %v6908_v41  ;;  %v6272_v25 = vmul.f32 %v6271_v18, %v11347_v63  ;;  %v6299_v33 = vmul.f32 %v6298_v21, %v11359_v29 }
 0x7ab   : > { %v7152_v56 = vadd.f32 %v7136_v52, %v6827_v45  ;;  %v11471_v5 = vadd.f32 %v11468_v37, %v5920_v57  ;;  %v6226_v30 = vadd.f32 1.1283791, %v6225_v44  ;;  %v6262_v26 = vadd.f32 0.05243302, %v6261_v15  ;;  %v5751_v44 = vpop.f32.mrf.mxu1 }
 0x7ac   : > { %v6620_v42 = vadd.f32 1.0, %v7741_v50  ;;  %v11473_v16 = vmin.f32 %v6415_v4, 16.0  ;;  %v11477_v52 = vsel %vm6658_vm6, %v11389_v20, %v11429_v53  ;;  %v6273_v8 = vadd.f32 0.112945676, %v6272_v25 }
 0x7ad   : > { %v7906_v62 = vpop.eup %7905  ;;  %7168 = vst.msk [vmem:[%s8119_s18 + $0x20] sm:$0xff] %vm1189_vm4, %v7152_v56  ;;  %v6309_v12 = vadd.f32 0.001143296, %v6308_v0  ;;  %v6700_v39 = vmul.f32 0.5267, %v11281_v54  ;;  %v11484_v6 = vmul.f32 0.5, %v11240_v14  ;;  %v6455_v4 = vmul.f32 %v11461_v55, %v11461_v55 }
 0x7ae   : > { %v6636_v32 = vmul.f32 %v6620_v42, %v11415_v22  ;;  %v6239_v47 = vmul.f32 %v7906_v62, %v11449_v58  ;;  %v7137_v49 = vadd.f32 %v11213_v23, %v7096_v51  ;;  %v6274_v53 = vmul.f32 %v6273_v8, %v11347_v63 }
 0x7af   : > { %v6300_v9 = vadd.f32 0.0036580483, %v6299_v33  ;;  %v11492_v48 = vmul.f32 0.70710677, %v11471_v5  ;;  %v6263_v54 = vmul.f32 %v6262_v26, %v11347_v63  ;;  %v6227_v14 = vmul.f32 %v6226_v30, %v11254_v27 }
 0x7b0   : > { %v6716_v34 = vmul.f32 0.4733, %v6636_v32  ;;  %v6240_v22 = vsub.f32 1.0, %v6239_v47  ;;  %v6249_v41 = vand.u32 2147483648, %v11449_v58  ;;  %v6275_v59 = vadd.f32 0.4994258, %v6274_v53  ;;  %v7098_v47 = vpop.f32.mrf.mxu0 }
 0x7b1   : > { %v6310_v43 = vmul.f32 %v6309_v12, %v11359_v29  ;;  %vm6244_vm7 = vweird.f32 %v7906_v62  ;;  %v6247_v45 = vand.u32 2147483647, %v11449_v58  ;;  %vm6243_vm8 = vweird.f32 %v11449_v58  ;;  %v6911_v12 = vpop.f32.mrf.mxu3 }
 0x7b2   : > { %v6748_v57 = vadd.f32 %v6716_v34, %v6700_v39  ;;  %v6241_v15 = vmul.f32 %v7906_v62, %v6240_v22  ;;  %v6276_v18 = vmul.f32 %v6275_v59, %v11347_v63  ;;  %v6301_v21 = vmul.f32 %v6300_v9, %v11359_v29  ;;  %vm6245_vm10 = vmor %vm6243_vm8, %vm6244_vm7 }
 0x7b3   : > { %v6311_v0 = vadd.f32 0.014752088, %v6310_v43  ;;  %v6264_v56 = vadd.f32 0.18741608, %v6263_v54  ;;  %v6250_v51 = vor.u32 1.1754944e-38, %v6249_v41  ;;  %vm6248_vm11 = vcmp.eq.f32.partialorder %v6247_v45, 8.507059e+37  ;;  %v5901_v54 = vpop.f32.mrf.mxu2 }
 0x7b4   : > { %vm6764_vm9 = vcmp.ge.f32.partialorder %v6748_v57, 0.0  ;;  %v6780_v27 = vmul.f32 0.2, %v6748_v57  ;;  %v6242_v50 = vadd.f32 %v7906_v62, %v6241_v15  ;;  %v11502_v25 = vadd.f32 1.0, %v6276_v18 }
 0x7b5   : > { %v6312_v33 = vmul.f32 %v6311_v0, %v11359_v29  ;;  %v6337_v42 = vmul.f32 2.1237322e-06, %v11401_v10  ;;  %v6732_v30 = vmul.f32 0.5497, %v6636_v32  ;;  %v6302_v53 = vadd.f32 0.05243302, %v6301_v21 }
 0x7b6   : > { %v6796_v26 = vsel %vm6764_vm9, %v6748_v57, %v6780_v27  ;;  %v6246_v58 = vsel %vm6245_vm10, %v7906_v62, %v6242_v50  ;;  %7907 = vrcp.f32 %v11502_v25  ;;  %v11507_v9 = vmin.f32 %v6455_v4, 16.0  ;;  %v5754_v27 = vpop.f32.mrf.mxu1 }
 0x7b7   : > { %v6812_v8 = vmul.f32 0.4591, %v6796_v26  ;;  %v6251_v39 = vsel %vm6248_vm11, %v6250_v51, %v6246_v58  ;;  %v11510_v34 = vmul.f32 0.2, %v11440_v19  ;;  %v6265_v41 = vmul.f32 %v6264_v56, %v11347_v63 }
 0x7b8   : > { %v6252_v22 = vmul.f32 %v6251_v39, %v6227_v14  ;;  %v5771_v62 = vadd.f32 %v5751_v44, %v11019_v3  ;;  %v6313_v59 = vadd.f32 0.112945676, %v6312_v33  ;;  %v6338_v43 = vadd.f32 0.00028619796, %v6337_v42 }
 0x7b9   : > { %v6828_v32 = vadd.f32 %v6812_v8, %v6732_v30  ;;  %v6495_v57 = vmul.f32 %v11492_v48, %v11492_v48  ;;  %v6701_v4 = vmul.f32 0.5267, %v11290_v17  ;;  %v7099_v45 = vadd.f32 %v7098_v47, %v6911_v12 }
 0x7ba   : > { %v7742_v15 = vclamps-f32 %v6252_v22, 1.0  ;;  %v5921_v21 = vadd.f32 %v5901_v54, %v5771_v62  ;;  %v6303_v14 = vmul.f32 %v6302_v53, %v11359_v29  ;;  %v6314_v0 = vmul.f32 %v6313_v59, %v11359_v29 }
 0x7bb   : > { %v7153_v18 = vadd.f32 %v7137_v49, %v6828_v32  ;;  %v11520_v3 = vmul.f32 0.5, %v11272_v61  ;;  %v6266_v44 = vadd.f32 1.1283791, %v6265_v41  ;;  %v11523_v50 = vmul.f32 0.5267, %v11317_v38  ;;  %v5904_v62 = vpop.f32.mrf.mxu2 }
 0x7bc   : > { %v6621_v63 = vadd.f32 1.0, %v7742_v15  ;;  %v7908_v56 = vpop.eup %7907  ;;  %v11528_v17 = vmul.f32 0.5, %v11297_v36  ;;  %v6315_v49 = vadd.f32 0.4994258, %v6314_v0  ;;  %v6339_v51 = vmul.f32 %v6338_v43, %v11401_v10 }
 0x7bd   : > { %7169 = vst.msk [vmem:[%s8119_s18 + $0x28] sm:$0xff] %vm1189_vm4, %v7153_v18  ;;  %v6348_v33 = vmul.f32 3.8918573e-05, %v11401_v10  ;;  %v11532_v42 = vmin.f32 %v6495_v57, 16.0  ;;  %v7138_v30 = vadd.f32 %v11213_v23, %v7099_v45  ;;  %v6279_v38 = vmul.f32 %v7908_v56, %v11502_v25 }
 0x7be   : > { %v6637_v61 = vmul.f32 %v6621_v63, %v11484_v6  ;;  %v11538_v26 = vadd.f32 %v11468_v37, %v5921_v21  ;;  %v5772_v58 = vadd.f32 %v5754_v27, %v11033_v1  ;;  %v6304_v36 = vadd.f32 0.18741608, %v6303_v14  ;;  %v6914_v63 = vpop.f32.mrf.mxu3 }
 0x7bf   : > { %v11542_v8 = vmul.f32 0.5267, %v11352_v60  ;;  %v6280_v39 = vsub.f32 1.0, %v6279_v38  ;;  %v6287_v47 = vand.u32 2147483647, %v11502_v25  ;;  %v6316_v53 = vmul.f32 %v6315_v49, %v11359_v29 }
 0x7c0   : > { %v6717_v12 = vmul.f32 0.4733, %v6637_v61  ;;  %v6267_v6 = vmul.f32 %v6266_v44, %v11293_v31  ;;  %v6289_v23 = vand.u32 2147483648, %v11502_v25  ;;  %v6340_v22 = vadd.f32 0.0036580483, %v6339_v51  ;;  %v7101_v44 = vpop.f32.mrf.mxu0 }
 0x7c1   : > { %v6349_v54 = vadd.f32 0.001143296, %v6348_v33  ;;  %v6281_v32 = vmul.f32 %v7908_v56, %v6280_v39  ;;  %vm6284_vm12 = vweird.f32 %v7908_v56  ;;  %v11548_v1 = vadd.f32 1.0, %v6316_v53 }
 0x7c2   : > { %v6749_v41 = vadd.f32 %v6717_v12, %v6701_v4  ;;  %v11551_v60 = vmul.f32 0.70710677, %v11538_v26  ;;  %vm6283_vm13 = vweird.f32 %v11502_v25  ;;  %v6305_v59 = vmul.f32 %v6304_v36, %v11359_v29 }
 0x7c3   : > { %v6350_v43 = vmul.f32 %v6349_v54, %v11401_v10  ;;  %v6282_v57 = vadd.f32 %v7908_v56, %v6281_v32  ;;  %7909 = vrcp.f32 %v11548_v1  ;;  %vm6285_vm15 = vmor %vm6283_vm13, %vm6284_vm12  ;;  %vm6288_vm0 = vcmp.eq.f32.partialorder %v6287_v47, 8.507059e+37 }
 0x7c4   : > { %vm6765_vm14 = vcmp.ge.f32.partialorder %v6749_v41, 0.0  ;;  %v6781_v31 = vmul.f32 0.2, %v6749_v41  ;;  %v6290_v15 = vor.u32 1.1754944e-38, %v6289_v23  ;;  %v6341_v4 = vmul.f32 %v6340_v22, %v11401_v10 }
 0x7c5   : > { %v6377_v45 = vmul.f32 2.1237322e-06, %v11457_v13  ;;  %v6286_v21 = vsel %vm6285_vm15, %v7908_v56, %v6282_v57  ;;  %v5922_v25 = vadd.f32 %v5904_v62, %v5772_v58  ;;  %v6351_v14 = vadd.f32 0.014752088, %v6350_v43 }
 0x7c6   : > { %v6797_v18 = vsel %vm6765_vm14, %v6749_v41, %v6781_v31  ;;  %v6733_v0 = vmul.f32 0.5497, %v6637_v61  ;;  %v6291_v27 = vsel %vm6288_vm0, %v6290_v15, %v6286_v21  ;;  %v6306_v49 = vadd.f32 1.1283791, %v6305_v59 }
 0x7c7   : > { %v6813_v29 = vmul.f32 0.4591, %v6797_v18  ;;  %v6535_v51 = vmul.f32 %v11551_v60, %v11551_v60  ;;  %v6292_v33 = vmul.f32 %v6291_v27, %v6267_v6  ;;  %v11562_v38 = vmul.f32 0.5, %v11328_v35 }
 0x7c8   : > { %v6352_v36 = vmul.f32 %v6351_v14, %v11401_v10  ;;  %v6342_v39 = vadd.f32 0.05243302, %v6341_v4  ;;  %v6378_v56 = vadd.f32 0.00028619796, %v6377_v45  ;;  %v6388_v61 = vmul.f32 3.8918573e-05, %v11457_v13 }
 0x7c9   : > { %v6829_v12 = vadd.f32 %v6813_v29, %v6733_v0  ;;  %v7910_v58 = vpop.eup %7909  ;;  %v7743_v47 = vclamps-f32 %v6292_v33, 1.0  ;;  %v7102_v53 = vadd.f32 %v7101_v44, %v6914_v63  ;;  %v11567_v23 = vadd.f32 %v11468_v37, %v5922_v25 }
 0x7ca   : > { %v6353_v22 = vadd.f32 0.112945676, %v6352_v36  ;;  %v6307_v6 = vmul.f32 %v6306_v49, %v11320_v11  ;;  %v6319_v35 = vmul.f32 %v7910_v58, %v11548_v1  ;;  %v6379_v41 = vmul.f32 %v6378_v56, %v11457_v13 }
 0x7cb   : > { %v7154_v54 = vadd.f32 %v7138_v30, %v6829_v12  ;;  %v6622_v32 = vadd.f32 1.0, %v7743_v47  ;;  %v6327_v62 = vand.u32 2147483647, %v11548_v1  ;;  %v6389_v43 = vadd.f32 0.001143296, %v6388_v61 }
 0x7cc   : > { %v6354_v59 = vmul.f32 %v6353_v22, %v11401_v10  ;;  %v6320_v31 = vsub.f32 1.0, %v6319_v35  ;;  %v6329_v37 = vand.u32 2147483648, %v11548_v1  ;;  %v6343_v57 = vmul.f32 %v6342_v39, %v11401_v10 }
 0x7cd   : > { %7170 = vst.msk [vmem:[%s8119_s18 + $0x30] sm:$0xff] %vm1189_vm4, %v7154_v54  ;;  %v6417_v30 = vmul.f32 2.1237322e-06, %v11473_v16  ;;  %v6638_v11 = vmul.f32 %v6622_v32, %v11520_v3  ;;  %v6390_v4 = vmul.f32 %v6389_v43, %v11457_v13  ;;  %v6428_v45 = vmul.f32 3.8918573e-05, %v11473_v16 }
 0x7ce   : > { %v6355_v15 = vadd.f32 0.4994258, %v6354_v59  ;;  %vm6659_vm1 = vcmp.ge.f32.partialorder %v11440_v19, 0.0  ;;  %v6321_v18 = vmul.f32 %v7910_v58, %v6320_v31  ;;  %vm6324_vm2 = vweird.f32 %v7910_v58 }
 0x7cf   : > { %v6380_v21 = vadd.f32 0.0036580483, %v6379_v41  ;;  %v6418_v25 = vadd.f32 0.00028619796, %v6417_v30  ;;  %v6718_v14 = vmul.f32 0.4733, %v6638_v11  ;;  %vm6323_vm3 = vweird.f32 %v11548_v1  ;;  %v7104_v30 = vpop.f32.mrf.mxu0 }
 0x7d0   : > { %v6356_v0 = vmul.f32 %v6355_v15, %v11401_v10  ;;  %v6391_v29 = vadd.f32 0.014752088, %v6390_v4  ;;  %v6322_v63 = vadd.f32 %v7910_v58, %v6321_v18  ;;  %v6344_v27 = vadd.f32 0.18741608, %v6343_v57  ;;  %vm6325_vm5 = vmor %vm6323_vm3, %vm6324_vm2  ;;  %v6917_v57 = vpop.f32.mrf.mxu3 }
 0x7d1   : > { %v6419_v3 = vmul.f32 %v6418_v25, %v11473_v16  ;;  %v6429_v44 = vadd.f32 0.001143296, %v6428_v45  ;;  %v6750_v49 = vadd.f32 %v6718_v14, %v11523_v50  ;;  %v6330_v33 = vor.u32 1.1754944e-38, %v6329_v37 }
 0x7d2   : > { %v11587_v36 = vadd.f32 1.0, %v6356_v0  ;;  %v6392_v12 = vmul.f32 %v6391_v29, %v11457_v13  ;;  %v6326_v39 = vsel %vm6325_vm5, %v7910_v58, %v6322_v63  ;;  %vm6328_vm6 = vcmp.eq.f32.partialorder %v6327_v62, 8.507059e+37  ;;  %v11599_v58 = vld [vmem:[%s11802_s10] ss:$0 sm:$0xff] }
 0x7d3   : > { %v6381_v1 = vmul.f32 %v6380_v21, %v11457_v13  ;;  %v6420_v56 = vadd.f32 0.0036580483, %v6419_v3  ;;  %vm6766_vm7 = vcmp.ge.f32.partialorder %v6750_v49, 0.0  ;;  %v6782_v61 = vmul.f32 0.2, %v6750_v49 }
 0x7d4   : > { %v6331_v47 = vsel %vm6328_vm6, %v6330_v33, %v6326_v39  ;;  %7911 = vrcp.f32 %v11587_v36  ;;  %v11592_v22 = vmin.f32 %v6535_v51, 16.0  ;;  %v6430_v50 = vmul.f32 %v6429_v44, %v11473_v16 }
 0x7d5   : > { %v6332_v54 = vmul.f32 %v6331_v47, %v6307_v6  ;;  %v6457_v35 = vmul.f32 2.1237322e-06, %v11507_v9  ;;  %v6798_v41 = vsel %vm6766_vm7, %v6750_v49, %v6782_v61  ;;  %v7139_v32 = vadd.f32 %v11599_v58, %v7102_v53 }
 0x7d6   : > { %v6393_v62 = vadd.f32 0.112945676, %v6392_v12  ;;  %v6421_v59 = vmul.f32 %v6420_v56, %v11473_v16  ;;  %v6734_v43 = vmul.f32 0.5497, %v6638_v11  ;;  %v6814_v31 = vmul.f32 0.4591, %v6798_v41 }
 0x7d7   : > { %v7744_v51 = vclamps-f32 %v6332_v54, 1.0  ;;  %v11604_v6 = vmul.f32 0.5, %v11382_v46  ;;  %v11607_v37 = vmul.f32 0.70710677, %v11567_v23  ;;  %v6345_v15 = vmul.f32 %v6344_v27, %v11401_v10 }
 0x7d8   : > { %v6382_v4 = vadd.f32 0.05243302, %v6381_v1  ;;  %v6394_v45 = vmul.f32 %v6393_v62, %v11457_v13  ;;  %v6830_v53 = vadd.f32 %v6814_v31, %v6734_v43  ;;  %v6431_v21 = vadd.f32 0.014752088, %v6430_v50  ;;  %v6920_v31 = vpop.f32.mrf.mxu3 }
 0x7d9   : > { %v6623_v18 = vadd.f32 1.0, %v7744_v51  ;;  %v6458_v11 = vadd.f32 0.00028619796, %v6457_v35  ;;  %v11615_v46 = vsel %vm6659_vm1, %v11440_v19, %v11510_v34  ;;  %v11618_v14 = vmul.f32 0.5267, %v11372_v40 }
 0x7da   : > { %v7912_v25 = vpop.eup %7911  ;;  %v6395_v0 = vadd.f32 0.4994258, %v6394_v45  ;;  %v6422_v10 = vadd.f32 0.05243302, %v6421_v59  ;;  %v7155_v29 = vadd.f32 %v7139_v32, %v6830_v53  ;;  %v7105_v27 = vadd.f32 %v7104_v30, %v6917_v57  ;;  %v7107_v57 = vpop.f32.mrf.mxu0 }
 0x7db   : > { %v6639_v63 = vmul.f32 %v6623_v18, %v11528_v17  ;;  %v6359_v3 = vmul.f32 %v7912_v25, %v11587_v36  ;;  %v6346_v44 = vadd.f32 1.1283791, %v6345_v15  ;;  %v6383_v49 = vmul.f32 %v6382_v4, %v11457_v13 }
 0x7dc   : > { %v6396_v33 = vmul.f32 %v6395_v0, %v11457_v13  ;;  %v6432_v12 = vmul.f32 %v6431_v21, %v11473_v16  ;;  %7171 = vst.msk [vmem:[%s8119_s18 + $0x38] sm:$0xff] %vm1189_vm4, %v7155_v29  ;;  %v6367_v39 = vand.u32 2147483647, %v11587_v36  ;;  %v6459_v1 = vmul.f32 %v6458_v11, %v11507_v9 }
 0x7dd   : > { %v6719_v34 = vmul.f32 0.4733, %v6639_v63  ;;  %v6360_v40 = vsub.f32 1.0, %v6359_v3  ;;  %v6369_v17 = vand.u32 2147483648, %v11587_v36  ;;  %v6423_v61 = vmul.f32 %v6422_v10, %v11473_v16 }
 0x7de   : > { %v11630_v56 = vadd.f32 1.0, %v6396_v33  ;;  %v6433_v47 = vadd.f32 0.112945676, %v6432_v12  ;;  %vm6364_vm8 = vweird.f32 %v7912_v25  ;;  %v6460_v35 = vadd.f32 0.0036580483, %v6459_v1 }
 0x7df   : > { %v6751_v54 = vadd.f32 %v6719_v34, %v11542_v8  ;;  %v6361_v50 = vmul.f32 %v7912_v25, %v6360_v40  ;;  %v7140_v41 = vadd.f32 %v11599_v58, %v7105_v27  ;;  %vm6363_vm9 = vweird.f32 %v11587_v36 }
 0x7e0   : > { %v6384_v32 = vadd.f32 0.18741608, %v6383_v49  ;;  %7913 = vrcp.f32 %v11630_v56  ;;  %v6468_v43 = vmul.f32 3.8918573e-05, %v11507_v9  ;;  %v6347_v51 = vmul.f32 %v6346_v44, %v11345_v24  ;;  %vm6365_vm11 = vmor %vm6363_vm9, %vm6364_vm8 }
 0x7e1   : > { %vm6767_vm10 = vcmp.ge.f32.partialorder %v6751_v54, 0.0  ;;  %v6783_v62 = vmul.f32 0.2, %v6751_v54  ;;  %v6362_v59 = vadd.f32 %v7912_v25, %v6361_v50  ;;  %vm6368_vm12 = vcmp.eq.f32.partialorder %v6367_v39, 8.507059e+37 }
 0x7e2   : > { %v6370_v8 = vor.u32 1.1754944e-38, %v6369_v17  ;;  %v6434_v30 = vmul.f32 %v6433_v47, %v11473_v16  ;;  %v6424_v36 = vadd.f32 0.18741608, %v6423_v61  ;;  %v6461_v45 = vmul.f32 %v6460_v35, %v11507_v9 }
 0x7e3   : > { %v6799_v15 = vsel %vm6767_vm10, %v6751_v54, %v6783_v62  ;;  %v6366_v4 = vsel %vm6365_vm11, %v7912_v25, %v6362_v59  ;;  %v6735_v53 = vmul.f32 0.5497, %v6639_v63  ;;  %v7108_v10 = vadd.f32 %v7107_v57, %v6920_v31 }
 0x7e4   : > { %v6815_v18 = vmul.f32 0.4591, %v6799_v15  ;;  %v6371_v21 = vsel %vm6368_vm12, %v6370_v8, %v6366_v4  ;;  %v6435_v11 = vadd.f32 0.4994258, %v6434_v30  ;;  %v6385_v29 = vmul.f32 %v6384_v32, %v11457_v13 }
 0x7e5   : > { %v6372_v0 = vmul.f32 %v6371_v21, %v6347_v51  ;;  %v6469_v24 = vadd.f32 0.001143296, %v6468_v43  ;;  %v6497_v49 = vmul.f32 2.1237322e-06, %v11532_v42  ;;  %v6508_v25 = vmul.f32 3.8918573e-05, %v11532_v42 }
 0x7e6   : > { %v7914_v27 = vpop.eup %7913  ;;  %v6831_v3 = vadd.f32 %v6815_v18, %v6735_v53  ;;  %v6436_v44 = vmul.f32 %v6435_v11, %v11473_v16  ;;  %v6425_v12 = vmul.f32 %v6424_v36, %v11473_v16  ;;  %v6462_v34 = vadd.f32 0.05243302, %v6461_v45 }
 0x7e7   : > { %v7745_v33 = vclamps-f32 %v6372_v0, 1.0  ;;  %v6399_v63 = vmul.f32 %v7914_v27, %v11630_v56  ;;  %v6470_v13 = vmul.f32 %v6469_v24, %v11507_v9  ;;  %v6498_v1 = vadd.f32 0.00028619796, %v6497_v49  ;;  %v7110_v24 = vpop.f32.mrf.mxu0 }
 0x7e8   : > { %v7156_v40 = vadd.f32 %v7140_v41, %v6831_v3  ;;  %v11647_v39 = vadd.f32 1.0, %v6436_v44  ;;  %v6386_v61 = vadd.f32 1.1283791, %v6385_v29  ;;  %v11651_v54 = vmul.f32 0.5267, %v11426_v7 }
 0x7e9   : > { %v6624_v17 = vadd.f32 1.0, %v7745_v33  ;;  %v6400_v47 = vsub.f32 1.0, %v6399_v63  ;;  %v6407_v50 = vand.u32 2147483647, %v11630_v56  ;;  %v6409_v35 = vand.u32 2147483648, %v11630_v56 }
 0x7ea   : > { %7172 = vst.msk [vmem:[%s8119_s18 + $0x40] sm:$0xff] %vm1189_vm4, %v7156_v40  ;;  %7915 = vrcp.f32 %v11647_v39  ;;  %v6509_v16 = vadd.f32 0.001143296, %v6508_v25  ;;  %vm6404_vm13 = vweird.f32 %v7914_v27  ;;  %v6426_v62 = vadd.f32 1.1283791, %v6425_v12 }
 0x7eb   : > { %v6640_v41 = vmul.f32 %v6624_v17, %v11562_v38  ;;  %v6401_v32 = vmul.f32 %v7914_v27, %v6400_v47  ;;  %v7141_v59 = vadd.f32 %v11599_v58, %v7108_v10  ;;  %v6463_v43 = vmul.f32 %v6462_v34, %v11507_v9  ;;  %v6923_v10 = vpop.f32.mrf.mxu3 }
 0x7ec   : > { %v6471_v7 = vadd.f32 0.014752088, %v6470_v13  ;;  %v6499_v31 = vmul.f32 %v6498_v1, %v11532_v42  ;;  %v6387_v8 = vmul.f32 %v6386_v61, %v11404_v2  ;;  %vm6403_vm14 = vweird.f32 %v11630_v56 }
 0x7ed   : > { %v6720_v51 = vmul.f32 0.4733, %v6640_v41  ;;  %v6402_v57 = vadd.f32 %v7914_v27, %v6401_v32  ;;  %vm6405_vm15 = vmor %vm6403_vm14, %vm6404_vm13  ;;  %v6410_v30 = vor.u32 1.1754944e-38, %v6409_v35  ;;  %v6510_v4 = vmul.f32 %v6509_v16, %v11532_v42 }
 0x7ee   : > { %v6472_v38 = vmul.f32 %v6471_v7, %v11507_v9  ;;  %v6500_v15 = vadd.f32 0.0036580483, %v6499_v31  ;;  %vm6408_vm0 = vcmp.eq.f32.partialorder %v6407_v50, 8.507059e+37  ;;  %v6427_v53 = vmul.f32 %v6426_v62, %v11410_v28 }
 0x7ef   : > { %v6752_v36 = vadd.f32 %v6720_v51, %v11618_v14  ;;  %v6406_v45 = vsel %vm6405_vm15, %v7914_v27, %v6402_v57  ;;  %v6447_v2 = vand.u32 2147483647, %v11647_v39  ;;  %v6464_v11 = vadd.f32 0.18741608, %v6463_v43 }
 0x7f0   : > { %v7916_v18 = vpop.eup %7915  ;;  %v6411_v21 = vsel %vm6408_vm0, %v6410_v30, %v6406_v45  ;;  %v6473_v0 = vadd.f32 0.112945676, %v6472_v38  ;;  %v6449_v44 = vand.u32 2147483648, %v11647_v39  ;;  %v6501_v27 = vmul.f32 %v6500_v15, %v11532_v42 }
 0x7f1   : > { %vm6768_vm1 = vcmp.ge.f32.partialorder %v6752_v36, 0.0  ;;  %v6784_v56 = vmul.f32 0.2, %v6752_v36  ;;  %v6412_v29 = vmul.f32 %v6411_v21, %v6387_v8  ;;  %v6439_v3 = vmul.f32 %v7916_v18, %v11647_v39 }
 0x7f2   : > { %v6474_v14 = vmul.f32 %v6473_v0, %v11507_v9  ;;  %v6511_v28 = vadd.f32 0.014752088, %v6510_v4  ;;  %v6537_v63 = vmul.f32 2.1237322e-06, %v11592_v22  ;;  %v6736_v12 = vmul.f32 0.5497, %v6640_v41 }
 0x7f3   : > { %v6800_v49 = vsel %vm6768_vm1, %v6752_v36, %v6784_v56  ;;  %v7746_v25 = vclamps-f32 %v6412_v29, 1.0  ;;  %v6440_v33 = vsub.f32 1.0, %v6439_v3  ;;  %vm6444_vm2 = vweird.f32 %v7916_v18  ;;  %v6926_v15 = vpop.f32.mrf.mxu3  ;;  %v7113_v36 = vpop.f32.mrf.mxu0 }
 0x7f4   : > { %v6816_v34 = vmul.f32 0.4591, %v6800_v49  ;;  %v6475_v40 = vadd.f32 0.4994258, %v6474_v14  ;;  %v6512_v13 = vmul.f32 %v6511_v28, %v11532_v42  ;;  %v6538_v61 = vadd.f32 0.00028619796, %v6537_v63 }
 0x7f5   : > { %v6625_v1 = vadd.f32 1.0, %v7746_v25  ;;  %v6441_v17 = vmul.f32 %v7916_v18, %v6440_v33  ;;  %vm6443_vm3 = vweird.f32 %v11647_v39  ;;  %v6502_v62 = vadd.f32 0.05243302, %v6501_v27 }
 0x7f6   : > { %v6832_v47 = vadd.f32 %v6816_v34, %v6736_v12  ;;  %v6476_v50 = vmul.f32 %v6475_v40, %v11507_v9  ;;  %v6513_v35 = vadd.f32 0.112945676, %v6512_v13  ;;  %v6548_v41 = vmul.f32 3.8918573e-05, %v11592_v22  ;;  %vm6445_vm5 = vmor %vm6443_vm3, %vm6444_vm2 }
 0x7f7   : > { %v6641_v16 = vmul.f32 %v6625_v1, %v11604_v6  ;;  %v6442_v32 = vadd.f32 %v7916_v18, %v6441_v17  ;;  %v6450_v7 = vor.u32 1.1754944e-38, %v6449_v44  ;;  %vm6448_vm6 = vcmp.eq.f32.partialorder %v6447_v2, 8.507059e+37 }
 0x7f8   : > { %v7157_v43 = vadd.f32 %v7141_v59, %v6832_v47  ;;  %v11679_v31 = vadd.f32 1.0, %v6476_v50  ;;  %v6514_v51 = vmul.f32 %v6513_v35, %v11532_v42  ;;  %v6539_v39 = vmul.f32 %v6538_v61, %v11592_v22 }
 0x7f9   : > { %v6721_v8 = vmul.f32 0.4733, %v6641_v16  ;;  %v6446_v57 = vsel %vm6445_vm5, %v7916_v18, %v6442_v32  ;;  %v6575_v30 = vmul.f32 %v11607_v37, %v11607_v37  ;;  %v6465_v38 = vmul.f32 %v6464_v11, %v11507_v9 }
 0x7fa   : > { %7173 = vst.msk [vmem:[%s8119_s18 + $0x48] sm:$0xff] %vm1189_vm4, %v7157_v43  ;;  %v6451_v6 = vsel %vm6448_vm6, %v6450_v7, %v6446_v57  ;;  %7917 = vrcp.f32 %v11679_v31  ;;  %v6503_v45 = vmul.f32 %v6502_v62, %v11532_v42  ;;  %v6549_v18 = vadd.f32 0.001143296, %v6548_v41 }
 0x7fb   : > { %v6753_v59 = vadd.f32 %v6721_v8, %v11651_v54  ;;  %v6452_v4 = vmul.f32 %v6451_v6, %v6427_v53  ;;  %v11692_v21 = vmul.f32 0.2, %v11471_v5  ;;  %v7111_v2 = vadd.f32 %v7110_v24, %v6923_v10 }
 0x7fc   : > { %v5954_v0 = vmul.f32 0.5, %v11389_v20  ;;  %v6515_v56 = vadd.f32 0.4994258, %v6514_v51  ;;  %v6540_v11 = vadd.f32 0.0036580483, %v6539_v39  ;;  %v11695_v3 = vmin.f32 %v6575_v30, 16.0 }
 0x7fd   : > { %vm6769_vm7 = vcmp.ge.f32.partialorder %v6753_v59, 0.0  ;;  %v6785_v29 = vmul.f32 0.2, %v6753_v59  ;;  %v7747_v9 = vclamps-f32 %v6452_v4, 1.0  ;;  %v7114_v54 = vadd.f32 %v7113_v36, %v6926_v15 }
 0x7fe   : > { %v6466_v44 = vadd.f32 1.1283791, %v6465_v38  ;;  %v6516_v53 = vmul.f32 %v6515_v56, %v11532_v42  ;;  %v6504_v28 = vadd.f32 0.18741608, %v6503_v45  ;;  %v6550_v49 = vmul.f32 %v6549_v18, %v11592_v22 }
 0x7ff   : > { %v6801_v14 = vsel %vm6769_vm7, %v6753_v59, %v6785_v29  ;;  %v6626_v27 = vadd.f32 1.0, %v7747_v9  ;;  %v6737_v10 = vmul.f32 0.5497, %v6641_v16  ;;  %v7142_v20 = vadd.f32 %v11599_v58, %v7111_v2 }
 0x800   : > { %v7918_v25 = vpop.eup %7917  ;;  %v6817_v24 = vmul.f32 0.4591, %v6801_v14  ;;  %v11700_v33 = vadd.f32 1.0, %v6516_v53  ;;  %v6541_v34 = vmul.f32 %v6540_v11, %v11592_v22  ;;  %v6551_v40 = vadd.f32 0.014752088, %v6550_v49 }
 0x801   : > { %v6642_v63 = vmul.f32 %v6626_v27, %v5954_v0  ;;  %v6479_v12 = vmul.f32 %v7918_v25, %v11679_v31  ;;  %v6706_v1 = vmul.f32 0.5267, %v11477_v52  ;;  %v6487_v17 = vand.u32 2147483647, %v11679_v31 }
 0x802   : > { %v6833_v13 = vadd.f32 %v6817_v24, %v6737_v10  ;;  %7919 = vrcp.f32 %v11700_v33  ;;  %v7143_v47 = vadd.f32 %v11599_v58, %v7114_v54  ;;  %v6505_v35 = vmul.f32 %v6504_v28, %v11532_v42 }
 0x803   : > { %v6722_v61 = vmul.f32 0.4733, %v6642_v63  ;;  %v6480_v50 = vsub.f32 1.0, %v6479_v12  ;;  %v6467_v32 = vmul.f32 %v6466_v44, %v11461_v55  ;;  %v6489_v62 = vand.u32 2147483648, %v11679_v31 }
 0x804   : > { %v7158_v16 = vadd.f32 %v7142_v20, %v6833_v13  ;;  %v6552_v41 = vmul.f32 %v6551_v40, %v11592_v22  ;;  %vm6484_vm8 = vweird.f32 %v7918_v25  ;;  %v6542_v52 = vadd.f32 0.05243302, %v6541_v34  ;;  %v6929_v13 = vpop.f32.mrf.mxu3 }
 0x805   : > { %v6754_v43 = vadd.f32 %v6722_v61, %v6706_v1  ;;  %v6481_v7 = vmul.f32 %v7918_v25, %v6480_v50  ;;  %vm6483_vm9 = vweird.f32 %v11679_v31  ;;  %vm11715_vm10 = vcmp.eq.f32.partialorder %v6487_v17, 8.507059e+37  ;;  %v7116_v1 = vpop.f32.mrf.mxu0 }
 0x806   : > { %7174 = vst.msk [vmem:[%s8119_s18 + $0x50] sm:$0xff] %vm1189_vm4, %v7158_v16  ;;  %v6553_v42 = vadd.f32 0.112945676, %v6552_v41  ;;  %v6577_v8 = vmul.f32 2.1237322e-06, %v11695_v3  ;;  %vm6485_vm12 = vmor %vm6483_vm9, %vm6484_vm8  ;;  %v6490_v6 = vor.u32 1.1754944e-38, %v6489_v62  ;;  %v6543_v45 = vmul.f32 %v6542_v52, %v11592_v22 }
 0x807   : > { %vm6770_vm11 = vcmp.ge.f32.partialorder %v6754_v43, 0.0  ;;  %v6786_v55 = vmul.f32 0.2, %v6754_v43  ;;  %v6482_v57 = vadd.f32 %v7918_v25, %v6481_v7  ;;  %v6506_v39 = vadd.f32 1.1283791, %v6505_v35 }
 0x808   : > { %v7920_v30 = vpop.eup %7919  ;;  %v6554_v38 = vmul.f32 %v6553_v42, %v11592_v22  ;;  %v6578_v59 = vadd.f32 0.00028619796, %v6577_v8  ;;  %v6588_v15 = vmul.f32 3.8918573e-05, %v11695_v3  ;;  %v6738_v18 = vmul.f32 0.5497, %v6642_v63 }
 0x809   : > { %v6802_v31 = vsel %vm6770_vm11, %v6754_v43, %v6786_v55  ;;  %v6486_v4 = vsel %vm6485_vm12, %v7918_v25, %v6482_v57  ;;  %v6519_v36 = vmul.f32 %v7920_v30, %v11700_v33  ;;  %v6527_v11 = vand.u32 2147483647, %v11700_v33 }
 0x80a   : > { %v6818_v2 = vmul.f32 0.4591, %v6802_v31  ;;  %v6491_v0 = vsel %vm11715_vm10, %v6490_v6, %v6486_v4  ;;  %v6555_v56 = vadd.f32 0.4994258, %v6554_v38  ;;  %v6589_v54 = vadd.f32 0.001143296, %v6588_v15 }
 0x80b   : > { %v6492_v29 = vmul.f32 %v6491_v0, %v6467_v32  ;;  %v6520_v9 = vsub.f32 1.0, %v6519_v36  ;;  %v6529_v53 = vand.u32 2147483648, %v11700_v33  ;;  %v6579_v27 = vmul.f32 %v6578_v59, %v11695_v3 }
 0x80c   : > { %v6834_v44 = vadd.f32 %v6818_v2, %v6738_v18  ;;  %v6556_v14 = vmul.f32 %v6555_v56, %v11592_v22  ;;  %vm6524_vm13 = vweird.f32 %v7920_v30  ;;  %v6590_v25 = vmul.f32 %v6589_v54, %v11695_v3  ;;  %v6932_v18 = vpop.f32.mrf.mxu3 }
 0x80d   : > { %v7748_v28 = vclamps-f32 %v6492_v29, 1.0  ;;  %v6521_v49 = vmul.f32 %v7920_v30, %v6520_v9  ;;  %v5955_v24 = vmul.f32 0.5, %v11440_v19  ;;  %v6507_v20 = vmul.f32 %v6506_v39, %v11492_v48 }
 0x80e   : > { %v7159_v10 = vadd.f32 %v7143_v47, %v6834_v44  ;;  %v11733_v63 = vadd.f32 1.0, %v6556_v14  ;;  %vm6523_vm14 = vweird.f32 %v11700_v33  ;;  %v6591_v40 = vadd.f32 0.014752088, %v6590_v25 }
 0x80f   : > { %v6627_v12 = vadd.f32 1.0, %v7748_v28  ;;  %v6522_v34 = vadd.f32 %v7920_v30, %v6521_v49  ;;  %vm6525_vm15 = vmor %vm6523_vm14, %vm6524_vm13  ;;  %vm6528_vm0 = vcmp.eq.f32.partialorder %v6527_v11, 8.507059e+37  ;;  %v6530_v17 = vor.u32 1.1754944e-38, %v6529_v53 }
 0x810   : > { %7175 = vst.msk [vmem:[%s8119_s18 + $0x58] sm:$0xff] %vm1189_vm4, %v7159_v10  ;;  %7921 = vrcp.f32 %v11733_v63  ;;  %v6580_v61 = vadd.f32 0.0036580483, %v6579_v27  ;;  %v6544_v48 = vadd.f32 0.18741608, %v6543_v45  ;;  %v6592_v50 = vmul.f32 %v6591_v40, %v11695_v3 }
 0x811   : > { %v6643_v19 = vmul.f32 %v6627_v12, %v5955_v24  ;;  %v6526_v47 = vsel %vm6525_vm15, %v7920_v30, %v6522_v34  ;;  %vm6660_vm1 = vcmp.ge.f32.partialorder %v11471_v5, 0.0  ;;  %v6707_v33 = vmul.f32 0.5267, %v11615_v46 }
 0x812   : > { %v6531_v35 = vsel %vm6528_vm0, %v6530_v17, %v6526_v47  ;;  %v7117_v62 = vadd.f32 %v7116_v1, %v6929_v13  ;;  %v6581_v41 = vmul.f32 %v6580_v61, %v11695_v3  ;;  %v6593_v43 = vadd.f32 0.112945676, %v6592_v50 }
 0x813   : > { %v6723_v16 = vmul.f32 0.4733, %v6643_v19  ;;  %v6532_v32 = vmul.f32 %v6531_v35, %v6507_v20  ;;  %v6692_v7 = vsel %vm6660_vm1, %v11471_v5, %v11692_v21  ;;  %v6545_v42 = vmul.f32 %v6544_v48, %v11592_v22 }
 0x814   : > { %v5956_v55 = vmul.f32 0.5, %v11471_v5  ;;  %v6594_v57 = vmul.f32 %v6593_v43, %v11695_v3  ;;  %v7144_v6 = vadd.f32 %v11599_v58, %v7117_v62  ;;  %v6708_v38 = vmul.f32 0.5267, %v6692_v7  ;;  %v7119_v5 = vpop.f32.mrf.mxu0 }
 0x815   : > { %v6755_v52 = vadd.f32 %v6723_v16, %v6707_v33  ;;  %v7749_v51 = vclamps-f32 %v6532_v32, 1.0  ;;  %v6582_v59 = vadd.f32 0.05243302, %v6581_v41  ;;  %v6546_v4 = vadd.f32 1.1283791, %v6545_v42 }
 0x816   : > { %v7922_v8 = vpop.eup %7921  ;;  %v6595_v15 = vadd.f32 0.4994258, %v6594_v57  ;;  %v6739_v22 = vmul.f32 0.5497, %v6643_v19  ;;  %v6569_v2 = vand.u32 2147483648, %v11733_v63  ;;  %v7120_v14 = vadd.f32 %v7119_v5, %v6932_v18 }
 0x817   : > { %vm6771_vm2 = vcmp.ge.f32.partialorder %v6755_v52, 0.0  ;;  %v6787_v46 = vmul.f32 0.2, %v6755_v52  ;;  %v6628_v39 = vadd.f32 1.0, %v7749_v51  ;;  %v6559_v30 = vmul.f32 %v7922_v8, %v11733_v63 }
 0x818   : > { %v6596_v0 = vmul.f32 %v6595_v15, %v11695_v3  ;;  %vm6564_vm3 = vweird.f32 %v7922_v8  ;;  %v6567_v9 = vand.u32 2147483647, %v11733_v63  ;;  %v6583_v54 = vmul.f32 %v6582_v59, %v11695_v3 }
 0x819   : > { %v6803_v21 = vsel %vm6771_vm2, %v6755_v52, %v6787_v46  ;;  %v6644_v31 = vmul.f32 %v6628_v39, %v5956_v55  ;;  %v6560_v36 = vsub.f32 1.0, %v6559_v30  ;;  %vm6563_vm5 = vweird.f32 %v11733_v63  ;;  %v6935_v52 = vpop.f32.mrf.mxu3 }
 0x81a   : > { %v6819_v45 = vmul.f32 0.4591, %v6803_v21  ;;  %v6597_v44 = vadd.f32 1.0, %v6596_v0  ;;  %v6547_v49 = vmul.f32 %v6546_v4, %v11551_v60  ;;  %vm6565_vm6 = vmor %vm6563_vm5, %vm6564_vm3  ;;  %v6570_v25 = vor.u32 1.1754944e-38, %v6569_v2 }
 0x81b   : > { %v6724_v56 = vmul.f32 0.4733, %v6644_v31  ;;  %v6561_v29 = vmul.f32 %v7922_v8, %v6560_v36  ;;  %vm6568_vm8 = vcmp.eq.f32.partialorder %v6567_v9, 8.507059e+37  ;;  %v6584_v12 = vadd.f32 0.18741608, %v6583_v54 }
 0x81c   : > { %v6835_v11 = vadd.f32 %v6819_v45, %v6739_v22  ;;  %7923 = vrcp.f32 %v6597_v44  ;;  %v6677_v34 = vmul.f32 0.2, %v11538_v26  ;;  %vm6661_vm9 = vcmp.ge.f32.partialorder %v11538_v26, 0.0  ;;  %v7122_v42 = vpop.f32.mrf.mxu0 }
 0x81d   : > { %v6756_v53 = vadd.f32 %v6724_v56, %v6708_v38  ;;  %v6562_v27 = vadd.f32 %v7922_v8, %v6561_v29  ;;  %v6740_v63 = vmul.f32 0.5497, %v6644_v31  ;;  %v7145_v1 = vadd.f32 %v11599_v58, %v7120_v14 }
 0x81e   : > { %v7160_v28 = vadd.f32 %v7144_v6, %v6835_v11  ;;  %v6585_v47 = vmul.f32 %v6584_v12, %v11695_v3  ;;  %v6693_v48 = vsel %vm6661_vm9, %v11538_v26, %v6677_v34  ;;  %v5957_v50 = vmul.f32 0.5, %v11538_v26 }
 0x81f   : > { %vm6772_vm7 = vcmp.ge.f32.partialorder %v6756_v53, 0.0  ;;  %v6788_v10 = vmul.f32 0.2, %v6756_v53  ;;  %v6566_v24 = vsel %vm6565_vm6, %v7922_v8, %v6562_v27  ;;  %v6709_v41 = vmul.f32 0.5267, %v6693_v48 }
 0x820   : > { %7176 = vst.msk [vmem:[%s8119_s18 + $0x60] sm:$0xff] %vm1189_vm4, %v7160_v28  ;;  %v6571_v20 = vsel %vm6568_vm8, %v6570_v25, %v6566_v24  ;;  %v6586_v43 = vadd.f32 1.1283791, %v6585_v47  ;;  %v6609_v7 = vand.u32 2147483648, %v6597_v44  ;;  %v6607_v3 = vand.u32 2147483647, %v6597_v44 }
 0x821   : > { %v6804_v40 = vsel %vm6772_vm7, %v6756_v53, %v6788_v10  ;;  %v6572_v13 = vmul.f32 %v6571_v20, %v6547_v49  ;;  %vm6603_vm11 = vweird.f32 %v6597_v44  ;;  %v7123_v26 = vadd.f32 %v7122_v42, %v6935_v52  ;;  %v6938_v56 = vpop.f32.mrf.mxu3 }
 0x822   : > { %v6820_v60 = vmul.f32 0.4591, %v6804_v40  ;;  %v7924_v61 = vpop.eup %7923  ;;  %v6587_v46 = vmul.f32 %v6586_v43, %v11607_v37  ;;  %v6610_v39 = vor.u32 1.1754944e-38, %v6609_v7  ;;  %vm6608_vm14 = vcmp.eq.f32.partialorder %v6607_v3, 8.507059e+37 }
 0x823   : > { %v7750_v17 = vclamps-f32 %v6572_v13, 1.0  ;;  %v6599_v33 = vmul.f32 %v7924_v61, %v6597_v44  ;;  %vm6604_vm10 = vweird.f32 %v7924_v61  ;;  %v6678_v21 = vmul.f32 0.2, %v11567_v23 }
 0x824   : > { %v6836_v19 = vadd.f32 %v6820_v60, %v6740_v63  ;;  %vm6605_vm12 = vmor %vm6603_vm11, %vm6604_vm10  ;;  %v7146_v36 = vadd.f32 %v11599_v58, %v7123_v26  ;;  %vm6662_vm15 = vcmp.ge.f32.partialorder %v11567_v23, 0.0  ;;  %v5958_v45 = vmul.f32 0.5, %v11567_v23  ;;  %v7125_v11 = vpop.f32.mrf.mxu0 }
 0x825   : > { %v6629_v35 = vadd.f32 1.0, %v7750_v17  ;;  %v6600_v62 = vsub.f32 1.0, %v6599_v33  ;;  %v6694_v5 = vsel %vm6662_vm15, %v11567_v23, %v6678_v21  ;;  %v7126_v44 = vadd.f32 %v7125_v11, %v6938_v56 }
 0x826   : > { %v7161_v16 = vadd.f32 %v7145_v1, %v6836_v19  ;;  %v6710_v29 = vmul.f32 0.5267, %v6694_v5 }
 0x827   : > { %v6645_v32 = vmul.f32 %v6629_v35, %v5957_v50  ;;  %v6601_v8 = vmul.f32 %v7924_v61, %v6600_v62  ;;  %v7147_v49 = vadd.f32 %v11599_v58, %v7126_v44 }
 0x828   : > { %7177 = vst.msk [vmem:[%s8119_s18 + $0x68] sm:$0xff] %vm1189_vm4, %v7161_v16 }
 0x829   : > { %v6725_v51 = vmul.f32 0.4733, %v6645_v32  ;;  %v6602_v57 = vadd.f32 %v7924_v61, %v6601_v8  ;;  %v6741_v31 = vmul.f32 0.5497, %v6645_v32 }
 0x82b   : > { %v6757_v55 = vadd.f32 %v6725_v51, %v6709_v41  ;;  %v6606_v6 = vsel %vm6605_vm12, %v7924_v61, %v6602_v57 }
 0x82c   : > { %v6611_v38 = vsel %vm6608_vm14, %v6610_v39, %v6606_v6 }
 0x82d   : > { %vm6773_vm13 = vcmp.ge.f32.partialorder %v6757_v55, 0.0  ;;  %v6789_v30 = vmul.f32 0.2, %v6757_v55  ;;  %v6612_v15 = vmul.f32 %v6611_v38, %v6587_v46 }
 0x82f   : > { %v6805_v59 = vsel %vm6773_vm13, %v6757_v55, %v6789_v30  ;;  %v7751_v22 = vclamps-f32 %v6612_v15, 1.0 }
 0x830   : > { %v6821_v4 = vmul.f32 0.4591, %v6805_v59 }
 0x831   : > { %v6630_v18 = vadd.f32 1.0, %v7751_v22 }
 0x832   : > { %v6837_v37 = vadd.f32 %v6821_v4, %v6741_v31 }
 0x833   : > { %v6646_v0 = vmul.f32 %v6630_v18, %v5958_v45 }
 0x834   : > { %v7162_v2 = vadd.f32 %v7146_v36, %v6837_v37 }
 0x835   : > { %v6726_v9 = vmul.f32 0.4733, %v6646_v0  ;;  %v6742_v27 = vmul.f32 0.5497, %v6646_v0 }
 0x836   : > { %7178 = vst.msk [vmem:[%s8119_s18 + $0x70] sm:$0xff] %vm1189_vm4, %v7162_v2 }
 0x837   : > { %v6758_v54 = vadd.f32 %v6726_v9, %v6710_v29 }
 0x839   : > { %vm6774_vm0 = vcmp.ge.f32.partialorder %v6758_v54, 0.0  ;;  %v6790_v53 = vmul.f32 0.2, %v6758_v54 }
 0x83b   : > { %v6806_v14 = vsel %vm6774_vm0, %v6758_v54, %v6790_v53 }
 0x83c   : > { %v6822_v28 = vmul.f32 0.4591, %v6806_v14 }
 0x83e   : > { %v6838_v25 = vadd.f32 %v6822_v28, %v6742_v27 }
 0x840   : > { %v7163_v23 = vadd.f32 %v7147_v49, %v6838_v25 }
 0x842   : > { %7179 = vst.msk [vmem:[%s8119_s18 + $0x78] sm:$0xff] %vm1189_vm4, %v7163_v23 }
 0x843 PF: > { %s21_s21 = sadd.s32 1, %s7965_s21   ;;  %s12116_s28 = sld [smem:[#allocation4_spill]] }
 0x844   : > { %p18_p11 = scmp.ge.s32.totalorder %s21_s21, 6   ;;  %s12117_s27 = sld [smem:[#allocation5_spill]] }
 0x845   : > { %s12118_s17 = smov %s7957_s19  ;;  %s12119_s18 = smov %s7961_s20 }
 0x846   :  { %20 = sbr.rel (!%p18_p11) target bundleno = 4 (0x4), region = 181 }
 0x849   : > { %s12120_s19 = smov %s12116_s28 }
 0x84a   : > { %s12121_s20 = smov %s12117_s27 }

</bundles_post_ra>
